<compile_context>
chip_gen: v5e
topology: v5e:2x2
jax: 0.10.0
libtpu: 0.0.40
codegen_flags: <defaults>
</compile_context>

<pallas_src>
import functools
import math

import jax
import jax.numpy as jnp
from jax.experimental import pallas as pl
from jax.experimental.pallas import tpu as pltpu

LN_EPS = 1e-5
BN_EPS = 1e-5

# Flat, fixed parameter order shared by the wrapper and the kernel body.
LAYER_PARAM_ORDER = (
    # FeedForward 1
    "ff1_g", "ff1_b", "ff1_w1", "ff1_b1", "ff1_w2", "ff1_b2",
    # Rotary multi-head attention
    "at_g", "at_b", "wq", "bq", "wk", "bk", "wv", "bv", "wo", "bo",
    # ConvModule
    "pw1_a", "pw1_b", "dw", "bn_s", "bn_b", "pw2", "pw2_b",
    # FeedForward 2
    "ff2_g", "ff2_b", "ff2_w1", "ff2_b1", "ff2_w2", "ff2_b2",
    # Block-final LayerNorm
    "norm_g", "norm_b",
)


# ---------------------------------------------------------------------------
# helpers
# ---------------------------------------------------------------------------
def _layernorm(x, g, b):
    mu = jnp.mean(x, axis=-1, keepdims=True)
    var = jnp.mean((x - mu) ** 2, axis=-1, keepdims=True)
    return (x - mu) * jax.lax.rsqrt(var + LN_EPS) * g + b


def _const_spec(shape):
    # whole-array block, constant block index -> fetched once, stays resident.
    n = len(shape)
    return pl.BlockSpec(shape, lambda b, _n=n: (0,) * _n)


# ---------------------------------------------------------------------------
# fused Conformer layer kernel
# ---------------------------------------------------------------------------
def _conformer_layer_kernel(x_ref, cos_ref, sin_ref, *refs,
                            num_heads, head_dim, kernel_size, pad_left):
    n_params = len(LAYER_PARAM_ORDER)
    p = {name: refs[i] for i, name in enumerate(LAYER_PARAM_ORDER)}
    o_ref = refs[n_params]
    ctx_ref = refs[n_params + 1]                     # (S, D) f32 scratch

    x = x_ref[0]                                     # (S, D) f32 residual stream
    S, D = x.shape
    cos = cos_ref[...]                               # (S, D) f32
    sin = sin_ref[...]

    lane = jax.lax.broadcasted_iota(jnp.int32, (S, D), 1)
    even_lane = (lane & 1) == 0
    row = jax.lax.broadcasted_iota(jnp.int32, (S, D), 0)

    def mm(a, w_ref):
        # bf16 operands on the MXU, f32 accumulation.
        return jnp.dot(a.astype(jnp.bfloat16), w_ref[...],
                       preferred_element_type=jnp.float32)

    def ffn(xx, g, b, w1, b1, w2, b2):
        h = _layernorm(xx, p[g][...], p[b][...])
        h = mm(h, p[w1]) + p[b1][...]
        h = h * jax.nn.sigmoid(h)                    # SiLU / Swish
        return mm(h, p[w2]) + p[b2][...]
    # TODO(synk): dropout is identity in inference mode (applies to all stages).

    # ---- ff1: x + 0.5 * FF(x) ---------------------------------------------
    x = x + 0.5 * ffn(x, "ff1_g", "ff1_b", "ff1_w1", "ff1_b1", "ff1_w2", "ff1_b2")

    # ---- attention: x + MHA(LN(x)) ------------------------------------------
    h = _layernorm(x, p["at_g"][...], p["at_b"][...])
    q = mm(h, p["wq"]) + p["bq"][...]                # full-width projections
    k = mm(h, p["wk"]) + p["bk"][...]
    v = mm(h, p["wv"]) + p["bv"][...]

    def rope(t):
        # adjacent-pair rotation: out[2i]   = t[2i]*c - t[2i+1]*s
        #                         out[2i+1] = t[2i+1]*c + t[2i]*s
        nxt = pltpu.roll(t, D - 1, axis=1)           # nxt[j] = t[(j+1) % D]  (XLU)
        prv = pltpu.roll(t, 1, axis=1)               # prv[j] = t[(j-1) % D]
        return t * cos + jnp.where(even_lane, -nxt, prv) * sin

    q = rope(q)
    k = rope(k)
    scale = 1.0 / math.sqrt(head_dim)
    for hh in range(num_heads):                      # static loop: scores/PV only
        s0 = hh * head_dim
        qh = q[:, s0:s0 + head_dim].astype(jnp.bfloat16)
        kh = k[:, s0:s0 + head_dim].astype(jnp.bfloat16)
        vh = v[:, s0:s0 + head_dim].astype(jnp.bfloat16)
        logits = jax.lax.dot_general(qh, kh, (((1,), (1,)), ((), ())),
                                     preferred_element_type=jnp.float32) * scale
        logits = logits - jnp.max(logits, axis=-1, keepdims=True)
        pexp = jnp.exp(logits)
        inv = pl.reciprocal(jnp.sum(pexp, axis=-1, keepdims=True), approx=True)
        prob = (pexp * inv).astype(jnp.bfloat16)
        ctx_ref[:, s0:s0 + head_dim] = jnp.dot(prob, vh,
                                               preferred_element_type=jnp.float32)
    # single full-width output projection over the concatenated heads
    x = x + mm(ctx_ref[...], p["wo"]) + p["bo"][...]

    # ---- conv module (ConformerBlock residual folded in: 2x + conv_inner(x)) --
    # NOTE: the reference ConvModule computes self.norm(x) and discards it, so
    # no LayerNorm is applied here (reproducing the original semantics).
    a = mm(x, p["pw1_a"])
    gate = mm(x, p["pw1_b"])
    y = a * jax.nn.sigmoid(gate)                     # pointwise conv1 + GLU(dim=1)

    # depthwise conv, padding='same' (left=(K-1)//2), groups=D:
    #   out[s] = sum_k w[k] * y[s + k - pad_left]   (out-of-range taps are zero)
    wd = p["dw"][...]                                # (K, D) f32 depthwise taps
    acc = jnp.zeros((S, D), jnp.float32)
    for kk in range(kernel_size):
        off = kk - pad_left
        if off == 0:
            acc = acc + wd[kk:kk + 1, :] * y
        else:
            shifted = pltpu.roll(y, (-off) % S, axis=0)   # shifted[s] = y[(s+off)%S]
            valid = (row + off >= 0) & (row + off < S)
            acc = acc + wd[kk:kk + 1, :] * jnp.where(valid, shifted, 0.0)

    y = acc * p["bn_s"][...] + p["bn_b"][...]        # BatchNorm1d (eval), folded
    y = y * jax.nn.sigmoid(y)                        # SiLU
    y = mm(y, p["pw2"]) + p["pw2_b"][...]
    x = 2.0 * x + y                                  # ConvModule residual + block residual

    # ---- ff2 + block-final LayerNorm ----------------------------------------
    x = x + 0.5 * ffn(x, "ff2_g", "ff2_b", "ff2_w1", "ff2_b1", "ff2_w2", "ff2_b2")
    o_ref[0] = _layernorm(x, p["norm_g"][...], p["norm_b"][...]).astype(o_ref.dtype)


def conformer_layer(x, params, cos_f, sin_f, *, num_heads, kernel_size):
    B, S, D = x.shape
    head_dim = D // num_heads
    pad_left = (kernel_size - 1) // 2
    kern = functools.partial(_conformer_layer_kernel, num_heads=num_heads,
                             head_dim=head_dim, kernel_size=kernel_size,
                             pad_left=pad_left)
    inputs = [x, cos_f, sin_f] + [params[name] for name in LAYER_PARAM_ORDER]
    in_specs = [pl.BlockSpec((1, S, D), lambda b: (b, 0, 0)),
                _const_spec(cos_f.shape), _const_spec(sin_f.shape)]
    # TODO(synk): on v7x at production D, add pipeline_mode=pl.Buffered(1) to
    # these constant-index weight specs to halve weight-resident VMEM.
    in_specs += [_const_spec(params[name].shape) for name in LAYER_PARAM_ORDER]
    return pl.pallas_call(
        kern,
        out_shape=jax.ShapeDtypeStruct((B, S, D), x.dtype),
        grid=(B,),
        in_specs=in_specs,
        out_specs=pl.BlockSpec((1, S, D), lambda b: (b, 0, 0)),
        scratch_shapes=[pltpu.VMEM((S, D), jnp.float32)],   # attention context
        compiler_params=pltpu.CompilerParams(dimension_semantics=("parallel",)),
    )(*inputs)


# ---------------------------------------------------------------------------
# parameter init (deterministic, synthetic) — weights bf16, stats/biases f32
# ---------------------------------------------------------------------------
def init_layer(key, D, Hff, K):
    keys = iter(jax.random.split(key, 40))
    nk = lambda: next(keys)

    def lin(fan_in, fan_out, scale=0.05):
        w = (scale * jax.random.normal(nk(), (fan_in, fan_out), jnp.float32)
             ).astype(jnp.bfloat16)
        b = 0.01 * jax.random.normal(nk(), (1, fan_out), jnp.float32)
        return w, b

    def lnorm():
        g = 1.0 + 0.01 * jax.random.normal(nk(), (1, D), jnp.float32)
        b = 0.01 * jax.random.normal(nk(), (1, D), jnp.float32)
        return g, b

    p = {}
    p["ff1_g"], p["ff1_b"] = lnorm()
    p["ff1_w1"], p["ff1_b1"] = lin(D, Hff)
    p["ff1_w2"], p["ff1_b2"] = lin(Hff, D)

    p["at_g"], p["at_b"] = lnorm()
    p["wq"], p["bq"] = lin(D, D)
    p["wk"], p["bk"] = lin(D, D)
    p["wv"], p["bv"] = lin(D, D)
    p["wo"], p["bo"] = lin(D, D)

    p["pw1_a"] = (0.05 * jax.random.normal(nk(), (D, D), jnp.float32)).astype(jnp.bfloat16)
    p["pw1_b"] = (0.05 * jax.random.normal(nk(), (D, D), jnp.float32)).astype(jnp.bfloat16)
    p["dw"] = 0.05 * jax.random.normal(nk(), (K, D), jnp.float32)
    gamma = 1.0 + 0.01 * jax.random.normal(nk(), (1, D), jnp.float32)
    beta = 0.01 * jax.random.normal(nk(), (1, D), jnp.float32)
    rmean = 0.01 * jax.random.normal(nk(), (1, D), jnp.float32)
    rvar = 1.0 + 0.1 * jnp.abs(jax.random.normal(nk(), (1, D), jnp.float32))
    p["bn_s"] = gamma * jax.lax.rsqrt(rvar + BN_EPS)
    p["bn_b"] = beta - rmean * p["bn_s"]
    p["pw2"], p["pw2_b"] = lin(D, D)

    p["ff2_g"], p["ff2_b"] = lnorm()
    p["ff2_w1"], p["ff2_b1"] = lin(D, Hff)
    p["ff2_w2"], p["ff2_b2"] = lin(Hff, D)

    p["norm_g"], p["norm_b"] = lnorm()
    return p


def precompute_rotary(head_dim, num_heads, seq_len, theta):
    inv_freq = 1.0 / (theta ** (jnp.arange(0, head_dim, 2, dtype=jnp.float32) / head_dim))
    t = jnp.arange(seq_len, dtype=jnp.float32)
    ang = jnp.outer(t, inv_freq)                     # (seq_len, head_dim//2)
    cos = jnp.repeat(jnp.cos(ang), 2, axis=1)        # (seq_len, head_dim)
    sin = jnp.repeat(jnp.sin(ang), 2, axis=1)
    # identical rotation for every head -> tile to the full embed width
    return jnp.tile(cos, (1, num_heads)), jnp.tile(sin, (1, num_heads))


# ---------------------------------------------------------------------------
# pure-JAX reference (mirrors the same bf16/f32 precision choices)
# ---------------------------------------------------------------------------
def ref_layer(x, p, cos_f, sin_f, num_heads, kernel_size):
    B, S, D = x.shape
    hd = D // num_heads
    pad_left = (kernel_size - 1) // 2

    def ln(t, g, b):
        mu = t.mean(-1, keepdims=True)
        var = ((t - mu) ** 2).mean(-1, keepdims=True)
        return (t - mu) * jax.lax.rsqrt(var + LN_EPS) * g + b

    def mm(a, w):
        return jnp.dot(a.astype(jnp.bfloat16), w, preferred_element_type=jnp.float32)

    def ffn(t, g, b, w1, b1, w2, b2):
        h = ln(t, p[g], p[b])
        h = mm(h, p[w1]) + p[b1]
        h = h * jax.nn.sigmoid(h)
        return mm(h, p[w2]) + p[b2]

    x = x + 0.5 * ffn(x, "ff1_g", "ff1_b", "ff1_w1", "ff1_b1", "ff1_w2", "ff1_b2")

    h = ln(x, p["at_g"], p["at_b"])
    q = mm(h, p["wq"]) + p["bq"]
    k = mm(h, p["wk"]) + p["bk"]
    v = mm(h, p["wv"]) + p["bv"]

    def rope(t):
        t2 = t.reshape(B, S, D // 2, 2)
        rot = jnp.stack([-t2[..., 1], t2[..., 0]], axis=-1).reshape(B, S, D)
        return t * cos_f + rot * sin_f

    q, k = rope(q), rope(k)
    qh = q.reshape(B, S, num_heads, hd).transpose(0, 2, 1, 3)
    kh = k.reshape(B, S, num_heads, hd).transpose(0, 2, 1, 3)
    vh = v.reshape(B, S, num_heads, hd).transpose(0, 2, 1, 3)
    logits = jnp.einsum("bhqd,bhkd->bhqk", qh.astype(jnp.bfloat16),
                        kh.astype(jnp.bfloat16),
                        preferred_element_type=jnp.float32) / math.sqrt(hd)
    prob = jax.nn.softmax(logits, axis=-1)
    ctx = jnp.einsum("bhqk,bhkd->bhqd", prob.astype(jnp.bfloat16),
                     vh.astype(jnp.bfloat16), preferred_element_type=jnp.float32)
    ctx = ctx.transpose(0, 2, 1, 3).reshape(B, S, D)
    x = x + mm(ctx, p["wo"]) + p["bo"]

    a = mm(x, p["pw1_a"])
    gate = mm(x, p["pw1_b"])
    y = a * jax.nn.sigmoid(gate)
    ypad = jnp.pad(y, ((0, 0), (pad_left, kernel_size - 1 - pad_left), (0, 0)))
    conv = jnp.zeros_like(y)
    for kk in range(kernel_size):
        conv = conv + p["dw"][kk] * ypad[:, kk:kk + S, :]
    y = conv * p["bn_s"] + p["bn_b"]
    y = y * jax.nn.sigmoid(y)
    y = mm(y, p["pw2"]) + p["pw2_b"]
    x = 2.0 * x + y

    x = x + 0.5 * ffn(x, "ff2_g", "ff2_b", "ff2_w1", "ff2_b1", "ff2_w2", "ff2_b2")
    return ln(x, p["norm_g"], p["norm_b"])


# ---------------------------------------------------------------------------
# main
# ---------------------------------------------------------------------------
if __name__ == "__main__":
    # small config consistent with ConformerParams; D, S chosen lane/sublane
    # aligned (D multiple of 128, S multiple of 8) per the perf review.
    B, S, D = 2, 16, 128
    n_layers = 2
    num_heads = 4
    ff_hidden = 256
    dw_kernel = 8
    max_seq_len = 64
    rotary_theta = 10000

    key = jax.random.PRNGKey(0)
    key, xk = jax.random.split(key)
    x = jax.random.normal(xk, (B, S, D), jnp.float32)

    layer_keys = jax.random.split(key, n_layers)
    layers = [init_layer(k, D, ff_hidden, dw_kernel) for k in layer_keys]

    cos_all, sin_all = precompute_rotary(D // num_heads, num_heads,
                                         max_seq_len, rotary_theta)
    cos_f, sin_f = cos_all[:S], sin_all[:S]          # rotary_freqs[:seq_len]

    @jax.jit
    def encoder(x):
        for p in layers:
            x = conformer_layer(x, p, cos_f, sin_f,
                                num_heads=num_heads, kernel_size=dw_kernel)
        return x

    @jax.jit
    def encoder_ref(x):
        for p in layers:
            x = ref_layer(x, p, cos_f, sin_f, num_heads, dw_kernel)
        return x

    out = jax.block_until_ready(encoder(x))
    assert out.shape == (B, S, D)
    assert bool(jnp.all(jnp.isfinite(out)))

    ref = jax.block_until_ready(encoder_ref(x))
    err = float(jnp.max(jnp.abs(out - ref)))
    assert err < 5e-2, f"kernel vs pure-JAX reference mismatch: max|diff|={err}"
    print("KERNEL_OK")
</pallas_src>

<mosaic_0001>
module attributes {stable_mosaic.version = 11 : i64} {
  func.func @_conformer_layer_kernel(%arg0: i32, %arg1: memref<1x16x128xf32, #tpu.memory_space<vmem>>, %arg2: memref<16x128xf32, #tpu.memory_space<vmem>>, %arg3: memref<16x128xf32, #tpu.memory_space<vmem>>, %arg4: memref<1x128xf32, #tpu.memory_space<vmem>>, %arg5: memref<1x128xf32, #tpu.memory_space<vmem>>, %arg6: memref<128x256xbf16, #tpu.memory_space<vmem>>, %arg7: memref<1x256xf32, #tpu.memory_space<vmem>>, %arg8: memref<256x128xbf16, #tpu.memory_space<vmem>>, %arg9: memref<1x128xf32, #tpu.memory_space<vmem>>, %arg10: memref<1x128xf32, #tpu.memory_space<vmem>>, %arg11: memref<1x128xf32, #tpu.memory_space<vmem>>, %arg12: memref<128x128xbf16, #tpu.memory_space<vmem>>, %arg13: memref<1x128xf32, #tpu.memory_space<vmem>>, %arg14: memref<128x128xbf16, #tpu.memory_space<vmem>>, %arg15: memref<1x128xf32, #tpu.memory_space<vmem>>, %arg16: memref<128x128xbf16, #tpu.memory_space<vmem>>, %arg17: memref<1x128xf32, #tpu.memory_space<vmem>>, %arg18: memref<128x128xbf16, #tpu.memory_space<vmem>>, %arg19: memref<1x128xf32, #tpu.memory_space<vmem>>, %arg20: memref<128x128xbf16, #tpu.memory_space<vmem>>, %arg21: memref<128x128xbf16, #tpu.memory_space<vmem>>, %arg22: memref<8x128xf32, #tpu.memory_space<vmem>>, %arg23: memref<1x128xf32, #tpu.memory_space<vmem>>, %arg24: memref<1x128xf32, #tpu.memory_space<vmem>>, %arg25: memref<128x128xbf16, #tpu.memory_space<vmem>>, %arg26: memref<1x128xf32, #tpu.memory_space<vmem>>, %arg27: memref<1x128xf32, #tpu.memory_space<vmem>>, %arg28: memref<1x128xf32, #tpu.memory_space<vmem>>, %arg29: memref<128x256xbf16, #tpu.memory_space<vmem>>, %arg30: memref<1x256xf32, #tpu.memory_space<vmem>>, %arg31: memref<256x128xbf16, #tpu.memory_space<vmem>>, %arg32: memref<1x128xf32, #tpu.memory_space<vmem>>, %arg33: memref<1x128xf32, #tpu.memory_space<vmem>>, %arg34: memref<1x128xf32, #tpu.memory_space<vmem>>, %arg35: memref<1x16x128xf32, #tpu.memory_space<vmem>>, %arg36: memref<16x128xf32, #tpu.memory_space<vmem>>) attributes {dimension_semantics = [#tpu.dimension_semantics<parallel>], iteration_bounds = array<i64: 2>, scalar_prefetch = 0 : i64, scratch_operands = 1 : i64, tpu.core_type = #tpu.core_type<tc>, window_params = [{transform_indices = @transform_0, window_bounds = array<i64: 1, 16, 128>}, {pipeline_mode = #tpu.pipeline_mode<synchronous>, transform_indices = @transform_1, window_bounds = array<i64: 16, 128>}, {pipeline_mode = #tpu.pipeline_mode<synchronous>, transform_indices = @transform_2, window_bounds = array<i64: 16, 128>}, {pipeline_mode = #tpu.pipeline_mode<synchronous>, transform_indices = @transform_3, window_bounds = array<i64: 1, 128>}, {pipeline_mode = #tpu.pipeline_mode<synchronous>, transform_indices = @transform_4, window_bounds = array<i64: 1, 128>}, {pipeline_mode = #tpu.pipeline_mode<synchronous>, transform_indices = @transform_5, window_bounds = array<i64: 128, 256>}, {pipeline_mode = #tpu.pipeline_mode<synchronous>, transform_indices = @transform_6, window_bounds = array<i64: 1, 256>}, {pipeline_mode = #tpu.pipeline_mode<synchronous>, transform_indices = @transform_7, window_bounds = array<i64: 256, 128>}, {pipeline_mode = #tpu.pipeline_mode<synchronous>, transform_indices = @transform_8, window_bounds = array<i64: 1, 128>}, {pipeline_mode = #tpu.pipeline_mode<synchronous>, transform_indices = @transform_9, window_bounds = array<i64: 1, 128>}, {pipeline_mode = #tpu.pipeline_mode<synchronous>, transform_indices = @transform_10, window_bounds = array<i64: 1, 128>}, {pipeline_mode = #tpu.pipeline_mode<synchronous>, transform_indices = @transform_11, window_bounds = array<i64: 128, 128>}, {pipeline_mode = #tpu.pipeline_mode<synchronous>, transform_indices = @transform_12, window_bounds = array<i64: 1, 128>}, {pipeline_mode = #tpu.pipeline_mode<synchronous>, transform_indices = @transform_13, window_bounds = array<i64: 128, 128>}, {pipeline_mode = #tpu.pipeline_mode<synchronous>, transform_indices = @transform_14, window_bounds = array<i64: 1, 128>}, {pipeline_mode = #tpu.pipeline_mode<synchronous>, transform_indices = @transform_15, window_bounds = array<i64: 128, 128>}, {pipeline_mode = #tpu.pipeline_mode<synchronous>, transform_indices = @transform_16, window_bounds = array<i64: 1, 128>}, {pipeline_mode = #tpu.pipeline_mode<synchronous>, transform_indices = @transform_17, window_bounds = array<i64: 128, 128>}, {pipeline_mode = #tpu.pipeline_mode<synchronous>, transform_indices = @transform_18, window_bounds = array<i64: 1, 128>}, {pipeline_mode = #tpu.pipeline_mode<synchronous>, transform_indices = @transform_19, window_bounds = array<i64: 128, 128>}, {pipeline_mode = #tpu.pipeline_mode<synchronous>, transform_indices = @transform_20, window_bounds = array<i64: 128, 128>}, {pipeline_mode = #tpu.pipeline_mode<synchronous>, transform_indices = @transform_21, window_bounds = array<i64: 8, 128>}, {pipeline_mode = #tpu.pipeline_mode<synchronous>, transform_indices = @transform_22, window_bounds = array<i64: 1, 128>}, {pipeline_mode = #tpu.pipeline_mode<synchronous>, transform_indices = @transform_23, window_bounds = array<i64: 1, 128>}, {pipeline_mode = #tpu.pipeline_mode<synchronous>, transform_indices = @transform_24, window_bounds = array<i64: 128, 128>}, {pipeline_mode = #tpu.pipeline_mode<synchronous>, transform_indices = @transform_25, window_bounds = array<i64: 1, 128>}, {pipeline_mode = #tpu.pipeline_mode<synchronous>, transform_indices = @transform_26, window_bounds = array<i64: 1, 128>}, {pipeline_mode = #tpu.pipeline_mode<synchronous>, transform_indices = @transform_27, window_bounds = array<i64: 1, 128>}, {pipeline_mode = #tpu.pipeline_mode<synchronous>, transform_indices = @transform_28, window_bounds = array<i64: 128, 256>}, {pipeline_mode = #tpu.pipeline_mode<synchronous>, transform_indices = @transform_29, window_bounds = array<i64: 1, 256>}, {pipeline_mode = #tpu.pipeline_mode<synchronous>, transform_indices = @transform_30, window_bounds = array<i64: 256, 128>}, {pipeline_mode = #tpu.pipeline_mode<synchronous>, transform_indices = @transform_31, window_bounds = array<i64: 1, 128>}, {pipeline_mode = #tpu.pipeline_mode<synchronous>, transform_indices = @transform_32, window_bounds = array<i64: 1, 128>}, {pipeline_mode = #tpu.pipeline_mode<synchronous>, transform_indices = @transform_33, window_bounds = array<i64: 1, 128>}, {transform_indices = @transform_34, window_bounds = array<i64: 1, 16, 128>}]} {
    %c0 = arith.constant 0 : index
    %c0_0 = arith.constant 0 : index
    %c0_1 = arith.constant 0 : index
    %0 = vector.load %arg1[%c0, %c0_0, %c0_1] : memref<1x16x128xf32, #tpu.memory_space<vmem>>, vector<1x16x128xf32>
    %1 = vector.shape_cast %0 : vector<1x16x128xf32> to vector<16x128xf32>
    %c0_2 = arith.constant 0 : index
    %c0_3 = arith.constant 0 : index
    %2 = vector.load %arg2[%c0_2, %c0_3] : memref<16x128xf32, #tpu.memory_space<vmem>>, vector<16x128xf32>
    %c0_4 = arith.constant 0 : index
    %c0_5 = arith.constant 0 : index
    %3 = vector.load %arg3[%c0_4, %c0_5] : memref<16x128xf32, #tpu.memory_space<vmem>>, vector<16x128xf32>
    %4 = tpu.iota {dimensions = array<i32: 1>} : vector<16x128xi32>
    %c1_i32 = arith.constant 1 : i32
    %5 = vector.broadcast %c1_i32 : i32 to vector<16x128xi32>
    %6 = arith.andi %4, %5 : vector<16x128xi32>
    %c0_i32 = arith.constant 0 : i32
    %7 = vector.broadcast %c0_i32 : i32 to vector<16x128xi32>
    %8 = arith.cmpi eq, %6, %7 : vector<16x128xi32>
    %9 = tpu.iota {dimensions = array<i32: 0>} : vector<16x128xi32>
    %c0_6 = arith.constant 0 : index
    %c0_7 = arith.constant 0 : index
    %10 = vector.load %arg4[%c0_6, %c0_7] : memref<1x128xf32, #tpu.memory_space<vmem>>, vector<1x128xf32>
    %c0_8 = arith.constant 0 : index
    %c0_9 = arith.constant 0 : index
    %11 = vector.load %arg5[%c0_8, %c0_9] : memref<1x128xf32, #tpu.memory_space<vmem>>, vector<1x128xf32>
    %cst = arith.constant dense<0.000000e+00> : vector<16xf32>
    %12 = vector.multi_reduction <add>, %1, %cst [1] : vector<16x128xf32> to vector<16xf32>
    %13 = vector.shape_cast %12 : vector<16xf32> to vector<16x1xf32>
    %cst_10 = arith.constant 1.280000e+02 : f32
    %14 = vector.broadcast %cst_10 : f32 to vector<16x1xf32>
    %15 = arith.divf %13, %14 : vector<16x1xf32>
    %16 = vector.broadcast %15 : vector<16x1xf32> to vector<16x128xf32>
    %17 = arith.subf %1, %16 : vector<16x128xf32>
    %18 = arith.mulf %17, %17 : vector<16x128xf32>
    %cst_11 = arith.constant dense<0.000000e+00> : vector<16xf32>
    %19 = vector.multi_reduction <add>, %18, %cst_11 [1] : vector<16x128xf32> to vector<16xf32>
    %20 = vector.shape_cast %19 : vector<16xf32> to vector<16x1xf32>
    %cst_12 = arith.constant 1.280000e+02 : f32
    %21 = vector.broadcast %cst_12 : f32 to vector<16x1xf32>
    %22 = arith.divf %20, %21 : vector<16x1xf32>
    %23 = vector.broadcast %15 : vector<16x1xf32> to vector<16x128xf32>
    %24 = arith.subf %1, %23 : vector<16x128xf32>
    %cst_13 = arith.constant 9.99999974E-6 : f32
    %25 = vector.broadcast %cst_13 : f32 to vector<16x1xf32>
    %26 = arith.addf %22, %25 : vector<16x1xf32>
    %27 = math.rsqrt %26 : vector<16x1xf32>
    %28 = vector.broadcast %27 : vector<16x1xf32> to vector<16x128xf32>
    %29 = arith.mulf %24, %28 : vector<16x128xf32>
    %30 = vector.broadcast %10 : vector<1x128xf32> to vector<16x128xf32>
    %31 = arith.mulf %29, %30 : vector<16x128xf32>
    %32 = vector.broadcast %11 : vector<1x128xf32> to vector<16x128xf32>
    %33 = arith.addf %31, %32 : vector<16x128xf32>
    %34 = arith.truncf %33 : vector<16x128xf32> to vector<16x128xbf16>
    %c0_14 = arith.constant 0 : index
    %c0_15 = arith.constant 0 : index
    %35 = vector.load %arg6[%c0_14, %c0_15] : memref<128x256xbf16, #tpu.memory_space<vmem>>, vector<128x256xbf16>
    %cst_16 = arith.constant dense<0.000000e+00> : vector<16x256xf32>
    %36 = tpu.matmul %34, %35, %cst_16 {dimension_numbers = #tpu.dot_dimension_numbers<[1], [0], [0], [1], [0, 0, 1, 1], [], []>} : vector<16x128xbf16>, vector<128x256xbf16>, vector<16x256xf32> -> vector<16x256xf32>
    %c0_17 = arith.constant 0 : index
    %c0_18 = arith.constant 0 : index
    %37 = vector.load %arg7[%c0_17, %c0_18] : memref<1x256xf32, #tpu.memory_space<vmem>>, vector<1x256xf32>
    %38 = vector.broadcast %37 : vector<1x256xf32> to vector<16x256xf32>
    %39 = arith.addf %36, %38 : vector<16x256xf32>
    %40 = arith.negf %39 : vector<16x256xf32>
    %41 = math.exp %40 : vector<16x256xf32>
    %cst_19 = arith.constant 1.000000e+00 : f32
    %42 = vector.broadcast %cst_19 : f32 to vector<16x256xf32>
    %43 = arith.addf %42, %41 : vector<16x256xf32>
    %44 = arith.divf %42, %43 : vector<16x256xf32>
    %45 = arith.mulf %39, %44 : vector<16x256xf32>
    %46 = arith.truncf %45 : vector<16x256xf32> to vector<16x256xbf16>
    %c0_20 = arith.constant 0 : index
    %c0_21 = arith.constant 0 : index
    %47 = vector.load %arg8[%c0_20, %c0_21] : memref<256x128xbf16, #tpu.memory_space<vmem>>, vector<256x128xbf16>
    %cst_22 = arith.constant dense<0.000000e+00> : vector<16x128xf32>
    %48 = tpu.matmul %46, %47, %cst_22 {dimension_numbers = #tpu.dot_dimension_numbers<[1], [0], [0], [1], [0, 0, 1, 1], [], []>} : vector<16x256xbf16>, vector<256x128xbf16>, vector<16x128xf32> -> vector<16x128xf32>
    %c0_23 = arith.constant 0 : index
    %c0_24 = arith.constant 0 : index
    %49 = vector.load %arg9[%c0_23, %c0_24] : memref<1x128xf32, #tpu.memory_space<vmem>>, vector<1x128xf32>
    %50 = vector.broadcast %49 : vector<1x128xf32> to vector<16x128xf32>
    %51 = arith.addf %48, %50 : vector<16x128xf32>
    %cst_25 = arith.constant 5.000000e-01 : f32
    %52 = vector.broadcast %cst_25 : f32 to vector<16x128xf32>
    %53 = arith.mulf %52, %51 : vector<16x128xf32>
    %54 = arith.addf %1, %53 : vector<16x128xf32>
    %c0_26 = arith.constant 0 : index
    %c0_27 = arith.constant 0 : index
    %55 = vector.load %arg10[%c0_26, %c0_27] : memref<1x128xf32, #tpu.memory_space<vmem>>, vector<1x128xf32>
    %c0_28 = arith.constant 0 : index
    %c0_29 = arith.constant 0 : index
    %56 = vector.load %arg11[%c0_28, %c0_29] : memref<1x128xf32, #tpu.memory_space<vmem>>, vector<1x128xf32>
    %cst_30 = arith.constant dense<0.000000e+00> : vector<16xf32>
    %57 = vector.multi_reduction <add>, %54, %cst_30 [1] : vector<16x128xf32> to vector<16xf32>
    %58 = vector.shape_cast %57 : vector<16xf32> to vector<16x1xf32>
    %cst_31 = arith.constant 1.280000e+02 : f32
    %59 = vector.broadcast %cst_31 : f32 to vector<16x1xf32>
    %60 = arith.divf %58, %59 : vector<16x1xf32>
    %61 = vector.broadcast %60 : vector<16x1xf32> to vector<16x128xf32>
    %62 = arith.subf %54, %61 : vector<16x128xf32>
    %63 = arith.mulf %62, %62 : vector<16x128xf32>
    %cst_32 = arith.constant dense<0.000000e+00> : vector<16xf32>
    %64 = vector.multi_reduction <add>, %63, %cst_32 [1] : vector<16x128xf32> to vector<16xf32>
    %65 = vector.shape_cast %64 : vector<16xf32> to vector<16x1xf32>
    %cst_33 = arith.constant 1.280000e+02 : f32
    %66 = vector.broadcast %cst_33 : f32 to vector<16x1xf32>
    %67 = arith.divf %65, %66 : vector<16x1xf32>
    %68 = vector.broadcast %60 : vector<16x1xf32> to vector<16x128xf32>
    %69 = arith.subf %54, %68 : vector<16x128xf32>
    %cst_34 = arith.constant 9.99999974E-6 : f32
    %70 = vector.broadcast %cst_34 : f32 to vector<16x1xf32>
    %71 = arith.addf %67, %70 : vector<16x1xf32>
    %72 = math.rsqrt %71 : vector<16x1xf32>
    %73 = vector.broadcast %72 : vector<16x1xf32> to vector<16x128xf32>
    %74 = arith.mulf %69, %73 : vector<16x128xf32>
    %75 = vector.broadcast %55 : vector<1x128xf32> to vector<16x128xf32>
    %76 = arith.mulf %74, %75 : vector<16x128xf32>
    %77 = vector.broadcast %56 : vector<1x128xf32> to vector<16x128xf32>
    %78 = arith.addf %76, %77 : vector<16x128xf32>
    %79 = arith.truncf %78 : vector<16x128xf32> to vector<16x128xbf16>
    %c0_35 = arith.constant 0 : index
    %c0_36 = arith.constant 0 : index
    %80 = vector.load %arg12[%c0_35, %c0_36] : memref<128x128xbf16, #tpu.memory_space<vmem>>, vector<128x128xbf16>
    %cst_37 = arith.constant dense<0.000000e+00> : vector<16x128xf32>
    %81 = tpu.matmul %79, %80, %cst_37 {dimension_numbers = #tpu.dot_dimension_numbers<[1], [0], [0], [1], [0, 0, 1, 1], [], []>} : vector<16x128xbf16>, vector<128x128xbf16>, vector<16x128xf32> -> vector<16x128xf32>
    %c0_38 = arith.constant 0 : index
    %c0_39 = arith.constant 0 : index
    %82 = vector.load %arg13[%c0_38, %c0_39] : memref<1x128xf32, #tpu.memory_space<vmem>>, vector<1x128xf32>
    %83 = vector.broadcast %82 : vector<1x128xf32> to vector<16x128xf32>
    %84 = arith.addf %81, %83 : vector<16x128xf32>
    %85 = arith.truncf %78 : vector<16x128xf32> to vector<16x128xbf16>
    %c0_40 = arith.constant 0 : index
    %c0_41 = arith.constant 0 : index
    %86 = vector.load %arg14[%c0_40, %c0_41] : memref<128x128xbf16, #tpu.memory_space<vmem>>, vector<128x128xbf16>
    %cst_42 = arith.constant dense<0.000000e+00> : vector<16x128xf32>
    %87 = tpu.matmul %85, %86, %cst_42 {dimension_numbers = #tpu.dot_dimension_numbers<[1], [0], [0], [1], [0, 0, 1, 1], [], []>} : vector<16x128xbf16>, vector<128x128xbf16>, vector<16x128xf32> -> vector<16x128xf32>
    %c0_43 = arith.constant 0 : index
    %c0_44 = arith.constant 0 : index
    %88 = vector.load %arg15[%c0_43, %c0_44] : memref<1x128xf32, #tpu.memory_space<vmem>>, vector<1x128xf32>
    %89 = vector.broadcast %88 : vector<1x128xf32> to vector<16x128xf32>
    %90 = arith.addf %87, %89 : vector<16x128xf32>
    %91 = arith.truncf %78 : vector<16x128xf32> to vector<16x128xbf16>
    %c0_45 = arith.constant 0 : index
    %c0_46 = arith.constant 0 : index
    %92 = vector.load %arg16[%c0_45, %c0_46] : memref<128x128xbf16, #tpu.memory_space<vmem>>, vector<128x128xbf16>
    %cst_47 = arith.constant dense<0.000000e+00> : vector<16x128xf32>
    %93 = tpu.matmul %91, %92, %cst_47 {dimension_numbers = #tpu.dot_dimension_numbers<[1], [0], [0], [1], [0, 0, 1, 1], [], []>} : vector<16x128xbf16>, vector<128x128xbf16>, vector<16x128xf32> -> vector<16x128xf32>
    %c0_48 = arith.constant 0 : index
    %c0_49 = arith.constant 0 : index
    %94 = vector.load %arg17[%c0_48, %c0_49] : memref<1x128xf32, #tpu.memory_space<vmem>>, vector<1x128xf32>
    %95 = vector.broadcast %94 : vector<1x128xf32> to vector<16x128xf32>
    %96 = arith.addf %93, %95 : vector<16x128xf32>
    %c127_i32 = arith.constant 127 : i32
    %97 = tpu.dynamic_rotate %84 by %c127_i32 dim 1 : vector<16x128xf32>, i32 -> vector<16x128xf32>
    %c1_i32_50 = arith.constant 1 : i32
    %98 = tpu.dynamic_rotate %84 by %c1_i32_50 dim 1 : vector<16x128xf32>, i32 -> vector<16x128xf32>
    %99 = arith.mulf %84, %2 : vector<16x128xf32>
    %cst_51 = arith.constant 0.000000e+00 : f32
    %100 = vector.broadcast %cst_51 : f32 to vector<16x128xf32>
    %101 = arith.subf %100, %97 : vector<16x128xf32>
    %102 = arith.select %8, %101, %98 : vector<16x128xi1>, vector<16x128xf32>
    %103 = arith.mulf %102, %3 : vector<16x128xf32>
    %104 = arith.addf %99, %103 : vector<16x128xf32>
    %c127_i32_52 = arith.constant 127 : i32
    %105 = tpu.dynamic_rotate %90 by %c127_i32_52 dim 1 : vector<16x128xf32>, i32 -> vector<16x128xf32>
    %c1_i32_53 = arith.constant 1 : i32
    %106 = tpu.dynamic_rotate %90 by %c1_i32_53 dim 1 : vector<16x128xf32>, i32 -> vector<16x128xf32>
    %107 = arith.mulf %90, %2 : vector<16x128xf32>
    %cst_54 = arith.constant 0.000000e+00 : f32
    %108 = vector.broadcast %cst_54 : f32 to vector<16x128xf32>
    %109 = arith.subf %108, %105 : vector<16x128xf32>
    %110 = arith.select %8, %109, %106 : vector<16x128xi1>, vector<16x128xf32>
    %111 = arith.mulf %110, %3 : vector<16x128xf32>
    %112 = arith.addf %107, %111 : vector<16x128xf32>
    %113 = vector.extract_strided_slice %104 {offsets = [0, 0], sizes = [16, 32], strides = [1, 1]} : vector<16x128xf32> to vector<16x32xf32>
    %114 = arith.truncf %113 : vector<16x32xf32> to vector<16x32xbf16>
    %115 = vector.extract_strided_slice %112 {offsets = [0, 0], sizes = [16, 32], strides = [1, 1]} : vector<16x128xf32> to vector<16x32xf32>
    %116 = arith.truncf %115 : vector<16x32xf32> to vector<16x32xbf16>
    %117 = vector.extract_strided_slice %96 {offsets = [0, 0], sizes = [16, 32], strides = [1, 1]} : vector<16x128xf32> to vector<16x32xf32>
    %118 = arith.truncf %117 : vector<16x32xf32> to vector<16x32xbf16>
    %cst_55 = arith.constant dense<0.000000e+00> : vector<16x16xf32>
    %119 = tpu.matmul %114, %116, %cst_55 {dimension_numbers = #tpu.dot_dimension_numbers<[1], [1], [0], [0], [0, 0, 1, 0], [], []>} : vector<16x32xbf16>, vector<16x32xbf16>, vector<16x16xf32> -> vector<16x16xf32>
    %cst_56 = arith.constant 0.176776692 : f32
    %120 = vector.broadcast %cst_56 : f32 to vector<16x16xf32>
    %121 = arith.mulf %119, %120 : vector<16x16xf32>
    %cst_57 = arith.constant dense<0xFF800000> : vector<16xf32>
    %122 = vector.multi_reduction <maximumf>, %121, %cst_57 [1] : vector<16x16xf32> to vector<16xf32>
    %123 = vector.shape_cast %122 : vector<16xf32> to vector<16x1xf32>
    %124 = vector.broadcast %123 : vector<16x1xf32> to vector<16x16xf32>
    %125 = arith.subf %121, %124 : vector<16x16xf32>
    %126 = math.exp %125 : vector<16x16xf32>
    %cst_58 = arith.constant dense<0.000000e+00> : vector<16xf32>
    %127 = vector.multi_reduction <add>, %126, %cst_58 [1] : vector<16x16xf32> to vector<16xf32>
    %128 = vector.shape_cast %127 : vector<16xf32> to vector<16x1xf32>
    %129 = tpu.reciprocal %128 {approx = true} : vector<16x1xf32> -> vector<16x1xf32>
    %130 = vector.broadcast %129 : vector<16x1xf32> to vector<16x16xf32>
    %131 = arith.mulf %126, %130 : vector<16x16xf32>
    %132 = arith.truncf %131 : vector<16x16xf32> to vector<16x16xbf16>
    %cst_59 = arith.constant dense<0.000000e+00> : vector<16x32xf32>
    %133 = tpu.matmul %132, %118, %cst_59 {dimension_numbers = #tpu.dot_dimension_numbers<[1], [0], [0], [1], [0, 0, 1, 1], [], []>} : vector<16x16xbf16>, vector<16x32xbf16>, vector<16x32xf32> -> vector<16x32xf32>
    %c0_60 = arith.constant 0 : index
    %c0_61 = arith.constant 0 : index
    %134 = vector.load %arg36[%c0_60, %c0_61] : memref<16x128xf32, #tpu.memory_space<vmem>>, vector<16x32xf32>
    tpu.vector_store %arg36[%c0_60, %c0_61], %133 {strides = array<i32>} : memref<16x128xf32, #tpu.memory_space<vmem>>, vector<16x32xf32>,
    %135 = vector.extract_strided_slice %104 {offsets = [0, 32], sizes = [16, 32], strides = [1, 1]} : vector<16x128xf32> to vector<16x32xf32>
    %136 = arith.truncf %135 : vector<16x32xf32> to vector<16x32xbf16>
    %137 = vector.extract_strided_slice %112 {offsets = [0, 32], sizes = [16, 32], strides = [1, 1]} : vector<16x128xf32> to vector<16x32xf32>
    %138 = arith.truncf %137 : vector<16x32xf32> to vector<16x32xbf16>
    %139 = vector.extract_strided_slice %96 {offsets = [0, 32], sizes = [16, 32], strides = [1, 1]} : vector<16x128xf32> to vector<16x32xf32>
    %140 = arith.truncf %139 : vector<16x32xf32> to vector<16x32xbf16>
    %cst_62 = arith.constant dense<0.000000e+00> : vector<16x16xf32>
    %141 = tpu.matmul %136, %138, %cst_62 {dimension_numbers = #tpu.dot_dimension_numbers<[1], [1], [0], [0], [0, 0, 1, 0], [], []>} : vector<16x32xbf16>, vector<16x32xbf16>, vector<16x16xf32> -> vector<16x16xf32>
    %cst_63 = arith.constant 0.176776692 : f32
    %142 = vector.broadcast %cst_63 : f32 to vector<16x16xf32>
    %143 = arith.mulf %141, %142 : vector<16x16xf32>
    %cst_64 = arith.constant dense<0xFF800000> : vector<16xf32>
    %144 = vector.multi_reduction <maximumf>, %143, %cst_64 [1] : vector<16x16xf32> to vector<16xf32>
    %145 = vector.shape_cast %144 : vector<16xf32> to vector<16x1xf32>
    %146 = vector.broadcast %145 : vector<16x1xf32> to vector<16x16xf32>
    %147 = arith.subf %143, %146 : vector<16x16xf32>
    %148 = math.exp %147 : vector<16x16xf32>
    %cst_65 = arith.constant dense<0.000000e+00> : vector<16xf32>
    %149 = vector.multi_reduction <add>, %148, %cst_65 [1] : vector<16x16xf32> to vector<16xf32>
    %150 = vector.shape_cast %149 : vector<16xf32> to vector<16x1xf32>
    %151 = tpu.reciprocal %150 {approx = true} : vector<16x1xf32> -> vector<16x1xf32>
    %152 = vector.broadcast %151 : vector<16x1xf32> to vector<16x16xf32>
    %153 = arith.mulf %148, %152 : vector<16x16xf32>
    %154 = arith.truncf %153 : vector<16x16xf32> to vector<16x16xbf16>
    %cst_66 = arith.constant dense<0.000000e+00> : vector<16x32xf32>
    %155 = tpu.matmul %154, %140, %cst_66 {dimension_numbers = #tpu.dot_dimension_numbers<[1], [0], [0], [1], [0, 0, 1, 1], [], []>} : vector<16x16xbf16>, vector<16x32xbf16>, vector<16x32xf32> -> vector<16x32xf32>
    %c0_67 = arith.constant 0 : index
    %c32 = arith.constant 32 : index
    %156 = vector.load %arg36[%c0_67, %c32] : memref<16x128xf32, #tpu.memory_space<vmem>>, vector<16x32xf32>
    tpu.vector_store %arg36[%c0_67, %c32], %155 {strides = array<i32>} : memref<16x128xf32, #tpu.memory_space<vmem>>, vector<16x32xf32>,
    %157 = vector.extract_strided_slice %104 {offsets = [0, 64], sizes = [16, 32], strides = [1, 1]} : vector<16x128xf32> to vector<16x32xf32>
    %158 = arith.truncf %157 : vector<16x32xf32> to vector<16x32xbf16>
    %159 = vector.extract_strided_slice %112 {offsets = [0, 64], sizes = [16, 32], strides = [1, 1]} : vector<16x128xf32> to vector<16x32xf32>
    %160 = arith.truncf %159 : vector<16x32xf32> to vector<16x32xbf16>
    %161 = vector.extract_strided_slice %96 {offsets = [0, 64], sizes = [16, 32], strides = [1, 1]} : vector<16x128xf32> to vector<16x32xf32>
    %162 = arith.truncf %161 : vector<16x32xf32> to vector<16x32xbf16>
    %cst_68 = arith.constant dense<0.000000e+00> : vector<16x16xf32>
    %163 = tpu.matmul %158, %160, %cst_68 {dimension_numbers = #tpu.dot_dimension_numbers<[1], [1], [0], [0], [0, 0, 1, 0], [], []>} : vector<16x32xbf16>, vector<16x32xbf16>, vector<16x16xf32> -> vector<16x16xf32>
    %cst_69 = arith.constant 0.176776692 : f32
    %164 = vector.broadcast %cst_69 : f32 to vector<16x16xf32>
    %165 = arith.mulf %163, %164 : vector<16x16xf32>
    %cst_70 = arith.constant dense<0xFF800000> : vector<16xf32>
    %166 = vector.multi_reduction <maximumf>, %165, %cst_70 [1] : vector<16x16xf32> to vector<16xf32>
    %167 = vector.shape_cast %166 : vector<16xf32> to vector<16x1xf32>
    %168 = vector.broadcast %167 : vector<16x1xf32> to vector<16x16xf32>
    %169 = arith.subf %165, %168 : vector<16x16xf32>
    %170 = math.exp %169 : vector<16x16xf32>
    %cst_71 = arith.constant dense<0.000000e+00> : vector<16xf32>
    %171 = vector.multi_reduction <add>, %170, %cst_71 [1] : vector<16x16xf32> to vector<16xf32>
    %172 = vector.shape_cast %171 : vector<16xf32> to vector<16x1xf32>
    %173 = tpu.reciprocal %172 {approx = true} : vector<16x1xf32> -> vector<16x1xf32>
    %174 = vector.broadcast %173 : vector<16x1xf32> to vector<16x16xf32>
    %175 = arith.mulf %170, %174 : vector<16x16xf32>
    %176 = arith.truncf %175 : vector<16x16xf32> to vector<16x16xbf16>
    %cst_72 = arith.constant dense<0.000000e+00> : vector<16x32xf32>
    %177 = tpu.matmul %176, %162, %cst_72 {dimension_numbers = #tpu.dot_dimension_numbers<[1], [0], [0], [1], [0, 0, 1, 1], [], []>} : vector<16x16xbf16>, vector<16x32xbf16>, vector<16x32xf32> -> vector<16x32xf32>
    %c0_73 = arith.constant 0 : index
    %c64 = arith.constant 64 : index
    %178 = vector.load %arg36[%c0_73, %c64] : memref<16x128xf32, #tpu.memory_space<vmem>>, vector<16x32xf32>
    tpu.vector_store %arg36[%c0_73, %c64], %177 {strides = array<i32>} : memref<16x128xf32, #tpu.memory_space<vmem>>, vector<16x32xf32>,
    %179 = vector.extract_strided_slice %104 {offsets = [0, 96], sizes = [16, 32], strides = [1, 1]} : vector<16x128xf32> to vector<16x32xf32>
    %180 = arith.truncf %179 : vector<16x32xf32> to vector<16x32xbf16>
    %181 = vector.extract_strided_slice %112 {offsets = [0, 96], sizes = [16, 32], strides = [1, 1]} : vector<16x128xf32> to vector<16x32xf32>
    %182 = arith.truncf %181 : vector<16x32xf32> to vector<16x32xbf16>
    %183 = vector.extract_strided_slice %96 {offsets = [0, 96], sizes = [16, 32], strides = [1, 1]} : vector<16x128xf32> to vector<16x32xf32>
    %184 = arith.truncf %183 : vector<16x32xf32> to vector<16x32xbf16>
    %cst_74 = arith.constant dense<0.000000e+00> : vector<16x16xf32>
    %185 = tpu.matmul %180, %182, %cst_74 {dimension_numbers = #tpu.dot_dimension_numbers<[1], [1], [0], [0], [0, 0, 1, 0], [], []>} : vector<16x32xbf16>, vector<16x32xbf16>, vector<16x16xf32> -> vector<16x16xf32>
    %cst_75 = arith.constant 0.176776692 : f32
    %186 = vector.broadcast %cst_75 : f32 to vector<16x16xf32>
    %187 = arith.mulf %185, %186 : vector<16x16xf32>
    %cst_76 = arith.constant dense<0xFF800000> : vector<16xf32>
    %188 = vector.multi_reduction <maximumf>, %187, %cst_76 [1] : vector<16x16xf32> to vector<16xf32>
    %189 = vector.shape_cast %188 : vector<16xf32> to vector<16x1xf32>
    %190 = vector.broadcast %189 : vector<16x1xf32> to vector<16x16xf32>
    %191 = arith.subf %187, %190 : vector<16x16xf32>
    %192 = math.exp %191 : vector<16x16xf32>
    %cst_77 = arith.constant dense<0.000000e+00> : vector<16xf32>
    %193 = vector.multi_reduction <add>, %192, %cst_77 [1] : vector<16x16xf32> to vector<16xf32>
    %194 = vector.shape_cast %193 : vector<16xf32> to vector<16x1xf32>
    %195 = tpu.reciprocal %194 {approx = true} : vector<16x1xf32> -> vector<16x1xf32>
    %196 = vector.broadcast %195 : vector<16x1xf32> to vector<16x16xf32>
    %197 = arith.mulf %192, %196 : vector<16x16xf32>
    %198 = arith.truncf %197 : vector<16x16xf32> to vector<16x16xbf16>
    %cst_78 = arith.constant dense<0.000000e+00> : vector<16x32xf32>
    %199 = tpu.matmul %198, %184, %cst_78 {dimension_numbers = #tpu.dot_dimension_numbers<[1], [0], [0], [1], [0, 0, 1, 1], [], []>} : vector<16x16xbf16>, vector<16x32xbf16>, vector<16x32xf32> -> vector<16x32xf32>
    %c0_79 = arith.constant 0 : index
    %c96 = arith.constant 96 : index
    %200 = vector.load %arg36[%c0_79, %c96] : memref<16x128xf32, #tpu.memory_space<vmem>>, vector<16x32xf32>
    tpu.vector_store %arg36[%c0_79, %c96], %199 {strides = array<i32>} : memref<16x128xf32, #tpu.memory_space<vmem>>, vector<16x32xf32>,
    %c0_80 = arith.constant 0 : index
    %c0_81 = arith.constant 0 : index
    %201 = vector.load %arg36[%c0_80, %c0_81] : memref<16x128xf32, #tpu.memory_space<vmem>>, vector<16x128xf32>
    %202 = arith.truncf %201 : vector<16x128xf32> to vector<16x128xbf16>
    %c0_82 = arith.constant 0 : index
    %c0_83 = arith.constant 0 : index
    %203 = vector.load %arg18[%c0_82, %c0_83] : memref<128x128xbf16, #tpu.memory_space<vmem>>, vector<128x128xbf16>
    %cst_84 = arith.constant dense<0.000000e+00> : vector<16x128xf32>
    %204 = tpu.matmul %202, %203, %cst_84 {dimension_numbers = #tpu.dot_dimension_numbers<[1], [0], [0], [1], [0, 0, 1, 1], [], []>} : vector<16x128xbf16>, vector<128x128xbf16>, vector<16x128xf32> -> vector<16x128xf32>
    %205 = arith.addf %54, %204 : vector<16x128xf32>
    %c0_85 = arith.constant 0 : index
    %c0_86 = arith.constant 0 : index
    %206 = vector.load %arg19[%c0_85, %c0_86] : memref<1x128xf32, #tpu.memory_space<vmem>>, vector<1x128xf32>
    %207 = vector.broadcast %206 : vector<1x128xf32> to vector<16x128xf32>
    %208 = arith.addf %205, %207 : vector<16x128xf32>
    %209 = arith.truncf %208 : vector<16x128xf32> to vector<16x128xbf16>
    %c0_87 = arith.constant 0 : index
    %c0_88 = arith.constant 0 : index
    %210 = vector.load %arg20[%c0_87, %c0_88] : memref<128x128xbf16, #tpu.memory_space<vmem>>, vector<128x128xbf16>
    %cst_89 = arith.constant dense<0.000000e+00> : vector<16x128xf32>
    %211 = tpu.matmul %209, %210, %cst_89 {dimension_numbers = #tpu.dot_dimension_numbers<[1], [0], [0], [1], [0, 0, 1, 1], [], []>} : vector<16x128xbf16>, vector<128x128xbf16>, vector<16x128xf32> -> vector<16x128xf32>
    %212 = arith.truncf %208 : vector<16x128xf32> to vector<16x128xbf16>
    %c0_90 = arith.constant 0 : index
    %c0_91 = arith.constant 0 : index
    %213 = vector.load %arg21[%c0_90, %c0_91] : memref<128x128xbf16, #tpu.memory_space<vmem>>, vector<128x128xbf16>
    %cst_92 = arith.constant dense<0.000000e+00> : vector<16x128xf32>
    %214 = tpu.matmul %212, %213, %cst_92 {dimension_numbers = #tpu.dot_dimension_numbers<[1], [0], [0], [1], [0, 0, 1, 1], [], []>} : vector<16x128xbf16>, vector<128x128xbf16>, vector<16x128xf32> -> vector<16x128xf32>
    %215 = arith.negf %214 : vector<16x128xf32>
    %216 = math.exp %215 : vector<16x128xf32>
    %cst_93 = arith.constant 1.000000e+00 : f32
    %217 = vector.broadcast %cst_93 : f32 to vector<16x128xf32>
    %218 = arith.addf %217, %216 : vector<16x128xf32>
    %219 = arith.divf %217, %218 : vector<16x128xf32>
    %220 = arith.mulf %211, %219 : vector<16x128xf32>
    %c0_94 = arith.constant 0 : index
    %c0_95 = arith.constant 0 : index
    %221 = vector.load %arg22[%c0_94, %c0_95] : memref<8x128xf32, #tpu.memory_space<vmem>>, vector<8x128xf32>
    %cst_96 = arith.constant 0.000000e+00 : f32
    %222 = vector.broadcast %cst_96 : f32 to vector<16x128xf32>
    %c3_i32 = arith.constant 3 : i32
    %223 = tpu.dynamic_rotate %220 by %c3_i32 dim 0 : vector<16x128xf32>, i32 -> vector<16x128xf32>
    %c-3_i32 = arith.constant -3 : i32
    %224 = vector.broadcast %c-3_i32 : i32 to vector<16x128xi32>
    %225 = arith.addi %9, %224 : vector<16x128xi32>
    %c0_i32_97 = arith.constant 0 : i32
    %226 = vector.broadcast %c0_i32_97 : i32 to vector<16x128xi32>
    %227 = arith.cmpi sge, %225, %226 : vector<16x128xi32>
    %c-3_i32_98 = arith.constant -3 : i32
    %228 = vector.broadcast %c-3_i32_98 : i32 to vector<16x128xi32>
    %229 = arith.addi %9, %228 : vector<16x128xi32>
    %c16_i32 = arith.constant 16 : i32
    %230 = vector.broadcast %c16_i32 : i32 to vector<16x128xi32>
    %231 = arith.cmpi slt, %229, %230 : vector<16x128xi32>
    %232 = arith.andi %227, %231 : vector<16x128xi1>
    %233 = vector.extract_strided_slice %221 {offsets = [0, 0], sizes = [1, 128], strides = [1, 1]} : vector<8x128xf32> to vector<1x128xf32>
    %cst_99 = arith.constant 0.000000e+00 : f32
    %234 = vector.broadcast %cst_99 : f32 to vector<16x128xf32>
    %235 = arith.select %232, %223, %234 : vector<16x128xi1>, vector<16x128xf32>
    %236 = vector.broadcast %233 : vector<1x128xf32> to vector<16x128xf32>
    %237 = arith.mulf %236, %235 : vector<16x128xf32>
    %238 = arith.addf %222, %237 : vector<16x128xf32>
    %c2_i32 = arith.constant 2 : i32
    %239 = tpu.dynamic_rotate %220 by %c2_i32 dim 0 : vector<16x128xf32>, i32 -> vector<16x128xf32>
    %c-2_i32 = arith.constant -2 : i32
    %240 = vector.broadcast %c-2_i32 : i32 to vector<16x128xi32>
    %241 = arith.addi %9, %240 : vector<16x128xi32>
    %c0_i32_100 = arith.constant 0 : i32
    %242 = vector.broadcast %c0_i32_100 : i32 to vector<16x128xi32>
    %243 = arith.cmpi sge, %241, %242 : vector<16x128xi32>
    %c-2_i32_101 = arith.constant -2 : i32
    %244 = vector.broadcast %c-2_i32_101 : i32 to vector<16x128xi32>
    %245 = arith.addi %9, %244 : vector<16x128xi32>
    %c16_i32_102 = arith.constant 16 : i32
    %246 = vector.broadcast %c16_i32_102 : i32 to vector<16x128xi32>
    %247 = arith.cmpi slt, %245, %246 : vector<16x128xi32>
    %248 = arith.andi %243, %247 : vector<16x128xi1>
    %249 = vector.extract_strided_slice %221 {offsets = [1, 0], sizes = [1, 128], strides = [1, 1]} : vector<8x128xf32> to vector<1x128xf32>
    %cst_103 = arith.constant 0.000000e+00 : f32
    %250 = vector.broadcast %cst_103 : f32 to vector<16x128xf32>
    %251 = arith.select %248, %239, %250 : vector<16x128xi1>, vector<16x128xf32>
    %252 = vector.broadcast %249 : vector<1x128xf32> to vector<16x128xf32>
    %253 = arith.mulf %252, %251 : vector<16x128xf32>
    %254 = arith.addf %238, %253 : vector<16x128xf32>
    %c1_i32_104 = arith.constant 1 : i32
    %255 = tpu.dynamic_rotate %220 by %c1_i32_104 dim 0 : vector<16x128xf32>, i32 -> vector<16x128xf32>
    %c-1_i32 = arith.constant -1 : i32
    %256 = vector.broadcast %c-1_i32 : i32 to vector<16x128xi32>
    %257 = arith.addi %9, %256 : vector<16x128xi32>
    %c0_i32_105 = arith.constant 0 : i32
    %258 = vector.broadcast %c0_i32_105 : i32 to vector<16x128xi32>
    %259 = arith.cmpi sge, %257, %258 : vector<16x128xi32>
    %c-1_i32_106 = arith.constant -1 : i32
    %260 = vector.broadcast %c-1_i32_106 : i32 to vector<16x128xi32>
    %261 = arith.addi %9, %260 : vector<16x128xi32>
    %c16_i32_107 = arith.constant 16 : i32
    %262 = vector.broadcast %c16_i32_107 : i32 to vector<16x128xi32>
    %263 = arith.cmpi slt, %261, %262 : vector<16x128xi32>
    %264 = arith.andi %259, %263 : vector<16x128xi1>
    %265 = vector.extract_strided_slice %221 {offsets = [2, 0], sizes = [1, 128], strides = [1, 1]} : vector<8x128xf32> to vector<1x128xf32>
    %cst_108 = arith.constant 0.000000e+00 : f32
    %266 = vector.broadcast %cst_108 : f32 to vector<16x128xf32>
    %267 = arith.select %264, %255, %266 : vector<16x128xi1>, vector<16x128xf32>
    %268 = vector.broadcast %265 : vector<1x128xf32> to vector<16x128xf32>
    %269 = arith.mulf %268, %267 : vector<16x128xf32>
    %270 = arith.addf %254, %269 : vector<16x128xf32>
    %271 = vector.extract_strided_slice %221 {offsets = [3, 0], sizes = [1, 128], strides = [1, 1]} : vector<8x128xf32> to vector<1x128xf32>
    %272 = vector.broadcast %271 : vector<1x128xf32> to vector<16x128xf32>
    %273 = arith.mulf %272, %220 : vector<16x128xf32>
    %274 = arith.addf %270, %273 : vector<16x128xf32>
    %c15_i32 = arith.constant 15 : i32
    %275 = tpu.dynamic_rotate %220 by %c15_i32 dim 0 : vector<16x128xf32>, i32 -> vector<16x128xf32>
    %c1_i32_109 = arith.constant 1 : i32
    %276 = vector.broadcast %c1_i32_109 : i32 to vector<16x128xi32>
    %277 = arith.addi %9, %276 : vector<16x128xi32>
    %c0_i32_110 = arith.constant 0 : i32
    %278 = vector.broadcast %c0_i32_110 : i32 to vector<16x128xi32>
    %279 = arith.cmpi sge, %277, %278 : vector<16x128xi32>
    %c1_i32_111 = arith.constant 1 : i32
    %280 = vector.broadcast %c1_i32_111 : i32 to vector<16x128xi32>
    %281 = arith.addi %9, %280 : vector<16x128xi32>
    %c16_i32_112 = arith.constant 16 : i32
    %282 = vector.broadcast %c16_i32_112 : i32 to vector<16x128xi32>
    %283 = arith.cmpi slt, %281, %282 : vector<16x128xi32>
    %284 = arith.andi %279, %283 : vector<16x128xi1>
    %285 = vector.extract_strided_slice %221 {offsets = [4, 0], sizes = [1, 128], strides = [1, 1]} : vector<8x128xf32> to vector<1x128xf32>
    %cst_113 = arith.constant 0.000000e+00 : f32
    %286 = vector.broadcast %cst_113 : f32 to vector<16x128xf32>
    %287 = arith.select %284, %275, %286 : vector<16x128xi1>, vector<16x128xf32>
    %288 = vector.broadcast %285 : vector<1x128xf32> to vector<16x128xf32>
    %289 = arith.mulf %288, %287 : vector<16x128xf32>
    %290 = arith.addf %274, %289 : vector<16x128xf32>
    %c14_i32 = arith.constant 14 : i32
    %291 = tpu.dynamic_rotate %220 by %c14_i32 dim 0 : vector<16x128xf32>, i32 -> vector<16x128xf32>
    %c2_i32_114 = arith.constant 2 : i32
    %292 = vector.broadcast %c2_i32_114 : i32 to vector<16x128xi32>
    %293 = arith.addi %9, %292 : vector<16x128xi32>
    %c0_i32_115 = arith.constant 0 : i32
    %294 = vector.broadcast %c0_i32_115 : i32 to vector<16x128xi32>
    %295 = arith.cmpi sge, %293, %294 : vector<16x128xi32>
    %c2_i32_116 = arith.constant 2 : i32
    %296 = vector.broadcast %c2_i32_116 : i32 to vector<16x128xi32>
    %297 = arith.addi %9, %296 : vector<16x128xi32>
    %c16_i32_117 = arith.constant 16 : i32
    %298 = vector.broadcast %c16_i32_117 : i32 to vector<16x128xi32>
    %299 = arith.cmpi slt, %297, %298 : vector<16x128xi32>
    %300 = arith.andi %295, %299 : vector<16x128xi1>
    %301 = vector.extract_strided_slice %221 {offsets = [5, 0], sizes = [1, 128], strides = [1, 1]} : vector<8x128xf32> to vector<1x128xf32>
    %cst_118 = arith.constant 0.000000e+00 : f32
    %302 = vector.broadcast %cst_118 : f32 to vector<16x128xf32>
    %303 = arith.select %300, %291, %302 : vector<16x128xi1>, vector<16x128xf32>
    %304 = vector.broadcast %301 : vector<1x128xf32> to vector<16x128xf32>
    %305 = arith.mulf %304, %303 : vector<16x128xf32>
    %306 = arith.addf %290, %305 : vector<16x128xf32>
    %c13_i32 = arith.constant 13 : i32
    %307 = tpu.dynamic_rotate %220 by %c13_i32 dim 0 : vector<16x128xf32>, i32 -> vector<16x128xf32>
    %c3_i32_119 = arith.constant 3 : i32
    %308 = vector.broadcast %c3_i32_119 : i32 to vector<16x128xi32>
    %309 = arith.addi %9, %308 : vector<16x128xi32>
    %c0_i32_120 = arith.constant 0 : i32
    %310 = vector.broadcast %c0_i32_120 : i32 to vector<16x128xi32>
    %311 = arith.cmpi sge, %309, %310 : vector<16x128xi32>
    %c3_i32_121 = arith.constant 3 : i32
    %312 = vector.broadcast %c3_i32_121 : i32 to vector<16x128xi32>
    %313 = arith.addi %9, %312 : vector<16x128xi32>
    %c16_i32_122 = arith.constant 16 : i32
    %314 = vector.broadcast %c16_i32_122 : i32 to vector<16x128xi32>
    %315 = arith.cmpi slt, %313, %314 : vector<16x128xi32>
    %316 = arith.andi %311, %315 : vector<16x128xi1>
    %317 = vector.extract_strided_slice %221 {offsets = [6, 0], sizes = [1, 128], strides = [1, 1]} : vector<8x128xf32> to vector<1x128xf32>
    %cst_123 = arith.constant 0.000000e+00 : f32
    %318 = vector.broadcast %cst_123 : f32 to vector<16x128xf32>
    %319 = arith.select %316, %307, %318 : vector<16x128xi1>, vector<16x128xf32>
    %320 = vector.broadcast %317 : vector<1x128xf32> to vector<16x128xf32>
    %321 = arith.mulf %320, %319 : vector<16x128xf32>
    %322 = arith.addf %306, %321 : vector<16x128xf32>
    %c12_i32 = arith.constant 12 : i32
    %323 = tpu.dynamic_rotate %220 by %c12_i32 dim 0 : vector<16x128xf32>, i32 -> vector<16x128xf32>
    %c4_i32 = arith.constant 4 : i32
    %324 = vector.broadcast %c4_i32 : i32 to vector<16x128xi32>
    %325 = arith.addi %9, %324 : vector<16x128xi32>
    %c0_i32_124 = arith.constant 0 : i32
    %326 = vector.broadcast %c0_i32_124 : i32 to vector<16x128xi32>
    %327 = arith.cmpi sge, %325, %326 : vector<16x128xi32>
    %c4_i32_125 = arith.constant 4 : i32
    %328 = vector.broadcast %c4_i32_125 : i32 to vector<16x128xi32>
    %329 = arith.addi %9, %328 : vector<16x128xi32>
    %c16_i32_126 = arith.constant 16 : i32
    %330 = vector.broadcast %c16_i32_126 : i32 to vector<16x128xi32>
    %331 = arith.cmpi slt, %329, %330 : vector<16x128xi32>
    %332 = arith.andi %327, %331 : vector<16x128xi1>
    %333 = vector.extract_strided_slice %221 {offsets = [7, 0], sizes = [1, 128], strides = [1, 1]} : vector<8x128xf32> to vector<1x128xf32>
    %cst_127 = arith.constant 0.000000e+00 : f32
    %334 = vector.broadcast %cst_127 : f32 to vector<16x128xf32>
    %335 = arith.select %332, %323, %334 : vector<16x128xi1>, vector<16x128xf32>
    %336 = vector.broadcast %333 : vector<1x128xf32> to vector<16x128xf32>
    %337 = arith.mulf %336, %335 : vector<16x128xf32>
    %338 = arith.addf %322, %337 : vector<16x128xf32>
    %c0_128 = arith.constant 0 : index
    %c0_129 = arith.constant 0 : index
    %339 = vector.load %arg23[%c0_128, %c0_129] : memref<1x128xf32, #tpu.memory_space<vmem>>, vector<1x128xf32>
    %340 = vector.broadcast %339 : vector<1x128xf32> to vector<16x128xf32>
    %341 = arith.mulf %338, %340 : vector<16x128xf32>
    %c0_130 = arith.constant 0 : index
    %c0_131 = arith.constant 0 : index
    %342 = vector.load %arg24[%c0_130, %c0_131] : memref<1x128xf32, #tpu.memory_space<vmem>>, vector<1x128xf32>
    %343 = vector.broadcast %342 : vector<1x128xf32> to vector<16x128xf32>
    %344 = arith.addf %341, %343 : vector<16x128xf32>
    %345 = arith.negf %344 : vector<16x128xf32>
    %346 = math.exp %345 : vector<16x128xf32>
    %cst_132 = arith.constant 1.000000e+00 : f32
    %347 = vector.broadcast %cst_132 : f32 to vector<16x128xf32>
    %348 = arith.addf %347, %346 : vector<16x128xf32>
    %349 = arith.divf %347, %348 : vector<16x128xf32>
    %350 = arith.mulf %344, %349 : vector<16x128xf32>
    %351 = arith.truncf %350 : vector<16x128xf32> to vector<16x128xbf16>
    %c0_133 = arith.constant 0 : index
    %c0_134 = arith.constant 0 : index
    %352 = vector.load %arg25[%c0_133, %c0_134] : memref<128x128xbf16, #tpu.memory_space<vmem>>, vector<128x128xbf16>
    %cst_135 = arith.constant dense<0.000000e+00> : vector<16x128xf32>
    %353 = tpu.matmul %351, %352, %cst_135 {dimension_numbers = #tpu.dot_dimension_numbers<[1], [0], [0], [1], [0, 0, 1, 1], [], []>} : vector<16x128xbf16>, vector<128x128xbf16>, vector<16x128xf32> -> vector<16x128xf32>
    %c0_136 = arith.constant 0 : index
    %c0_137 = arith.constant 0 : index
    %354 = vector.load %arg26[%c0_136, %c0_137] : memref<1x128xf32, #tpu.memory_space<vmem>>, vector<1x128xf32>
    %355 = vector.broadcast %354 : vector<1x128xf32> to vector<16x128xf32>
    %356 = arith.addf %353, %355 : vector<16x128xf32>
    %cst_138 = arith.constant 2.000000e+00 : f32
    %357 = vector.broadcast %cst_138 : f32 to vector<16x128xf32>
    %358 = arith.mulf %357, %208 : vector<16x128xf32>
    %359 = arith.addf %358, %356 : vector<16x128xf32>
    %c0_139 = arith.constant 0 : index
    %c0_140 = arith.constant 0 : index
    %360 = vector.load %arg27[%c0_139, %c0_140] : memref<1x128xf32, #tpu.memory_space<vmem>>, vector<1x128xf32>
    %c0_141 = arith.constant 0 : index
    %c0_142 = arith.constant 0 : index
    %361 = vector.load %arg28[%c0_141, %c0_142] : memref<1x128xf32, #tpu.memory_space<vmem>>, vector<1x128xf32>
    %cst_143 = arith.constant dense<0.000000e+00> : vector<16xf32>
    %362 = vector.multi_reduction <add>, %359, %cst_143 [1] : vector<16x128xf32> to vector<16xf32>
    %363 = vector.shape_cast %362 : vector<16xf32> to vector<16x1xf32>
    %cst_144 = arith.constant 1.280000e+02 : f32
    %364 = vector.broadcast %cst_144 : f32 to vector<16x1xf32>
    %365 = arith.divf %363, %364 : vector<16x1xf32>
    %366 = vector.broadcast %365 : vector<16x1xf32> to vector<16x128xf32>
    %367 = arith.subf %359, %366 : vector<16x128xf32>
    %368 = arith.mulf %367, %367 : vector<16x128xf32>
    %cst_145 = arith.constant dense<0.000000e+00> : vector<16xf32>
    %369 = vector.multi_reduction <add>, %368, %cst_145 [1] : vector<16x128xf32> to vector<16xf32>
    %370 = vector.shape_cast %369 : vector<16xf32> to vector<16x1xf32>
    %cst_146 = arith.constant 1.280000e+02 : f32
    %371 = vector.broadcast %cst_146 : f32 to vector<16x1xf32>
    %372 = arith.divf %370, %371 : vector<16x1xf32>
    %373 = vector.broadcast %365 : vector<16x1xf32> to vector<16x128xf32>
    %374 = arith.subf %359, %373 : vector<16x128xf32>
    %cst_147 = arith.constant 9.99999974E-6 : f32
    %375 = vector.broadcast %cst_147 : f32 to vector<16x1xf32>
    %376 = arith.addf %372, %375 : vector<16x1xf32>
    %377 = math.rsqrt %376 : vector<16x1xf32>
    %378 = vector.broadcast %377 : vector<16x1xf32> to vector<16x128xf32>
    %379 = arith.mulf %374, %378 : vector<16x128xf32>
    %380 = vector.broadcast %360 : vector<1x128xf32> to vector<16x128xf32>
    %381 = arith.mulf %379, %380 : vector<16x128xf32>
    %382 = vector.broadcast %361 : vector<1x128xf32> to vector<16x128xf32>
    %383 = arith.addf %381, %382 : vector<16x128xf32>
    %384 = arith.truncf %383 : vector<16x128xf32> to vector<16x128xbf16>
    %c0_148 = arith.constant 0 : index
    %c0_149 = arith.constant 0 : index
    %385 = vector.load %arg29[%c0_148, %c0_149] : memref<128x256xbf16, #tpu.memory_space<vmem>>, vector<128x256xbf16>
    %cst_150 = arith.constant dense<0.000000e+00> : vector<16x256xf32>
    %386 = tpu.matmul %384, %385, %cst_150 {dimension_numbers = #tpu.dot_dimension_numbers<[1], [0], [0], [1], [0, 0, 1, 1], [], []>} : vector<16x128xbf16>, vector<128x256xbf16>, vector<16x256xf32> -> vector<16x256xf32>
    %c0_151 = arith.constant 0 : index
    %c0_152 = arith.constant 0 : index
    %387 = vector.load %arg30[%c0_151, %c0_152] : memref<1x256xf32, #tpu.memory_space<vmem>>, vector<1x256xf32>
    %388 = vector.broadcast %387 : vector<1x256xf32> to vector<16x256xf32>
    %389 = arith.addf %386, %388 : vector<16x256xf32>
    %390 = arith.negf %389 : vector<16x256xf32>
    %391 = math.exp %390 : vector<16x256xf32>
    %cst_153 = arith.constant 1.000000e+00 : f32
    %392 = vector.broadcast %cst_153 : f32 to vector<16x256xf32>
    %393 = arith.addf %392, %391 : vector<16x256xf32>
    %394 = arith.divf %392, %393 : vector<16x256xf32>
    %395 = arith.mulf %389, %394 : vector<16x256xf32>
    %396 = arith.truncf %395 : vector<16x256xf32> to vector<16x256xbf16>
    %c0_154 = arith.constant 0 : index
    %c0_155 = arith.constant 0 : index
    %397 = vector.load %arg31[%c0_154, %c0_155] : memref<256x128xbf16, #tpu.memory_space<vmem>>, vector<256x128xbf16>
    %cst_156 = arith.constant dense<0.000000e+00> : vector<16x128xf32>
    %398 = tpu.matmul %396, %397, %cst_156 {dimension_numbers = #tpu.dot_dimension_numbers<[1], [0], [0], [1], [0, 0, 1, 1], [], []>} : vector<16x256xbf16>, vector<256x128xbf16>, vector<16x128xf32> -> vector<16x128xf32>
    %c0_157 = arith.constant 0 : index
    %c0_158 = arith.constant 0 : index
    %399 = vector.load %arg32[%c0_157, %c0_158] : memref<1x128xf32, #tpu.memory_space<vmem>>, vector<1x128xf32>
    %400 = vector.broadcast %399 : vector<1x128xf32> to vector<16x128xf32>
    %401 = arith.addf %398, %400 : vector<16x128xf32>
    %cst_159 = arith.constant 5.000000e-01 : f32
    %402 = vector.broadcast %cst_159 : f32 to vector<16x128xf32>
    %403 = arith.mulf %402, %401 : vector<16x128xf32>
    %404 = arith.addf %359, %403 : vector<16x128xf32>
    %c0_160 = arith.constant 0 : index
    %c0_161 = arith.constant 0 : index
    %405 = vector.load %arg33[%c0_160, %c0_161] : memref<1x128xf32, #tpu.memory_space<vmem>>, vector<1x128xf32>
    %c0_162 = arith.constant 0 : index
    %c0_163 = arith.constant 0 : index
    %406 = vector.load %arg34[%c0_162, %c0_163] : memref<1x128xf32, #tpu.memory_space<vmem>>, vector<1x128xf32>
    %cst_164 = arith.constant dense<0.000000e+00> : vector<16xf32>
    %407 = vector.multi_reduction <add>, %404, %cst_164 [1] : vector<16x128xf32> to vector<16xf32>
    %408 = vector.shape_cast %407 : vector<16xf32> to vector<16x1xf32>
    %cst_165 = arith.constant 1.280000e+02 : f32
    %409 = vector.broadcast %cst_165 : f32 to vector<16x1xf32>
    %410 = arith.divf %408, %409 : vector<16x1xf32>
    %411 = vector.broadcast %410 : vector<16x1xf32> to vector<16x128xf32>
    %412 = arith.subf %404, %411 : vector<16x128xf32>
    %413 = arith.mulf %412, %412 : vector<16x128xf32>
    %cst_166 = arith.constant dense<0.000000e+00> : vector<16xf32>
    %414 = vector.multi_reduction <add>, %413, %cst_166 [1] : vector<16x128xf32> to vector<16xf32>
    %415 = vector.shape_cast %414 : vector<16xf32> to vector<16x1xf32>
    %cst_167 = arith.constant 1.280000e+02 : f32
    %416 = vector.broadcast %cst_167 : f32 to vector<16x1xf32>
    %417 = arith.divf %415, %416 : vector<16x1xf32>
    %418 = vector.broadcast %410 : vector<16x1xf32> to vector<16x128xf32>
    %419 = arith.subf %404, %418 : vector<16x128xf32>
    %cst_168 = arith.constant 9.99999974E-6 : f32
    %420 = vector.broadcast %cst_168 : f32 to vector<16x1xf32>
    %421 = arith.addf %417, %420 : vector<16x1xf32>
    %422 = math.rsqrt %421 : vector<16x1xf32>
    %423 = vector.broadcast %422 : vector<16x1xf32> to vector<16x128xf32>
    %424 = arith.mulf %419, %423 : vector<16x128xf32>
    %425 = vector.broadcast %405 : vector<1x128xf32> to vector<16x128xf32>
    %426 = arith.mulf %424, %425 : vector<16x128xf32>
    %427 = vector.broadcast %406 : vector<1x128xf32> to vector<16x128xf32>
    %428 = arith.addf %426, %427 : vector<16x128xf32>
    %c0_169 = arith.constant 0 : index
    %c0_170 = arith.constant 0 : index
    %c0_171 = arith.constant 0 : index
    %429 = vector.load %arg35[%c0_169, %c0_170, %c0_171] : memref<1x16x128xf32, #tpu.memory_space<vmem>>, vector<1x16x128xf32>
    %430 = vector.shape_cast %429 : vector<1x16x128xf32> to vector<16x128xf32>
    %431 = vector.shape_cast %428 : vector<16x128xf32> to vector<1x16x128xf32>
    tpu.vector_store %arg35[%c0_169, %c0_170, %c0_171], %431 {strides = array<i32>} : memref<1x16x128xf32, #tpu.memory_space<vmem>>, vector<1x16x128xf32>,
    return
  }
  func.func @transform_0(%arg0: i32) -> (i32, i32, i32) {
    %c0_i32 = arith.constant 0 : i32
    %c0_i32_0 = arith.constant 0 : i32
    %c0_i32_1 = arith.constant 0 : i32
    return %arg0, %c0_i32, %c0_i32_0 : i32, i32, i32
  }
  func.func @transform_1(%arg0: i32) -> (i32, i32) {
    %c0_i32 = arith.constant 0 : i32
    %c0_i32_0 = arith.constant 0 : i32
    %c0_i32_1 = arith.constant 0 : i32
    return %c0_i32, %c0_i32_0 : i32, i32
  }
  func.func @transform_2(%arg0: i32) -> (i32, i32) {
    %c0_i32 = arith.constant 0 : i32
    %c0_i32_0 = arith.constant 0 : i32
    %c0_i32_1 = arith.constant 0 : i32
    return %c0_i32, %c0_i32_0 : i32, i32
  }
  func.func @transform_3(%arg0: i32) -> (i32, i32) {
    %c0_i32 = arith.constant 0 : i32
    %c0_i32_0 = arith.constant 0 : i32
    %c0_i32_1 = arith.constant 0 : i32
    return %c0_i32, %c0_i32_0 : i32, i32
  }
  func.func @transform_4(%arg0: i32) -> (i32, i32) {
    %c0_i32 = arith.constant 0 : i32
    %c0_i32_0 = arith.constant 0 : i32
    %c0_i32_1 = arith.constant 0 : i32
    return %c0_i32, %c0_i32_0 : i32, i32
  }
  func.func @transform_5(%arg0: i32) -> (i32, i32) {
    %c0_i32 = arith.constant 0 : i32
    %c0_i32_0 = arith.constant 0 : i32
    %c0_i32_1 = arith.constant 0 : i32
    return %c0_i32, %c0_i32_0 : i32, i32
  }
  func.func @transform_6(%arg0: i32) -> (i32, i32) {
    %c0_i32 = arith.constant 0 : i32
    %c0_i32_0 = arith.constant 0 : i32
    %c0_i32_1 = arith.constant 0 : i32
    return %c0_i32, %c0_i32_0 : i32, i32
  }
  func.func @transform_7(%arg0: i32) -> (i32, i32) {
    %c0_i32 = arith.constant 0 : i32
    %c0_i32_0 = arith.constant 0 : i32
    %c0_i32_1 = arith.constant 0 : i32
    return %c0_i32, %c0_i32_0 : i32, i32
  }
  func.func @transform_8(%arg0: i32) -> (i32, i32) {
    %c0_i32 = arith.constant 0 : i32
    %c0_i32_0 = arith.constant 0 : i32
    %c0_i32_1 = arith.constant 0 : i32
    return %c0_i32, %c0_i32_0 : i32, i32
  }
  func.func @transform_9(%arg0: i32) -> (i32, i32) {
    %c0_i32 = arith.constant 0 : i32
    %c0_i32_0 = arith.constant 0 : i32
    %c0_i32_1 = arith.constant 0 : i32
    return %c0_i32, %c0_i32_0 : i32, i32
  }
  func.func @transform_10(%arg0: i32) -> (i32, i32) {
    %c0_i32 = arith.constant 0 : i32
    %c0_i32_0 = arith.constant 0 : i32
    %c0_i32_1 = arith.constant 0 : i32
    return %c0_i32, %c0_i32_0 : i32, i32
  }
  func.func @transform_11(%arg0: i32) -> (i32, i32) {
    %c0_i32 = arith.constant 0 : i32
    %c0_i32_0 = arith.constant 0 : i32
    %c0_i32_1 = arith.constant 0 : i32
    return %c0_i32, %c0_i32_0 : i32, i32
  }
  func.func @transform_12(%arg0: i32) -> (i32, i32) {
    %c0_i32 = arith.constant 0 : i32
    %c0_i32_0 = arith.constant 0 : i32
    %c0_i32_1 = arith.constant 0 : i32
    return %c0_i32, %c0_i32_0 : i32, i32
  }
  func.func @transform_13(%arg0: i32) -> (i32, i32) {
    %c0_i32 = arith.constant 0 : i32
    %c0_i32_0 = arith.constant 0 : i32
    %c0_i32_1 = arith.constant 0 : i32
    return %c0_i32, %c0_i32_0 : i32, i32
  }
  func.func @transform_14(%arg0: i32) -> (i32, i32) {
    %c0_i32 = arith.constant 0 : i32
    %c0_i32_0 = arith.constant 0 : i32
    %c0_i32_1 = arith.constant 0 : i32
    return %c0_i32, %c0_i32_0 : i32, i32
  }
  func.func @transform_15(%arg0: i32) -> (i32, i32) {
    %c0_i32 = arith.constant 0 : i32
    %c0_i32_0 = arith.constant 0 : i32
    %c0_i32_1 = arith.constant 0 : i32
    return %c0_i32, %c0_i32_0 : i32, i32
  }
  func.func @transform_16(%arg0: i32) -> (i32, i32) {
    %c0_i32 = arith.constant 0 : i32
    %c0_i32_0 = arith.constant 0 : i32
    %c0_i32_1 = arith.constant 0 : i32
    return %c0_i32, %c0_i32_0 : i32, i32
  }
  func.func @transform_17(%arg0: i32) -> (i32, i32) {
    %c0_i32 = arith.constant 0 : i32
    %c0_i32_0 = arith.constant 0 : i32
    %c0_i32_1 = arith.constant 0 : i32
    return %c0_i32, %c0_i32_0 : i32, i32
  }
  func.func @transform_18(%arg0: i32) -> (i32, i32) {
    %c0_i32 = arith.constant 0 : i32
    %c0_i32_0 = arith.constant 0 : i32
    %c0_i32_1 = arith.constant 0 : i32
    return %c0_i32, %c0_i32_0 : i32, i32
  }
  func.func @transform_19(%arg0: i32) -> (i32, i32) {
    %c0_i32 = arith.constant 0 : i32
    %c0_i32_0 = arith.constant 0 : i32
    %c0_i32_1 = arith.constant 0 : i32
    return %c0_i32, %c0_i32_0 : i32, i32
  }
  func.func @transform_20(%arg0: i32) -> (i32, i32) {
    %c0_i32 = arith.constant 0 : i32
    %c0_i32_0 = arith.constant 0 : i32
    %c0_i32_1 = arith.constant 0 : i32
    return %c0_i32, %c0_i32_0 : i32, i32
  }
  func.func @transform_21(%arg0: i32) -> (i32, i32) {
    %c0_i32 = arith.constant 0 : i32
    %c0_i32_0 = arith.constant 0 : i32
    %c0_i32_1 = arith.constant 0 : i32
    return %c0_i32, %c0_i32_0 : i32, i32
  }
  func.func @transform_22(%arg0: i32) -> (i32, i32) {
    %c0_i32 = arith.constant 0 : i32
    %c0_i32_0 = arith.constant 0 : i32
    %c0_i32_1 = arith.constant 0 : i32
    return %c0_i32, %c0_i32_0 : i32, i32
  }
  func.func @transform_23(%arg0: i32) -> (i32, i32) {
    %c0_i32 = arith.constant 0 : i32
    %c0_i32_0 = arith.constant 0 : i32
    %c0_i32_1 = arith.constant 0 : i32
    return %c0_i32, %c0_i32_0 : i32, i32
  }
  func.func @transform_24(%arg0: i32) -> (i32, i32) {
    %c0_i32 = arith.constant 0 : i32
    %c0_i32_0 = arith.constant 0 : i32
    %c0_i32_1 = arith.constant 0 : i32
    return %c0_i32, %c0_i32_0 : i32, i32
  }
  func.func @transform_25(%arg0: i32) -> (i32, i32) {
    %c0_i32 = arith.constant 0 : i32
    %c0_i32_0 = arith.constant 0 : i32
    %c0_i32_1 = arith.constant 0 : i32
    return %c0_i32, %c0_i32_0 : i32, i32
  }
  func.func @transform_26(%arg0: i32) -> (i32, i32) {
    %c0_i32 = arith.constant 0 : i32
    %c0_i32_0 = arith.constant 0 : i32
    %c0_i32_1 = arith.constant 0 : i32
    return %c0_i32, %c0_i32_0 : i32, i32
  }
  func.func @transform_27(%arg0: i32) -> (i32, i32) {
    %c0_i32 = arith.constant 0 : i32
    %c0_i32_0 = arith.constant 0 : i32
    %c0_i32_1 = arith.constant 0 : i32
    return %c0_i32, %c0_i32_0 : i32, i32
  }
  func.func @transform_28(%arg0: i32) -> (i32, i32) {
    %c0_i32 = arith.constant 0 : i32
    %c0_i32_0 = arith.constant 0 : i32
    %c0_i32_1 = arith.constant 0 : i32
    return %c0_i32, %c0_i32_0 : i32, i32
  }
  func.func @transform_29(%arg0: i32) -> (i32, i32) {
    %c0_i32 = arith.constant 0 : i32
    %c0_i32_0 = arith.constant 0 : i32
    %c0_i32_1 = arith.constant 0 : i32
    return %c0_i32, %c0_i32_0 : i32, i32
  }
  func.func @transform_30(%arg0: i32) -> (i32, i32) {
    %c0_i32 = arith.constant 0 : i32
    %c0_i32_0 = arith.constant 0 : i32
    %c0_i32_1 = arith.constant 0 : i32
    return %c0_i32, %c0_i32_0 : i32, i32
  }
  func.func @transform_31(%arg0: i32) -> (i32, i32) {
    %c0_i32 = arith.constant 0 : i32
    %c0_i32_0 = arith.constant 0 : i32
    %c0_i32_1 = arith.constant 0 : i32
    return %c0_i32, %c0_i32_0 : i32, i32
  }
  func.func @transform_32(%arg0: i32) -> (i32, i32) {
    %c0_i32 = arith.constant 0 : i32
    %c0_i32_0 = arith.constant 0 : i32
    %c0_i32_1 = arith.constant 0 : i32
    return %c0_i32, %c0_i32_0 : i32, i32
  }
  func.func @transform_33(%arg0: i32) -> (i32, i32) {
    %c0_i32 = arith.constant 0 : i32
    %c0_i32_0 = arith.constant 0 : i32
    %c0_i32_1 = arith.constant 0 : i32
    return %c0_i32, %c0_i32_0 : i32, i32
  }
  func.func @transform_34(%arg0: i32) -> (i32, i32, i32) {
    %c0_i32 = arith.constant 0 : i32
    %c0_i32_0 = arith.constant 0 : i32
    %c0_i32_1 = arith.constant 0 : i32
    return %arg0, %c0_i32, %c0_i32_0 : i32, i32, i32
  }
}

module attributes {stable_mosaic.version = 11 : i64} {
  func.func @_conformer_layer_kernel(%arg0: i32, %arg1: memref<1x16x128xf32, #tpu.memory_space<vmem>>, %arg2: memref<16x128xf32, #tpu.memory_space<vmem>>, %arg3: memref<16x128xf32, #tpu.memory_space<vmem>>, %arg4: memref<1x128xf32, #tpu.memory_space<vmem>>, %arg5: memref<1x128xf32, #tpu.memory_space<vmem>>, %arg6: memref<128x256xbf16, #tpu.memory_space<vmem>>, %arg7: memref<1x256xf32, #tpu.memory_space<vmem>>, %arg8: memref<256x128xbf16, #tpu.memory_space<vmem>>, %arg9: memref<1x128xf32, #tpu.memory_space<vmem>>, %arg10: memref<1x128xf32, #tpu.memory_space<vmem>>, %arg11: memref<1x128xf32, #tpu.memory_space<vmem>>, %arg12: memref<128x128xbf16, #tpu.memory_space<vmem>>, %arg13: memref<1x128xf32, #tpu.memory_space<vmem>>, %arg14: memref<128x128xbf16, #tpu.memory_space<vmem>>, %arg15: memref<1x128xf32, #tpu.memory_space<vmem>>, %arg16: memref<128x128xbf16, #tpu.memory_space<vmem>>, %arg17: memref<1x128xf32, #tpu.memory_space<vmem>>, %arg18: memref<128x128xbf16, #tpu.memory_space<vmem>>, %arg19: memref<1x128xf32, #tpu.memory_space<vmem>>, %arg20: memref<128x128xbf16, #tpu.memory_space<vmem>>, %arg21: memref<128x128xbf16, #tpu.memory_space<vmem>>, %arg22: memref<8x128xf32, #tpu.memory_space<vmem>>, %arg23: memref<1x128xf32, #tpu.memory_space<vmem>>, %arg24: memref<1x128xf32, #tpu.memory_space<vmem>>, %arg25: memref<128x128xbf16, #tpu.memory_space<vmem>>, %arg26: memref<1x128xf32, #tpu.memory_space<vmem>>, %arg27: memref<1x128xf32, #tpu.memory_space<vmem>>, %arg28: memref<1x128xf32, #tpu.memory_space<vmem>>, %arg29: memref<128x256xbf16, #tpu.memory_space<vmem>>, %arg30: memref<1x256xf32, #tpu.memory_space<vmem>>, %arg31: memref<256x128xbf16, #tpu.memory_space<vmem>>, %arg32: memref<1x128xf32, #tpu.memory_space<vmem>>, %arg33: memref<1x128xf32, #tpu.memory_space<vmem>>, %arg34: memref<1x128xf32, #tpu.memory_space<vmem>>, %arg35: memref<1x16x128xf32, #tpu.memory_space<vmem>>, %arg36: memref<16x128xf32, #tpu.memory_space<vmem>>) attributes {dimension_semantics = [#tpu.dimension_semantics<parallel>], iteration_bounds = array<i64: 2>, scalar_prefetch = 0 : i64, scratch_operands = 1 : i64, tpu.core_type = #tpu.core_type<tc>, window_params = [{transform_indices = @transform_0, window_bounds = array<i64: 1, 16, 128>}, {pipeline_mode = #tpu.pipeline_mode<synchronous>, transform_indices = @transform_1, window_bounds = array<i64: 16, 128>}, {pipeline_mode = #tpu.pipeline_mode<synchronous>, transform_indices = @transform_2, window_bounds = array<i64: 16, 128>}, {pipeline_mode = #tpu.pipeline_mode<synchronous>, transform_indices = @transform_3, window_bounds = array<i64: 1, 128>}, {pipeline_mode = #tpu.pipeline_mode<synchronous>, transform_indices = @transform_4, window_bounds = array<i64: 1, 128>}, {pipeline_mode = #tpu.pipeline_mode<synchronous>, transform_indices = @transform_5, window_bounds = array<i64: 128, 256>}, {pipeline_mode = #tpu.pipeline_mode<synchronous>, transform_indices = @transform_6, window_bounds = array<i64: 1, 256>}, {pipeline_mode = #tpu.pipeline_mode<synchronous>, transform_indices = @transform_7, window_bounds = array<i64: 256, 128>}, {pipeline_mode = #tpu.pipeline_mode<synchronous>, transform_indices = @transform_8, window_bounds = array<i64: 1, 128>}, {pipeline_mode = #tpu.pipeline_mode<synchronous>, transform_indices = @transform_9, window_bounds = array<i64: 1, 128>}, {pipeline_mode = #tpu.pipeline_mode<synchronous>, transform_indices = @transform_10, window_bounds = array<i64: 1, 128>}, {pipeline_mode = #tpu.pipeline_mode<synchronous>, transform_indices = @transform_11, window_bounds = array<i64: 128, 128>}, {pipeline_mode = #tpu.pipeline_mode<synchronous>, transform_indices = @transform_12, window_bounds = array<i64: 1, 128>}, {pipeline_mode = #tpu.pipeline_mode<synchronous>, transform_indices = @transform_13, window_bounds = array<i64: 128, 128>}, {pipeline_mode = #tpu.pipeline_mode<synchronous>, transform_indices = @transform_14, window_bounds = array<i64: 1, 128>}, {pipeline_mode = #tpu.pipeline_mode<synchronous>, transform_indices = @transform_15, window_bounds = array<i64: 128, 128>}, {pipeline_mode = #tpu.pipeline_mode<synchronous>, transform_indices = @transform_16, window_bounds = array<i64: 1, 128>}, {pipeline_mode = #tpu.pipeline_mode<synchronous>, transform_indices = @transform_17, window_bounds = array<i64: 128, 128>}, {pipeline_mode = #tpu.pipeline_mode<synchronous>, transform_indices = @transform_18, window_bounds = array<i64: 1, 128>}, {pipeline_mode = #tpu.pipeline_mode<synchronous>, transform_indices = @transform_19, window_bounds = array<i64: 128, 128>}, {pipeline_mode = #tpu.pipeline_mode<synchronous>, transform_indices = @transform_20, window_bounds = array<i64: 128, 128>}, {pipeline_mode = #tpu.pipeline_mode<synchronous>, transform_indices = @transform_21, window_bounds = array<i64: 8, 128>}, {pipeline_mode = #tpu.pipeline_mode<synchronous>, transform_indices = @transform_22, window_bounds = array<i64: 1, 128>}, {pipeline_mode = #tpu.pipeline_mode<synchronous>, transform_indices = @transform_23, window_bounds = array<i64: 1, 128>}, {pipeline_mode = #tpu.pipeline_mode<synchronous>, transform_indices = @transform_24, window_bounds = array<i64: 128, 128>}, {pipeline_mode = #tpu.pipeline_mode<synchronous>, transform_indices = @transform_25, window_bounds = array<i64: 1, 128>}, {pipeline_mode = #tpu.pipeline_mode<synchronous>, transform_indices = @transform_26, window_bounds = array<i64: 1, 128>}, {pipeline_mode = #tpu.pipeline_mode<synchronous>, transform_indices = @transform_27, window_bounds = array<i64: 1, 128>}, {pipeline_mode = #tpu.pipeline_mode<synchronous>, transform_indices = @transform_28, window_bounds = array<i64: 128, 256>}, {pipeline_mode = #tpu.pipeline_mode<synchronous>, transform_indices = @transform_29, window_bounds = array<i64: 1, 256>}, {pipeline_mode = #tpu.pipeline_mode<synchronous>, transform_indices = @transform_30, window_bounds = array<i64: 256, 128>}, {pipeline_mode = #tpu.pipeline_mode<synchronous>, transform_indices = @transform_31, window_bounds = array<i64: 1, 128>}, {pipeline_mode = #tpu.pipeline_mode<synchronous>, transform_indices = @transform_32, window_bounds = array<i64: 1, 128>}, {pipeline_mode = #tpu.pipeline_mode<synchronous>, transform_indices = @transform_33, window_bounds = array<i64: 1, 128>}, {transform_indices = @transform_34, window_bounds = array<i64: 1, 16, 128>}]} {
    %c0 = arith.constant 0 : index
    %c0_0 = arith.constant 0 : index
    %c0_1 = arith.constant 0 : index
    %0 = vector.load %arg1[%c0, %c0_0, %c0_1] : memref<1x16x128xf32, #tpu.memory_space<vmem>>, vector<1x16x128xf32>
    %1 = vector.shape_cast %0 : vector<1x16x128xf32> to vector<16x128xf32>
    %c0_2 = arith.constant 0 : index
    %c0_3 = arith.constant 0 : index
    %2 = vector.load %arg2[%c0_2, %c0_3] : memref<16x128xf32, #tpu.memory_space<vmem>>, vector<16x128xf32>
    %c0_4 = arith.constant 0 : index
    %c0_5 = arith.constant 0 : index
    %3 = vector.load %arg3[%c0_4, %c0_5] : memref<16x128xf32, #tpu.memory_space<vmem>>, vector<16x128xf32>
    %4 = tpu.iota {dimensions = array<i32: 1>} : vector<16x128xi32>
    %c1_i32 = arith.constant 1 : i32
    %5 = vector.broadcast %c1_i32 : i32 to vector<16x128xi32>
    %6 = arith.andi %4, %5 : vector<16x128xi32>
    %c0_i32 = arith.constant 0 : i32
    %7 = vector.broadcast %c0_i32 : i32 to vector<16x128xi32>
    %8 = arith.cmpi eq, %6, %7 : vector<16x128xi32>
    %9 = tpu.iota {dimensions = array<i32: 0>} : vector<16x128xi32>
    %c0_6 = arith.constant 0 : index
    %c0_7 = arith.constant 0 : index
    %10 = vector.load %arg4[%c0_6, %c0_7] : memref<1x128xf32, #tpu.memory_space<vmem>>, vector<1x128xf32>
    %c0_8 = arith.constant 0 : index
    %c0_9 = arith.constant 0 : index
    %11 = vector.load %arg5[%c0_8, %c0_9] : memref<1x128xf32, #tpu.memory_space<vmem>>, vector<1x128xf32>
    %cst = arith.constant dense<0.000000e+00> : vector<16xf32>
    %12 = vector.multi_reduction <add>, %1, %cst [1] : vector<16x128xf32> to vector<16xf32>
    %13 = vector.shape_cast %12 : vector<16xf32> to vector<16x1xf32>
    %cst_10 = arith.constant 1.280000e+02 : f32
    %14 = vector.broadcast %cst_10 : f32 to vector<16x1xf32>
    %15 = arith.divf %13, %14 : vector<16x1xf32>
    %16 = vector.broadcast %15 : vector<16x1xf32> to vector<16x128xf32>
    %17 = arith.subf %1, %16 : vector<16x128xf32>
    %18 = arith.mulf %17, %17 : vector<16x128xf32>
    %cst_11 = arith.constant dense<0.000000e+00> : vector<16xf32>
    %19 = vector.multi_reduction <add>, %18, %cst_11 [1] : vector<16x128xf32> to vector<16xf32>
    %20 = vector.shape_cast %19 : vector<16xf32> to vector<16x1xf32>
    %cst_12 = arith.constant 1.280000e+02 : f32
    %21 = vector.broadcast %cst_12 : f32 to vector<16x1xf32>
    %22 = arith.divf %20, %21 : vector<16x1xf32>
    %23 = vector.broadcast %15 : vector<16x1xf32> to vector<16x128xf32>
    %24 = arith.subf %1, %23 : vector<16x128xf32>
    %cst_13 = arith.constant 9.99999974E-6 : f32
    %25 = vector.broadcast %cst_13 : f32 to vector<16x1xf32>
    %26 = arith.addf %22, %25 : vector<16x1xf32>
    %27 = math.rsqrt %26 : vector<16x1xf32>
    %28 = vector.broadcast %27 : vector<16x1xf32> to vector<16x128xf32>
    %29 = arith.mulf %24, %28 : vector<16x128xf32>
    %30 = vector.broadcast %10 : vector<1x128xf32> to vector<16x128xf32>
    %31 = arith.mulf %29, %30 : vector<16x128xf32>
    %32 = vector.broadcast %11 : vector<1x128xf32> to vector<16x128xf32>
    %33 = arith.addf %31, %32 : vector<16x128xf32>
    %34 = arith.truncf %33 : vector<16x128xf32> to vector<16x128xbf16>
    %c0_14 = arith.constant 0 : index
    %c0_15 = arith.constant 0 : index
    %35 = vector.load %arg6[%c0_14, %c0_15] : memref<128x256xbf16, #tpu.memory_space<vmem>>, vector<128x256xbf16>
    %cst_16 = arith.constant dense<0.000000e+00> : vector<16x256xf32>
    %36 = tpu.matmul %34, %35, %cst_16 {dimension_numbers = #tpu.dot_dimension_numbers<[1], [0], [0], [1], [0, 0, 1, 1], [], []>} : vector<16x128xbf16>, vector<128x256xbf16>, vector<16x256xf32> -> vector<16x256xf32>
    %c0_17 = arith.constant 0 : index
    %c0_18 = arith.constant 0 : index
    %37 = vector.load %arg7[%c0_17, %c0_18] : memref<1x256xf32, #tpu.memory_space<vmem>>, vector<1x256xf32>
    %38 = vector.broadcast %37 : vector<1x256xf32> to vector<16x256xf32>
    %39 = arith.addf %36, %38 : vector<16x256xf32>
    %40 = arith.negf %39 : vector<16x256xf32>
    %41 = math.exp %40 : vector<16x256xf32>
    %cst_19 = arith.constant 1.000000e+00 : f32
    %42 = vector.broadcast %cst_19 : f32 to vector<16x256xf32>
    %43 = arith.addf %42, %41 : vector<16x256xf32>
    %44 = arith.divf %42, %43 : vector<16x256xf32>
    %45 = arith.mulf %39, %44 : vector<16x256xf32>
    %46 = arith.truncf %45 : vector<16x256xf32> to vector<16x256xbf16>
    %c0_20 = arith.constant 0 : index
    %c0_21 = arith.constant 0 : index
    %47 = vector.load %arg8[%c0_20, %c0_21] : memref<256x128xbf16, #tpu.memory_space<vmem>>, vector<256x128xbf16>
    %cst_22 = arith.constant dense<0.000000e+00> : vector<16x128xf32>
    %48 = tpu.matmul %46, %47, %cst_22 {dimension_numbers = #tpu.dot_dimension_numbers<[1], [0], [0], [1], [0, 0, 1, 1], [], []>} : vector<16x256xbf16>, vector<256x128xbf16>, vector<16x128xf32> -> vector<16x128xf32>
    %c0_23 = arith.constant 0 : index
    %c0_24 = arith.constant 0 : index
    %49 = vector.load %arg9[%c0_23, %c0_24] : memref<1x128xf32, #tpu.memory_space<vmem>>, vector<1x128xf32>
    %50 = vector.broadcast %49 : vector<1x128xf32> to vector<16x128xf32>
    %51 = arith.addf %48, %50 : vector<16x128xf32>
    %cst_25 = arith.constant 5.000000e-01 : f32
    %52 = vector.broadcast %cst_25 : f32 to vector<16x128xf32>
    %53 = arith.mulf %52, %51 : vector<16x128xf32>
    %54 = arith.addf %1, %53 : vector<16x128xf32>
    %c0_26 = arith.constant 0 : index
    %c0_27 = arith.constant 0 : index
    %55 = vector.load %arg10[%c0_26, %c0_27] : memref<1x128xf32, #tpu.memory_space<vmem>>, vector<1x128xf32>
    %c0_28 = arith.constant 0 : index
    %c0_29 = arith.constant 0 : index
    %56 = vector.load %arg11[%c0_28, %c0_29] : memref<1x128xf32, #tpu.memory_space<vmem>>, vector<1x128xf32>
    %cst_30 = arith.constant dense<0.000000e+00> : vector<16xf32>
    %57 = vector.multi_reduction <add>, %54, %cst_30 [1] : vector<16x128xf32> to vector<16xf32>
    %58 = vector.shape_cast %57 : vector<16xf32> to vector<16x1xf32>
    %cst_31 = arith.constant 1.280000e+02 : f32
    %59 = vector.broadcast %cst_31 : f32 to vector<16x1xf32>
    %60 = arith.divf %58, %59 : vector<16x1xf32>
    %61 = vector.broadcast %60 : vector<16x1xf32> to vector<16x128xf32>
    %62 = arith.subf %54, %61 : vector<16x128xf32>
    %63 = arith.mulf %62, %62 : vector<16x128xf32>
    %cst_32 = arith.constant dense<0.000000e+00> : vector<16xf32>
    %64 = vector.multi_reduction <add>, %63, %cst_32 [1] : vector<16x128xf32> to vector<16xf32>
    %65 = vector.shape_cast %64 : vector<16xf32> to vector<16x1xf32>
    %cst_33 = arith.constant 1.280000e+02 : f32
    %66 = vector.broadcast %cst_33 : f32 to vector<16x1xf32>
    %67 = arith.divf %65, %66 : vector<16x1xf32>
    %68 = vector.broadcast %60 : vector<16x1xf32> to vector<16x128xf32>
    %69 = arith.subf %54, %68 : vector<16x128xf32>
    %cst_34 = arith.constant 9.99999974E-6 : f32
    %70 = vector.broadcast %cst_34 : f32 to vector<16x1xf32>
    %71 = arith.addf %67, %70 : vector<16x1xf32>
    %72 = math.rsqrt %71 : vector<16x1xf32>
    %73 = vector.broadcast %72 : vector<16x1xf32> to vector<16x128xf32>
    %74 = arith.mulf %69, %73 : vector<16x128xf32>
    %75 = vector.broadcast %55 : vector<1x128xf32> to vector<16x128xf32>
    %76 = arith.mulf %74, %75 : vector<16x128xf32>
    %77 = vector.broadcast %56 : vector<1x128xf32> to vector<16x128xf32>
    %78 = arith.addf %76, %77 : vector<16x128xf32>
    %79 = arith.truncf %78 : vector<16x128xf32> to vector<16x128xbf16>
    %c0_35 = arith.constant 0 : index
    %c0_36 = arith.constant 0 : index
    %80 = vector.load %arg12[%c0_35, %c0_36] : memref<128x128xbf16, #tpu.memory_space<vmem>>, vector<128x128xbf16>
    %cst_37 = arith.constant dense<0.000000e+00> : vector<16x128xf32>
    %81 = tpu.matmul %79, %80, %cst_37 {dimension_numbers = #tpu.dot_dimension_numbers<[1], [0], [0], [1], [0, 0, 1, 1], [], []>} : vector<16x128xbf16>, vector<128x128xbf16>, vector<16x128xf32> -> vector<16x128xf32>
    %c0_38 = arith.constant 0 : index
    %c0_39 = arith.constant 0 : index
    %82 = vector.load %arg13[%c0_38, %c0_39] : memref<1x128xf32, #tpu.memory_space<vmem>>, vector<1x128xf32>
    %83 = vector.broadcast %82 : vector<1x128xf32> to vector<16x128xf32>
    %84 = arith.addf %81, %83 : vector<16x128xf32>
    %85 = arith.truncf %78 : vector<16x128xf32> to vector<16x128xbf16>
    %c0_40 = arith.constant 0 : index
    %c0_41 = arith.constant 0 : index
    %86 = vector.load %arg14[%c0_40, %c0_41] : memref<128x128xbf16, #tpu.memory_space<vmem>>, vector<128x128xbf16>
    %cst_42 = arith.constant dense<0.000000e+00> : vector<16x128xf32>
    %87 = tpu.matmul %85, %86, %cst_42 {dimension_numbers = #tpu.dot_dimension_numbers<[1], [0], [0], [1], [0, 0, 1, 1], [], []>} : vector<16x128xbf16>, vector<128x128xbf16>, vector<16x128xf32> -> vector<16x128xf32>
    %c0_43 = arith.constant 0 : index
    %c0_44 = arith.constant 0 : index
    %88 = vector.load %arg15[%c0_43, %c0_44] : memref<1x128xf32, #tpu.memory_space<vmem>>, vector<1x128xf32>
    %89 = vector.broadcast %88 : vector<1x128xf32> to vector<16x128xf32>
    %90 = arith.addf %87, %89 : vector<16x128xf32>
    %91 = arith.truncf %78 : vector<16x128xf32> to vector<16x128xbf16>
    %c0_45 = arith.constant 0 : index
    %c0_46 = arith.constant 0 : index
    %92 = vector.load %arg16[%c0_45, %c0_46] : memref<128x128xbf16, #tpu.memory_space<vmem>>, vector<128x128xbf16>
    %cst_47 = arith.constant dense<0.000000e+00> : vector<16x128xf32>
    %93 = tpu.matmul %91, %92, %cst_47 {dimension_numbers = #tpu.dot_dimension_numbers<[1], [0], [0], [1], [0, 0, 1, 1], [], []>} : vector<16x128xbf16>, vector<128x128xbf16>, vector<16x128xf32> -> vector<16x128xf32>
    %c0_48 = arith.constant 0 : index
    %c0_49 = arith.constant 0 : index
    %94 = vector.load %arg17[%c0_48, %c0_49] : memref<1x128xf32, #tpu.memory_space<vmem>>, vector<1x128xf32>
    %95 = vector.broadcast %94 : vector<1x128xf32> to vector<16x128xf32>
    %96 = arith.addf %93, %95 : vector<16x128xf32>
    %c127_i32 = arith.constant 127 : i32
    %97 = tpu.dynamic_rotate %84 by %c127_i32 dim 1 : vector<16x128xf32>, i32 -> vector<16x128xf32>
    %c1_i32_50 = arith.constant 1 : i32
    %98 = tpu.dynamic_rotate %84 by %c1_i32_50 dim 1 : vector<16x128xf32>, i32 -> vector<16x128xf32>
    %99 = arith.mulf %84, %2 : vector<16x128xf32>
    %cst_51 = arith.constant 0.000000e+00 : f32
    %100 = vector.broadcast %cst_51 : f32 to vector<16x128xf32>
    %101 = arith.subf %100, %97 : vector<16x128xf32>
    %102 = arith.select %8, %101, %98 : vector<16x128xi1>, vector<16x128xf32>
    %103 = arith.mulf %102, %3 : vector<16x128xf32>
    %104 = arith.addf %99, %103 : vector<16x128xf32>
    %c127_i32_52 = arith.constant 127 : i32
    %105 = tpu.dynamic_rotate %90 by %c127_i32_52 dim 1 : vector<16x128xf32>, i32 -> vector<16x128xf32>
    %c1_i32_53 = arith.constant 1 : i32
    %106 = tpu.dynamic_rotate %90 by %c1_i32_53 dim 1 : vector<16x128xf32>, i32 -> vector<16x128xf32>
    %107 = arith.mulf %90, %2 : vector<16x128xf32>
    %cst_54 = arith.constant 0.000000e+00 : f32
    %108 = vector.broadcast %cst_54 : f32 to vector<16x128xf32>
    %109 = arith.subf %108, %105 : vector<16x128xf32>
    %110 = arith.select %8, %109, %106 : vector<16x128xi1>, vector<16x128xf32>
    %111 = arith.mulf %110, %3 : vector<16x128xf32>
    %112 = arith.addf %107, %111 : vector<16x128xf32>
    %113 = vector.extract_strided_slice %104 {offsets = [0, 0], sizes = [16, 32], strides = [1, 1]} : vector<16x128xf32> to vector<16x32xf32>
    %114 = arith.truncf %113 : vector<16x32xf32> to vector<16x32xbf16>
    %115 = vector.extract_strided_slice %112 {offsets = [0, 0], sizes = [16, 32], strides = [1, 1]} : vector<16x128xf32> to vector<16x32xf32>
    %116 = arith.truncf %115 : vector<16x32xf32> to vector<16x32xbf16>
    %117 = vector.extract_strided_slice %96 {offsets = [0, 0], sizes = [16, 32], strides = [1, 1]} : vector<16x128xf32> to vector<16x32xf32>
    %118 = arith.truncf %117 : vector<16x32xf32> to vector<16x32xbf16>
    %cst_55 = arith.constant dense<0.000000e+00> : vector<16x16xf32>
    %119 = tpu.matmul %114, %116, %cst_55 {dimension_numbers = #tpu.dot_dimension_numbers<[1], [1], [0], [0], [0, 0, 1, 0], [], []>} : vector<16x32xbf16>, vector<16x32xbf16>, vector<16x16xf32> -> vector<16x16xf32>
    %cst_56 = arith.constant 0.176776692 : f32
    %120 = vector.broadcast %cst_56 : f32 to vector<16x16xf32>
    %121 = arith.mulf %119, %120 : vector<16x16xf32>
    %cst_57 = arith.constant dense<0xFF800000> : vector<16xf32>
    %122 = vector.multi_reduction <maximumf>, %121, %cst_57 [1] : vector<16x16xf32> to vector<16xf32>
    %123 = vector.shape_cast %122 : vector<16xf32> to vector<16x1xf32>
    %124 = vector.broadcast %123 : vector<16x1xf32> to vector<16x16xf32>
    %125 = arith.subf %121, %124 : vector<16x16xf32>
    %126 = math.exp %125 : vector<16x16xf32>
    %cst_58 = arith.constant dense<0.000000e+00> : vector<16xf32>
    %127 = vector.multi_reduction <add>, %126, %cst_58 [1] : vector<16x16xf32> to vector<16xf32>
    %128 = vector.shape_cast %127 : vector<16xf32> to vector<16x1xf32>
    %129 = tpu.reciprocal %128 {approx = true} : vector<16x1xf32> -> vector<16x1xf32>
    %130 = vector.broadcast %129 : vector<16x1xf32> to vector<16x16xf32>
    %131 = arith.mulf %126, %130 : vector<16x16xf32>
    %132 = arith.truncf %131 : vector<16x16xf32> to vector<16x16xbf16>
    %cst_59 = arith.constant dense<0.000000e+00> : vector<16x32xf32>
    %133 = tpu.matmul %132, %118, %cst_59 {dimension_numbers = #tpu.dot_dimension_numbers<[1], [0], [0], [1], [0, 0, 1, 1], [], []>} : vector<16x16xbf16>, vector<16x32xbf16>, vector<16x32xf32> -> vector<16x32xf32>
    %c0_60 = arith.constant 0 : index
    %c0_61 = arith.constant 0 : index
    %134 = vector.load %arg36[%c0_60, %c0_61] : memref<16x128xf32, #tpu.memory_space<vmem>>, vector<16x32xf32>
    tpu.vector_store %arg36[%c0_60, %c0_61], %133 {strides = array<i32>} : memref<16x128xf32, #tpu.memory_space<vmem>>, vector<16x32xf32>,
    %135 = vector.extract_strided_slice %104 {offsets = [0, 32], sizes = [16, 32], strides = [1, 1]} : vector<16x128xf32> to vector<16x32xf32>
    %136 = arith.truncf %135 : vector<16x32xf32> to vector<16x32xbf16>
    %137 = vector.extract_strided_slice %112 {offsets = [0, 32], sizes = [16, 32], strides = [1, 1]} : vector<16x128xf32> to vector<16x32xf32>
    %138 = arith.truncf %137 : vector<16x32xf32> to vector<16x32xbf16>
    %139 = vector.extract_strided_slice %96 {offsets = [0, 32], sizes = [16, 32], strides = [1, 1]} : vector<16x128xf32> to vector<16x32xf32>
    %140 = arith.truncf %139 : vector<16x32xf32> to vector<16x32xbf16>
    %cst_62 = arith.constant dense<0.000000e+00> : vector<16x16xf32>
    %141 = tpu.matmul %136, %138, %cst_62 {dimension_numbers = #tpu.dot_dimension_numbers<[1], [1], [0], [0], [0, 0, 1, 0], [], []>} : vector<16x32xbf16>, vector<16x32xbf16>, vector<16x16xf32> -> vector<16x16xf32>
    %cst_63 = arith.constant 0.176776692 : f32
    %142 = vector.broadcast %cst_63 : f32 to vector<16x16xf32>
    %143 = arith.mulf %141, %142 : vector<16x16xf32>
    %cst_64 = arith.constant dense<0xFF800000> : vector<16xf32>
    %144 = vector.multi_reduction <maximumf>, %143, %cst_64 [1] : vector<16x16xf32> to vector<16xf32>
    %145 = vector.shape_cast %144 : vector<16xf32> to vector<16x1xf32>
    %146 = vector.broadcast %145 : vector<16x1xf32> to vector<16x16xf32>
    %147 = arith.subf %143, %146 : vector<16x16xf32>
    %148 = math.exp %147 : vector<16x16xf32>
    %cst_65 = arith.constant dense<0.000000e+00> : vector<16xf32>
    %149 = vector.multi_reduction <add>, %148, %cst_65 [1] : vector<16x16xf32> to vector<16xf32>
    %150 = vector.shape_cast %149 : vector<16xf32> to vector<16x1xf32>
    %151 = tpu.reciprocal %150 {approx = true} : vector<16x1xf32> -> vector<16x1xf32>
    %152 = vector.broadcast %151 : vector<16x1xf32> to vector<16x16xf32>
    %153 = arith.mulf %148, %152 : vector<16x16xf32>
    %154 = arith.truncf %153 : vector<16x16xf32> to vector<16x16xbf16>
    %cst_66 = arith.constant dense<0.000000e+00> : vector<16x32xf32>
    %155 = tpu.matmul %154, %140, %cst_66 {dimension_numbers = #tpu.dot_dimension_numbers<[1], [0], [0], [1], [0, 0, 1, 1], [], []>} : vector<16x16xbf16>, vector<16x32xbf16>, vector<16x32xf32> -> vector<16x32xf32>
    %c0_67 = arith.constant 0 : index
    %c32 = arith.constant 32 : index
    %156 = vector.load %arg36[%c0_67, %c32] : memref<16x128xf32, #tpu.memory_space<vmem>>, vector<16x32xf32>
    tpu.vector_store %arg36[%c0_67, %c32], %155 {strides = array<i32>} : memref<16x128xf32, #tpu.memory_space<vmem>>, vector<16x32xf32>,
    %157 = vector.extract_strided_slice %104 {offsets = [0, 64], sizes = [16, 32], strides = [1, 1]} : vector<16x128xf32> to vector<16x32xf32>
    %158 = arith.truncf %157 : vector<16x32xf32> to vector<16x32xbf16>
    %159 = vector.extract_strided_slice %112 {offsets = [0, 64], sizes = [16, 32], strides = [1, 1]} : vector<16x128xf32> to vector<16x32xf32>
    %160 = arith.truncf %159 : vector<16x32xf32> to vector<16x32xbf16>
    %161 = vector.extract_strided_slice %96 {offsets = [0, 64], sizes = [16, 32], strides = [1, 1]} : vector<16x128xf32> to vector<16x32xf32>
    %162 = arith.truncf %161 : vector<16x32xf32> to vector<16x32xbf16>
    %cst_68 = arith.constant dense<0.000000e+00> : vector<16x16xf32>
    %163 = tpu.matmul %158, %160, %cst_68 {dimension_numbers = #tpu.dot_dimension_numbers<[1], [1], [0], [0], [0, 0, 1, 0], [], []>} : vector<16x32xbf16>, vector<16x32xbf16>, vector<16x16xf32> -> vector<16x16xf32>
    %cst_69 = arith.constant 0.176776692 : f32
    %164 = vector.broadcast %cst_69 : f32 to vector<16x16xf32>
    %165 = arith.mulf %163, %164 : vector<16x16xf32>
    %cst_70 = arith.constant dense<0xFF800000> : vector<16xf32>
    %166 = vector.multi_reduction <maximumf>, %165, %cst_70 [1] : vector<16x16xf32> to vector<16xf32>
    %167 = vector.shape_cast %166 : vector<16xf32> to vector<16x1xf32>
    %168 = vector.broadcast %167 : vector<16x1xf32> to vector<16x16xf32>
    %169 = arith.subf %165, %168 : vector<16x16xf32>
    %170 = math.exp %169 : vector<16x16xf32>
    %cst_71 = arith.constant dense<0.000000e+00> : vector<16xf32>
    %171 = vector.multi_reduction <add>, %170, %cst_71 [1] : vector<16x16xf32> to vector<16xf32>
    %172 = vector.shape_cast %171 : vector<16xf32> to vector<16x1xf32>
    %173 = tpu.reciprocal %172 {approx = true} : vector<16x1xf32> -> vector<16x1xf32>
    %174 = vector.broadcast %173 : vector<16x1xf32> to vector<16x16xf32>
    %175 = arith.mulf %170, %174 : vector<16x16xf32>
    %176 = arith.truncf %175 : vector<16x16xf32> to vector<16x16xbf16>
    %cst_72 = arith.constant dense<0.000000e+00> : vector<16x32xf32>
    %177 = tpu.matmul %176, %162, %cst_72 {dimension_numbers = #tpu.dot_dimension_numbers<[1], [0], [0], [1], [0, 0, 1, 1], [], []>} : vector<16x16xbf16>, vector<16x32xbf16>, vector<16x32xf32> -> vector<16x32xf32>
    %c0_73 = arith.constant 0 : index
    %c64 = arith.constant 64 : index
    %178 = vector.load %arg36[%c0_73, %c64] : memref<16x128xf32, #tpu.memory_space<vmem>>, vector<16x32xf32>
    tpu.vector_store %arg36[%c0_73, %c64], %177 {strides = array<i32>} : memref<16x128xf32, #tpu.memory_space<vmem>>, vector<16x32xf32>,
    %179 = vector.extract_strided_slice %104 {offsets = [0, 96], sizes = [16, 32], strides = [1, 1]} : vector<16x128xf32> to vector<16x32xf32>
    %180 = arith.truncf %179 : vector<16x32xf32> to vector<16x32xbf16>
    %181 = vector.extract_strided_slice %112 {offsets = [0, 96], sizes = [16, 32], strides = [1, 1]} : vector<16x128xf32> to vector<16x32xf32>
    %182 = arith.truncf %181 : vector<16x32xf32> to vector<16x32xbf16>
    %183 = vector.extract_strided_slice %96 {offsets = [0, 96], sizes = [16, 32], strides = [1, 1]} : vector<16x128xf32> to vector<16x32xf32>
    %184 = arith.truncf %183 : vector<16x32xf32> to vector<16x32xbf16>
    %cst_74 = arith.constant dense<0.000000e+00> : vector<16x16xf32>
    %185 = tpu.matmul %180, %182, %cst_74 {dimension_numbers = #tpu.dot_dimension_numbers<[1], [1], [0], [0], [0, 0, 1, 0], [], []>} : vector<16x32xbf16>, vector<16x32xbf16>, vector<16x16xf32> -> vector<16x16xf32>
    %cst_75 = arith.constant 0.176776692 : f32
    %186 = vector.broadcast %cst_75 : f32 to vector<16x16xf32>
    %187 = arith.mulf %185, %186 : vector<16x16xf32>
    %cst_76 = arith.constant dense<0xFF800000> : vector<16xf32>
    %188 = vector.multi_reduction <maximumf>, %187, %cst_76 [1] : vector<16x16xf32> to vector<16xf32>
    %189 = vector.shape_cast %188 : vector<16xf32> to vector<16x1xf32>
    %190 = vector.broadcast %189 : vector<16x1xf32> to vector<16x16xf32>
    %191 = arith.subf %187, %190 : vector<16x16xf32>
    %192 = math.exp %191 : vector<16x16xf32>
    %cst_77 = arith.constant dense<0.000000e+00> : vector<16xf32>
    %193 = vector.multi_reduction <add>, %192, %cst_77 [1] : vector<16x16xf32> to vector<16xf32>
    %194 = vector.shape_cast %193 : vector<16xf32> to vector<16x1xf32>
    %195 = tpu.reciprocal %194 {approx = true} : vector<16x1xf32> -> vector<16x1xf32>
    %196 = vector.broadcast %195 : vector<16x1xf32> to vector<16x16xf32>
    %197 = arith.mulf %192, %196 : vector<16x16xf32>
    %198 = arith.truncf %197 : vector<16x16xf32> to vector<16x16xbf16>
    %cst_78 = arith.constant dense<0.000000e+00> : vector<16x32xf32>
    %199 = tpu.matmul %198, %184, %cst_78 {dimension_numbers = #tpu.dot_dimension_numbers<[1], [0], [0], [1], [0, 0, 1, 1], [], []>} : vector<16x16xbf16>, vector<16x32xbf16>, vector<16x32xf32> -> vector<16x32xf32>
    %c0_79 = arith.constant 0 : index
    %c96 = arith.constant 96 : index
    %200 = vector.load %arg36[%c0_79, %c96] : memref<16x128xf32, #tpu.memory_space<vmem>>, vector<16x32xf32>
    tpu.vector_store %arg36[%c0_79, %c96], %199 {strides = array<i32>} : memref<16x128xf32, #tpu.memory_space<vmem>>, vector<16x32xf32>,
    %c0_80 = arith.constant 0 : index
    %c0_81 = arith.constant 0 : index
    %201 = vector.load %arg36[%c0_80, %c0_81] : memref<16x128xf32, #tpu.memory_space<vmem>>, vector<16x128xf32>
    %202 = arith.truncf %201 : vector<16x128xf32> to vector<16x128xbf16>
    %c0_82 = arith.constant 0 : index
    %c0_83 = arith.constant 0 : index
    %203 = vector.load %arg18[%c0_82, %c0_83] : memref<128x128xbf16, #tpu.memory_space<vmem>>, vector<128x128xbf16>
    %cst_84 = arith.constant dense<0.000000e+00> : vector<16x128xf32>
    %204 = tpu.matmul %202, %203, %cst_84 {dimension_numbers = #tpu.dot_dimension_numbers<[1], [0], [0], [1], [0, 0, 1, 1], [], []>} : vector<16x128xbf16>, vector<128x128xbf16>, vector<16x128xf32> -> vector<16x128xf32>
    %205 = arith.addf %54, %204 : vector<16x128xf32>
    %c0_85 = arith.constant 0 : index
    %c0_86 = arith.constant 0 : index
    %206 = vector.load %arg19[%c0_85, %c0_86] : memref<1x128xf32, #tpu.memory_space<vmem>>, vector<1x128xf32>
    %207 = vector.broadcast %206 : vector<1x128xf32> to vector<16x128xf32>
    %208 = arith.addf %205, %207 : vector<16x128xf32>
    %209 = arith.truncf %208 : vector<16x128xf32> to vector<16x128xbf16>
    %c0_87 = arith.constant 0 : index
    %c0_88 = arith.constant 0 : index
    %210 = vector.load %arg20[%c0_87, %c0_88] : memref<128x128xbf16, #tpu.memory_space<vmem>>, vector<128x128xbf16>
    %cst_89 = arith.constant dense<0.000000e+00> : vector<16x128xf32>
    %211 = tpu.matmul %209, %210, %cst_89 {dimension_numbers = #tpu.dot_dimension_numbers<[1], [0], [0], [1], [0, 0, 1, 1], [], []>} : vector<16x128xbf16>, vector<128x128xbf16>, vector<16x128xf32> -> vector<16x128xf32>
    %212 = arith.truncf %208 : vector<16x128xf32> to vector<16x128xbf16>
    %c0_90 = arith.constant 0 : index
    %c0_91 = arith.constant 0 : index
    %213 = vector.load %arg21[%c0_90, %c0_91] : memref<128x128xbf16, #tpu.memory_space<vmem>>, vector<128x128xbf16>
    %cst_92 = arith.constant dense<0.000000e+00> : vector<16x128xf32>
    %214 = tpu.matmul %212, %213, %cst_92 {dimension_numbers = #tpu.dot_dimension_numbers<[1], [0], [0], [1], [0, 0, 1, 1], [], []>} : vector<16x128xbf16>, vector<128x128xbf16>, vector<16x128xf32> -> vector<16x128xf32>
    %215 = arith.negf %214 : vector<16x128xf32>
    %216 = math.exp %215 : vector<16x128xf32>
    %cst_93 = arith.constant 1.000000e+00 : f32
    %217 = vector.broadcast %cst_93 : f32 to vector<16x128xf32>
    %218 = arith.addf %217, %216 : vector<16x128xf32>
    %219 = arith.divf %217, %218 : vector<16x128xf32>
    %220 = arith.mulf %211, %219 : vector<16x128xf32>
    %c0_94 = arith.constant 0 : index
    %c0_95 = arith.constant 0 : index
    %221 = vector.load %arg22[%c0_94, %c0_95] : memref<8x128xf32, #tpu.memory_space<vmem>>, vector<8x128xf32>
    %cst_96 = arith.constant 0.000000e+00 : f32
    %222 = vector.broadcast %cst_96 : f32 to vector<16x128xf32>
    %c3_i32 = arith.constant 3 : i32
    %223 = tpu.dynamic_rotate %220 by %c3_i32 dim 0 : vector<16x128xf32>, i32 -> vector<16x128xf32>
    %c-3_i32 = arith.constant -3 : i32
    %224 = vector.broadcast %c-3_i32 : i32 to vector<16x128xi32>
    %225 = arith.addi %9, %224 : vector<16x128xi32>
    %c0_i32_97 = arith.constant 0 : i32
    %226 = vector.broadcast %c0_i32_97 : i32 to vector<16x128xi32>
    %227 = arith.cmpi sge, %225, %226 : vector<16x128xi32>
    %c-3_i32_98 = arith.constant -3 : i32
    %228 = vector.broadcast %c-3_i32_98 : i32 to vector<16x128xi32>
    %229 = arith.addi %9, %228 : vector<16x128xi32>
    %c16_i32 = arith.constant 16 : i32
    %230 = vector.broadcast %c16_i32 : i32 to vector<16x128xi32>
    %231 = arith.cmpi slt, %229, %230 : vector<16x128xi32>
    %232 = arith.andi %227, %231 : vector<16x128xi1>
    %233 = vector.extract_strided_slice %221 {offsets = [0, 0], sizes = [1, 128], strides = [1, 1]} : vector<8x128xf32> to vector<1x128xf32>
    %cst_99 = arith.constant 0.000000e+00 : f32
    %234 = vector.broadcast %cst_99 : f32 to vector<16x128xf32>
    %235 = arith.select %232, %223, %234 : vector<16x128xi1>, vector<16x128xf32>
    %236 = vector.broadcast %233 : vector<1x128xf32> to vector<16x128xf32>
    %237 = arith.mulf %236, %235 : vector<16x128xf32>
    %238 = arith.addf %222, %237 : vector<16x128xf32>
    %c2_i32 = arith.constant 2 : i32
    %239 = tpu.dynamic_rotate %220 by %c2_i32 dim 0 : vector<16x128xf32>, i32 -> vector<16x128xf32>
    %c-2_i32 = arith.constant -2 : i32
    %240 = vector.broadcast %c-2_i32 : i32 to vector<16x128xi32>
    %241 = arith.addi %9, %240 : vector<16x128xi32>
    %c0_i32_100 = arith.constant 0 : i32
    %242 = vector.broadcast %c0_i32_100 : i32 to vector<16x128xi32>
    %243 = arith.cmpi sge, %241, %242 : vector<16x128xi32>
    %c-2_i32_101 = arith.constant -2 : i32
    %244 = vector.broadcast %c-2_i32_101 : i32 to vector<16x128xi32>
    %245 = arith.addi %9, %244 : vector<16x128xi32>
    %c16_i32_102 = arith.constant 16 : i32
    %246 = vector.broadcast %c16_i32_102 : i32 to vector<16x128xi32>
    %247 = arith.cmpi slt, %245, %246 : vector<16x128xi32>
    %248 = arith.andi %243, %247 : vector<16x128xi1>
    %249 = vector.extract_strided_slice %221 {offsets = [1, 0], sizes = [1, 128], strides = [1, 1]} : vector<8x128xf32> to vector<1x128xf32>
    %cst_103 = arith.constant 0.000000e+00 : f32
    %250 = vector.broadcast %cst_103 : f32 to vector<16x128xf32>
    %251 = arith.select %248, %239, %250 : vector<16x128xi1>, vector<16x128xf32>
    %252 = vector.broadcast %249 : vector<1x128xf32> to vector<16x128xf32>
    %253 = arith.mulf %252, %251 : vector<16x128xf32>
    %254 = arith.addf %238, %253 : vector<16x128xf32>
    %c1_i32_104 = arith.constant 1 : i32
    %255 = tpu.dynamic_rotate %220 by %c1_i32_104 dim 0 : vector<16x128xf32>, i32 -> vector<16x128xf32>
    %c-1_i32 = arith.constant -1 : i32
    %256 = vector.broadcast %c-1_i32 : i32 to vector<16x128xi32>
    %257 = arith.addi %9, %256 : vector<16x128xi32>
    %c0_i32_105 = arith.constant 0 : i32
    %258 = vector.broadcast %c0_i32_105 : i32 to vector<16x128xi32>
    %259 = arith.cmpi sge, %257, %258 : vector<16x128xi32>
    %c-1_i32_106 = arith.constant -1 : i32
    %260 = vector.broadcast %c-1_i32_106 : i32 to vector<16x128xi32>
    %261 = arith.addi %9, %260 : vector<16x128xi32>
    %c16_i32_107 = arith.constant 16 : i32
    %262 = vector.broadcast %c16_i32_107 : i32 to vector<16x128xi32>
    %263 = arith.cmpi slt, %261, %262 : vector<16x128xi32>
    %264 = arith.andi %259, %263 : vector<16x128xi1>
    %265 = vector.extract_strided_slice %221 {offsets = [2, 0], sizes = [1, 128], strides = [1, 1]} : vector<8x128xf32> to vector<1x128xf32>
    %cst_108 = arith.constant 0.000000e+00 : f32
    %266 = vector.broadcast %cst_108 : f32 to vector<16x128xf32>
    %267 = arith.select %264, %255, %266 : vector<16x128xi1>, vector<16x128xf32>
    %268 = vector.broadcast %265 : vector<1x128xf32> to vector<16x128xf32>
    %269 = arith.mulf %268, %267 : vector<16x128xf32>
    %270 = arith.addf %254, %269 : vector<16x128xf32>
    %271 = vector.extract_strided_slice %221 {offsets = [3, 0], sizes = [1, 128], strides = [1, 1]} : vector<8x128xf32> to vector<1x128xf32>
    %272 = vector.broadcast %271 : vector<1x128xf32> to vector<16x128xf32>
    %273 = arith.mulf %272, %220 : vector<16x128xf32>
    %274 = arith.addf %270, %273 : vector<16x128xf32>
    %c15_i32 = arith.constant 15 : i32
    %275 = tpu.dynamic_rotate %220 by %c15_i32 dim 0 : vector<16x128xf32>, i32 -> vector<16x128xf32>
    %c1_i32_109 = arith.constant 1 : i32
    %276 = vector.broadcast %c1_i32_109 : i32 to vector<16x128xi32>
    %277 = arith.addi %9, %276 : vector<16x128xi32>
    %c0_i32_110 = arith.constant 0 : i32
    %278 = vector.broadcast %c0_i32_110 : i32 to vector<16x128xi32>
    %279 = arith.cmpi sge, %277, %278 : vector<16x128xi32>
    %c1_i32_111 = arith.constant 1 : i32
    %280 = vector.broadcast %c1_i32_111 : i32 to vector<16x128xi32>
    %281 = arith.addi %9, %280 : vector<16x128xi32>
    %c16_i32_112 = arith.constant 16 : i32
    %282 = vector.broadcast %c16_i32_112 : i32 to vector<16x128xi32>
    %283 = arith.cmpi slt, %281, %282 : vector<16x128xi32>
    %284 = arith.andi %279, %283 : vector<16x128xi1>
    %285 = vector.extract_strided_slice %221 {offsets = [4, 0], sizes = [1, 128], strides = [1, 1]} : vector<8x128xf32> to vector<1x128xf32>
    %cst_113 = arith.constant 0.000000e+00 : f32
    %286 = vector.broadcast %cst_113 : f32 to vector<16x128xf32>
    %287 = arith.select %284, %275, %286 : vector<16x128xi1>, vector<16x128xf32>
    %288 = vector.broadcast %285 : vector<1x128xf32> to vector<16x128xf32>
    %289 = arith.mulf %288, %287 : vector<16x128xf32>
    %290 = arith.addf %274, %289 : vector<16x128xf32>
    %c14_i32 = arith.constant 14 : i32
    %291 = tpu.dynamic_rotate %220 by %c14_i32 dim 0 : vector<16x128xf32>, i32 -> vector<16x128xf32>
    %c2_i32_114 = arith.constant 2 : i32
    %292 = vector.broadcast %c2_i32_114 : i32 to vector<16x128xi32>
    %293 = arith.addi %9, %292 : vector<16x128xi32>
    %c0_i32_115 = arith.constant 0 : i32
    %294 = vector.broadcast %c0_i32_115 : i32 to vector<16x128xi32>
    %295 = arith.cmpi sge, %293, %294 : vector<16x128xi32>
    %c2_i32_116 = arith.constant 2 : i32
    %296 = vector.broadcast %c2_i32_116 : i32 to vector<16x128xi32>
    %297 = arith.addi %9, %296 : vector<16x128xi32>
    %c16_i32_117 = arith.constant 16 : i32
    %298 = vector.broadcast %c16_i32_117 : i32 to vector<16x128xi32>
    %299 = arith.cmpi slt, %297, %298 : vector<16x128xi32>
    %300 = arith.andi %295, %299 : vector<16x128xi1>
    %301 = vector.extract_strided_slice %221 {offsets = [5, 0], sizes = [1, 128], strides = [1, 1]} : vector<8x128xf32> to vector<1x128xf32>
    %cst_118 = arith.constant 0.000000e+00 : f32
    %302 = vector.broadcast %cst_118 : f32 to vector<16x128xf32>
    %303 = arith.select %300, %291, %302 : vector<16x128xi1>, vector<16x128xf32>
    %304 = vector.broadcast %301 : vector<1x128xf32> to vector<16x128xf32>
    %305 = arith.mulf %304, %303 : vector<16x128xf32>
    %306 = arith.addf %290, %305 : vector<16x128xf32>
    %c13_i32 = arith.constant 13 : i32
    %307 = tpu.dynamic_rotate %220 by %c13_i32 dim 0 : vector<16x128xf32>, i32 -> vector<16x128xf32>
    %c3_i32_119 = arith.constant 3 : i32
    %308 = vector.broadcast %c3_i32_119 : i32 to vector<16x128xi32>
    %309 = arith.addi %9, %308 : vector<16x128xi32>
    %c0_i32_120 = arith.constant 0 : i32
    %310 = vector.broadcast %c0_i32_120 : i32 to vector<16x128xi32>
    %311 = arith.cmpi sge, %309, %310 : vector<16x128xi32>
    %c3_i32_121 = arith.constant 3 : i32
    %312 = vector.broadcast %c3_i32_121 : i32 to vector<16x128xi32>
    %313 = arith.addi %9, %312 : vector<16x128xi32>
    %c16_i32_122 = arith.constant 16 : i32
    %314 = vector.broadcast %c16_i32_122 : i32 to vector<16x128xi32>
    %315 = arith.cmpi slt, %313, %314 : vector<16x128xi32>
    %316 = arith.andi %311, %315 : vector<16x128xi1>
    %317 = vector.extract_strided_slice %221 {offsets = [6, 0], sizes = [1, 128], strides = [1, 1]} : vector<8x128xf32> to vector<1x128xf32>
    %cst_123 = arith.constant 0.000000e+00 : f32
    %318 = vector.broadcast %cst_123 : f32 to vector<16x128xf32>
    %319 = arith.select %316, %307, %318 : vector<16x128xi1>, vector<16x128xf32>
    %320 = vector.broadcast %317 : vector<1x128xf32> to vector<16x128xf32>
    %321 = arith.mulf %320, %319 : vector<16x128xf32>
    %322 = arith.addf %306, %321 : vector<16x128xf32>
    %c12_i32 = arith.constant 12 : i32
    %323 = tpu.dynamic_rotate %220 by %c12_i32 dim 0 : vector<16x128xf32>, i32 -> vector<16x128xf32>
    %c4_i32 = arith.constant 4 : i32
    %324 = vector.broadcast %c4_i32 : i32 to vector<16x128xi32>
    %325 = arith.addi %9, %324 : vector<16x128xi32>
    %c0_i32_124 = arith.constant 0 : i32
    %326 = vector.broadcast %c0_i32_124 : i32 to vector<16x128xi32>
    %327 = arith.cmpi sge, %325, %326 : vector<16x128xi32>
    %c4_i32_125 = arith.constant 4 : i32
    %328 = vector.broadcast %c4_i32_125 : i32 to vector<16x128xi32>
    %329 = arith.addi %9, %328 : vector<16x128xi32>
    %c16_i32_126 = arith.constant 16 : i32
    %330 = vector.broadcast %c16_i32_126 : i32 to vector<16x128xi32>
    %331 = arith.cmpi slt, %329, %330 : vector<16x128xi32>
    %332 = arith.andi %327, %331 : vector<16x128xi1>
    %333 = vector.extract_strided_slice %221 {offsets = [7, 0], sizes = [1, 128], strides = [1, 1]} : vector<8x128xf32> to vector<1x128xf32>
    %cst_127 = arith.constant 0.000000e+00 : f32
    %334 = vector.broadcast %cst_127 : f32 to vector<16x128xf32>
    %335 = arith.select %332, %323, %334 : vector<16x128xi1>, vector<16x128xf32>
    %336 = vector.broadcast %333 : vector<1x128xf32> to vector<16x128xf32>
    %337 = arith.mulf %336, %335 : vector<16x128xf32>
    %338 = arith.addf %322, %337 : vector<16x128xf32>
    %c0_128 = arith.constant 0 : index
    %c0_129 = arith.constant 0 : index
    %339 = vector.load %arg23[%c0_128, %c0_129] : memref<1x128xf32, #tpu.memory_space<vmem>>, vector<1x128xf32>
    %340 = vector.broadcast %339 : vector<1x128xf32> to vector<16x128xf32>
    %341 = arith.mulf %338, %340 : vector<16x128xf32>
    %c0_130 = arith.constant 0 : index
    %c0_131 = arith.constant 0 : index
    %342 = vector.load %arg24[%c0_130, %c0_131] : memref<1x128xf32, #tpu.memory_space<vmem>>, vector<1x128xf32>
    %343 = vector.broadcast %342 : vector<1x128xf32> to vector<16x128xf32>
    %344 = arith.addf %341, %343 : vector<16x128xf32>
    %345 = arith.negf %344 : vector<16x128xf32>
    %346 = math.exp %345 : vector<16x128xf32>
    %cst_132 = arith.constant 1.000000e+00 : f32
    %347 = vector.broadcast %cst_132 : f32 to vector<16x128xf32>
    %348 = arith.addf %347, %346 : vector<16x128xf32>
    %349 = arith.divf %347, %348 : vector<16x128xf32>
    %350 = arith.mulf %344, %349 : vector<16x128xf32>
    %351 = arith.truncf %350 : vector<16x128xf32> to vector<16x128xbf16>
    %c0_133 = arith.constant 0 : index
    %c0_134 = arith.constant 0 : index
    %352 = vector.load %arg25[%c0_133, %c0_134] : memref<128x128xbf16, #tpu.memory_space<vmem>>, vector<128x128xbf16>
    %cst_135 = arith.constant dense<0.000000e+00> : vector<16x128xf32>
    %353 = tpu.matmul %351, %352, %cst_135 {dimension_numbers = #tpu.dot_dimension_numbers<[1], [0], [0], [1], [0, 0, 1, 1], [], []>} : vector<16x128xbf16>, vector<128x128xbf16>, vector<16x128xf32> -> vector<16x128xf32>
    %c0_136 = arith.constant 0 : index
    %c0_137 = arith.constant 0 : index
    %354 = vector.load %arg26[%c0_136, %c0_137] : memref<1x128xf32, #tpu.memory_space<vmem>>, vector<1x128xf32>
    %355 = vector.broadcast %354 : vector<1x128xf32> to vector<16x128xf32>
    %356 = arith.addf %353, %355 : vector<16x128xf32>
    %cst_138 = arith.constant 2.000000e+00 : f32
    %357 = vector.broadcast %cst_138 : f32 to vector<16x128xf32>
    %358 = arith.mulf %357, %208 : vector<16x128xf32>
    %359 = arith.addf %358, %356 : vector<16x128xf32>
    %c0_139 = arith.constant 0 : index
    %c0_140 = arith.constant 0 : index
    %360 = vector.load %arg27[%c0_139, %c0_140] : memref<1x128xf32, #tpu.memory_space<vmem>>, vector<1x128xf32>
    %c0_141 = arith.constant 0 : index
    %c0_142 = arith.constant 0 : index
    %361 = vector.load %arg28[%c0_141, %c0_142] : memref<1x128xf32, #tpu.memory_space<vmem>>, vector<1x128xf32>
    %cst_143 = arith.constant dense<0.000000e+00> : vector<16xf32>
    %362 = vector.multi_reduction <add>, %359, %cst_143 [1] : vector<16x128xf32> to vector<16xf32>
    %363 = vector.shape_cast %362 : vector<16xf32> to vector<16x1xf32>
    %cst_144 = arith.constant 1.280000e+02 : f32
    %364 = vector.broadcast %cst_144 : f32 to vector<16x1xf32>
    %365 = arith.divf %363, %364 : vector<16x1xf32>
    %366 = vector.broadcast %365 : vector<16x1xf32> to vector<16x128xf32>
    %367 = arith.subf %359, %366 : vector<16x128xf32>
    %368 = arith.mulf %367, %367 : vector<16x128xf32>
    %cst_145 = arith.constant dense<0.000000e+00> : vector<16xf32>
    %369 = vector.multi_reduction <add>, %368, %cst_145 [1] : vector<16x128xf32> to vector<16xf32>
    %370 = vector.shape_cast %369 : vector<16xf32> to vector<16x1xf32>
    %cst_146 = arith.constant 1.280000e+02 : f32
    %371 = vector.broadcast %cst_146 : f32 to vector<16x1xf32>
    %372 = arith.divf %370, %371 : vector<16x1xf32>
    %373 = vector.broadcast %365 : vector<16x1xf32> to vector<16x128xf32>
    %374 = arith.subf %359, %373 : vector<16x128xf32>
    %cst_147 = arith.constant 9.99999974E-6 : f32
    %375 = vector.broadcast %cst_147 : f32 to vector<16x1xf32>
    %376 = arith.addf %372, %375 : vector<16x1xf32>
    %377 = math.rsqrt %376 : vector<16x1xf32>
    %378 = vector.broadcast %377 : vector<16x1xf32> to vector<16x128xf32>
    %379 = arith.mulf %374, %378 : vector<16x128xf32>
    %380 = vector.broadcast %360 : vector<1x128xf32> to vector<16x128xf32>
    %381 = arith.mulf %379, %380 : vector<16x128xf32>
    %382 = vector.broadcast %361 : vector<1x128xf32> to vector<16x128xf32>
    %383 = arith.addf %381, %382 : vector<16x128xf32>
    %384 = arith.truncf %383 : vector<16x128xf32> to vector<16x128xbf16>
    %c0_148 = arith.constant 0 : index
    %c0_149 = arith.constant 0 : index
    %385 = vector.load %arg29[%c0_148, %c0_149] : memref<128x256xbf16, #tpu.memory_space<vmem>>, vector<128x256xbf16>
    %cst_150 = arith.constant dense<0.000000e+00> : vector<16x256xf32>
    %386 = tpu.matmul %384, %385, %cst_150 {dimension_numbers = #tpu.dot_dimension_numbers<[1], [0], [0], [1], [0, 0, 1, 1], [], []>} : vector<16x128xbf16>, vector<128x256xbf16>, vector<16x256xf32> -> vector<16x256xf32>
    %c0_151 = arith.constant 0 : index
    %c0_152 = arith.constant 0 : index
    %387 = vector.load %arg30[%c0_151, %c0_152] : memref<1x256xf32, #tpu.memory_space<vmem>>, vector<1x256xf32>
    %388 = vector.broadcast %387 : vector<1x256xf32> to vector<16x256xf32>
    %389 = arith.addf %386, %388 : vector<16x256xf32>
    %390 = arith.negf %389 : vector<16x256xf32>
    %391 = math.exp %390 : vector<16x256xf32>
    %cst_153 = arith.constant 1.000000e+00 : f32
    %392 = vector.broadcast %cst_153 : f32 to vector<16x256xf32>
    %393 = arith.addf %392, %391 : vector<16x256xf32>
    %394 = arith.divf %392, %393 : vector<16x256xf32>
    %395 = arith.mulf %389, %394 : vector<16x256xf32>
    %396 = arith.truncf %395 : vector<16x256xf32> to vector<16x256xbf16>
    %c0_154 = arith.constant 0 : index
    %c0_155 = arith.constant 0 : index
    %397 = vector.load %arg31[%c0_154, %c0_155] : memref<256x128xbf16, #tpu.memory_space<vmem>>, vector<256x128xbf16>
    %cst_156 = arith.constant dense<0.000000e+00> : vector<16x128xf32>
    %398 = tpu.matmul %396, %397, %cst_156 {dimension_numbers = #tpu.dot_dimension_numbers<[1], [0], [0], [1], [0, 0, 1, 1], [], []>} : vector<16x256xbf16>, vector<256x128xbf16>, vector<16x128xf32> -> vector<16x128xf32>
    %c0_157 = arith.constant 0 : index
    %c0_158 = arith.constant 0 : index
    %399 = vector.load %arg32[%c0_157, %c0_158] : memref<1x128xf32, #tpu.memory_space<vmem>>, vector<1x128xf32>
    %400 = vector.broadcast %399 : vector<1x128xf32> to vector<16x128xf32>
    %401 = arith.addf %398, %400 : vector<16x128xf32>
    %cst_159 = arith.constant 5.000000e-01 : f32
    %402 = vector.broadcast %cst_159 : f32 to vector<16x128xf32>
    %403 = arith.mulf %402, %401 : vector<16x128xf32>
    %404 = arith.addf %359, %403 : vector<16x128xf32>
    %c0_160 = arith.constant 0 : index
    %c0_161 = arith.constant 0 : index
    %405 = vector.load %arg33[%c0_160, %c0_161] : memref<1x128xf32, #tpu.memory_space<vmem>>, vector<1x128xf32>
    %c0_162 = arith.constant 0 : index
    %c0_163 = arith.constant 0 : index
    %406 = vector.load %arg34[%c0_162, %c0_163] : memref<1x128xf32, #tpu.memory_space<vmem>>, vector<1x128xf32>
    %cst_164 = arith.constant dense<0.000000e+00> : vector<16xf32>
    %407 = vector.multi_reduction <add>, %404, %cst_164 [1] : vector<16x128xf32> to vector<16xf32>
    %408 = vector.shape_cast %407 : vector<16xf32> to vector<16x1xf32>
    %cst_165 = arith.constant 1.280000e+02 : f32
    %409 = vector.broadcast %cst_165 : f32 to vector<16x1xf32>
    %410 = arith.divf %408, %409 : vector<16x1xf32>
    %411 = vector.broadcast %410 : vector<16x1xf32> to vector<16x128xf32>
    %412 = arith.subf %404, %411 : vector<16x128xf32>
    %413 = arith.mulf %412, %412 : vector<16x128xf32>
    %cst_166 = arith.constant dense<0.000000e+00> : vector<16xf32>
    %414 = vector.multi_reduction <add>, %413, %cst_166 [1] : vector<16x128xf32> to vector<16xf32>
    %415 = vector.shape_cast %414 : vector<16xf32> to vector<16x1xf32>
    %cst_167 = arith.constant 1.280000e+02 : f32
    %416 = vector.broadcast %cst_167 : f32 to vector<16x1xf32>
    %417 = arith.divf %415, %416 : vector<16x1xf32>
    %418 = vector.broadcast %410 : vector<16x1xf32> to vector<16x128xf32>
    %419 = arith.subf %404, %418 : vector<16x128xf32>
    %cst_168 = arith.constant 9.99999974E-6 : f32
    %420 = vector.broadcast %cst_168 : f32 to vector<16x1xf32>
    %421 = arith.addf %417, %420 : vector<16x1xf32>
    %422 = math.rsqrt %421 : vector<16x1xf32>
    %423 = vector.broadcast %422 : vector<16x1xf32> to vector<16x128xf32>
    %424 = arith.mulf %419, %423 : vector<16x128xf32>
    %425 = vector.broadcast %405 : vector<1x128xf32> to vector<16x128xf32>
    %426 = arith.mulf %424, %425 : vector<16x128xf32>
    %427 = vector.broadcast %406 : vector<1x128xf32> to vector<16x128xf32>
    %428 = arith.addf %426, %427 : vector<16x128xf32>
    %c0_169 = arith.constant 0 : index
    %c0_170 = arith.constant 0 : index
    %c0_171 = arith.constant 0 : index
    %429 = vector.load %arg35[%c0_169, %c0_170, %c0_171] : memref<1x16x128xf32, #tpu.memory_space<vmem>>, vector<1x16x128xf32>
    %430 = vector.shape_cast %429 : vector<1x16x128xf32> to vector<16x128xf32>
    %431 = vector.shape_cast %428 : vector<16x128xf32> to vector<1x16x128xf32>
    tpu.vector_store %arg35[%c0_169, %c0_170, %c0_171], %431 {strides = array<i32>} : memref<1x16x128xf32, #tpu.memory_space<vmem>>, vector<1x16x128xf32>,
    return
  }
  func.func @transform_0(%arg0: i32) -> (i32, i32, i32) {
    %c0_i32 = arith.constant 0 : i32
    %c0_i32_0 = arith.constant 0 : i32
    %c0_i32_1 = arith.constant 0 : i32
    return %arg0, %c0_i32, %c0_i32_0 : i32, i32, i32
  }
  func.func @transform_1(%arg0: i32) -> (i32, i32) {
    %c0_i32 = arith.constant 0 : i32
    %c0_i32_0 = arith.constant 0 : i32
    %c0_i32_1 = arith.constant 0 : i32
    return %c0_i32, %c0_i32_0 : i32, i32
  }
  func.func @transform_2(%arg0: i32) -> (i32, i32) {
    %c0_i32 = arith.constant 0 : i32
    %c0_i32_0 = arith.constant 0 : i32
    %c0_i32_1 = arith.constant 0 : i32
    return %c0_i32, %c0_i32_0 : i32, i32
  }
  func.func @transform_3(%arg0: i32) -> (i32, i32) {
    %c0_i32 = arith.constant 0 : i32
    %c0_i32_0 = arith.constant 0 : i32
    %c0_i32_1 = arith.constant 0 : i32
    return %c0_i32, %c0_i32_0 : i32, i32
  }
  func.func @transform_4(%arg0: i32) -> (i32, i32) {
    %c0_i32 = arith.constant 0 : i32
    %c0_i32_0 = arith.constant 0 : i32
    %c0_i32_1 = arith.constant 0 : i32
    return %c0_i32, %c0_i32_0 : i32, i32
  }
  func.func @transform_5(%arg0: i32) -> (i32, i32) {
    %c0_i32 = arith.constant 0 : i32
    %c0_i32_0 = arith.constant 0 : i32
    %c0_i32_1 = arith.constant 0 : i32
    return %c0_i32, %c0_i32_0 : i32, i32
  }
  func.func @transform_6(%arg0: i32) -> (i32, i32) {
    %c0_i32 = arith.constant 0 : i32
    %c0_i32_0 = arith.constant 0 : i32
    %c0_i32_1 = arith.constant 0 : i32
    return %c0_i32, %c0_i32_0 : i32, i32
  }
  func.func @transform_7(%arg0: i32) -> (i32, i32) {
    %c0_i32 = arith.constant 0 : i32
    %c0_i32_0 = arith.constant 0 : i32
    %c0_i32_1 = arith.constant 0 : i32
    return %c0_i32, %c0_i32_0 : i32, i32
  }
  func.func @transform_8(%arg0: i32) -> (i32, i32) {
    %c0_i32 = arith.constant 0 : i32
    %c0_i32_0 = arith.constant 0 : i32
    %c0_i32_1 = arith.constant 0 : i32
    return %c0_i32, %c0_i32_0 : i32, i32
  }
  func.func @transform_9(%arg0: i32) -> (i32, i32) {
    %c0_i32 = arith.constant 0 : i32
    %c0_i32_0 = arith.constant 0 : i32
    %c0_i32_1 = arith.constant 0 : i32
    return %c0_i32, %c0_i32_0 : i32, i32
  }
  func.func @transform_10(%arg0: i32) -> (i32, i32) {
    %c0_i32 = arith.constant 0 : i32
    %c0_i32_0 = arith.constant 0 : i32
    %c0_i32_1 = arith.constant 0 : i32
    return %c0_i32, %c0_i32_0 : i32, i32
  }
  func.func @transform_11(%arg0: i32) -> (i32, i32) {
    %c0_i32 = arith.constant 0 : i32
    %c0_i32_0 = arith.constant 0 : i32
    %c0_i32_1 = arith.constant 0 : i32
    return %c0_i32, %c0_i32_0 : i32, i32
  }
  func.func @transform_12(%arg0: i32) -> (i32, i32) {
    %c0_i32 = arith.constant 0 : i32
    %c0_i32_0 = arith.constant 0 : i32
    %c0_i32_1 = arith.constant 0 : i32
    return %c0_i32, %c0_i32_0 : i32, i32
  }
  func.func @transform_13(%arg0: i32) -> (i32, i32) {
    %c0_i32 = arith.constant 0 : i32
    %c0_i32_0 = arith.constant 0 : i32
    %c0_i32_1 = arith.constant 0 : i32
    return %c0_i32, %c0_i32_0 : i32, i32
  }
  func.func @transform_14(%arg0: i32) -> (i32, i32) {
    %c0_i32 = arith.constant 0 : i32
    %c0_i32_0 = arith.constant 0 : i32
    %c0_i32_1 = arith.constant 0 : i32
    return %c0_i32, %c0_i32_0 : i32, i32
  }
  func.func @transform_15(%arg0: i32) -> (i32, i32) {
    %c0_i32 = arith.constant 0 : i32
    %c0_i32_0 = arith.constant 0 : i32
    %c0_i32_1 = arith.constant 0 : i32
    return %c0_i32, %c0_i32_0 : i32, i32
  }
  func.func @transform_16(%arg0: i32) -> (i32, i32) {
    %c0_i32 = arith.constant 0 : i32
    %c0_i32_0 = arith.constant 0 : i32
    %c0_i32_1 = arith.constant 0 : i32
    return %c0_i32, %c0_i32_0 : i32, i32
  }
  func.func @transform_17(%arg0: i32) -> (i32, i32) {
    %c0_i32 = arith.constant 0 : i32
    %c0_i32_0 = arith.constant 0 : i32
    %c0_i32_1 = arith.constant 0 : i32
    return %c0_i32, %c0_i32_0 : i32, i32
  }
  func.func @transform_18(%arg0: i32) -> (i32, i32) {
    %c0_i32 = arith.constant 0 : i32
    %c0_i32_0 = arith.constant 0 : i32
    %c0_i32_1 = arith.constant 0 : i32
    return %c0_i32, %c0_i32_0 : i32, i32
  }
  func.func @transform_19(%arg0: i32) -> (i32, i32) {
    %c0_i32 = arith.constant 0 : i32
    %c0_i32_0 = arith.constant 0 : i32
    %c0_i32_1 = arith.constant 0 : i32
    return %c0_i32, %c0_i32_0 : i32, i32
  }
  func.func @transform_20(%arg0: i32) -> (i32, i32) {
    %c0_i32 = arith.constant 0 : i32
    %c0_i32_0 = arith.constant 0 : i32
    %c0_i32_1 = arith.constant 0 : i32
    return %c0_i32, %c0_i32_0 : i32, i32
  }
  func.func @transform_21(%arg0: i32) -> (i32, i32) {
    %c0_i32 = arith.constant 0 : i32
    %c0_i32_0 = arith.constant 0 : i32
    %c0_i32_1 = arith.constant 0 : i32
    return %c0_i32, %c0_i32_0 : i32, i32
  }
  func.func @transform_22(%arg0: i32) -> (i32, i32) {
    %c0_i32 = arith.constant 0 : i32
    %c0_i32_0 = arith.constant 0 : i32
    %c0_i32_1 = arith.constant 0 : i32
    return %c0_i32, %c0_i32_0 : i32, i32
  }
  func.func @transform_23(%arg0: i32) -> (i32, i32) {
    %c0_i32 = arith.constant 0 : i32
    %c0_i32_0 = arith.constant 0 : i32
    %c0_i32_1 = arith.constant 0 : i32
    return %c0_i32, %c0_i32_0 : i32, i32
  }
  func.func @transform_24(%arg0: i32) -> (i32, i32) {
    %c0_i32 = arith.constant 0 : i32
    %c0_i32_0 = arith.constant 0 : i32
    %c0_i32_1 = arith.constant 0 : i32
    return %c0_i32, %c0_i32_0 : i32, i32
  }
  func.func @transform_25(%arg0: i32) -> (i32, i32) {
    %c0_i32 = arith.constant 0 : i32
    %c0_i32_0 = arith.constant 0 : i32
    %c0_i32_1 = arith.constant 0 : i32
    return %c0_i32, %c0_i32_0 : i32, i32
  }
  func.func @transform_26(%arg0: i32) -> (i32, i32) {
    %c0_i32 = arith.constant 0 : i32
    %c0_i32_0 = arith.constant 0 : i32
    %c0_i32_1 = arith.constant 0 : i32
    return %c0_i32, %c0_i32_0 : i32, i32
  }
  func.func @transform_27(%arg0: i32) -> (i32, i32) {
    %c0_i32 = arith.constant 0 : i32
    %c0_i32_0 = arith.constant 0 : i32
    %c0_i32_1 = arith.constant 0 : i32
    return %c0_i32, %c0_i32_0 : i32, i32
  }
  func.func @transform_28(%arg0: i32) -> (i32, i32) {
    %c0_i32 = arith.constant 0 : i32
    %c0_i32_0 = arith.constant 0 : i32
    %c0_i32_1 = arith.constant 0 : i32
    return %c0_i32, %c0_i32_0 : i32, i32
  }
  func.func @transform_29(%arg0: i32) -> (i32, i32) {
    %c0_i32 = arith.constant 0 : i32
    %c0_i32_0 = arith.constant 0 : i32
    %c0_i32_1 = arith.constant 0 : i32
    return %c0_i32, %c0_i32_0 : i32, i32
  }
  func.func @transform_30(%arg0: i32) -> (i32, i32) {
    %c0_i32 = arith.constant 0 : i32
    %c0_i32_0 = arith.constant 0 : i32
    %c0_i32_1 = arith.constant 0 : i32
    return %c0_i32, %c0_i32_0 : i32, i32
  }
  func.func @transform_31(%arg0: i32) -> (i32, i32) {
    %c0_i32 = arith.constant 0 : i32
    %c0_i32_0 = arith.constant 0 : i32
    %c0_i32_1 = arith.constant 0 : i32
    return %c0_i32, %c0_i32_0 : i32, i32
  }
  func.func @transform_32(%arg0: i32) -> (i32, i32) {
    %c0_i32 = arith.constant 0 : i32
    %c0_i32_0 = arith.constant 0 : i32
    %c0_i32_1 = arith.constant 0 : i32
    return %c0_i32, %c0_i32_0 : i32, i32
  }
  func.func @transform_33(%arg0: i32) -> (i32, i32) {
    %c0_i32 = arith.constant 0 : i32
    %c0_i32_0 = arith.constant 0 : i32
    %c0_i32_1 = arith.constant 0 : i32
    return %c0_i32, %c0_i32_0 : i32, i32
  }
  func.func @transform_34(%arg0: i32) -> (i32, i32, i32) {
    %c0_i32 = arith.constant 0 : i32
    %c0_i32_0 = arith.constant 0 : i32
    %c0_i32_1 = arith.constant 0 : i32
    return %arg0, %c0_i32, %c0_i32_0 : i32, i32, i32
  }
}

</mosaic_0001>

<bundles_post_ra>
// kernel: encoder.3
= control target key start
LH: loop header
LB: loop body
LE: loop exit
PB: predicated region body
PF: predicated region fallthrough
CT: control target
= control target key end

     0   :  { %s6122_s6 = smov 1   ;;  %s6123_s10 = smov 2   ;;  %s7225_s0 = inlined_call_operand.smem [shape: u32[35], index: -1, kind: input, shape index: {}] }
   0x1   :  { %s6206_s5 = sld [smem:[%s7225_s0]]   ;;  %s6124_s14 = smov 3  }
   0x2   :  { %s6211_s9 = sld [smem:[%s7225_s0 + %s6122_s6]]   ;;  %s6125_s18 = smov 4  }
   0x3   :  { %s6216_s13 = sld [smem:[%s7225_s0 + %s6123_s10]]   ;;  %s6126_s22 = smov 5  }
   0x4   :  { %s6221_s17 = sld [smem:[%s7225_s0 + %s6124_s14]]   ;;  %s6127_s26 = smov 6  }
   0x5   :  { %s6226_s21 = sld [smem:[%s7225_s0 + %s6125_s18]]   ;;  %s6128_s30 = smov 7  }
   0x6   :  { %s6231_s25 = sld [smem:[%s7225_s0 + %s6126_s22]]   ;;  %s6129_s4 = smov 8  }
   0x7   :  { %7273 = sst [smem:[#allocation68_spill]] %s6206_s5  ;;  %s6130_s10 = smov 9  }
   0x8   :  { %7274 = sst [smem:[#allocation69_spill]] %s6211_s9  ;;  %s6131_s15 = smov 10  }
   0x9   :  { %7275 = sst [smem:[#allocation70_spill]] %s6216_s13  ;;  %s6132_s20 = smov 11  }
   0xa   :  { %7276 = sst [smem:[#allocation71_spill]] %s6221_s17  ;;  %s6134_s1 = smov 13  }
   0xb   :  { %s6236_s29 = sld [smem:[%s7225_s0 + %s6127_s26]]   ;;  %s6133_s26 = smov 12  }
   0xc   :  { %7277 = sst [smem:[#allocation72_spill]] %s6231_s25  ;;  %s6135_s7 = smov 14  }
   0xd   :  { %s6241_s3 = sld [smem:[%s7225_s0 + %s6128_s30]]   ;;  %s6137_s22 = smov 16  }
   0xe   :  { %s6246_s8 = sld [smem:[%s7225_s0 + %s6129_s4]]   ;;  %s6138_s28 = smov 17  }
   0xf   :  { %s6251_s14 = sld [smem:[%s7225_s0 + %s6130_s10]]  }
  0x10   :  { %s6256_s19 = sld [smem:[%s7225_s0 + %s6131_s15]]   ;;  %s6136_s15 = smov 15  }
  0x11   :  { %s6261_s24 = sld [smem:[%s7225_s0 + %s6132_s20]]  }
  0x12   :  { %s6266_s30 = sld [smem:[%s7225_s0 + %s6133_s26]]  }
  0x13   :  { %7278 = sst [smem:[#allocation73_spill]] %s6241_s3 }
  0x14   :  { %7279 = sst [smem:[#allocation74_spill]] %s6246_s8 }
  0x15   :  { %7280 = sst [smem:[#allocation75_spill]] %s6251_s14 }
  0x16   :  { %s6271_s6 = sld [smem:[%s7225_s0 + %s6134_s1]]  }
  0x17   :  { %7281 = sst [smem:[#allocation76_spill]] %s6261_s24 }
  0x18   :  { %s6276_s12 = sld [smem:[%s7225_s0 + %s6135_s7]]   ;;  %s6139_s7 = smov 18  }
  0x19   :  { %s6281_s20 = sld [smem:[%s7225_s0 + %s6136_s15]]   ;;  %s6140_s15 = smov 19  }
  0x1a   :  { %s6286_s27 = sld [smem:[%s7225_s0 + %s6137_s22]]   ;;  %s6141_s22 = smov 20  }
  0x1b   :  { %s6291_s4 = sld [smem:[%s7225_s0 + %s6138_s28]]   ;;  %s6142_s28 = smov 21  }
  0x1c   :  { %7282 = sst [smem:[#allocation77_spill]] %s6271_s6 }
  0x1d   :  { %s6296_s9 = sld [smem:[%s7225_s0 + %s6139_s7]]   ;;  %s6143_s7 = smov 22  }
  0x1e   :  { %7283 = sst [smem:[#allocation78_spill]] %s6276_s12 }
  0x1f   :  { %7284 = sst [smem:[#allocation79_spill]] %s6281_s20 }
  0x20   :  { %s6301_s13 = sld [smem:[%s7225_s0 + %s6140_s15]]   ;;  %s6144_s15 = smov 23  }
  0x21   :  { %7285 = sst [smem:[#allocation80_spill]] %s6291_s4 }
  0x22   :  { %s6306_s5 = sld [smem:[%s7225_s0 + %s6141_s22]]   ;;  %s6145_s22 = smov 24  }
  0x23   :  { %7286 = sst [smem:[#allocation81_spill]] %s6296_s9 }
  0x24   :  { %s6311_s4 = sld [smem:[%s7225_s0 + %s6142_s28]]   ;;  %s6146_s28 = smov 25  }
  0x25   :  { %s6316_s20 = sld [smem:[%s7225_s0 + %s6143_s7]]   ;;  %s6147_s7 = smov 26  }
  0x26   :  { %7287 = sst [smem:[#allocation82_spill]] %s6301_s13 }
  0x27   :  { %s6321_s13 = sld [smem:[%s7225_s0 + %s6144_s15]]   ;;  %s6148_s15 = smov 27  }
  0x28   :  { %7288 = sst [smem:[#allocation83_spill]] %s6306_s5 }
  0x29   :  { %s6326_s6 = sld [smem:[%s7225_s0 + %s6145_s22]]   ;;  %s6149_s22 = smov 28  }
  0x2a   :  { %7289 = sst [smem:[#allocation84_spill]] %s6311_s4 }
  0x2b   :  { %s6331_s4 = sld [smem:[%s7225_s0 + %s6146_s28]]   ;;  %s6150_s28 = smov 29  }
  0x2c   :  { %s6336_s24 = sld [smem:[%s7225_s0 + %s6147_s7]]   ;;  %s6151_s7 = smov 30  }
  0x2d   :  { %7290 = sst [smem:[#allocation85_spill]] %s6321_s13 }
  0x2e   :  { %s6341_s13 = sld [smem:[%s7225_s0 + %s6148_s15]]   ;;  %s6152_s15 = smov 31  }
  0x2f   :  { %7291 = sst [smem:[#allocation86_spill]] %s6326_s6 }
  0x30   :  { %s6346_s14 = sld [smem:[%s7225_s0 + %s6149_s22]]   ;;  %s6153_s22 = smov 32  }
  0x31   :  { %7292 = sst [smem:[#allocation87_spill]] %s6331_s4 }
  0x32   :  { %s6351_s4 = sld [smem:[%s7225_s0 + %s6150_s28]]   ;;  %s6154_s28 = smov 33  }
  0x33   :  { %s6356_s3 = sld [smem:[%s7225_s0 + %s6151_s7]]   ;;  %s6155_s7 = smov 34  }
  0x34   :  { %7293 = sst [smem:[#allocation88_spill]] %s6341_s13 }
  0x35   :  { %s6361_s13 = sld [smem:[%s7225_s0 + %s6152_s15]]  }
  0x36   :  { %7294 = sst [smem:[#allocation89_spill]] %s6346_s14 }
  0x37   :  { %s6366_s25 = sld [smem:[%s7225_s0 + %s6153_s22]]  }
  0x38   :  { %7295 = sst [smem:[#allocation90_spill]] %s6351_s4 }
  0x39   :  { %7296 = sst [smem:[#allocation91_spill]] %s6356_s3 }
  0x3a   :  { %s6371_s4 = sld [smem:[%s7225_s0 + %s6154_s28]]  }
  0x3b   :  { %s6376_s17 = sld [smem:[%s7225_s0 + %s6155_s7]]  }
  0x40   :  { %7297 = sst [smem:[#allocation92_spill]] %s6371_s4 }
  0x41   :  { %74 = vsyncpa [#allocation4], 0 }
  0x42   :  { %75 = vsyncpa [#allocation7], 0 }
  0x43   :  { %76 = vsyncpa [#allocation10], 0 }
  0x44   :  { %77 = vsyncpa [#allocation13], 0 }
  0x45   :  { %78 = vsyncpa [#allocation16], 0 }
  0x46   :  { %79 = vsyncpa [#allocation19], 0 }
  0x47   :  { %80 = vsyncpa [#allocation22], 0 }
  0x48   :  { %81 = vsyncpa [#allocation25], 0 }
  0x49   :  { %82 = vsyncpa [#allocation28], 0 }
  0x4a   :  { %83 = vsyncpa [#allocation31], 0 }
  0x4b   :  { %84 = vsyncpa [#allocation34], 0 }
  0x4c   :  { %85 = vsyncpa [#allocation37], 0 }
  0x4d   :  { %86 = vsyncpa [#allocation40], 0 }
  0x4e   :  { %87 = vsyncpa [#allocation43], 0 }
  0x4f   :  { %88 = vsyncpa [#allocation46], 0 }
  0x50   :  { %89 = vsyncpa [#allocation49], 0 }
  0x51   :  { %90 = vsyncpa [#allocation5], 0 }
  0x52   :  { %92 = vsyncpa [#allocation5 + $0x1], 0  ;;  %s6378_s0 = smov 0   ;;  %s6380_s15 = smov 0  }
  0x53   :  { %s6382_s16 = smov 0   ;;  %s6384_s18 = smov 0  }
  0x54 LB: > { %s7298_s14 = sld [smem:[#allocation89_spill]]  ;;  %s6399_s22 = sadd.s32 4294967295, %s6120_s18   ;;  %s6116_s16 = sphi %s6382_s16, %s7357_s16   ;;  %s6112_s15 = sphi %s6380_s15, %s7359_s15   ;;  %s6108_s0 = sphi %s6378_s0, %s7358_s0   ;;  %s6120_s18 = sphi %s6384_s18, %s7355_s18  }
  0x55   : > { %s7299_s12 = sld [smem:[#allocation78_spill]]  ;;  %s4050_s23 = sadd.s32 4294967294, %s6120_s18  }
  0x56   : > { %s7300_s9 = sld [smem:[#allocation81_spill]]  ;;  %s6403_s26 = sadd.s32 1, %s6120_s18  }
  0x57   : > { %s7301_s3 = sld [smem:[#allocation91_spill]]  ;;  %s824_s28 = sadd.s32 1, %s6116_s16 }
  0x58   : > { %s7302_s8 = sld [smem:[#allocation74_spill]]  ;;  %s821_s1 = ssub.s32 %s6120_s18, %s6403_s26 }
  0x59   : > { %s7303_s6 = sld [smem:[#allocation86_spill]]  ;;  %p834_p0 = scmp.ne.s32.totalorder %s6116_s16, %s6112_s15 }
  0x5a   : > { %s7304_s5 = sld [smem:[#allocation83_spill]]  ;;  %p822_p1 = scmp.eq.s32.totalorder %s821_s1, 0 }
  0x5b   : > { %7305 = sst [smem:[#allocation93_spill]] %s6108_s0  ;;  %p835_p2 = scmp.eq.s32.totalorder %s6399_s22, 1 }
  0x5c   : > { %7306 = sst [smem:[#allocation94_spill]] %s6116_s16  ;;  %p840_p3 = scmp.ne.s32.totalorder %s6112_s15, %s6108_s0 }
  0x5d   : > { %7307 = sst [smem:[#allocation95_spill]] %s6120_s18  ;;  %p841_p4 = scmp.eq.s32.totalorder %s4050_s23, 1 }
  0x5e   : > { %7308 = sst [smem:[#allocation96_spill]] %s6403_s26  ;;  %p6416_p5 = por %p835_p2, %p834_p0 }
  0x5f   : > { %s6414_s2 = scalar_select %p822_p1, %s6116_s16, %s824_s28  }
  0x60   : > { %s7310_s7 = scalar_select %p6416_p5, 1, 0 }
  0x61   : > { %7309 = sst [smem:[#allocation97_spill]] %s6414_s2  ;;  %p6420_p6 = por %p841_p4, %p840_p3 }
  0x62   : > { %7311 = sst [smem:[#allocation98_spill]] %s7310_s7  ;;  %p4051_p7 = scmp.ge.s32.totalorder %s6120_s18, 1 }
  0x63   : > { %s7312_s10 = scalar_select %p6420_p6, 1, 0 }
  0x64   : > { %p848_p8 = scmp.lt.s32.totalorder %s6120_s18, 3 }
  0x65   : > { %7313 = sst [smem:[#allocation99_spill]] %s7312_s10 }
  0x66   : > { %p6426_p9 = pnand %p4051_p7, %p848_p8 }
  0x67   : > { %p4870_p10 = scmp.eq.s32.totalorder (!%p6426_p9), %s6399_s22, 0  ;;  %s878_s23 = sshll.u32 (!%p6426_p9), %s6226_s21, 4  ;;  %s879_s23 = int_to_ptr.hbm [resolvable:$true] %s878_s23 }
  0x68   : > { %852 = sbr.rel (%p6426_p9) target bundleno = 499 (0x1f3), region = 12  ;;  %s6156_s28 = smov (!%p6426_p9), [#allocation6]  }
  0x69   : > { %s880_s1 = sshll.u32 (!%p6426_p9), %s6156_s28, 4  ;;  %s904_s2 = sshll.u32 (!%p6426_p9), %s6236_s29, 4  ;;  %s881_s1 = int_to_ptr.vmem [resolvable:$true] %s880_s1  ;;  %s6435_s2 = int_to_ptr.hbm [resolvable:$true] %s904_s2 }
  0x6a   : > { %s5154_s16 = sshra.s32 (!%p6426_p9), %s879_s23, 4  ;;  %s5160_s10 = scalar_lea.hbm (!%p6426_p9), %s6226_s21, 1  ;;  %s5155_s16 = int_to_ptr.hbm [resolvable:$true] %s5154_s16 }
  0x6b   : > { %s5156_s26 = scalar_lea.hbm (!%p6426_p9), %s5155_s16, 1  ;;  %p5161_p0 = scmp.lt.s32.totalorder (!%p6426_p9), %s5155_s16, %s6226_s21 }
  0x6c   : > { %p5157_p11 = scmp.ne.s32.totalorder (!%p6426_p9), %s5155_s16, %s5156_s26  ;;  %p5162_p1 = scmp.lt.s32.totalorder (!%p6426_p9), %s5160_s10, %s5156_s26 }
  0x6e   : > { %p5158_p12 = pnand %p5157_p11, %p4870_p10  ;;  %p5163_p2 = por %p5162_p1, %p5161_p0 }
  0x70   : > { %p5159_p13 = pneg %p5158_p12 }
  0x72   : > { %p5164_p3 = pnand %p5163_p2, %p5159_p13 }
  0x74   : > { %5167 = shalt.err (!%p5164_p3)
}
  0x75   : > { %4747 = dma.hbm_to_vmem [thread:$0]  (%p4870_p10), %s879_s23, 16, %s881_s1, [#allocation7]  }
  0x76   : > { %s930_s28 = sshll.u32 %s7302_s8, 4  ;;  %s6157_s0 = smov [#allocation9]   ;;  %s6444_s28 = int_to_ptr.hbm [resolvable:$true] %s930_s28 }
  0x77   : > { %s906_s18 = sshll.u32 %s6157_s0, 4  ;;  %s5182_s7 = sshra.s32 %s6435_s2, 4  ;;  %s907_s18 = int_to_ptr.vmem [resolvable:$true] %s906_s18  ;;  %s5183_s7 = int_to_ptr.hbm [resolvable:$true] %s5182_s7 }
  0x78   : > { %s5184_s16 = scalar_lea.hbm %s5183_s7, 2  ;;  %s5188_s26 = scalar_lea.hbm %s6236_s29, 2 }
  0x79   : > { %p5185_p4 = scmp.ne.s32.totalorder %s5183_s7, %s5184_s16  ;;  %p5189_p11 = scmp.lt.s32.totalorder %s5183_s7, %s6236_s29 }
  0x7a   : > { %p5190_p12 = scmp.lt.s32.totalorder %s5188_s26, %s5184_s16 }
  0x7b   : > { %p5186_p7 = pnand %p5185_p4, %p4870_p10 }
  0x7c   : > { %p5191_p13 = por %p5190_p12, %p5189_p11 }
  0x7d   : > { %p5187_p8 = pneg %p5186_p7 }
  0x7f   : > { %p5192_p0 = pnand %p5191_p13, %p5187_p8 }
  0x81   : > { %5195 = shalt.err (!%p5192_p0)
}
  0x82   : > { %4751 = dma.hbm_to_vmem [thread:$0]  (%p4870_p10), %s6435_s2, 32, %s907_s18, [#allocation10]  }
  0x83   : > { %s6158_s0 = smov [#allocation12]   ;;  %s954_s23 = sshll.u32 %s6256_s19, 4  ;;  %s6455_s23 = int_to_ptr.hbm [resolvable:$true] %s954_s23 }
  0x84   : > { %s932_s10 = sshll.u32 %s6158_s0, 4  ;;  %s5210_s7 = sshra.s32 %s6444_s28, 4  ;;  %s933_s10 = int_to_ptr.vmem [resolvable:$true] %s932_s10  ;;  %s5211_s7 = int_to_ptr.hbm [resolvable:$true] %s5210_s7 }
  0x85   : > { %s5212_s1 = scalar_lea.hbm %s5211_s7, 1  ;;  %s5216_s16 = scalar_lea.hbm %s7302_s8, 1 }
  0x86   : > { %p5213_p1 = scmp.ne.s32.totalorder %s5211_s7, %s5212_s1  ;;  %p5217_p4 = scmp.lt.s32.totalorder %s5211_s7, %s7302_s8 }
  0x87   : > { %p5218_p7 = scmp.lt.s32.totalorder %s5216_s16, %s5212_s1 }
  0x88   : > { %p5214_p2 = pnand %p5213_p1, %p4870_p10 }
  0x89   : > { %p5219_p8 = por %p5218_p7, %p5217_p4 }
  0x8a   : > { %p5215_p3 = pneg %p5214_p2 }
  0x8c   : > { %p5220_p11 = pnand %p5219_p8, %p5215_p3 }
  0x8e   : > { %5223 = shalt.err (!%p5220_p11)
}
  0x8f   : > { %4755 = dma.hbm_to_vmem [thread:$0]  (%p4870_p10), %s6444_s28, 16, %s933_s10, [#allocation13]  }
  0x90   : > { %s980_s18 = sshll.u32 %s6266_s30, 4  ;;  %s6159_s2 = smov [#allocation15]   ;;  %s6466_s18 = int_to_ptr.hbm [resolvable:$true] %s980_s18 }
  0x91   : > { %s956_s26 = sshll.u32 %s6159_s2, 4  ;;  %s5238_s0 = sshra.s32 %s6455_s23, 4  ;;  %s957_s26 = int_to_ptr.vmem [resolvable:$true] %s956_s26  ;;  %s5239_s0 = int_to_ptr.hbm [resolvable:$true] %s5238_s0 }
  0x92   : > { %s5240_s7 = scalar_lea.hbm %s5239_s0, 1  ;;  %s5244_s1 = scalar_lea.hbm %s6256_s19, 1 }
  0x93   : > { %p5241_p12 = scmp.ne.s32.totalorder %s5239_s0, %s5240_s7  ;;  %p5245_p1 = scmp.lt.s32.totalorder %s5239_s0, %s6256_s19 }
  0x94   : > { %p5246_p2 = scmp.lt.s32.totalorder %s5244_s1, %s5240_s7 }
  0x95   : > { %p5242_p13 = pnand %p5241_p12, %p4870_p10 }
  0x96   : > { %p5247_p3 = por %p5246_p2, %p5245_p1 }
  0x97   : > { %p5243_p0 = pneg %p5242_p13 }
  0x99   : > { %p5248_p4 = pnand %p5247_p3, %p5243_p0 }
  0x9b   : > { %5251 = shalt.err (!%p5248_p4)
}
  0x9c   : > { %4759 = dma.hbm_to_vmem [thread:$0]  (%p4870_p10), %s6455_s23, 16, %s957_s26, [#allocation16]  }
  0x9d   : > { %s6160_s28 = smov [#allocation18]   ;;  %s1006_s16 = sshll.u32 %s7299_s12, 4  ;;  %s6477_s16 = int_to_ptr.hbm [resolvable:$true] %s1006_s16 }
  0x9e   : > { %s982_s10 = sshll.u32 %s6160_s28, 4  ;;  %s5266_s2 = sshra.s32 %s6466_s18, 4  ;;  %s983_s10 = int_to_ptr.vmem [resolvable:$true] %s982_s10  ;;  %s5267_s2 = int_to_ptr.hbm [resolvable:$true] %s5266_s2 }
  0x9f   : > { %s5268_s0 = scalar_lea.hbm %s5267_s2, 1  ;;  %s5272_s7 = scalar_lea.hbm %s6266_s30, 1 }
  0xa0   : > { %p5269_p7 = scmp.ne.s32.totalorder %s5267_s2, %s5268_s0  ;;  %p5273_p12 = scmp.lt.s32.totalorder %s5267_s2, %s6266_s30 }
  0xa1   : > { %p5274_p13 = scmp.lt.s32.totalorder %s5272_s7, %s5268_s0 }
  0xa2   : > { %p5270_p8 = pnand %p5269_p7, %p4870_p10 }
  0xa3   : > { %p5275_p0 = por %p5274_p13, %p5273_p12 }
  0xa4   : > { %p5271_p11 = pneg %p5270_p8 }
  0xa6   : > { %p5276_p1 = pnand %p5275_p0, %p5271_p11 }
  0xa8   : > { %5279 = shalt.err (!%p5276_p1)
}
  0xa9   : > { %4763 = dma.hbm_to_vmem [thread:$0]  (%p4870_p10), %s6466_s18, 16, %s983_s10, [#allocation19]  }
  0xaa   : > { %s1032_s23 = sshll.u32 %s6286_s27, 4  ;;  %s6161_s26 = smov [#allocation21]   ;;  %s6488_s23 = int_to_ptr.hbm [resolvable:$true] %s1032_s23 }
  0xab   : > { %s1008_s1 = sshll.u32 %s6161_s26, 4  ;;  %s5294_s28 = sshra.s32 %s6477_s16, 4  ;;  %s1009_s1 = int_to_ptr.vmem [resolvable:$true] %s1008_s1  ;;  %s5295_s28 = int_to_ptr.hbm [resolvable:$true] %s5294_s28 }
  0xac   : > { %s5296_s2 = scalar_lea.hbm %s5295_s28, 1  ;;  %s5300_s0 = scalar_lea.hbm %s7299_s12, 1 }
  0xad   : > { %p5297_p2 = scmp.ne.s32.totalorder %s5295_s28, %s5296_s2  ;;  %p5301_p7 = scmp.lt.s32.totalorder %s5295_s28, %s7299_s12 }
  0xae   : > { %p5302_p8 = scmp.lt.s32.totalorder %s5300_s0, %s5296_s2 }
  0xaf   : > { %p5298_p3 = pnand %p5297_p2, %p4870_p10 }
  0xb0   : > { %p5303_p11 = por %p5302_p8, %p5301_p7 }
  0xb1   : > { %p5299_p4 = pneg %p5298_p3 }
  0xb3   : > { %p5304_p12 = pnand %p5303_p11, %p5299_p4 }
  0xb5   : > { %5307 = shalt.err (!%p5304_p12)
}
  0xb6   : > { %4767 = dma.hbm_to_vmem [thread:$0]  (%p4870_p10), %s6477_s16, 16, %s1009_s1, [#allocation22]  }
  0xb7   : > { %s6162_s18 = smov [#allocation24]   ;;  %s1058_s7 = sshll.u32 %s7300_s9, 4  ;;  %s6499_s7 = int_to_ptr.hbm [resolvable:$true] %s1058_s7 }
  0xb8   : > { %s1034_s10 = sshll.u32 %s6162_s18, 4  ;;  %s5322_s26 = sshra.s32 %s6488_s23, 4  ;;  %s1035_s10 = int_to_ptr.vmem [resolvable:$true] %s1034_s10  ;;  %s5323_s26 = int_to_ptr.hbm [resolvable:$true] %s5322_s26 }
  0xb9   : > { %s5324_s28 = scalar_lea.hbm %s5323_s26, 1  ;;  %s5328_s2 = scalar_lea.hbm %s6286_s27, 1 }
  0xba   : > { %p5325_p13 = scmp.ne.s32.totalorder %s5323_s26, %s5324_s28  ;;  %p5329_p2 = scmp.lt.s32.totalorder %s5323_s26, %s6286_s27 }
  0xbb   : > { %p5330_p3 = scmp.lt.s32.totalorder %s5328_s2, %s5324_s28 }
  0xbc   : > { %p5326_p0 = pnand %p5325_p13, %p4870_p10 }
  0xbd   : > { %p5331_p4 = por %p5330_p3, %p5329_p2 }
  0xbe   : > { %p5327_p1 = pneg %p5326_p0 }
  0xc0   : > { %p5332_p7 = pnand %p5331_p4, %p5327_p1 }
  0xc2   : > { %5335 = shalt.err (!%p5332_p7)
}
  0xc3   : > { %4771 = dma.hbm_to_vmem [thread:$0]  (%p4870_p10), %s6488_s23, 16, %s1035_s10, [#allocation25]  }
  0xc4   : > { %s6163_s16 = smov [#allocation27]   ;;  %s1083_s0 = sshll.u32 %s7304_s5, 4  ;;  %s1084_s0 = int_to_ptr.hbm [resolvable:$true] %s1083_s0 }
  0xc5   : > { %s1060_s1 = sshll.u32 %s6163_s16, 4  ;;  %s5350_s18 = sshra.s32 %s6499_s7, 4  ;;  %s1061_s1 = int_to_ptr.vmem [resolvable:$true] %s1060_s1  ;;  %s5351_s18 = int_to_ptr.hbm [resolvable:$true] %s5350_s18 }
  0xc6   : > { %s5352_s26 = scalar_lea.hbm %s5351_s18, 1  ;;  %s5356_s28 = scalar_lea.hbm %s7300_s9, 1 }
  0xc7   : > { %p5353_p8 = scmp.ne.s32.totalorder %s5351_s18, %s5352_s26  ;;  %p5357_p13 = scmp.lt.s32.totalorder %s5351_s18, %s7300_s9 }
  0xc8   : > { %p5358_p0 = scmp.lt.s32.totalorder %s5356_s28, %s5352_s26 }
  0xc9   : > { %p5354_p11 = pnand %p5353_p8, %p4870_p10 }
  0xca   : > { %p5359_p1 = por %p5358_p0, %p5357_p13 }
  0xcb   : > { %p5355_p12 = pneg %p5354_p11 }
  0xcd   : > { %p5360_p2 = pnand %p5359_p1, %p5355_p12 }
  0xcf   : > { %5363 = shalt.err (!%p5360_p2)
}
  0xd0   : > { %4775 = dma.hbm_to_vmem [thread:$0]  (%p4870_p10), %s6499_s7, 16, %s1061_s1, [#allocation28]  }
  0xd1   : > { %s6164_s23 = smov [#allocation30]   ;;  %s1110_s2 = sshll.u32 %s6316_s20, 4  ;;  %s6519_s2 = int_to_ptr.hbm [resolvable:$true] %s1110_s2 }
  0xd2   : > { %s1085_s10 = sshll.u32 %s6164_s23, 4  ;;  %s5378_s16 = sshra.s32 %s1084_s0, 4  ;;  %s1086_s10 = int_to_ptr.vmem [resolvable:$true] %s1085_s10  ;;  %s5379_s16 = int_to_ptr.hbm [resolvable:$true] %s5378_s16 }
  0xd3   : > { %s5380_s18 = scalar_lea.hbm %s5379_s16, 64  ;;  %s5384_s26 = scalar_lea.hbm %s7304_s5, 64 }
  0xd4   : > { %p5381_p3 = scmp.ne.s32.totalorder %s5379_s16, %s5380_s18  ;;  %p5385_p8 = scmp.lt.s32.totalorder %s5379_s16, %s7304_s5 }
  0xd5   : > { %p5386_p11 = scmp.lt.s32.totalorder %s5384_s26, %s5380_s18 }
  0xd6   : > { %p5382_p4 = pnand %p5381_p3, %p4870_p10 }
  0xd7   : > { %p5387_p12 = por %p5386_p11, %p5385_p8 }
  0xd8   : > { %p5383_p7 = pneg %p5382_p4 }
  0xda   : > { %p5388_p13 = pnand %p5387_p12, %p5383_p7 }
  0xdc   : > { %5391 = shalt.err (!%p5388_p13)
}
  0xdd   : > { %s7251_s7 = smov 64   ;;  %s7253_s1 = smov 4  }
  0xde   : > { %4779 = dma.hbm_to_vmem [thread:$0]  (%p4870_p10), %s1084_s0, 1024, %s1086_s10, [#allocation31], %s7251_s7, %s7251_s7, %s7253_s1  }
  0xdf   : > { %s1133_s28 = sshll.u32 %s7303_s6, 4  ;;  %s6167_s23 = smov [#allocation33]   ;;  %s6531_s28 = int_to_ptr.hbm [resolvable:$true] %s1133_s28 }
  0xe0   : > { %s1112_s16 = sshll.u32 %s6167_s23, 4  ;;  %s5406_s18 = sshra.s32 %s6519_s2, 4  ;;  %s1113_s16 = int_to_ptr.vmem [resolvable:$true] %s1112_s16  ;;  %s5407_s18 = int_to_ptr.hbm [resolvable:$true] %s5406_s18 }
  0xe1   : > { %s5408_s26 = scalar_lea.hbm %s5407_s18, 1  ;;  %s5412_s5 = scalar_lea.hbm %s6316_s20, 1 }
  0xe2   : > { %p5409_p0 = scmp.ne.s32.totalorder %s5407_s18, %s5408_s26  ;;  %p5413_p3 = scmp.lt.s32.totalorder %s5407_s18, %s6316_s20 }
  0xe3   : > { %p5414_p4 = scmp.lt.s32.totalorder %s5412_s5, %s5408_s26 }
  0xe4   : > { %p5410_p1 = pnand %p5409_p0, %p4870_p10 }
  0xe5   : > { %p5415_p7 = por %p5414_p4, %p5413_p3 }
  0xe6   : > { %p5411_p2 = pneg %p5410_p1 }
  0xe8   : > { %p5416_p8 = pnand %p5415_p7, %p5411_p2 }
  0xea   : > { %5419 = shalt.err (!%p5416_p8)
}
  0xeb   : > { %4783 = dma.hbm_to_vmem [thread:$0]  (%p4870_p10), %s6519_s2, 16, %s1113_s16, [#allocation34]  }
  0xec   : > { %s6168_s0 = smov [#allocation36]   ;;  %s1160_s23 = sshll.u32 %s6336_s24, 4  ;;  %s6542_s23 = int_to_ptr.hbm [resolvable:$true] %s1160_s23 }
  0xed   : > { %s1135_s10 = sshll.u32 %s6168_s0, 4  ;;  %s5434_s18 = sshra.s32 %s6531_s28, 4  ;;  %s1136_s10 = int_to_ptr.vmem [resolvable:$true] %s1135_s10  ;;  %s5435_s18 = int_to_ptr.hbm [resolvable:$true] %s5434_s18 }
  0xee   : > { %s5436_s5 = scalar_lea.hbm %s5435_s18, 64  ;;  %s5440_s26 = scalar_lea.hbm %s7303_s6, 64 }
  0xef   : > { %p5437_p11 = scmp.ne.s32.totalorder %s5435_s18, %s5436_s5  ;;  %p5441_p0 = scmp.lt.s32.totalorder %s5435_s18, %s7303_s6 }
  0xf0   : > { %p5442_p1 = scmp.lt.s32.totalorder %s5440_s26, %s5436_s5 }
  0xf1   : > { %p5438_p12 = pnand %p5437_p11, %p4870_p10 }
  0xf2   : > { %p5443_p2 = por %p5442_p1, %p5441_p0 }
  0xf3   : > { %p5439_p13 = pneg %p5438_p12 }
  0xf5   : > { %p5444_p3 = pnand %p5443_p2, %p5439_p13 }
  0xf7   : > { %5447 = shalt.err (!%p5444_p3)
}
  0xf8   : > { %4787 = dma.hbm_to_vmem [thread:$0]  (%p4870_p10), %s6531_s28, 1024, %s1136_s10, [#allocation37], %s7251_s7, %s7251_s7, %s7253_s1  }
  0xf9   : > { %s6169_s2 = smov [#allocation39]   ;;  %s1183_s0 = sshll.u32 %s7298_s14, 4  ;;  %s1184_s0 = int_to_ptr.hbm [resolvable:$true] %s1183_s0 }
  0xfa   : > { %s1162_s16 = sshll.u32 %s6169_s2, 4  ;;  %s5462_s18 = sshra.s32 %s6542_s23, 4  ;;  %s1163_s16 = int_to_ptr.vmem [resolvable:$true] %s1162_s16  ;;  %s5463_s18 = int_to_ptr.hbm [resolvable:$true] %s5462_s18 }
  0xfb   : > { %s5464_s5 = scalar_lea.hbm %s5463_s18, 1  ;;  %s5468_s26 = scalar_lea.hbm %s6336_s24, 1 }
  0xfc   : > { %p5465_p4 = scmp.ne.s32.totalorder %s5463_s18, %s5464_s5  ;;  %p5469_p11 = scmp.lt.s32.totalorder %s5463_s18, %s6336_s24 }
  0xfd   : > { %p5470_p12 = scmp.lt.s32.totalorder %s5468_s26, %s5464_s5 }
  0xfe   : > { %p5466_p7 = pnand %p5465_p4, %p4870_p10 }
  0xff   : > { %p5471_p13 = por %p5470_p12, %p5469_p11 }
 0x100   : > { %p5467_p8 = pneg %p5466_p7 }
 0x102   : > { %p5472_p0 = pnand %p5471_p13, %p5467_p8 }
 0x104   : > { %5475 = shalt.err (!%p5472_p0)
}
 0x105   : > { %4791 = dma.hbm_to_vmem [thread:$0]  (%p4870_p10), %s6542_s23, 16, %s1163_s16, [#allocation40]  }
 0x106   : > { %s6170_s28 = smov [#allocation42]   ;;  %s1209_s2 = sshll.u32 %s7301_s3, 4  ;;  %s6565_s2 = int_to_ptr.hbm [resolvable:$true] %s1209_s2 }
 0x107   : > { %s1185_s10 = sshll.u32 %s6170_s28, 4  ;;  %s5490_s18 = sshra.s32 %s1184_s0, 4  ;;  %s1186_s10 = int_to_ptr.vmem [resolvable:$true] %s1185_s10  ;;  %s5491_s18 = int_to_ptr.hbm [resolvable:$true] %s5490_s18 }
 0x108   : > { %s5492_s5 = scalar_lea.hbm %s5491_s18, 128  ;;  %s5496_s26 = scalar_lea.hbm %s7298_s14, 128 }
 0x109   : > { %p5493_p1 = scmp.ne.s32.totalorder %s5491_s18, %s5492_s5  ;;  %p5497_p4 = scmp.lt.s32.totalorder %s5491_s18, %s7298_s14 }
 0x10a   : > { %p5498_p7 = scmp.lt.s32.totalorder %s5496_s26, %s5492_s5 }
 0x10b   : > { %p5494_p2 = pnand %p5493_p1, %p4870_p10 }
 0x10c   : > { %p5499_p8 = por %p5498_p7, %p5497_p4 }
 0x10d   : > { %p5495_p3 = pneg %p5494_p2 }
 0x10f   : > { %p5500_p11 = pnand %p5499_p8, %p5495_p3 }
 0x111   : > { %5503 = shalt.err (!%p5500_p11)
}
 0x112   : > { %s7257_s23 = smov 128   ;;  %s7315_s16 = sld [smem:[#allocation71_spill]] }
 0x113   : > { %s7258_s7 = smov 8   ;;  %s6173_s1 = smov [#allocation45]  }
 0x114   : > { %4795 = dma.hbm_to_vmem [thread:$0]  (%p4870_p10), %s1184_s0, 2048, %s1186_s10, [#allocation43], %s7257_s23, %s7257_s23, %s7258_s7  }
 0x115   : > { %s1211_s6 = sshll.u32 %s6173_s1, 4  ;;  %s5518_s5 = sshra.s32 %s6565_s2, 4  ;;  %s1212_s6 = int_to_ptr.vmem [resolvable:$true] %s1211_s6  ;;  %s5519_s5 = int_to_ptr.hbm [resolvable:$true] %s5518_s5 }
 0x116   : > { %s5520_s26 = scalar_lea.hbm %s5519_s5, 128  ;;  %s5524_s8 = scalar_lea.hbm %s7301_s3, 128 }
 0x117   : > { %p5521_p12 = scmp.ne.s32.totalorder %s5519_s5, %s5520_s26  ;;  %p5525_p1 = scmp.lt.s32.totalorder %s5519_s5, %s7301_s3 }
 0x118   : > { %s7316_s28 = smov %s7315_s16  ;;  %s866_s18 = sshll.u32 %s7315_s16, 4  ;;  %s6577_s18 = int_to_ptr.hbm [resolvable:$true] %s866_s18 }
 0x119   : > { %p5522_p13 = pnand %p5521_p12, %p4870_p10  ;;  %p5526_p2 = scmp.lt.s32.totalorder %s5524_s8, %s5520_s26 }
 0x11b   : > { %p5523_p0 = pneg %p5522_p13  ;;  %p5527_p3 = por %p5526_p2, %p5525_p1 }
 0x11d   : > { %p5528_p4 = pnand %p5527_p3, %p5523_p0 }
 0x11f   : > { %5531 = shalt.err (!%p5528_p4)
}
 0x120   : > { %s7317_s1 = smov 4   ;;  %s7318_s0 = smov 64  }
 0x121   : > { %s7319_s10 = sld [smem:[#allocation72_spill]]  ;;  %s6174_s23 = smov [#allocation3]  }
 0x122   : > { %4799 = dma.hbm_to_vmem [thread:$0]  (%p4870_p10), %s6565_s2, 2048, %s1212_s6, [#allocation46], %s7318_s0, %s7318_s0, %s7317_s1  }
 0x123   : > { %s868_s7 = sshll.u32 %s6174_s23, 4  ;;  %s5546_s8 = sshra.s32 %s6577_s18, 4  ;;  %s869_s7 = int_to_ptr.vmem [resolvable:$true] %s868_s7  ;;  %s5547_s8 = int_to_ptr.hbm [resolvable:$true] %s5546_s8 }
 0x124   : > { %s5548_s5 = scalar_lea.hbm %s5547_s8, 1  ;;  %s5552_s26 = scalar_lea.hbm %s7316_s28, 1 }
 0x125   : > { %p5549_p7 = scmp.ne.s32.totalorder %s5547_s8, %s5548_s5  ;;  %p5553_p12 = scmp.lt.s32.totalorder %s5547_s8, %s7316_s28 }
 0x126   : > { %p5554_p13 = scmp.lt.s32.totalorder %s5552_s26, %s5548_s5 }
 0x127   : > { %s889_s16 = sshll.u32 %s7319_s10, 4  ;;  %p5550_p8 = pnand %p5549_p7, %p4870_p10  ;;  %s6591_s16 = int_to_ptr.hbm [resolvable:$true] %s889_s16 }
 0x128   : > { %p5555_p0 = por %p5554_p13, %p5553_p12 }
 0x129   : > { %p5551_p11 = pneg %p5550_p8 }
 0x12b   : > { %p5556_p1 = pnand %p5555_p0, %p5551_p11 }
 0x12d   : > { %5559 = shalt.err (!%p5556_p1)
}
 0x12e   : > { %s7320_s6 = sld [smem:[#allocation73_spill]]  ;;  %s6175_s2 = smov [#allocation8]  }
 0x12f   : > { %4745 = dma.hbm_to_vmem [thread:$0]  (%p4870_p10), %s6577_s18, 16, %s869_s7, [#allocation4]  }
 0x130   : > { %s891_s23 = sshll.u32 %s6175_s2, 4  ;;  %s5574_s8 = sshra.s32 %s6591_s16, 4  ;;  %s892_s23 = int_to_ptr.vmem [resolvable:$true] %s891_s23  ;;  %s5575_s8 = int_to_ptr.hbm [resolvable:$true] %s5574_s8 }
 0x131   : > { %s5576_s5 = scalar_lea.hbm %s5575_s8, 128  ;;  %s5580_s26 = scalar_lea.hbm %s7319_s10, 128 }
 0x132   : > { %p5577_p2 = scmp.ne.s32.totalorder %s5575_s8, %s5576_s5  ;;  %p5581_p7 = scmp.lt.s32.totalorder %s5575_s8, %s7319_s10 }
 0x133   : > { %p5582_p8 = scmp.lt.s32.totalorder %s5580_s26, %s5576_s5 }
 0x134   : > { %s915_s3 = sshll.u32 %s7320_s6, 4  ;;  %p5578_p3 = pnand %p5577_p2, %p4870_p10  ;;  %s6602_s3 = int_to_ptr.hbm [resolvable:$true] %s915_s3 }
 0x135   : > { %p5583_p11 = por %p5582_p8, %p5581_p7 }
 0x136   : > { %p5579_p4 = pneg %p5578_p3 }
 0x138   : > { %p5584_p12 = pnand %p5583_p11, %p5579_p4 }
 0x13a   : > { %5587 = shalt.err (!%p5584_p12)
}
 0x13b   : > { %s7321_s7 = smov 8   ;;  %s7322_s18 = smov 128  }
 0x13c   : > { %s7323_s2 = sld [smem:[#allocation75_spill]]  ;;  %s6176_s12 = smov [#allocation11]  }
 0x13d   : > { %4749 = dma.hbm_to_vmem [thread:$0]  (%p4870_p10), %s6591_s16, 2048, %s892_s23, [#allocation7], %s7322_s18, %s7322_s18, %s7321_s7  }
 0x13e   : > { %s917_s14 = sshll.u32 %s6176_s12, 4  ;;  %s5602_s8 = sshra.s32 %s6602_s3, 4  ;;  %s918_s14 = int_to_ptr.vmem [resolvable:$true] %s917_s14  ;;  %s5603_s8 = int_to_ptr.hbm [resolvable:$true] %s5602_s8 }
 0x13f   : > { %s5604_s5 = scalar_lea.hbm %s5603_s8, 128  ;;  %s5608_s26 = scalar_lea.hbm %s7320_s6, 128 }
 0x140   : > { %p5605_p13 = scmp.ne.s32.totalorder %s5603_s8, %s5604_s5  ;;  %p5609_p2 = scmp.lt.s32.totalorder %s5603_s8, %s7320_s6 }
 0x141   : > { %p5610_p3 = scmp.lt.s32.totalorder %s5608_s26, %s5604_s5 }
 0x142   : > { %s942_s9 = sshll.u32 %s7323_s2, 4  ;;  %p5606_p0 = pnand %p5605_p13, %p4870_p10  ;;  %s6616_s9 = int_to_ptr.hbm [resolvable:$true] %s942_s9 }
 0x143   : > { %p5611_p4 = por %p5610_p3, %p5609_p2 }
 0x144   : > { %p5607_p1 = pneg %p5606_p0 }
 0x146   : > { %p5612_p7 = pnand %p5611_p4, %p5607_p1 }
 0x148   : > { %5615 = shalt.err (!%p5612_p7)
}
 0x149   : > { %s7324_s12 = sld [smem:[#allocation76_spill]]  ;;  %s6177_s16 = smov [#allocation14]  }
 0x14a   : > { %4753 = dma.hbm_to_vmem [thread:$0]  (%p4870_p10), %s6602_s3, 2048, %s918_s14, [#allocation10], %s7318_s0, %s7318_s0, %s7317_s1  }
 0x14b   : > { %s944_s23 = sshll.u32 %s6177_s16, 4  ;;  %s5630_s18 = sshra.s32 %s6616_s9, 4  ;;  %s945_s23 = int_to_ptr.vmem [resolvable:$true] %s944_s23  ;;  %s5631_s18 = int_to_ptr.hbm [resolvable:$true] %s5630_s18 }
 0x14c   : > { %s5632_s8 = scalar_lea.hbm %s5631_s18, 1  ;;  %s5636_s5 = scalar_lea.hbm %s7323_s2, 1 }
 0x14d   : > { %p5633_p8 = scmp.ne.s32.totalorder %s5631_s18, %s5632_s8  ;;  %p5637_p13 = scmp.lt.s32.totalorder %s5631_s18, %s7323_s2 }
 0x14e   : > { %p5638_p0 = scmp.lt.s32.totalorder %s5636_s5, %s5632_s8 }
 0x14f   : > { %s965_s7 = sshll.u32 %s7324_s12, 4  ;;  %p5634_p11 = pnand %p5633_p8, %p4870_p10  ;;  %s6630_s7 = int_to_ptr.hbm [resolvable:$true] %s965_s7 }
 0x150   : > { %p5639_p1 = por %p5638_p0, %p5637_p13 }
 0x151   : > { %p5635_p12 = pneg %p5634_p11 }
 0x153   : > { %p5640_p2 = pnand %p5639_p1, %p5635_p12 }
 0x155   : > { %5643 = shalt.err (!%p5640_p2)
}
 0x156   : > { %s7325_s3 = sld [smem:[#allocation77_spill]]  ;;  %s6178_s26 = smov [#allocation17]  }
 0x157   : > { %4757 = dma.hbm_to_vmem [thread:$0]  (%p4870_p10), %s6616_s9, 16, %s945_s23, [#allocation13]  }
 0x158   : > { %s967_s16 = sshll.u32 %s6178_s26, 4  ;;  %s5658_s18 = sshra.s32 %s6630_s7, 4  ;;  %s968_s16 = int_to_ptr.vmem [resolvable:$true] %s967_s16  ;;  %s5659_s18 = int_to_ptr.hbm [resolvable:$true] %s5658_s18 }
 0x159   : > { %s5660_s8 = scalar_lea.hbm %s5659_s18, 64  ;;  %s5664_s5 = scalar_lea.hbm %s7324_s12, 64 }
 0x15a   : > { %p5661_p3 = scmp.ne.s32.totalorder %s5659_s18, %s5660_s8  ;;  %p5665_p8 = scmp.lt.s32.totalorder %s5659_s18, %s7324_s12 }
 0x15b   : > { %p5666_p11 = scmp.lt.s32.totalorder %s5664_s5, %s5660_s8 }
 0x15c   : > { %s991_s14 = sshll.u32 %s7325_s3, 4  ;;  %p5662_p4 = pnand %p5661_p3, %p4870_p10  ;;  %s6641_s14 = int_to_ptr.hbm [resolvable:$true] %s991_s14 }
 0x15d   : > { %p5667_p12 = por %p5666_p11, %p5665_p8 }
 0x15e   : > { %p5663_p7 = pneg %p5662_p4 }
 0x160   : > { %p5668_p13 = pnand %p5667_p12, %p5663_p7 }
 0x162   : > { %5671 = shalt.err (!%p5668_p13)
}
 0x163   : > { %s7326_s9 = sld [smem:[#allocation79_spill]]  ;;  %s6179_s23 = smov [#allocation20]  }
 0x164   : > { %4761 = dma.hbm_to_vmem [thread:$0]  (%p4870_p10), %s6630_s7, 1024, %s968_s16, [#allocation16], %s7318_s0, %s7318_s0, %s7317_s1  }
 0x165   : > { %s993_s26 = sshll.u32 %s6179_s23, 4  ;;  %s5686_s18 = sshra.s32 %s6641_s14, 4  ;;  %s994_s26 = int_to_ptr.vmem [resolvable:$true] %s993_s26  ;;  %s5687_s18 = int_to_ptr.hbm [resolvable:$true] %s5686_s18 }
 0x166   : > { %s5688_s8 = scalar_lea.hbm %s5687_s18, 64  ;;  %s5692_s5 = scalar_lea.hbm %s7325_s3, 64 }
 0x167   : > { %p5689_p0 = scmp.ne.s32.totalorder %s5687_s18, %s5688_s8  ;;  %p5693_p3 = scmp.lt.s32.totalorder %s5687_s18, %s7325_s3 }
 0x168   : > { %p5694_p4 = scmp.lt.s32.totalorder %s5692_s5, %s5688_s8 }
 0x169   : > { %s1017_s2 = sshll.u32 %s7326_s9, 4  ;;  %p5690_p1 = pnand %p5689_p0, %p4870_p10  ;;  %s6655_s2 = int_to_ptr.hbm [resolvable:$true] %s1017_s2 }
 0x16a   : > { %p5695_p7 = por %p5694_p4, %p5693_p3 }
 0x16b   : > { %p5691_p2 = pneg %p5690_p1 }
 0x16d   : > { %p5696_p8 = pnand %p5695_p7, %p5691_p2 }
 0x16f   : > { %5699 = shalt.err (!%p5696_p8)
}
 0x170   : > { %s7327_s7 = sld [smem:[#allocation80_spill]]  ;;  %s6180_s23 = smov [#allocation23]  }
 0x171   : > { %4765 = dma.hbm_to_vmem [thread:$0]  (%p4870_p10), %s6641_s14, 1024, %s994_s26, [#allocation19], %s7318_s0, %s7318_s0, %s7317_s1  }
 0x172   : > { %s1019_s6 = sshll.u32 %s6180_s23, 4  ;;  %s5714_s18 = sshra.s32 %s6655_s2, 4  ;;  %s1020_s6 = int_to_ptr.vmem [resolvable:$true] %s1019_s6  ;;  %s5715_s18 = int_to_ptr.hbm [resolvable:$true] %s5714_s18 }
 0x173   : > { %s5716_s8 = scalar_lea.hbm %s5715_s18, 64  ;;  %s5720_s5 = scalar_lea.hbm %s7326_s9, 64 }
 0x174   : > { %p5717_p11 = scmp.ne.s32.totalorder %s5715_s18, %s5716_s8  ;;  %p5721_p0 = scmp.lt.s32.totalorder %s5715_s18, %s7326_s9 }
 0x175   : > { %p5722_p1 = scmp.lt.s32.totalorder %s5720_s5, %s5716_s8 }
 0x176   : > { %s1043_s16 = sshll.u32 %s7327_s7, 4  ;;  %p5718_p12 = pnand %p5717_p11, %p4870_p10  ;;  %s6669_s16 = int_to_ptr.hbm [resolvable:$true] %s1043_s16 }
 0x177   : > { %p5723_p2 = por %p5722_p1, %p5721_p0 }
 0x178   : > { %p5719_p13 = pneg %p5718_p12 }
 0x17a   : > { %p5724_p3 = pnand %p5723_p2, %p5719_p13 }
 0x17c   : > { %5727 = shalt.err (!%p5724_p3)
}
 0x17d   : > { %s7328_s14 = sld [smem:[#allocation82_spill]]  ;;  %s6181_s26 = smov [#allocation26]  }
 0x17e   : > { %4769 = dma.hbm_to_vmem [thread:$0]  (%p4870_p10), %s6655_s2, 1024, %s1020_s6, [#allocation22], %s7318_s0, %s7318_s0, %s7317_s1  }
 0x17f   : > { %s1045_s23 = sshll.u32 %s6181_s26, 4  ;;  %s5742_s18 = sshra.s32 %s6669_s16, 4  ;;  %s1046_s23 = int_to_ptr.vmem [resolvable:$true] %s1045_s23  ;;  %s5743_s18 = int_to_ptr.hbm [resolvable:$true] %s5742_s18 }
 0x180   : > { %s5744_s8 = scalar_lea.hbm %s5743_s18, 64  ;;  %s5748_s5 = scalar_lea.hbm %s7327_s7, 64 }
 0x181   : > { %p5745_p4 = scmp.ne.s32.totalorder %s5743_s18, %s5744_s8  ;;  %p5749_p11 = scmp.lt.s32.totalorder %s5743_s18, %s7327_s7 }
 0x182   : > { %p5750_p12 = scmp.lt.s32.totalorder %s5748_s5, %s5744_s8 }
 0x183   : > { %s1069_s3 = sshll.u32 %s7328_s14, 4  ;;  %p5746_p7 = pnand %p5745_p4, %p4870_p10  ;;  %s6683_s3 = int_to_ptr.hbm [resolvable:$true] %s1069_s3 }
 0x184   : > { %p5751_p13 = por %p5750_p12, %p5749_p11 }
 0x185   : > { %p5747_p8 = pneg %p5746_p7 }
 0x187   : > { %p5752_p0 = pnand %p5751_p13, %p5747_p8 }
 0x189   : > { %5755 = shalt.err (!%p5752_p0)
}
 0x18a   : > { %s7329_s6 = sld [smem:[#allocation84_spill]]  ;;  %s6182_s26 = smov [#allocation29]  }
 0x18b   : > { %4773 = dma.hbm_to_vmem [thread:$0]  (%p4870_p10), %s6669_s16, 1024, %s1046_s23, [#allocation25], %s7318_s0, %s7318_s0, %s7317_s1  }
 0x18c   : > { %s1071_s9 = sshll.u32 %s6182_s26, 4  ;;  %s5770_s18 = sshra.s32 %s6683_s3, 4  ;;  %s1072_s9 = int_to_ptr.vmem [resolvable:$true] %s1071_s9  ;;  %s5771_s18 = int_to_ptr.hbm [resolvable:$true] %s5770_s18 }
 0x18d   : > { %s5772_s8 = scalar_lea.hbm %s5771_s18, 64  ;;  %s5776_s5 = scalar_lea.hbm %s7328_s14, 64 }
 0x18e   : > { %p5773_p1 = scmp.ne.s32.totalorder %s5771_s18, %s5772_s8  ;;  %p5777_p4 = scmp.lt.s32.totalorder %s5771_s18, %s7328_s14 }
 0x18f   : > { %p5778_p7 = scmp.lt.s32.totalorder %s5776_s5, %s5772_s8 }
 0x190   : > { %s1098_s2 = sshll.u32 %s7329_s6, 4  ;;  %p5774_p2 = pnand %p5773_p1, %p4870_p10  ;;  %s6697_s2 = int_to_ptr.hbm [resolvable:$true] %s1098_s2 }
 0x191   : > { %p5779_p8 = por %p5778_p7, %p5777_p4 }
 0x192   : > { %p5775_p3 = pneg %p5774_p2 }
 0x194   : > { %p5780_p11 = pnand %p5779_p8, %p5775_p3 }
 0x196   : > { %5783 = shalt.err (!%p5780_p11)
}
 0x197   : > { %s7330_s16 = sld [smem:[#allocation85_spill]]  ;;  %s6183_s26 = smov [#allocation32]  }
 0x198   : > { %4777 = dma.hbm_to_vmem [thread:$0]  (%p4870_p10), %s6683_s3, 1024, %s1072_s9, [#allocation28], %s7318_s0, %s7318_s0, %s7317_s1  }
 0x199   : > { %s1100_s7 = sshll.u32 %s6183_s26, 4  ;;  %s5798_s18 = sshra.s32 %s6697_s2, 4  ;;  %s1101_s7 = int_to_ptr.vmem [resolvable:$true] %s1100_s7  ;;  %s5799_s18 = int_to_ptr.hbm [resolvable:$true] %s5798_s18 }
 0x19a   : > { %s5800_s8 = scalar_lea.hbm %s5799_s18, 8  ;;  %s5804_s5 = scalar_lea.hbm %s7329_s6, 8 }
 0x19b   : > { %p5801_p12 = scmp.ne.s32.totalorder %s5799_s18, %s5800_s8  ;;  %p5805_p1 = scmp.lt.s32.totalorder %s5799_s18, %s7329_s6 }
 0x19c   : > { %p5806_p2 = scmp.lt.s32.totalorder %s5804_s5, %s5800_s8 }
 0x19d   : > { %s7331_s23 = smov %s7330_s16  ;;  %s1122_s10 = sshll.u32 %s7330_s16, 4  ;;  %s6711_s10 = int_to_ptr.hbm [resolvable:$true] %s1122_s10 }
 0x19e   : > { %p5802_p13 = pnand %p5801_p12, %p4870_p10  ;;  %p5807_p3 = por %p5806_p2, %p5805_p1 }
 0x1a0   : > { %p5803_p0 = pneg %p5802_p13 }
 0x1a2   : > { %p5808_p4 = pnand %p5807_p3, %p5803_p0 }
 0x1a4   : > { %5811 = shalt.err (!%p5808_p4)
}
 0x1a5   : > { %s7332_s1 = sld [smem:[#allocation87_spill]]  ;;  %s6184_s3 = smov [#allocation35]  }
 0x1a6   : > { %4781 = dma.hbm_to_vmem [thread:$0]  (%p4870_p10), %s6697_s2, 128, %s1101_s7, [#allocation31]  }
 0x1a7   : > { %s1124_s9 = sshll.u32 %s6184_s3, 4  ;;  %s5826_s16 = sshra.s32 %s6711_s10, 4  ;;  %s1125_s9 = int_to_ptr.vmem [resolvable:$true] %s1124_s9  ;;  %s5827_s16 = int_to_ptr.hbm [resolvable:$true] %s5826_s16 }
 0x1a8   : > { %s5828_s26 = scalar_lea.hbm %s5827_s16, 1  ;;  %s5832_s18 = scalar_lea.hbm %s7331_s23, 1 }
 0x1a9   : > { %p5829_p7 = scmp.ne.s32.totalorder %s5827_s16, %s5828_s26  ;;  %p5833_p12 = scmp.lt.s32.totalorder %s5827_s16, %s7331_s23 }
 0x1aa   : > { %p5834_p13 = scmp.lt.s32.totalorder %s5832_s18, %s5828_s26 }
 0x1ab   : > { %s1148_s0 = sshll.u32 %s7332_s1, 4  ;;  %p5830_p8 = pnand %p5829_p7, %p4870_p10  ;;  %s6722_s0 = int_to_ptr.hbm [resolvable:$true] %s1148_s0 }
 0x1ac   : > { %p5835_p0 = por %p5834_p13, %p5833_p12 }
 0x1ad   : > { %p5831_p11 = pneg %p5830_p8 }
 0x1af   : > { %p5836_p1 = pnand %p5835_p0, %p5831_p11 }
 0x1b1   : > { %5839 = shalt.err (!%p5836_p1)
}
 0x1b2   : > { %s7333_s7 = sld [smem:[#allocation88_spill]]  ;;  %s6185_s2 = smov [#allocation38]  }
 0x1b3   : > { %4785 = dma.hbm_to_vmem [thread:$0]  (%p4870_p10), %s6711_s10, 16, %s1125_s9, [#allocation34]  }
 0x1b4   : > { %s1150_s8 = sshll.u32 %s6185_s2, 4  ;;  %s5854_s3 = sshra.s32 %s6722_s0, 4  ;;  %s1151_s8 = int_to_ptr.vmem [resolvable:$true] %s1150_s8  ;;  %s5855_s3 = int_to_ptr.hbm [resolvable:$true] %s5854_s3 }
 0x1b5   : > { %s5856_s16 = scalar_lea.hbm %s5855_s3, 1  ;;  %s5860_s26 = scalar_lea.hbm %s7332_s1, 1 }
 0x1b6   : > { %p5857_p2 = scmp.ne.s32.totalorder %s5855_s3, %s5856_s16  ;;  %p5861_p7 = scmp.lt.s32.totalorder %s5855_s3, %s7332_s1 }
 0x1b7   : > { %p5862_p8 = scmp.lt.s32.totalorder %s5860_s26, %s5856_s16 }
 0x1b8   : > { %s1172_s5 = sshll.u32 %s7333_s7, 4  ;;  %p5858_p3 = pnand %p5857_p2, %p4870_p10  ;;  %s6733_s5 = int_to_ptr.hbm [resolvable:$true] %s1172_s5 }
 0x1b9   : > { %p5863_p11 = por %p5862_p8, %p5861_p7 }
 0x1ba   : > { %p5859_p4 = pneg %p5858_p3 }
 0x1bc   : > { %p5864_p12 = pnand %p5863_p11, %p5859_p4 }
 0x1be   : > { %5867 = shalt.err (!%p5864_p12)
}
 0x1bf   : > { %s7334_s10 = sld [smem:[#allocation90_spill]]  ;;  %s6186_s18 = smov [#allocation41]  }
 0x1c0   : > { %4789 = dma.hbm_to_vmem [thread:$0]  (%p4870_p10), %s6722_s0, 16, %s1151_s8, [#allocation37]  }
 0x1c1   : > { %s1174_s2 = sshll.u32 %s6186_s18, 4  ;;  %s5882_s3 = sshra.s32 %s6733_s5, 4  ;;  %s1175_s2 = int_to_ptr.vmem [resolvable:$true] %s1174_s2  ;;  %s5883_s3 = int_to_ptr.hbm [resolvable:$true] %s5882_s3 }
 0x1c2   : > { %s5884_s16 = scalar_lea.hbm %s5883_s3, 1  ;;  %s5888_s26 = scalar_lea.hbm %s7333_s7, 1 }
 0x1c3   : > { %p5885_p13 = scmp.ne.s32.totalorder %s5883_s3, %s5884_s16  ;;  %p5889_p2 = scmp.lt.s32.totalorder %s5883_s3, %s7333_s7 }
 0x1c4   : > { %p5890_p3 = scmp.lt.s32.totalorder %s5888_s26, %s5884_s16 }
 0x1c5   : > { %s1198_s9 = sshll.u32 %s7334_s10, 4  ;;  %p5886_p0 = pnand %p5885_p13, %p4870_p10  ;;  %s6744_s9 = int_to_ptr.hbm [resolvable:$true] %s1198_s9 }
 0x1c6   : > { %p5891_p4 = por %p5890_p3, %p5889_p2 }
 0x1c7   : > { %p5887_p1 = pneg %p5886_p0 }
 0x1c9   : > { %p5892_p7 = pnand %p5891_p4, %p5887_p1 }
 0x1cb   : > { %5895 = shalt.err (!%p5892_p7)
}
 0x1cc   : > { %4793 = dma.hbm_to_vmem [thread:$0]  (%p4870_p10), %s6733_s5, 16, %s1175_s2, [#allocation40]  }
 0x1cd   : > { %s6187_s0 = smov [#allocation44]   ;;  %s1224_s18 = sshll.u32 %s6361_s13, 4  ;;  %s6755_s18 = int_to_ptr.hbm [resolvable:$true] %s1224_s18 }
 0x1ce   : > { %s1200_s8 = sshll.u32 %s6187_s0, 4  ;;  %s5910_s3 = sshra.s32 %s6744_s9, 4  ;;  %s1201_s8 = int_to_ptr.vmem [resolvable:$true] %s1200_s8  ;;  %s5911_s3 = int_to_ptr.hbm [resolvable:$true] %s5910_s3 }
 0x1cf   : > { %s5912_s16 = scalar_lea.hbm %s5911_s3, 2  ;;  %s5916_s26 = scalar_lea.hbm %s7334_s10, 2 }
 0x1d0   : > { %p5913_p8 = scmp.ne.s32.totalorder %s5911_s3, %s5912_s16  ;;  %p5917_p13 = scmp.lt.s32.totalorder %s5911_s3, %s7334_s10 }
 0x1d1   : > { %p5918_p0 = scmp.lt.s32.totalorder %s5916_s26, %s5912_s16 }
 0x1d2   : > { %p5914_p11 = pnand %p5913_p8, %p4870_p10 }
 0x1d3   : > { %p5919_p1 = por %p5918_p0, %p5917_p13 }
 0x1d4   : > { %p5915_p12 = pneg %p5914_p11 }
 0x1d6   : > { %p5920_p2 = pnand %p5919_p1, %p5915_p12 }
 0x1d8   : > { %5923 = shalt.err (!%p5920_p2)
}
 0x1d9   : > { %4797 = dma.hbm_to_vmem [thread:$0]  (%p4870_p10), %s6744_s9, 32, %s1201_s8, [#allocation43]  }
 0x1da   : > { %s1236_s5 = sshll.u32 %s6366_s25, 4  ;;  %s6188_s2 = smov [#allocation47]   ;;  %s6766_s5 = int_to_ptr.hbm [resolvable:$true] %s1236_s5 }
 0x1db   : > { %s1226_s0 = sshll.u32 %s6188_s2, 4  ;;  %s5938_s3 = sshra.s32 %s6755_s18, 4  ;;  %s1227_s0 = int_to_ptr.vmem [resolvable:$true] %s1226_s0  ;;  %s5939_s3 = int_to_ptr.hbm [resolvable:$true] %s5938_s3 }
 0x1dc   : > { %s5940_s16 = scalar_lea.hbm %s5939_s3, 1  ;;  %s5944_s26 = scalar_lea.hbm %s6361_s13, 1 }
 0x1dd   : > { %p5941_p3 = scmp.ne.s32.totalorder %s5939_s3, %s5940_s16  ;;  %p5945_p8 = scmp.lt.s32.totalorder %s5939_s3, %s6361_s13 }
 0x1de   : > { %p5946_p11 = scmp.lt.s32.totalorder %s5944_s26, %s5940_s16 }
 0x1df   : > { %p5942_p4 = pnand %p5941_p3, %p4870_p10 }
 0x1e0   : > { %p5947_p12 = por %p5946_p11, %p5945_p8 }
 0x1e1   : > { %p5943_p7 = pneg %p5942_p4 }
 0x1e3   : > { %p5948_p13 = pnand %p5947_p12, %p5943_p7 }
 0x1e5   : > { %5951 = shalt.err (!%p5948_p13)
}
 0x1e6   : > { %4801 = dma.hbm_to_vmem [thread:$0]  (%p4870_p10), %s6755_s18, 16, %s1227_s0, [#allocation46]  }
 0x1e7   : > { %s6189_s9 = smov [#allocation48]   ;;  %s5966_s2 = sshra.s32 %s6766_s5, 4  ;;  %s5967_s2 = int_to_ptr.hbm [resolvable:$true] %s5966_s2 }
 0x1e8   : > { %s1238_s8 = sshll.u32 %s6189_s9, 4  ;;  %s5968_s1 = scalar_lea.hbm %s5967_s2, 1  ;;  %s1239_s8 = int_to_ptr.vmem [resolvable:$true] %s1238_s8 }
 0x1e9   : > { %p5969_p0 = scmp.ne.s32.totalorder %s5967_s2, %s5968_s1  ;;  %s5972_s3 = scalar_lea.hbm %s6366_s25, 1 }
 0x1ea   : > { %p5973_p3 = scmp.lt.s32.totalorder %s5967_s2, %s6366_s25  ;;  %p5974_p4 = scmp.lt.s32.totalorder %s5972_s3, %s5968_s1 }
 0x1eb   : > { %p5970_p1 = pnand %p5969_p0, %p4870_p10 }
 0x1ec   : > { %p5975_p7 = por %p5974_p4, %p5973_p3 }
 0x1ed   : > { %p5971_p2 = pneg %p5970_p1 }
 0x1ef   : > { %p5976_p8 = pnand %p5975_p7, %p5971_p2 }
 0x1f1   : > { %5979 = shalt.err (!%p5976_p8)
}
 0x1f2   : > { %4803 = dma.hbm_to_vmem [thread:$0]  (%p4870_p10), %s6766_s5, 16, %s1239_s8, [#allocation49]  }
 0x1f3 PF: > { %1262 = sbr.rel (%p6426_p9) target bundleno = 3834 (0xefa), region = 156  ;;  %p4900_p11 = scmp.eq.s32.totalorder (!%p6426_p9), %s6399_s22, 0 }
 0x1f8   : > { %6039 = dma.done.wait (%p4900_p11), [#allocation4], 16  }
 0x1f9   : > { %6041 = vsyncadd (%p4900_p11), [#allocation4], 4294967280 }
 0x1fa   : > { %6043 = dma.done.wait (%p4900_p11), [#allocation7], 2064  }
 0x1fb   : > { %6045 = vsyncadd (%p4900_p11), [#allocation7], 4294965232 }
 0x1fc   : > { %6047 = dma.done.wait (%p4900_p11), [#allocation10], 2080  }
 0x1fd   : > { %6049 = vsyncadd (%p4900_p11), [#allocation10], 4294965216 }
 0x1fe   : > { %6051 = dma.done.wait (%p4900_p11), [#allocation13], 32  }
 0x1ff   : > { %6053 = vsyncadd (%p4900_p11), [#allocation13], 4294967264 }
 0x200   : > { %6055 = dma.done.wait (%p4900_p11), [#allocation16], 1040  }
 0x201   : > { %6057 = vsyncadd (%p4900_p11), [#allocation16], 4294966256 }
 0x202   : > { %6059 = dma.done.wait (%p4900_p11), [#allocation19], 1040  }
 0x203   : > { %6061 = vsyncadd (%p4900_p11), [#allocation19], 4294966256 }
 0x204   : > { %6063 = dma.done.wait (%p4900_p11), [#allocation22], 1040  }
 0x205   : > { %6065 = vsyncadd (%p4900_p11), [#allocation22], 4294966256 }
 0x206   : > { %6067 = dma.done.wait (%p4900_p11), [#allocation25], 1040  }
 0x207   : > { %6069 = vsyncadd (%p4900_p11), [#allocation25], 4294966256 }
 0x208   : > { %6071 = dma.done.wait (%p4900_p11), [#allocation28], 1040  }
 0x209   : > { %6073 = vsyncadd (%p4900_p11), [#allocation28], 4294966256 }
 0x20a   : > { %6075 = dma.done.wait (%p4900_p11), [#allocation31], 1152  }
 0x20b   : > { %6077 = vsyncadd (%p4900_p11), [#allocation31], 4294966144 }
 0x20c   : > { %6079 = dma.done.wait (%p4900_p11), [#allocation34], 32  }
 0x20d   : > { %6081 = vsyncadd (%p4900_p11), [#allocation34], 4294967264 }
 0x20e   : > { %6083 = dma.done.wait (%p4900_p11), [#allocation37], 1040  }
 0x20f   : > { %6085 = vsyncadd (%p4900_p11), [#allocation37], 4294966256 }
 0x210   : > { %6087 = dma.done.wait (%p4900_p11), [#allocation40], 32  }
 0x211   : > { %6089 = vsyncadd (%p4900_p11), [#allocation40], 4294967264 }
 0x212   : > { %6091 = dma.done.wait (%p4900_p11), [#allocation43], 2080  }
 0x213   : > { %6093 = vsyncadd (%p4900_p11), [#allocation43], 4294965216 }
 0x214   : > { %6095 = dma.done.wait (%p4900_p11), [#allocation46], 2064  }
 0x215   : > { %6097 = vsyncadd (%p4900_p11), [#allocation46], 4294965232 }
 0x216   : > { %6099 = dma.done.wait (%p4900_p11), [#allocation49], 16  }
 0x217   : > { %6101 = vsyncadd (%p4900_p11), [#allocation49], 4294967280  ;;  %s7335_s11 = sld [smem:[#allocation68_spill]]  ;;  %p1494_p9 = scmp.lt.s32.totalorder %s6399_s22, 1  ;;  %v6190_v2 = vmov 128.0  }
 0x218   : > { %5056 = vrcp.f32 %v6190_v2  ;;  %v4175_v17 = vld [vmem:[#allocation8 + $0x70] sm:$0xf]  ;;  %v4638_v18 = vld [vmem:[#allocation8 + $0x74] sm:$0xf0]  ;;  %v4637_v19 = vld [vmem:[#allocation8 + $0x74] sm:$0xf] }
 0x219   : > { %s1495_s1 = scalar_select %p1494_p9, %s6399_s22, 1  ;;  %v4176_v20 = vor.u32 %v4638_v18, %v4175_v17  ;;  %v4177_v21 = vld [vmem:[#allocation8 + $0x78] sm:$0xf0]  ;;  %v4167_v23 = vld [vmem:[#allocation8 + $0x60] sm:$0xf] }
 0x21a   : > { %v4180_v22 = vor.u32 %v4637_v19, %v4177_v21  ;;  %v4636_v24 = vld [vmem:[#allocation8 + $0x64] sm:$0xf0]  ;;  %v4635_v25 = vld [vmem:[#allocation8 + $0x64] sm:$0xf]  ;;  %v4169_v27 = vld [vmem:[#allocation8 + $0x68] sm:$0xf0] }
 0x21b   : > { %s4622_s18 = sshll.u32 %s1495_s1, 4  ;;  %1675 = vmatpush.bf16.msra.mxu0 %v4176_v20  ;;  %v4168_v26 = vor.u32 %v4636_v24, %v4167_v23  ;;  %v4172_v28 = vor.u32 %v4635_v25, %v4169_v27  ;;  %v4159_v29 = vld [vmem:[#allocation8 + $0x50] sm:$0xf]  ;;  %v4634_v30 = vld [vmem:[#allocation8 + $0x54] sm:$0xf0]  ;;  %s6191_s0 = smov 1  }
 0x21c   : > { %1689 = vmatpush.bf16.msra.mxu1 %v4180_v22  ;;  %v4633_v31 = vld [vmem:[#allocation8 + $0x54] sm:$0xf]  ;;  %v4160_v32 = vor.u32 %v4634_v30, %v4159_v29  ;;  %v4161_v33 = vld [vmem:[#allocation8 + $0x58] sm:$0xf0]  ;;  %v4151_v35 = vld [vmem:[#allocation8 + $0x40] sm:$0xf] }
 0x21d   : > { %s1498_s5 = scalar_lea.vmem %s7335_s11, %s4622_s18  ;;  %v4164_v34 = vor.u32 %v4633_v31, %v4161_v33  ;;  %v4632_v36 = vld [vmem:[#allocation8 + $0x44] sm:$0xf0]  ;;  %v4631_v37 = vld [vmem:[#allocation8 + $0x44] sm:$0xf]  ;;  %v4153_v39 = vld [vmem:[#allocation8 + $0x48] sm:$0xf0] }
 0x21e   : > { %v6854_v0 = vld [vmem:[%s1498_s5] sm:$0xff]  ;;  %v6857_v1 = vld [vmem:[%s1498_s5 + $0x8] sm:$0xff]  ;;  %v5057_v3 = vpop.eup %5056  ;;  %v4152_v38 = vor.u32 %v4632_v36, %v4151_v35  ;;  %v4156_v40 = vor.u32 %v4631_v37, %v4153_v39  ;;  %v4145_v45 = vld [vmem:[#allocation8 + $0x38] sm:$0xf0]  ;;  %s6192_s16 = smov 127   ;;  %s7340_s26 = sld [smem:[#allocation70_spill]] }
 0x21f   : > { %1515 = vadd.xlane.f32.xlu0 %v6854_v0  ;;  %v1520_v4 = vmul.f32 128.0, %v5057_v3  ;;  %vm1524_vm0 = vweird.f32 %v5057_v3  ;;  %1676 = vmatpush.bf16.msra.mxu0 %v4168_v26  ;;  %v4143_v41 = vld [vmem:[#allocation8 + $0x30] sm:$0xf]  ;;  %v4630_v42 = vld [vmem:[#allocation8 + $0x34] sm:$0xf0]  ;;  %s7341_s9 = sld [smem:[#allocation69_spill]] }
 0x220   : > { %1690 = vmatpush.bf16.msra.mxu1 %v4172_v28  ;;  %v4629_v43 = vld [vmem:[#allocation8 + $0x34] sm:$0xf]  ;;  %v4144_v44 = vor.u32 %v4630_v42, %v4143_v41  ;;  %v4135_v47 = vld [vmem:[#allocation8 + $0x20] sm:$0xf]  ;;  %v4628_v48 = vld [vmem:[#allocation8 + $0x24] sm:$0xf0] }
 0x221   : > { %v1521_v5 = vsub.f32 1.0, %v1520_v4  ;;  %v4148_v46 = vor.u32 %v4629_v43, %v4145_v45  ;;  %v4627_v49 = vld [vmem:[#allocation8 + $0x24] sm:$0xf]  ;;  %v4136_v50 = vor.u32 %v4628_v48, %v4135_v47  ;;  %v4137_v51 = vld [vmem:[#allocation8 + $0x28] sm:$0xf0]  ;;  %v4646_v35 = vld [vmem:[#allocation11 + $0x38] sm:$0xff] }
 0x222   : > { %v4140_v52 = vor.u32 %v4627_v49, %v4137_v51  ;;  %v4127_v53 = vld [vmem:[#allocation8 + $0x10] sm:$0xf]  ;;  %v4626_v54 = vld [vmem:[#allocation8 + $0x14] sm:$0xf0]  ;;  %v4625_v55 = vld [vmem:[#allocation8 + $0x14] sm:$0xf]  ;;  %1917 = vmatpush.bf16.msra.mxu2 %v4646_v35 }
 0x223   : > { %v1522_v6 = vmul.f32 %v5057_v3, %v1521_v5  ;;  %1677 = vmatpush.bf16.msra.mxu0 %v4160_v32  ;;  %v4128_v56 = vor.u32 %v4626_v54, %v4127_v53  ;;  %v4129_v57 = vld [vmem:[#allocation8 + $0x18] sm:$0xf0]  ;;  %v4119_v58 = vld [vmem:[#allocation8] sm:$0xf]  ;;  %v4624_v59 = vld [vmem:[#allocation8 + $0x4] sm:$0xf0] }
 0x224   : > { %1691 = vmatpush.bf16.msra.mxu1 %v4164_v34  ;;  %v4132_v60 = vor.u32 %v4625_v55, %v4129_v57  ;;  %v4623_v61 = vld [vmem:[#allocation8 + $0x4] sm:$0xf]  ;;  %v4121_v62 = vld [vmem:[#allocation8 + $0x8] sm:$0xf0]  ;;  %v4120_v2 = vor.u32 %v4624_v59, %v4119_v58  ;;  %v5039_v25 = vld [vmem:[#allocation3] ss:$0 sm:$0xff] }
 0x225   : > { %v1523_v7 = vadd.f32 %v5057_v3, %v1522_v6  ;;  %v4124_v4 = vor.u32 %v4623_v61, %v4121_v62  ;;  %v5040_v30 = vld [vmem:[#allocation6] ss:$0 sm:$0xff]  ;;  %v4653_v37 = vld [vmem:[#allocation11 + $0x70] sm:$0xff]  ;;  %v4652_v39 = vld [vmem:[#allocation11 + $0x68] sm:$0xff]  ;;  %s6193_s8 = smov 96   ;;  %s6194_s2 = smov 64  }
 0x226   : > { %v4654_v36 = vld [vmem:[#allocation11 + $0x78] sm:$0xff]  ;;  %v4651_v41 = vld [vmem:[#allocation11 + $0x60] sm:$0xff]  ;;  %v4649_v51 = vld [vmem:[#allocation11 + $0x50] sm:$0xff]  ;;  %s6195_s3 = smov 32   ;;  %s7350_s4 = sld [smem:[#allocation92_spill]] }
 0x227   : > { %1517 = vadd.xlane.f32.xlu0 %v6857_v1  ;;  %v6860_v8 = vsel %vm1524_vm0, %v5057_v3, %v1523_v7  ;;  %1678 = vmatpush.bf16.msra.mxu0 %v4152_v38  ;;  %v4644_v38 = vld [vmem:[#allocation11 + $0x28] sm:$0xff]  ;;  %v4650_v45 = vld [vmem:[#allocation11 + $0x58] sm:$0xff]  ;;  %v4647_v61 = vld [vmem:[#allocation11 + $0x40] sm:$0xff]  ;;  %s1491_s11 = sand.u32 1, %s6112_s15   ;;  %s4743_s18 = sshll.u32 %s6399_s22, 4 }
 0x228   : > { %1692 = vmatpush.bf16.msra.mxu1 %v4156_v40  ;;  %1931 = vmatpush.bf16.msra.mxu3 %v4654_v36  ;;  %v4643_v40 = vld [vmem:[#allocation11 + $0x20] sm:$0xff]  ;;  %v4640_v54 = vld [vmem:[#allocation11 + $0x8] sm:$0xff]  ;;  %s4114_s1 = sshll.u32 %s1491_s11, 4  ;;  %s3662_s5 = scalar_lea.hbm %s6376_s17, %s4743_s18 }
 0x229   : > { %v4648_v55 = vld [vmem:[#allocation11 + $0x48] sm:$0xff]  ;;  %s3651_s22 = scalar_lea.sflag [#allocation5], %s1491_s11 }
 0x22b   : > { %1679 = vmatpush.bf16.msra.mxu0 %v4144_v44  ;;  %v4642_v44 = vld [vmem:[#allocation11 + $0x18] sm:$0xff] }
 0x22c   : > { %1693 = vmatpush.bf16.msra.mxu1 %v4148_v46  ;;  %1932 = vmatpush.bf16.msra.mxu3 %v4653_v37 }
 0x22f   : > { %1680 = vmatpush.bf16.msra.mxu0 %v4136_v50  ;;  %v4641_v50 = vld [vmem:[#allocation11 + $0x10] sm:$0xff] }
 0x230   : > { %1694 = vmatpush.bf16.msra.mxu1 %v4140_v52  ;;  %1933 = vmatpush.bf16.msra.mxu3 %v4652_v39 }
 0x233   : > { %1681 = vmatpush.bf16.msra.mxu0 %v4128_v56 }
 0x234   : > { %1695 = vmatpush.bf16.msra.mxu1 %v4132_v60  ;;  %1934 = vmatpush.bf16.msra.mxu3 %v4651_v41  ;;  %v4639_v60 = vld [vmem:[#allocation11] sm:$0xff] }
 0x237   : > { %1682 = vmatpush.bf16.msra.mxu0 %v4120_v2 }
 0x238   : > { %1696 = vmatpush.bf16.msra.mxu1 %v4124_v4  ;;  %1935 = vmatpush.bf16.msra.mxu3 %v4650_v45 }
 0x23c   : > { %1936 = vmatpush.bf16.msra.mxu3 %v4649_v51 }
 0x240   : > { %1937 = vmatpush.bf16.msra.mxu3 %v4648_v55 }
 0x244   : > { %1938 = vmatpush.bf16.msra.mxu3 %v4647_v61 }
 0x292   : > { %v1516_v9 = vpop.xlane.xlu0 %1515 }
 0x293   : > { %v1526_v10 = vmul.f32 %v6860_v8, %v1516_v9 }
 0x295   : > { %v6864_v11 = vsub.f32 %v6854_v0, %v1526_v10 }
 0x297   : > { %v1530_v12 = vmul.f32 %v6864_v11, %v6864_v11 }
 0x299   : > { %1532 = vadd.xlane.f32.xlu1 %v1530_v12 }
 0x29a   : > { %v1518_v13 = vpop.xlane.xlu0 %1517 }
 0x29b   : > { %v1527_v14 = vmul.f32 %v6860_v8, %v1518_v13 }
 0x29d   : > { %v6870_v15 = vsub.f32 %v6857_v1, %v1527_v14 }
 0x29f   : > { %v1531_v16 = vmul.f32 %v6870_v15, %v6870_v15 }
 0x2a1   : > { %1534 = vadd.xlane.f32.xlu1 %v1531_v16 }
 0x30c   : > { %v1533_v63 = vpop.xlane.xlu1 %1532 }
 0x30d   : > { %v1536_v3 = vmul.f32 %v1533_v63, %v6860_v8 }
 0x30f   : > { %v1538_v5 = vadd.f32 1e-05, %v1536_v3 }
 0x311   : > { %5058 = vrsqrt.f32 %v1538_v5  ;;  %vm1546_vm2 = vweird.f32 %v1538_v5 }
 0x314   : > { %v1535_v6 = vpop.xlane.xlu1 %1534 }
 0x315   : > { %v1537_v7 = vmul.f32 %v1535_v6, %v6860_v8 }
 0x317   : > { %v5059_v9 = vpop.eup %5058  ;;  %v1539_v10 = vadd.f32 1e-05, %v1537_v7 }
 0x318   : > { %v1541_v12 = vmul.f32 %v5059_v9, %v1538_v5  ;;  %vm1547_vm1 = vweird.f32 %v5059_v9 }
 0x319   : > { %5060 = vrsqrt.f32 %v1539_v10  ;;  %vm1548_vm3 = vmor %vm1546_vm2, %vm1547_vm1  ;;  %vm1556_vm5 = vweird.f32 %v1539_v10 }
 0x31a   : > { %v1542_v13 = vmul.f32 %v5059_v9, %v1541_v12 }
 0x31c   : > { %v1543_v14 = vmul.f32 0.5, %v1542_v13 }
 0x31e   : > { %v1544_v16 = vsub.f32 1.5, %v1543_v14 }
 0x31f   : > { %v5061_v17 = vpop.eup %5060 }
 0x320   : > { %v1545_v18 = vmul.f32 %v5059_v9, %v1544_v16  ;;  %v1551_v19 = vmul.f32 %v5061_v17, %v1539_v10  ;;  %vm1557_vm4 = vweird.f32 %v5061_v17 }
 0x321   : > { %vm1558_vm6 = vmor %vm1556_vm5, %vm1557_vm4 }
 0x322   : > { %v1552_v20 = vmul.f32 %v5061_v17, %v1551_v19  ;;  %v1549_v22 = vsel %vm1548_vm3, %v5059_v9, %v1545_v18 }
 0x323   : > { %v1560_v24 = vmul.f32 %v1549_v22, %v6864_v11  ;;  %v4645_v11 = vld [vmem:[#allocation11 + $0x30] sm:$0xff] }
 0x324   : > { %v1553_v21 = vmul.f32 0.5, %v1552_v20  ;;  %1918 = vmatpush.bf16.msra.mxu2 %v4645_v11 }
 0x325   : > { %v1565_v29 = vmul.f32 %v5039_v25, %v1560_v24 }
 0x326   : > { %v1554_v23 = vsub.f32 1.5, %v1553_v21 }
 0x327   : > { %v1570_v32 = vadd.f32 %v5040_v30, %v1565_v29 }
 0x328   : > { %v1555_v26 = vmul.f32 %v5061_v17, %v1554_v23  ;;  %1919 = vmatpush.bf16.msra.mxu2 %v4644_v38 }
 0x32a   : > { %v1559_v27 = vsel %vm1558_vm6, %v5061_v17, %v1555_v26 }
 0x32b   : > { %v1561_v28 = vmul.f32 %v1559_v27, %v6870_v15  ;;  %v1589_v15 = vld [vmem:[#allocation9] sm:$0x3] }
 0x32c   : > { %1920 = vmatpush.bf16.msra.mxu2 %v4643_v40  ;;  %v1591_v42 = vperm.slane %v1589_v15, 0  ;;  %v1592_v43 = vperm.slane %v1589_v15, 1 }
 0x32d   : > { %v1566_v31 = vmul.f32 %v5039_v25, %v1561_v28 }
 0x32f   : > { %v1571_v33 = vadd.f32 %v5040_v30, %v1566_v31  ;;  %v4675_v30 = vld [vmem:[#allocation23 + $0x20] sm:$0xff] }
 0x330   : > { %1921 = vmatpush.bf16.msra.mxu2 %v4642_v44 }
 0x331   : > { %v1572_v34 = vpack.c.bf16 %v1571_v33, %v1570_v32 }
 0x333   : > { %1683 = vmatmul.bf16.vlgmr.msra.gmra.mxu0 %v1572_v34  ;;  %1697 = vmatmul.bf16.vlgmr.msra.gmra.mxu1 %v1572_v34 }
 0x334   : > { %1922 = vmatpush.bf16.msra.mxu2 %v4641_v50 }
 0x338   : > { %1923 = vmatpush.bf16.msra.mxu2 %v4640_v54 }
 0x33c   : > { %1924 = vmatpush.bf16.msra.mxu2 %v4639_v60 }
 0x3b0   : > { %v1684_v46 = vpop.f32.mrf.mxu0  ;;  %v1698_v47 = vpop.f32.mrf.mxu1 }
 0x3b1   : > { %v6878_v48 = vadd.f32 %v1684_v46, %v1591_v42  ;;  %v6880_v49 = vadd.f32 %v1698_v47, %v1592_v43 }
 0x3b3   : > { %v4181_v52 = vmul.f32 -1.442695, %v6878_v48  ;;  %v4182_v53 = vmul.f32 -1.442695, %v6880_v49 }
 0x3b5   : > { %5062 = vpow2.f32 %v4181_v52 }
 0x3b6   : > { %5064 = vpow2.f32 %v4182_v53 }
 0x3b8   : > { %v1686_v56 = vpop.f32.mrf.mxu0  ;;  %v1700_v57 = vpop.f32.mrf.mxu1 }
 0x3b9   : > { %v6884_v58 = vadd.f32 %v1686_v56, %v1591_v42  ;;  %v6886_v59 = vadd.f32 %v1700_v57, %v1592_v43 }
 0x3bb   : > { %v5063_v62 = vpop.eup %5062  ;;  %v4183_v63 = vmul.f32 -1.442695, %v6884_v58  ;;  %v4184_v4 = vmul.f32 -1.442695, %v6886_v59 }
 0x3bc   : > { %v5065_v2 = vpop.eup %5064  ;;  %v1715_v3 = vadd.f32 1.0, %v5063_v62 }
 0x3bd   : > { %v1716_v5 = vadd.f32 1.0, %v5065_v2  ;;  %5066 = vpow2.f32 %v4183_v63  ;;  %v5041_v63 = vld [vmem:[#allocation12] ss:$0 sm:$0xff] }
 0x3be   : > { %5068 = vrcp.f32 %v1715_v3  ;;  %vm1724_vm8 = vweird.f32 %v1715_v3  ;;  %v1728_v24 = vand.u32 2147483647, %v1715_v3  ;;  %v1730_v25 = vand.u32 2147483648, %v1715_v3 }
 0x3bf   : > { %5070 = vrcp.f32 %v1716_v5  ;;  %vm1739_vm9 = vweird.f32 %v1716_v5  ;;  %v1743_v27 = vand.u32 2147483647, %v1716_v5  ;;  %v1745_v32 = vand.u32 2147483648, %v1716_v5 }
 0x3c0   : > { %5072 = vpow2.f32 %v4184_v4  ;;  %vm1729_vm13 = vcmp.eq.f32.partialorder %v1728_v24, 8.507059e+37  ;;  %v1731_v11 = vor.u32 1.1754944e-38, %v1730_v25  ;;  %v4677_v24 = vld [vmem:[#allocation23 + $0x30] sm:$0xff]  ;;  %v4660_v25 = vld [vmem:[#allocation17 + $0x28] sm:$0xff] }
 0x3c1   : > { %v1746_v45 = vor.u32 1.1754944e-38, %v1745_v32  ;;  %vm1744_vm3 = vcmp.eq.f32.partialorder %v1743_v27, 8.507059e+37  ;;  %v4676_v27 = vld [vmem:[#allocation23 + $0x28] sm:$0xff]  ;;  %v4666_v32 = vld [vmem:[#allocation20 + $0x18] sm:$0xff] }
 0x3c3   : > { %v5067_v6 = vpop.eup %5066 }
 0x3c4   : > { %v5069_v7 = vpop.eup %5068  ;;  %v1717_v9 = vadd.f32 1.0, %v5067_v6 }
 0x3c5   : > { %v5071_v10 = vpop.eup %5070  ;;  %v1720_v12 = vmul.f32 %v5069_v7, %v1715_v3  ;;  %vm1725_vm7 = vweird.f32 %v5069_v7 }
 0x3c6   : > { %v5073_v13 = vpop.eup %5072  ;;  %v1735_v14 = vmul.f32 %v5071_v10, %v1716_v5  ;;  %5074 = vrcp.f32 %v1717_v9  ;;  %v1760_v29 = vand.u32 2147483648, %v1717_v9  ;;  %vm6890_vm10 = vmor %vm1724_vm8, %vm1725_vm7  ;;  %vm1740_vm11 = vweird.f32 %v5071_v10 }
 0x3c7   : > { %v1721_v16 = vsub.f32 1.0, %v1720_v12  ;;  %v1718_v17 = vadd.f32 1.0, %v5073_v13  ;;  %v1758_v36 = vand.u32 2147483647, %v1717_v9  ;;  %vm1754_vm14 = vweird.f32 %v1717_v9  ;;  %vm6897_vm15 = vmor %vm1739_vm9, %vm1740_vm11 }
 0x3c8   : > { %v1736_v18 = vsub.f32 1.0, %v1735_v14  ;;  %v1761_v15 = vor.u32 1.1754944e-38, %v1760_v29  ;;  %v4667_v29 = vld [vmem:[#allocation20 + $0x20] sm:$0xff] }
 0x3c9   : > { %v1722_v19 = vmul.f32 %v5069_v7, %v1721_v16  ;;  %5076 = vrcp.f32 %v1718_v17  ;;  %v1773_v40 = vand.u32 2147483647, %v1718_v17  ;;  %v1775_v41 = vand.u32 2147483648, %v1718_v17 }
 0x3ca   : > { %v1737_v21 = vmul.f32 %v5071_v10, %v1736_v18  ;;  %vm1759_vm2 = vcmp.eq.f32.partialorder %v1758_v36, 8.507059e+37  ;;  %vm1769_vm4 = vweird.f32 %v1718_v17  ;;  %v4673_v36 = vld [vmem:[#allocation23 + $0x10] sm:$0xff] }
 0x3cb   : > { %v1723_v22 = vadd.f32 %v5069_v7, %v1722_v19  ;;  %v1776_v54 = vor.u32 1.1754944e-38, %v1775_v41  ;;  %vm1774_vm6 = vcmp.eq.f32.partialorder %v1773_v40, 8.507059e+37  ;;  %v4662_v19 = vld [vmem:[#allocation17 + $0x38] sm:$0xff]  ;;  %v4655_v41 = vld [vmem:[#allocation17] sm:$0xff] }
 0x3cc   : > { %v5075_v20 = vpop.eup %5074  ;;  %v1738_v31 = vadd.f32 %v5071_v10, %v1737_v21  ;;  %v4678_v21 = vld [vmem:[#allocation23 + $0x38] sm:$0xff]  ;;  %2070 = vmatpush.bf16.msrb.mxu0 %v4662_v19 }
 0x3cd   : > { %v1750_v23 = vmul.f32 %v5075_v20, %v1717_v9  ;;  %v1727_v34 = vsel %vm6890_vm10, %v5069_v7, %v1723_v22  ;;  %vm1755_vm12 = vweird.f32 %v5075_v20  ;;  %2234 = vmatpush.bf16.msrb.mxu2 %v4678_v21  ;;  %v4661_v22 = vld [vmem:[#allocation17 + $0x30] sm:$0xff]  ;;  %v1506_v21 = vlaneseq }
 0x3ce   : > { %v1732_v42 = vsel %vm1729_vm13, %v1731_v11, %v1727_v34  ;;  %v1742_v43 = vsel %vm6897_vm15, %v5071_v10, %v1738_v31  ;;  %vm1756_vm0 = vmor %vm1754_vm14, %vm1755_vm12  ;;  %v4658_v31 = vld [vmem:[#allocation17 + $0x18] sm:$0xff]  ;;  %v4657_v34 = vld [vmem:[#allocation17 + $0x10] sm:$0xff]  ;;  %vm2287_vm14 = vcmask 261120   ;;  %vm2310_vm15 = vcmask 130048  }
 0x3cf   : > { %v5077_v26 = vpop.eup %5076  ;;  %v1751_v28 = vsub.f32 1.0, %v1750_v23  ;;  %v1779_v51 = vmul.f32 %v1732_v42, %v6878_v48  ;;  %v1747_v52 = vsel %vm1744_vm3, %v1746_v45, %v1742_v43  ;;  %v4669_v23 = vld [vmem:[#allocation20 + $0x30] sm:$0xff]  ;;  %v4656_v11 = vld [vmem:[#allocation17 + $0x8] sm:$0xff] }
 0x3d0   : > { %v1765_v33 = vmul.f32 %v5077_v26, %v1718_v17  ;;  %vm1770_vm1 = vweird.f32 %v5077_v26  ;;  %v1780_v60 = vmul.f32 %v1747_v52, %v6880_v49  ;;  %2071 = vmatpush.bf16.msrb.mxu0 %v4661_v22  ;;  %v4663_v42 = vld [vmem:[#allocation20] sm:$0xff]  ;;  %v1507_v22 = vand.u32 127, %v1506_v21 }
 0x3d1   : > { %v1752_v35 = vmul.f32 %v5075_v20, %v1751_v28  ;;  %vm1771_vm5 = vmor %vm1769_vm4, %vm1770_vm1  ;;  %2235 = vmatpush.bf16.msrb.mxu2 %v4677_v24  ;;  %v4659_v28 = vld [vmem:[#allocation17 + $0x20] sm:$0xff]  ;;  %vm2513_vm1 = vcmask 785920  }
 0x3d2   : > { %v1766_v37 = vsub.f32 1.0, %v1765_v33  ;;  %v4674_v33 = vld [vmem:[#allocation23 + $0x18] sm:$0xff]  ;;  %v4671_v43 = vld [vmem:[#allocation23] sm:$0xff]  ;;  %v1508_v24 = vand.u32 1, %v1507_v22 }
 0x3d3   : > { %v1753_v39 = vadd.f32 %v5075_v20, %v1752_v35  ;;  %v4665_v35 = vld [vmem:[#allocation20 + $0x10] sm:$0xff] }
 0x3d4   : > { %v1767_v44 = vmul.f32 %v5077_v26, %v1766_v37  ;;  %2072 = vmatpush.bf16.msrb.mxu0 %v4660_v25  ;;  %v4664_v37 = vld [vmem:[#allocation20 + $0x8] sm:$0xff]  ;;  %vm6932_vm13 = vcmp.eq.s32.totalorder %v1508_v24, 0 }
 0x3d5   : > { %v1757_v46 = vsel %vm1756_vm0, %v5075_v20, %v1753_v39  ;;  %v4670_v20 = vld [vmem:[#allocation20 + $0x38] sm:$0xff]  ;;  %2236 = vmatpush.bf16.msrb.mxu2 %v4676_v27  ;;  %v4672_v39 = vld [vmem:[#allocation23 + $0x8] sm:$0xff]  ;;  %vm2433_vm0 = vcmask 523520  }
 0x3d6   : > { %v1762_v47 = vsel %vm1759_vm2, %v1761_v15, %v1757_v46  ;;  %v1768_v50 = vadd.f32 %v5077_v26, %v1767_v44  ;;  %2152 = vmatpush.bf16.msrb.mxu1 %v4670_v20  ;;  %vm2593_vm2 = vcmask 1048320  }
 0x3d7   : > { %v1781_v53 = vmul.f32 %v1762_v47, %v6884_v58 }
 0x3d8   : > { %v1772_v55 = vsel %vm1771_vm5, %v5077_v26, %v1768_v50  ;;  %v4668_v26 = vld [vmem:[#allocation20 + $0x28] sm:$0xff]  ;;  %2073 = vmatpush.bf16.msrb.mxu0 %v4659_v28 }
 0x3d9   : > { %v1777_v56 = vsel %vm1774_vm6, %v1776_v54, %v1772_v55  ;;  %v1783_v57 = vpack.c.bf16 %v1781_v53, %v1779_v51  ;;  %2237 = vmatpush.bf16.msrb.mxu2 %v4675_v30 }
 0x3da   : > { %v1782_v61 = vmul.f32 %v1777_v56, %v6886_v59  ;;  %2153 = vmatpush.bf16.msrb.mxu1 %v4669_v23 }
 0x3db   : > { %1925 = vmatmul.bf16.vlgmr.msra.gmra.mxu2 %v1783_v57 }
 0x3dc   : > { %v1784_v62 = vpack.c.bf16 %v1782_v61, %v1780_v60  ;;  %2074 = vmatpush.bf16.msrb.mxu0 %v4658_v31 }
 0x3dd   : > { %2238 = vmatpush.bf16.msrb.mxu2 %v4674_v33  ;;  %v1503_v33 = vld [vmem:[%s7341_s9 + $0x8] sm:$0xff] }
 0x3de   : > { %1939 = vmatmul.bf16.vlgmr.msra.gmra.mxu3 %v1784_v62  ;;  %2154 = vmatpush.bf16.msrb.mxu1 %v4668_v26 }
 0x3e0   : > { %2075 = vmatpush.bf16.msrb.mxu0 %v4657_v34  ;;  %v1505_v34 = vld [vmem:[%s7340_s26 + $0x8] sm:$0xff] }
 0x3e1   : > { %2239 = vmatpush.bf16.msrb.mxu2 %v4673_v36 }
 0x3e2   : > { %2155 = vmatpush.bf16.msrb.mxu1 %v4667_v29  ;;  %v1504_v29 = vld [vmem:[%s7340_s26] sm:$0xff] }
 0x3e4   : > { %2076 = vmatpush.bf16.msrb.mxu0 %v4656_v11 }
 0x3e5   : > { %2240 = vmatpush.bf16.msrb.mxu2 %v4672_v39 }
 0x3e6   : > { %2156 = vmatpush.bf16.msrb.mxu1 %v4666_v32  ;;  %v1502_v32 = vld [vmem:[%s7341_s9] sm:$0xff] }
 0x3e8   : > { %2077 = vmatpush.bf16.msrb.mxu0 %v4655_v41 }
 0x3e9   : > { %2241 = vmatpush.bf16.msrb.mxu2 %v4671_v43 }
 0x3ea   : > { %2157 = vmatpush.bf16.msrb.mxu1 %v4665_v35 }
 0x3ee   : > { %2158 = vmatpush.bf16.msrb.mxu1 %v4664_v37 }
 0x3f2   : > { %2159 = vmatpush.bf16.msrb.mxu1 %v4663_v42 }
 0x45e   : > { %v1926_v2 = vpop.f32.mrf.mxu2 }
 0x45f   : > { %v1927_v3 = vadd.f32 %v5041_v63, %v1926_v2  ;;  %v5042_v2 = vld [vmem:[#allocation14] ss:$0 sm:$0xff] }
 0x461   : > { %v1940_v48 = vpop.f32.mrf.mxu3 }
 0x462   : > { %v1941_v4 = vadd.f32 %v1940_v48, %v1927_v3 }
 0x464   : > { %v1945_v5 = vmul.f32 0.5, %v1941_v4 }
 0x466   : > { %v6908_v58 = vadd.f32 %v1945_v5, %v6854_v0  ;;  %v1928_v6 = vpop.f32.mrf.mxu2 }
 0x467   : > { %v1929_v7 = vadd.f32 %v5041_v63, %v1928_v6  ;;  %v5043_v6 = vld [vmem:[#allocation15] ss:$0 sm:$0xff] }
 0x468   : > { %1951 = vadd.xlane.f32.xlu2 %v6908_v58 }
 0x469   : > { %v1942_v9 = vpop.f32.mrf.mxu3 }
 0x46a   : > { %v1943_v49 = vadd.f32 %v1942_v9, %v1929_v7 }
 0x46c   : > { %v1946_v10 = vmul.f32 0.5, %v1943_v49 }
 0x46e   : > { %v6912_v59 = vadd.f32 %v1946_v10, %v6857_v1 }
 0x470   : > { %1953 = vadd.xlane.f32.xlu2 %v6912_v59 }
 0x4db   : > { %v1952_v12 = vpop.xlane.xlu2 %1951 }
 0x4dc   : > { %v1955_v13 = vmul.f32 %v1952_v12, %v6860_v8  ;;  %v5045_v12 = vld [vmem:[#allocation21] ss:$0 sm:$0xff] }
 0x4de   : > { %v6917_v14 = vsub.f32 %v6908_v58, %v1955_v13 }
 0x4e0   : > { %v1959_v0 = vmul.f32 %v6917_v14, %v6917_v14 }
 0x4e2   : > { %1961 = vadd.xlane.f32.xlu0 %v1959_v0 }
 0x4e3   : > { %v1954_v16 = vpop.xlane.xlu2 %1953 }
 0x4e4   : > { %v1956_v17 = vmul.f32 %v1954_v16, %v6860_v8  ;;  %v5044_v16 = vld [vmem:[#allocation18] ss:$0 sm:$0xff] }
 0x4e6   : > { %v6923_v18 = vsub.f32 %v6912_v59, %v1956_v17 }
 0x4e8   : > { %v1960_v1 = vmul.f32 %v6923_v18, %v6923_v18 }
 0x4ea   : > { %1963 = vadd.xlane.f32.xlu1 %v1960_v1 }
 0x555   : > { %v1962_v38 = vpop.xlane.xlu0 %1961 }
 0x556   : > { %v1965_v15 = vmul.f32 %v1962_v38, %v6860_v8 }
 0x558   : > { %v1967_v40 = vadd.f32 1e-05, %v1965_v15  ;;  %v5046_v15 = vld [vmem:[#allocation24] ss:$0 sm:$0xff] }
 0x55a   : > { %5078 = vrsqrt.f32 %v1967_v40  ;;  %vm1975_vm8 = vweird.f32 %v1967_v40 }
 0x55d   : > { %v1964_v44 = vpop.xlane.xlu1 %1963 }
 0x55e   : > { %v1966_v45 = vmul.f32 %v1964_v44, %v6860_v8 }
 0x560   : > { %v5079_v46 = vpop.eup %5078  ;;  %v1968_v47 = vadd.f32 1e-05, %v1966_v45 }
 0x561   : > { %v1970_v50 = vmul.f32 %v5079_v46, %v1967_v40  ;;  %vm1976_vm7 = vweird.f32 %v5079_v46 }
 0x562   : > { %5080 = vrsqrt.f32 %v1968_v47  ;;  %vm1977_vm9 = vmor %vm1975_vm8, %vm1976_vm7  ;;  %vm1985_vm11 = vweird.f32 %v1968_v47 }
 0x563   : > { %v1971_v51 = vmul.f32 %v5079_v46, %v1970_v50 }
 0x565   : > { %v1972_v52 = vmul.f32 0.5, %v1971_v51 }
 0x567   : > { %v1973_v53 = vsub.f32 1.5, %v1972_v52 }
 0x568   : > { %v5081_v54 = vpop.eup %5080 }
 0x569   : > { %v1974_v55 = vmul.f32 %v5079_v46, %v1973_v53  ;;  %v1980_v56 = vmul.f32 %v5081_v54, %v1968_v47  ;;  %vm1986_vm10 = vweird.f32 %v5081_v54 }
 0x56a   : > { %vm1987_vm12 = vmor %vm1985_vm11, %vm1986_vm10 }
 0x56b   : > { %v1981_v57 = vmul.f32 %v5081_v54, %v1980_v56  ;;  %v1978_v60 = vsel %vm1977_vm9, %v5079_v46, %v1974_v55 }
 0x56c   : > { %v1989_v63 = vmul.f32 %v1978_v60, %v6917_v14 }
 0x56d   : > { %v1982_v61 = vmul.f32 0.5, %v1981_v57 }
 0x56e   : > { %v1994_v5 = vmul.f32 %v5042_v2, %v1989_v63 }
 0x56f   : > { %v1983_v62 = vsub.f32 1.5, %v1982_v61 }
 0x570   : > { %v1999_v9 = vadd.f32 %v5043_v6, %v1994_v5 }
 0x571   : > { %v1984_v3 = vmul.f32 %v5081_v54, %v1983_v62 }
 0x573   : > { %v1988_v48 = vsel %vm1987_vm12, %v5081_v54, %v1984_v3 }
 0x574   : > { %v1990_v4 = vmul.f32 %v1988_v48, %v6923_v18 }
 0x576   : > { %v1995_v7 = vmul.f32 %v5042_v2, %v1990_v4 }
 0x578   : > { %v2000_v49 = vadd.f32 %v5043_v6, %v1995_v7 }
 0x57a   : > { %v2001_v10 = vpack.c.bf16 %v2000_v49, %v1999_v9 }
 0x57c   : > { %2078 = vmatmul.bf16.vlgmr.msrb.gmra.mxu0 %v2001_v10  ;;  %2160 = vmatmul.bf16.vlgmr.msrb.gmra.mxu1 %v2001_v10 }
 0x57d   : > { %2242 = vmatmul.bf16.vlgmr.msrb.gmra.mxu2 %v2001_v10 }
 0x5f9   : > { %v2161_v13 = vpop.f32.mrf.mxu1  ;;  %v2079_v14 = vpop.f32.mrf.mxu0 }
 0x5fa   : > { %v2162_v0 = vadd.f32 %v5045_v12, %v2161_v13  ;;  %v2080_v1 = vadd.f32 %v5044_v16, %v2079_v14 }
 0x5fc   : > { %2270 = vrot.lane.b32.xlu1 %v2162_v0, %s6191_s0  ;;  %2266 = vrot.lane.b32.xlu2 %v2162_v0, %s6192_s16  ;;  %v2274_v39 = vmul.f32 %v2162_v0, %v1502_v32  ;;  %v2256_v62 = vmul.f32 %v2080_v1, %v1502_v32 }
 0x600   : > { %v2243_v25 = vpop.f32.mrf.mxu2 }
 0x601   : > { %v2163_v17 = vpop.f32.mrf.mxu1  ;;  %v2081_v19 = vpop.f32.mrf.mxu0  ;;  %v2244_v45 = vadd.f32 %v5046_v15, %v2243_v25 }
 0x602   : > { %v2164_v18 = vadd.f32 %v5045_v12, %v2163_v17  ;;  %v2082_v20 = vadd.f32 %v5044_v16, %v2081_v19 }
 0x604   : > { %2268 = vrot.lane.b32.xlu0 %v2164_v18, %s6192_s16  ;;  %2272 = vrot.lane.b32.xlu2 %v2164_v18, %s6191_s0  ;;  %v2275_v40 = vmul.f32 %v2164_v18, %v1503_v33  ;;  %v2257_v63 = vmul.f32 %v2082_v20, %v1503_v33 }
 0x605   : > { %2252 = vrot.lane.b32.xlu1 %v2080_v1, %s6191_s0 }
 0x608   : > { %v2245_v37 = vpop.f32.mrf.mxu2 }
 0x609   : > { %v2246_v42 = vadd.f32 %v5046_v15, %v2245_v37 }
 0x60b   : > { %v6944_v51 = vpack.c.bf16 %v2246_v42, %v2244_v45 }
 0x60c   : > { %2250 = vrot.lane.b32.xlu2 %v2082_v20, %s6192_s16  ;;  %2248 = vrot.lane.b32.xlu0 %v2080_v1, %s6192_s16 }
 0x614   : > { %2254 = vrot.lane.b32.xlu0 %v2082_v20, %s6191_s0  ;;  %s1493_s0 = scalar_lea.vmem [#allocation50], %s4114_s1  ;;  %s6014_s1 = scalar_lea.hbm %s6376_s17, 32 }
 0x656   : > { %v2267_v23 = vpop.permute.xlu2 %2266 }
 0x657   : > { %v2276_v28 = vsub.f32 0.0, %v2267_v23 }
 0x65e   : > { %v2273_v36 = vpop.permute.xlu2 %2272 }
 0x666   : > { %v2251_v53 = vpop.permute.xlu2 %2250 }
 0x667   : > { %v2259_v56 = vsub.f32 0.0, %v2251_v53 }
 0x66e   : > { %v2271_v27 = vpop.permute.xlu1 %2270 }
 0x66f   : > { %v2278_v30 = vsel %vm6932_vm13, %v2276_v28, %v2271_v27 }
 0x670   : > { %v2280_v11 = vmul.f32 %v2278_v30, %v1504_v29 }
 0x672   : > { %v2282_v43 = vadd.f32 %v2280_v11, %v2274_v39 }
 0x676   : > { %v2269_v31 = vpop.permute.xlu0 %2268 }
 0x677   : > { %v2277_v35 = vsub.f32 0.0, %v2269_v31  ;;  %v2253_v54 = vpop.permute.xlu1 %2252 }
 0x679   : > { %v2279_v38 = vsel %vm6932_vm13, %v2277_v35, %v2273_v36 }
 0x67a   : > { %v2281_v41 = vmul.f32 %v2279_v38, %v1505_v34 }
 0x67c   : > { %v2283_v44 = vadd.f32 %v2281_v41, %v2275_v40 }
 0x67e   : > { %v2249_v46 = vpop.permute.xlu0 %2248  ;;  %v2285_v47 = vpack.c.bf16 %v2283_v44, %v2282_v43 }
 0x67f   : > { %v2258_v50 = vsub.f32 0.0, %v2249_v46 }
 0x680   : > { %2357 = vrot.lane.b32.xlu2 %v2285_v47, %s6193_s8  ;;  %2438 = vrot.lane.b32.xlu1 %v2285_v47, %s6194_s2  ;;  %v2292_v52 = vsel %vm2287_vm14, %v2285_v47, 0 }
 0x681   : > { %2301 = vmatpush.bf16.xpose.msrb.mxu3 %v2292_v52  ;;  %v2260_v55 = vsel %vm6932_vm13, %v2258_v50, %v2253_v54 }
 0x682   : > { %v2262_v57 = vmul.f32 %v2260_v55, %v1504_v29 }
 0x684   : > { %v2264_v3 = vadd.f32 %v2262_v57, %v2256_v62 }
 0x686   : > { %v2255_v60 = vpop.permute.xlu0 %2254 }
 0x687   : > { %v2261_v61 = vsel %vm6932_vm13, %v2259_v56, %v2255_v60 }
 0x688   : > { %v2263_v2 = vmul.f32 %v2261_v61, %v1505_v34  ;;  %2518 = vrot.lane.b32.xlu1 %v2285_v47, %s6195_s3 }
 0x689   : > { %2344 = vmatpush.bf16.msra.mxu3 %v6944_v51 }
 0x68a   : > { %v2265_v48 = vadd.f32 %v2263_v2, %v2257_v63 }
 0x68c   : > { %v2284_v4 = vpack.c.bf16 %v2265_v48, %v2264_v3 }
 0x68e   : > { %2436 = vrot.lane.b32.xlu2 %v2284_v4, %s6194_s2  ;;  %2354 = vrot.lane.b32.xlu0 %v2284_v4, %s6193_s8 }
 0x68f   : > { %4345 = vmatmul.msk.bf16.vlgmr.msrb.gmra.mxu3 %vm2287_vm14, %v2284_v4 }
 0x696   : > { %2516 = vrot.lane.b32.xlu0 %v2284_v4, %s6195_s3 }
 0x6da   : > { %v2358_v5 = vpop.permute.xlu2 %2357 }
 0x6db   : > { %v2363_v6 = vsel %vm2287_vm14, %v2358_v5, 0 }
 0x6dc   : > { %2372 = vmatpush.bf16.xpose.msra.mxu0 %v2363_v6 }
 0x6e8   : > { %v2437_v49 = vpop.permute.xlu2 %2436 }
 0x6f2   : > { %v2439_v7 = vpop.permute.xlu1 %2438 }
 0x6f3   : > { %v2444_v9 = vsel %vm2287_vm14, %v2439_v7, 0 }
 0x6f4   : > { %2453 = vmatpush.bf16.xpose.msra.mxu2 %v2444_v9 }
 0x6fa   : > { %v2519_v10 = vpop.permute.xlu1 %2518 }
 0x6fb   : > { %v2524_v12 = vsel %vm2287_vm14, %v2519_v10, 0  ;;  %4349 = vmatmul.msk.bf16.vlgmr.msra.gmra.mxu2 %vm2287_vm14, %v2437_v49 }
 0x6fc   : > { %2533 = vmatpush.bf16.xpose.msrb.mxu0 %v2524_v12 }
 0x700   : > { %v2355_v13 = vpop.permute.xlu0 %2354 }
 0x701   : > { %4347 = vmatmul.msk.bf16.vlgmr.msra.gmra.mxu0 %vm2287_vm14, %v2355_v13 }
 0x708   : > { %v2517_v0 = vpop.permute.xlu0 %2516 }
 0x711   : > { %4351 = vmatmul.msk.bf16.vlgmr.msrb.gmra.mxu0 %vm2287_vm14, %v2517_v0 }
 0x712   : > { %v2303_v14 = vpop.f32.mrf.mxu3 }
 0x713   : > { %v2308_v16 = vmul.f32 0.17677669, %v2303_v14 }
 0x715   : > { %v2311_v17 = vsel %vm2310_vm15, %v2308_v16, -inf }
 0x716   : > { %2312 = vmax.xlane.f32.xlu2 %v2311_v17 }
 0x71a   : > { %v2305_v18 = vpop.f32.mrf.mxu3 }
 0x71b   : > { %v2309_v1 = vmul.f32 0.17677669, %v2305_v18 }
 0x71d   : > { %v2314_v19 = vsel %vm2310_vm15, %v2309_v1, -inf }
 0x71e   : > { %2315 = vmax.xlane.f32.xlu1 %v2314_v19 }
 0x77e   : > { %v2374_v20 = vpop.f32.mrf.mxu0  ;;  %v2455_v22 = vpop.f32.mrf.mxu2 }
 0x77f   : > { %v2379_v23 = vmul.f32 0.17677669, %v2374_v20  ;;  %v2460_v24 = vmul.f32 0.17677669, %v2455_v22 }
 0x781   : > { %v2381_v25 = vsel %vm2310_vm15, %v2379_v23, -inf  ;;  %v2462_v26 = vsel %vm2310_vm15, %v2460_v24, -inf }
 0x782   : > { %2382 = vmax.xlane.f32.xlu0 %v2381_v25  ;;  %2463 = vmax.xlane.f32.xlu1 %v2462_v26 }
 0x786   : > { %v2376_v27 = vpop.f32.mrf.mxu0  ;;  %v2457_v28 = vpop.f32.mrf.mxu2 }
 0x787   : > { %v2380_v29 = vmul.f32 0.17677669, %v2376_v27  ;;  %v2461_v30 = vmul.f32 0.17677669, %v2457_v28 }
 0x789   : > { %v2313_v31 = vpop.xlane.xlu2 %2312  ;;  %v2465_v32 = vsel %vm2310_vm15, %v2461_v30, -inf  ;;  %v2384_v33 = vsel %vm2310_vm15, %v2380_v29, -inf }
 0x78a   : > { %v2317_v34 = vsub.f32 %v2308_v16, %v2313_v31  ;;  %2466 = vmax.xlane.f32.xlu0 %v2465_v32  ;;  %2385 = vmax.xlane.f32.xlu2 %v2384_v33 }
 0x78c   : > { %v2319_v35 = vmul.f32 1.442695, %v2317_v34 }
 0x78e   : > { %5082 = vpow2.f32 %v2319_v35  ;;  %v2535_v36 = vpop.f32.mrf.mxu0 }
 0x78f   : > { %v2540_v11 = vmul.f32 0.17677669, %v2535_v36 }
 0x791   : > { %v2316_v37 = vpop.xlane.xlu1 %2315  ;;  %v2542_v38 = vsel %vm2310_vm15, %v2540_v11, -inf }
 0x792   : > { %v2318_v39 = vsub.f32 %v2309_v1, %v2316_v37  ;;  %2543 = vmax.xlane.f32.xlu2 %v2542_v38 }
 0x794   : > { %v5083_v15 = vpop.eup %5082  ;;  %v2321_v40 = vmul.f32 1.442695, %v2318_v39 }
 0x795   : > { %v2323_v41 = vsel %vm2310_vm15, %v5083_v15, 0.0 }
 0x796   : > { %5084 = vpow2.f32 %v2321_v40  ;;  %2324 = vadd.xlane.f32.xlu0 %v2323_v41  ;;  %v2537_v42 = vpop.f32.mrf.mxu0 }
 0x797   : > { %v2541_v43 = vmul.f32 0.17677669, %v2537_v42 }
 0x799   : > { %v2545_v44 = vsel %vm2310_vm15, %v2541_v43, -inf }
 0x79a   : > { %2546 = vmax.xlane.f32.xlu1 %v2545_v44 }
 0x79c   : > { %v5085_v45 = vpop.eup %5084 }
 0x79d   : > { %v2326_v46 = vsel %vm2310_vm15, %v5085_v45, 0.0 }
 0x79e   : > { %2327 = vadd.xlane.f32.xlu2 %v2326_v46 }
 0x7b6   : > { %2405 = vrot.lane.b32.xlu2 %v6944_v51, %s6193_s8 }
 0x7f5   : > { %v2383_v47 = vpop.xlane.xlu0 %2382  ;;  %v2464_v50 = vpop.xlane.xlu1 %2463 }
 0x7f6   : > { %v2387_v52 = vsub.f32 %v2379_v23, %v2383_v47  ;;  %v2468_v54 = vsub.f32 %v2460_v24, %v2464_v50 }
 0x7f8   : > { %v2389_v53 = vmul.f32 1.442695, %v2387_v52  ;;  %v2470_v55 = vmul.f32 1.442695, %v2468_v54 }
 0x7fa   : > { %5086 = vpow2.f32 %v2389_v53 }
 0x7fb   : > { %5088 = vpow2.f32 %v2470_v55 }
 0x7fd   : > { %v2386_v56 = vpop.xlane.xlu2 %2385  ;;  %v2467_v57 = vpop.xlane.xlu0 %2466 }
 0x7fe   : > { %v2388_v60 = vsub.f32 %v2380_v29, %v2386_v56  ;;  %v2469_v63 = vsub.f32 %v2461_v30, %v2467_v57 }
 0x800   : > { %v5087_v61 = vpop.eup %5086  ;;  %v2391_v62 = vmul.f32 1.442695, %v2388_v60  ;;  %v2472_v3 = vmul.f32 1.442695, %v2469_v63  ;;  %v4685_v63 = vld [vmem:[#allocation26 + $0x30] sm:$0xff] }
 0x801   : > { %v2393_v2 = vsel %vm2310_vm15, %v5087_v61, 0.0  ;;  %v5089_v4 = vpop.eup %5088 }
 0x802   : > { %2394 = vadd.xlane.f32.xlu1 %v2393_v2  ;;  %5090 = vpow2.f32 %v2391_v62  ;;  %v2474_v9 = vsel %vm2310_vm15, %v5089_v4, 0.0  ;;  %v4686_v62 = vld [vmem:[#allocation26 + $0x38] sm:$0xff] }
 0x803   : > { %5092 = vpow2.f32 %v2472_v3  ;;  %2663 = vmatpush.bf16.msrb.mxu2 %v4686_v62  ;;  %v4684_v3 = vld [vmem:[#allocation26 + $0x28] sm:$0xff] }
 0x805   : > { %v2544_v48 = vpop.xlane.xlu2 %2543 }
 0x806   : > { %v2548_v5 = vsub.f32 %v2540_v11, %v2544_v48  ;;  %v4683_v48 = vld [vmem:[#allocation26 + $0x20] sm:$0xff] }
 0x807   : > { %2664 = vmatpush.bf16.msrb.mxu2 %v4685_v63 }
 0x808   : > { %v2550_v6 = vmul.f32 1.442695, %v2548_v5  ;;  %v5091_v7 = vpop.eup %5090 }
 0x809   : > { %v2396_v49 = vsel %vm2310_vm15, %v5091_v7, 0.0  ;;  %v2325_v12 = vpop.xlane.xlu0 %2324  ;;  %v5093_v0 = vpop.eup %5092 }
 0x80a   : > { %5094 = vpow2.f32 %v2550_v6  ;;  %2475 = vadd.xlane.f32.xlu1 %v2474_v9  ;;  %2397 = vadd.xlane.f32.xlu0 %v2396_v49  ;;  %v2477_v1 = vsel %vm2310_vm15, %v5093_v0, 0.0  ;;  %v4681_v6 = vld [vmem:[#allocation26 + $0x10] sm:$0xff]  ;;  %v4679_v9 = vld [vmem:[#allocation26] sm:$0xff] }
 0x80b   : > { %5096 = vrcp.f32 %v2325_v12  ;;  %2665 = vmatpush.bf16.msrb.mxu2 %v4684_v3  ;;  %v4694_v49 = vld [vmem:[#allocation29 + $0x38] sm:$0xff]  ;;  %v4693_v12 = vld [vmem:[#allocation29 + $0x30] sm:$0xff] }
 0x80d   : > { %v2547_v10 = vpop.xlane.xlu1 %2546 }
 0x80e   : > { %v2549_v13 = vsub.f32 %v2541_v43, %v2547_v10  ;;  %v4702_v10 = vld [vmem:[#allocation30 + $0x38] sm:$0xff] }
 0x80f   : > { %2666 = vmatpush.bf16.msrb.mxu2 %v4683_v48  ;;  %2828 = vmatpush.bf16.msra.mxu0 %v4702_v10 }
 0x810   : > { %v5095_v14 = vpop.eup %5094  ;;  %v2552_v16 = vmul.f32 1.442695, %v2549_v13  ;;  %v4701_v13 = vld [vmem:[#allocation30 + $0x30] sm:$0xff] }
 0x811   : > { %v2328_v17 = vpop.xlane.xlu2 %2327  ;;  %v2554_v18 = vsel %vm2310_vm15, %v5095_v14, 0.0  ;;  %v5097_v19 = vpop.eup %5096 }
 0x812   : > { %5098 = vpow2.f32 %v2552_v16  ;;  %2555 = vadd.xlane.f32.xlu1 %v2554_v18  ;;  %2478 = vadd.xlane.f32.xlu0 %v2477_v1  ;;  %v2331_v25 = vmul.f32 %v5097_v19, %v5083_v15  ;;  %v4699_v18 = vld [vmem:[#allocation30 + $0x20] sm:$0xff] }
 0x813   : > { %5100 = vrcp.f32 %v2328_v17  ;;  %2829 = vmatpush.bf16.msra.mxu0 %v4701_v13  ;;  %v4691_v17 = vld [vmem:[#allocation29 + $0x20] sm:$0xff] }
 0x818   : > { %v5099_v20 = vpop.eup %5098 }
 0x819   : > { %v5101_v22 = vpop.eup %5100  ;;  %v2406_v23 = vpop.permute.xlu2 %2405  ;;  %v2557_v24 = vsel %vm2310_vm15, %v5099_v20, 0.0 }
 0x81a   : > { %v2332_v26 = vmul.f32 %v5101_v22, %v5085_v45  ;;  %2418 = vmatpush.bf16.msra.mxu1 %v2406_v23  ;;  %2558 = vadd.xlane.f32.xlu0 %v2557_v24  ;;  %v4690_v24 = vld [vmem:[#allocation29 + $0x18] sm:$0xff] }
 0x81c   : > { %v2333_v27 = vpack.c.bf16 %v2332_v26, %v2331_v25  ;;  %v4698_v25 = vld [vmem:[#allocation30 + $0x18] sm:$0xff]  ;;  %v4689_v26 = vld [vmem:[#allocation29 + $0x10] sm:$0xff] }
 0x81e   : > { %4346 = vmatmul.msk.bf16.vlgmr.msra.gmra.mxu3 %vm2310_vm15, %v2333_v27  ;;  %v4697_v27 = vld [vmem:[#allocation30 + $0x10] sm:$0xff] }
 0x82b   : > { %2485 = vrot.lane.b32.xlu1 %v6944_v51, %s6194_s2 }
 0x82e   : > { %2565 = vrot.lane.b32.xlu0 %v6944_v51, %s6195_s3 }
 0x875   : > { %v2395_v28 = vpop.xlane.xlu1 %2394 }
 0x876   : > { %5102 = vrcp.f32 %v2395_v28  ;;  %v4688_v28 = vld [vmem:[#allocation29 + $0x8] sm:$0xff] }
 0x87c   : > { %v5103_v30 = vpop.eup %5102 }
 0x87d   : > { %v2398_v29 = vpop.xlane.xlu0 %2397  ;;  %v2401_v32 = vmul.f32 %v5103_v30, %v5087_v61  ;;  %v2476_v36 = vpop.xlane.xlu1 %2475  ;;  %v4687_v30 = vld [vmem:[#allocation29] sm:$0xff] }
 0x87e   : > { %5104 = vrcp.f32 %v2398_v29  ;;  %v4696_v29 = vld [vmem:[#allocation30 + $0x8] sm:$0xff] }
 0x884   : > { %v5105_v31 = vpop.eup %5104 }
 0x885   : > { %v2402_v33 = vmul.f32 %v5105_v31, %v5091_v7  ;;  %v2479_v35 = vpop.xlane.xlu0 %2478  ;;  %v2556_v37 = vpop.xlane.xlu1 %2555  ;;  %v4680_v7 = vld [vmem:[#allocation26 + $0x8] sm:$0xff] }
 0x886   : > { %5106 = vrcp.f32 %v2479_v35  ;;  %v4695_v31 = vld [vmem:[#allocation30] sm:$0xff] }
 0x887   : > { %v2403_v34 = vpack.c.bf16 %v2402_v33, %v2401_v32  ;;  %5108 = vrcp.f32 %v2476_v36 }
 0x889   : > { %4348 = vmatmul.msk.bf16.vlgmr.msra.gmra.mxu1 %vm2310_vm15, %v2403_v34  ;;  %v5047_v34 = vld [vmem:[#allocation27] ss:$0 sm:$0xff] }
 0x88c   : > { %v5107_v38 = vpop.eup %5106 }
 0x88d   : > { %v2559_v11 = vpop.xlane.xlu0 %2558  ;;  %v5109_v51 = vpop.eup %5108  ;;  %v2483_v39 = vmul.f32 %v5107_v38, %v5093_v0  ;;  %v4692_v0 = vld [vmem:[#allocation29 + $0x28] sm:$0xff] }
 0x88e   : > { %5110 = vrcp.f32 %v2559_v11  ;;  %v2482_v40 = vmul.f32 %v5109_v51, %v5089_v4  ;;  %v4682_v4 = vld [vmem:[#allocation26 + $0x18] sm:$0xff] }
 0x88f   : > { %5112 = vrcp.f32 %v2556_v37  ;;  %2667 = vmatpush.bf16.msrb.mxu2 %v4682_v4 }
 0x890   : > { %v2484_v43 = vpack.c.bf16 %v2483_v39, %v2482_v40 }
 0x893   : > { %2668 = vmatpush.bf16.msrb.mxu2 %v4681_v6 }
 0x894   : > { %v5111_v15 = vpop.eup %5110 }
 0x895   : > { %v5113_v42 = vpop.eup %5112  ;;  %v2563_v44 = vmul.f32 %v5111_v15, %v5099_v20  ;;  %v4710_v15 = vld [vmem:[#allocation36 + $0x38] sm:$0xff] }
 0x896   : > { %v2562_v45 = vmul.f32 %v5113_v42, %v5095_v14  ;;  %v4700_v14 = vld [vmem:[#allocation30 + $0x28] sm:$0xff]  ;;  %v4709_v42 = vld [vmem:[#allocation36 + $0x30] sm:$0xff] }
 0x897   : > { %2669 = vmatpush.bf16.msrb.mxu2 %v4680_v7  ;;  %2830 = vmatpush.bf16.msra.mxu0 %v4700_v14 }
 0x898   : > { %v2564_v50 = vpack.c.bf16 %v2563_v44, %v2562_v45  ;;  %v4707_v45 = vld [vmem:[#allocation36 + $0x20] sm:$0xff] }
 0x89b   : > { %2670 = vmatpush.bf16.msrb.mxu2 %v4679_v9  ;;  %2831 = vmatpush.bf16.msra.mxu0 %v4699_v18 }
 0x89d   : > { %v2486_v41 = vpop.permute.xlu1 %2485 }
 0x89e   : > { %2498 = vmatpush.bf16.msrb.mxu3 %v2486_v41 }
 0x89f   : > { %2832 = vmatpush.bf16.msra.mxu0 %v4698_v25 }
 0x8a0   : > { %v2566_v47 = vpop.permute.xlu0 %2565 }
 0x8a1   : > { %v2346_v46 = vpop.f32.mrf.mxu3  ;;  %4350 = vmatmul.msk.bf16.vlgmr.msrb.gmra.mxu3 %vm2310_vm15, %v2484_v43  ;;  %2578 = vmatpush.bf16.msrb.mxu1 %v2566_v47 }
 0x8a2   : > { %2351 = vst.msk [vmem:[#allocation2] sm:$0xff] %vm2287_vm14, %v2346_v46  ;;  %2750 = vmatpush.bf16.msra.mxu3 %v4694_v49  ;;  %v4704_v49 = vld [vmem:[#allocation36 + $0x8] sm:$0xff] }
 0x8a3   : > { %2833 = vmatpush.bf16.msra.mxu0 %v4697_v27 }
 0x8a4   : > { %4352 = vmatmul.msk.bf16.vlgmr.msrb.gmra.mxu1 %vm2310_vm15, %v2564_v50 }
 0x8a5   : > { %3149 = vmatpush.bf16.msra.mxu1 %v4710_v15 }
 0x8a6   : > { %2751 = vmatpush.bf16.msra.mxu3 %v4693_v12 }
 0x8a7   : > { %2834 = vmatpush.bf16.msra.mxu0 %v4696_v29 }
 0x8a9   : > { %v2348_v52 = vpop.f32.mrf.mxu3  ;;  %3150 = vmatpush.bf16.msra.mxu1 %v4709_v42 }
 0x8aa   : > { %2352 = vst.msk [vmem:[#allocation2 + $0x8] sm:$0xff] %vm2287_vm14, %v2348_v52  ;;  %2752 = vmatpush.bf16.msra.mxu3 %v4692_v0 }
 0x8ab   : > { %2835 = vmatpush.bf16.msra.mxu0 %v4695_v31 }
 0x8ae   : > { %2753 = vmatpush.bf16.msra.mxu3 %v4691_v17 }
 0x8b2   : > { %2754 = vmatpush.bf16.msra.mxu3 %v4690_v24 }
 0x8b6   : > { %2755 = vmatpush.bf16.msra.mxu3 %v4689_v26 }
 0x8ba   : > { %2756 = vmatpush.bf16.msra.mxu3 %v4688_v28 }
 0x8be   : > { %2757 = vmatpush.bf16.msra.mxu3 %v4687_v30 }
 0x906   : > { %v2420_v53 = vpop.f32.mrf.mxu1 }
 0x907   : > { %2427 = vrot.lane.b32.xlu2 %v2420_v53, %s6195_s3  ;;  %v4706_v53 = vld [vmem:[#allocation36 + $0x18] sm:$0xff] }
 0x90e   : > { %v2422_v54 = vpop.f32.mrf.mxu1 }
 0x90f   : > { %2429 = vrot.lane.b32.xlu2 %v2422_v54, %s6195_s3 }
 0x921   : > { %v2580_v55 = vpop.f32.mrf.mxu1 }
 0x922   : > { %2587 = vrot.lane.b32.xlu1 %v2580_v55, %s6193_s8  ;;  %v7010_v55 = vshrl.u32 %v1506_v21, 7 }
 0x924   : > { %v2500_v56 = vpop.f32.mrf.mxu3  ;;  %v7019_v4 = vadd.s32 4294967293, %v7010_v55  ;;  %v7025_v6 = vadd.s32 4294967294, %v7010_v55  ;;  %v7028_v10 = vadd.s32 4294967295, %v7010_v55  ;;  %vm2885_vm7 = vcmp.lt.s32.totalorder %v7010_v55, 3 }
 0x925   : > { %2507 = vrot.lane.b32.xlu2 %v2500_v56, %s6194_s2  ;;  %vm2905_vm8 = vcmp.lt.s32.totalorder %v7010_v55, 2  ;;  %vm2925_vm12 = vcmp.lt.s32.totalorder %v7010_v55, 1 }
 0x926   : > { %vm2890_vm10 = vcmp.ge.s32.totalorder %v7019_v4, 0  ;;  %vm2910_vm11 = vcmp.ge.s32.totalorder %v7025_v6, 0  ;;  %vm2930_vm14 = vcmp.ge.s32.totalorder %v7028_v10, 0 }
 0x929   : > { %v2582_v57 = vpop.f32.mrf.mxu1 }
 0x92c   : > { %v2502_v60 = vpop.f32.mrf.mxu3 }
 0x92d   : > { %2589 = vrot.lane.b32.xlu2 %v2582_v57, %s6193_s8  ;;  %2509 = vrot.lane.b32.xlu0 %v2502_v60, %s6194_s2  ;;  %v4705_v60 = vld [vmem:[#allocation36 + $0x10] sm:$0xff]  ;;  %s3663_s8 = sshll.u32 %s1493_s0, 4  ;;  %s3665_s2 = sshll.u32 %s3662_s5, 4  ;;  %s3664_s8 = int_to_ptr.vmem [resolvable:$true] %s3663_s8  ;;  %s3666_s2 = int_to_ptr.hbm [resolvable:$true] %s3665_s2 }
 0x92e   : > { %s6008_s3 = sshra.s32 %s3666_s2, 4  ;;  %s6009_s3 = int_to_ptr.hbm [resolvable:$true] %s6008_s3 }
 0x92f   : > { %p6015_p0 = scmp.lt.s32.totalorder %s6009_s3, %s6376_s17 }
 0x961   : > { %v2428_v61 = vpop.permute.xlu2 %2427 }
 0x962   : > { %2434 = vst.msk [vmem:[#allocation2] sm:$0xff] %vm2433_vm0, %v2428_v61 }
 0x969   : > { %v2430_v2 = vpop.permute.xlu2 %2429 }
 0x96a   : > { %2435 = vst.msk [vmem:[#allocation2 + $0x8] sm:$0xff] %vm2433_vm0, %v2430_v2  ;;  %v7012_v2 = vld [vmem:[#allocation32] sm:$0xff]  ;;  %vm2950_vm0 = vcmp.lt.s32.totalorder %v7010_v55, 7 }
 0x96b   : > { %v2943_v12 = vperm.slane %v7012_v2, 3  ;;  %v2898_v0 = vperm.slane %v7012_v2, 0  ;;  %v2918_v18 = vperm.slane %v7012_v2, 1  ;;  %v2963_v28 = vperm.slane %v7012_v2, 4 }
 0x96c   : > { %v2983_v31 = vperm.slane %v7012_v2, 5 }
 0x97f   : > { %v2508_v5 = vpop.permute.xlu2 %2507 }
 0x980   : > { %2514 = vst.msk [vmem:[#allocation2] sm:$0xff] %vm2513_vm1, %v2508_v5  ;;  %v1512_v5 = vadd.s32 8, %v7010_v55 }
 0x982   : > { %v7046_v26 = vadd.s32 3, %v1512_v5 }
 0x987   : > { %v2590_v19 = vpop.permute.xlu2 %2589 }
 0x994   : > { %v2588_v16 = vpop.permute.xlu1 %2587 }
 0x995   : > { %2594 = vst.msk [vmem:[#allocation2] sm:$0xff] %vm2593_vm2, %v2588_v16 }
 0x99c   : > { %v2596_v20 = vld [vmem:[#allocation2] sm:$0xff] }
 0x99f   : > { %v2510_v1 = vpop.permute.xlu0 %2509 }
 0x9a0   : > { %2515 = vst.msk [vmem:[#allocation2 + $0x8] sm:$0xff] %vm2513_vm1, %v2510_v1  ;;  %v7038_v1 = vadd.s32 1, %v1512_v5 }
 0x9a1   : > { %2595 = vst.msk [vmem:[#allocation2 + $0x8] sm:$0xff] %vm2593_vm2, %v2590_v19  ;;  %vm2970_vm2 = vcmp.lt.s32.totalorder %v7010_v55, 6 }
 0x9a8   : > { %v2597_v22 = vld [vmem:[#allocation2 + $0x8] sm:$0xff] }
 0x9a9   : > { %v2598_v23 = vpack.c.bf16 %v2597_v22, %v2596_v20  ;;  %v4703_v20 = vld [vmem:[#allocation36] sm:$0xff]  ;;  %v2938_v22 = vperm.slane %v7012_v2, 2 }
 0x9ab   : > { %2671 = vmatmul.bf16.vlgmr.msrb.gmra.mxu2 %v2598_v23  ;;  %v2974_v23 = vadd.s32 2, %v1512_v5 }
 0xa2e   : > { %v2672_v32 = vpop.f32.mrf.mxu2 }
 0xa2f   : > { %v2677_v33 = vadd.f32 %v2672_v32, %v6908_v58  ;;  %v7052_v32 = vadd.s32 4, %v1512_v5 }
 0xa31   : > { %v7003_v11 = vadd.f32 %v5047_v34, %v2677_v33 }
 0xa36   : > { %v2674_v35 = vpop.f32.mrf.mxu2 }
 0xa37   : > { %v2678_v36 = vadd.f32 %v2674_v35, %v6912_v59  ;;  %v4708_v59 = vld [vmem:[#allocation36 + $0x28] sm:$0xff] }
 0xa38   : > { %3151 = vmatpush.bf16.msra.mxu1 %v4708_v59 }
 0xa39   : > { %v7005_v37 = vadd.f32 %v5047_v34, %v2678_v36  ;;  %v3003_v34 = vperm.slane %v7012_v2, 6 }
 0xa3b   : > { %v2685_v38 = vpack.c.bf16 %v7005_v37, %v7003_v11 }
 0xa3c   : > { %3152 = vmatpush.bf16.msra.mxu1 %v4707_v45 }
 0xa3d   : > { %2758 = vmatmul.bf16.vlgmr.msra.gmra.mxu3 %v2685_v38  ;;  %2836 = vmatmul.bf16.vlgmr.msra.gmra.mxu0 %v2685_v38 }
 0xa40   : > { %3153 = vmatpush.bf16.msra.mxu1 %v4706_v53 }
 0xa44   : > { %3154 = vmatpush.bf16.msra.mxu1 %v4705_v60 }
 0xa48   : > { %3155 = vmatpush.bf16.msra.mxu1 %v4704_v49 }
 0xa4c   : > { %3156 = vmatpush.bf16.msra.mxu1 %v4703_v20 }
 0xaba   : > { %v2837_v51 = vpop.f32.mrf.mxu0 }
 0xabb   : > { %v4449_v39 = vmul.f32 -1.442695, %v2837_v51 }
 0xabd   : > { %5114 = vpow2.f32 %v4449_v39 }
 0xac0   : > { %v2759_v62 = vpop.f32.mrf.mxu3 }
 0xac2   : > { %v2839_v40 = vpop.f32.mrf.mxu0 }
 0xac3   : > { %v5115_v41 = vpop.eup %5114  ;;  %v4450_v58 = vmul.f32 -1.442695, %v2839_v40 }
 0xac4   : > { %v2848_v43 = vadd.f32 1.0, %v5115_v41 }
 0xac5   : > { %5116 = vpow2.f32 %v4450_v58 }
 0xac6   : > { %5118 = vrcp.f32 %v2848_v43  ;;  %v2861_v57 = vand.u32 2147483648, %v2848_v43  ;;  %vm2855_vm4 = vweird.f32 %v2848_v43  ;;  %v2859_v63 = vand.u32 2147483647, %v2848_v43 }
 0xac8   : > { %v2862_v7 = vor.u32 1.1754944e-38, %v2861_v57  ;;  %vm2860_vm6 = vcmp.eq.f32.partialorder %v2859_v63, 8.507059e+37  ;;  %v2761_v29 = vpop.f32.mrf.mxu3 }
 0xacb   : > { %v5117_v44 = vpop.eup %5116 }
 0xacc   : > { %v5119_v46 = vpop.eup %5118  ;;  %v2849_v47 = vadd.f32 1.0, %v5117_v44 }
 0xacd   : > { %v2851_v50 = vmul.f32 %v5119_v46, %v2848_v43  ;;  %vm2856_vm3 = vweird.f32 %v5119_v46 }
 0xace   : > { %5120 = vrcp.f32 %v2849_v47  ;;  %vm7014_vm5 = vmor %vm2855_vm4, %vm2856_vm3  ;;  %v2876_v13 = vand.u32 2147483648, %v2849_v47  ;;  %v2874_v17 = vand.u32 2147483647, %v2849_v47  ;;  %vm2870_vm13 = vweird.f32 %v2849_v47 }
 0xacf   : > { %v2852_v52 = vsub.f32 1.0, %v2851_v50  ;;  %vm2958_vm3 = vcmp.lt.s32.totalorder %v7038_v1, 16  ;;  %vm2978_vm4 = vcmp.lt.s32.totalorder %v2974_v23, 16 }
 0xad0   : > { %v2877_v25 = vor.u32 1.1754944e-38, %v2876_v13  ;;  %vm2875_vm1 = vcmp.eq.f32.partialorder %v2874_v17, 8.507059e+37 }
 0xad1   : > { %v2853_v54 = vmul.f32 %v5119_v46, %v2852_v52 }
 0xad3   : > { %v2854_v56 = vadd.f32 %v5119_v46, %v2853_v54 }
 0xad4   : > { %v5121_v61 = vpop.eup %5120 }
 0xad5   : > { %v2866_v48 = vmul.f32 %v5121_v61, %v2849_v47  ;;  %v2858_v21 = vsel %vm7014_vm5, %v5119_v46, %v2854_v56  ;;  %vm2871_vm9 = vweird.f32 %v5121_v61  ;;  %vm2990_vm5 = vcmp.lt.s32.totalorder %v7010_v55, 5 }
 0xad6   : > { %v2863_v14 = vsel %vm2860_vm6, %v2862_v7, %v2858_v21  ;;  %vm2872_vm15 = vmor %vm2870_vm13, %vm2871_vm9  ;;  %vm2998_vm6 = vcmp.lt.s32.totalorder %v7046_v26, 16  ;;  %vm3010_vm9 = vcmp.lt.s32.totalorder %v7010_v55, 4  ;;  %vm3018_vm13 = vcmp.lt.s32.totalorder %v7052_v32, 16 }
 0xad7   : > { %v2867_v9 = vsub.f32 1.0, %v2866_v48  ;;  %v7042_v24 = vmul.f32 %v2863_v14, %v2759_v62 }
 0xad9   : > { %v2868_v16 = vmul.f32 %v5121_v61, %v2867_v9  ;;  %v2883_v35 = vrot.slane %v7042_v24, 5  ;;  %v2903_v36 = vrot.slane %v7042_v24, 6  ;;  %v2923_v38 = vrot.slane %v7042_v24, 7 }
 0xada   : > { %v2948_v51 = vrot.slane %v7042_v24, 1  ;;  %v2968_v41 = vrot.slane %v7042_v24, 2  ;;  %v2988_v59 = vrot.slane %v7042_v24, 3 }
 0xadb   : > { %v2869_v19 = vadd.f32 %v5121_v61, %v2868_v16  ;;  %v3008_v16 = vrot.slane %v7042_v24, 4 }
 0xadd   : > { %v2873_v27 = vsel %vm2872_vm15, %v5121_v61, %v2869_v19 }
 0xade   : > { %v2878_v30 = vsel %vm2875_vm1, %v2877_v25, %v2873_v27  ;;  %v3023_v27 = vperm.slane %v7012_v2, 7 }
 0xadf   : > { %v7054_v33 = vmul.f32 %v2878_v30, %v2761_v29 }
 0xae1   : > { %v2884_v39 = vrot.slane %v7054_v33, 5  ;;  %v2904_v15 = vrot.slane %v7054_v33, 6  ;;  %v2924_v40 = vrot.slane %v7054_v33, 7  ;;  %v2945_v58 = vmul.f32 %v2943_v12, %v7054_v33 }
 0xae2   : > { %v2949_v42 = vrot.slane %v7054_v33, 1  ;;  %v2969_v43 = vrot.slane %v7054_v33, 2  ;;  %v2989_v48 = vrot.slane %v7054_v33, 3  ;;  %v3009_v6 = vrot.slane %v7054_v33, 4 }
 0xae3   : > { %v2886_v44 = vsel %vm2885_vm7, %v2883_v35, %v2884_v39  ;;  %v2887_v45 = vsel %vm2885_vm7, %v2884_v39, %v2883_v35  ;;  %v2906_v46 = vsel %vm2905_vm8, %v2903_v36, %v2904_v15  ;;  %v2907_v47 = vsel %vm2905_vm8, %v2904_v15, %v2903_v36 }
 0xae4   : > { %v2896_v50 = vsel %vm2890_vm10, %v2887_v45, 0.0  ;;  %v2900_v52 = vmul.f32 %v2898_v0, %v2886_v44  ;;  %v2916_v53 = vsel %vm2910_vm11, %v2907_v47, 0.0  ;;  %v2920_v54 = vmul.f32 %v2918_v18, %v2906_v46 }
 0xae5   : > { %v2899_v56 = vmul.f32 %v2898_v0, %v2896_v50  ;;  %v2919_v57 = vmul.f32 %v2918_v18, %v2916_v53  ;;  %v2926_v60 = vsel %vm2925_vm12, %v2923_v38, %v2924_v40  ;;  %v2927_v61 = vsel %vm2925_vm12, %v2924_v40, %v2923_v38  ;;  %v5048_v40 = vld [vmem:[#allocation33] ss:$0 sm:$0xff] }
 0xae6   : > { %v2922_v62 = vadd.f32 %v2920_v54, %v2900_v52  ;;  %v2936_v63 = vsel %vm2930_vm14, %v2927_v61, 0.0  ;;  %v2940_v3 = vmul.f32 %v2938_v22, %v2926_v60  ;;  %v2952_v5 = vsel %vm2950_vm0, %v2949_v42, %v2948_v51 }
 0xae7   : > { %v2921_v4 = vadd.f32 %v2919_v57, %v2899_v56  ;;  %v2939_v21 = vmul.f32 %v2938_v22, %v2936_v63  ;;  %v2951_v9 = vsel %vm2950_vm0, %v2948_v51, %v2949_v42  ;;  %v2962_v49 = vsel %vm2958_vm3, %v2952_v5, 0.0  ;;  %v5049_v42 = vld [vmem:[#allocation35] ss:$0 sm:$0xff] }
 0xae8   : > { %v2942_v7 = vadd.f32 %v2940_v3, %v2922_v62  ;;  %v2972_v10 = vsel %vm2970_vm2, %v2969_v43, %v2968_v41  ;;  %v2944_v0 = vmul.f32 %v2943_v12, %v7042_v24  ;;  %v2965_v18 = vmul.f32 %v2963_v28, %v2962_v49 }
 0xae9   : > { %v2941_v13 = vadd.f32 %v2939_v21, %v2921_v4  ;;  %v2982_v14 = vsel %vm2978_vm4, %v2972_v10, 0.0  ;;  %v2971_v19 = vsel %vm2970_vm2, %v2968_v41, %v2969_v43  ;;  %v2992_v1 = vsel %vm2990_vm5, %v2989_v48, %v2988_v59 }
 0xaea   : > { %v2947_v17 = vadd.f32 %v2945_v58, %v2942_v7  ;;  %v2964_v22 = vmul.f32 %v2963_v28, %v2951_v9  ;;  %v3002_v25 = vsel %vm2998_vm6, %v2992_v1, 0.0  ;;  %v2985_v23 = vmul.f32 %v2983_v31, %v2982_v14 }
 0xaeb   : > { %v2946_v20 = vadd.f32 %v2944_v0, %v2941_v13  ;;  %v2991_v24 = vsel %vm2990_vm5, %v2988_v59, %v2989_v48  ;;  %v3012_v29 = vsel %vm3010_vm9, %v3009_v6, %v3008_v16  ;;  %v2984_v33 = vmul.f32 %v2983_v31, %v2971_v19 }
 0xaec   : > { %v2967_v12 = vadd.f32 %v2965_v18, %v2947_v17  ;;  %v3022_v26 = vsel %vm3018_vm13, %v3012_v29, 0.0  ;;  %v3005_v35 = vmul.f32 %v3003_v34, %v3002_v25  ;;  %v3011_v36 = vsel %vm3010_vm9, %v3008_v16, %v3009_v6  ;;  %v5050_v17 = vld [vmem:[#allocation38] ss:$0 sm:$0xff] }
 0xaed   : > { %v2966_v30 = vadd.f32 %v2964_v22, %v2946_v20  ;;  %v3004_v51 = vmul.f32 %v3003_v34, %v2991_v24  ;;  %v3025_v15 = vmul.f32 %v3023_v27, %v3022_v26  ;;  %v3024_v58 = vmul.f32 %v3023_v27, %v3011_v36  ;;  %v4725_v36 = vld [vmem:[#allocation42 + $0x74] sm:$0xf] }
 0xaee   : > { %v2987_v28 = vadd.f32 %v2985_v23, %v2967_v12  ;;  %v3163_v1 = vmul.f32 2.0, %v7003_v11  ;;  %v3164_v27 = vmul.f32 2.0, %v7005_v37 }
 0xaef   : > { %v2986_v38 = vadd.f32 %v2984_v33, %v2966_v30 }
 0xaf0   : > { %v3007_v39 = vadd.f32 %v3005_v35, %v2987_v28  ;;  %v4543_v28 = vld [vmem:[#allocation42 + $0x70] sm:$0xf]  ;;  %v4726_v35 = vld [vmem:[#allocation42 + $0x74] sm:$0xf0] }
 0xaf1   : > { %v3006_v41 = vadd.f32 %v3004_v51, %v2986_v38  ;;  %v4544_v38 = vor.u32 %v4726_v35, %v4543_v28  ;;  %v4545_v51 = vld [vmem:[#allocation42 + $0x78] sm:$0xf0] }
 0xaf2   : > { %v3027_v31 = vadd.f32 %v3025_v15, %v3007_v39  ;;  %v4548_v39 = vor.u32 %v4725_v36, %v4545_v51  ;;  %v4535_v15 = vld [vmem:[#allocation42 + $0x60] sm:$0xf] }
 0xaf3   : > { %v3026_v32 = vadd.f32 %v3024_v58, %v3006_v41  ;;  %3322 = vmatpush.bf16.msra.mxu2 %v4544_v38  ;;  %v4723_v41 = vld [vmem:[#allocation42 + $0x64] sm:$0xf] }
 0xaf4   : > { %v3033_v43 = vmul.f32 %v5048_v40, %v3027_v31  ;;  %3336 = vmatpush.bf16.msrb.mxu3 %v4548_v39  ;;  %v4537_v31 = vld [vmem:[#allocation42 + $0x68] sm:$0xf0] }
 0xaf5   : > { %v3032_v59 = vmul.f32 %v5048_v40, %v3026_v32  ;;  %v4724_v40 = vld [vmem:[#allocation42 + $0x64] sm:$0xf0]  ;;  %v4527_v32 = vld [vmem:[#allocation42 + $0x50] sm:$0xf] }
 0xaf6   : > { %v3039_v44 = vadd.f32 %v5049_v42, %v3033_v43  ;;  %v4536_v58 = vor.u32 %v4724_v40, %v4535_v15  ;;  %v4722_v43 = vld [vmem:[#allocation42 + $0x54] sm:$0xf0] }
 0xaf7   : > { %v3038_v45 = vadd.f32 %v5049_v42, %v3032_v59  ;;  %v4540_v42 = vor.u32 %v4723_v41, %v4537_v31  ;;  %v4721_v59 = vld [vmem:[#allocation42 + $0x54] sm:$0xf]  ;;  %v5051_v41 = vld [vmem:[#allocation39] ss:$0 sm:$0xff] }
 0xaf8   : > { %v4452_v46 = vmul.f32 -1.442695, %v3039_v44  ;;  %3323 = vmatpush.bf16.msra.mxu2 %v4536_v58 }
 0xaf9   : > { %v4451_v47 = vmul.f32 -1.442695, %v3038_v45  ;;  %3337 = vmatpush.bf16.msrb.mxu3 %v4540_v42 }
 0xafa   : > { %5122 = vpow2.f32 %v4452_v46 }
 0xafb   : > { %5124 = vpow2.f32 %v4451_v47  ;;  %v4519_v47 = vld [vmem:[#allocation42 + $0x40] sm:$0xf] }
 0xb00   : > { %v5123_v55 = vpop.eup %5122 }
 0xb01   : > { %v5125_v50 = vpop.eup %5124  ;;  %v3047_v2 = vadd.f32 1.0, %v5123_v55  ;;  %v4720_v55 = vld [vmem:[#allocation42 + $0x44] sm:$0xf0] }
 0xb02   : > { %v3046_v34 = vadd.f32 1.0, %v5125_v50  ;;  %v4719_v50 = vld [vmem:[#allocation42 + $0x44] sm:$0xf] }
 0xb03   : > { %5126 = vrcp.f32 %v3047_v2  ;;  %v3074_v61 = vand.u32 2147483648, %v3047_v2  ;;  %v3072_v3 = vand.u32 2147483647, %v3047_v2  ;;  %vm3068_vm10 = vweird.f32 %v3047_v2 }
 0xb04   : > { %5128 = vrcp.f32 %v3046_v34  ;;  %v3059_v62 = vand.u32 2147483648, %v3046_v34  ;;  %v3057_v4 = vand.u32 2147483647, %v3046_v34  ;;  %vm3053_vm11 = vweird.f32 %v3046_v34 }
 0xb05   : > { %v3075_v6 = vor.u32 1.1754944e-38, %v3074_v61  ;;  %vm3073_vm15 = vcmp.eq.f32.partialorder %v3072_v3, 8.507059e+37  ;;  %v4503_v61 = vld [vmem:[#allocation42 + $0x20] sm:$0xf] }
 0xb06   : > { %v3060_v7 = vor.u32 1.1754944e-38, %v3059_v62  ;;  %vm3058_vm0 = vcmp.eq.f32.partialorder %v3057_v4, 8.507059e+37  ;;  %v4716_v62 = vld [vmem:[#allocation42 + $0x24] sm:$0xf0]  ;;  %v4505_v4 = vld [vmem:[#allocation42 + $0x28] sm:$0xf0] }
 0xb09   : > { %v5127_v52 = vpop.eup %5126 }
 0xb0a   : > { %v5129_v53 = vpop.eup %5128  ;;  %v3064_v54 = vmul.f32 %v5127_v52, %v3047_v2  ;;  %vm3069_vm7 = vweird.f32 %v5127_v52  ;;  %v4520_v2 = vor.u32 %v4720_v55, %v4519_v47  ;;  %v4734_v47 = vld [vmem:[#allocation45 + $0x38] sm:$0xff] }
 0xb0b   : > { %v3049_v56 = vmul.f32 %v5129_v53, %v3046_v34  ;;  %vm3054_vm8 = vweird.f32 %v5129_v53  ;;  %vm3070_vm12 = vmor %vm3068_vm10, %vm3069_vm7  ;;  %v4521_v34 = vld [vmem:[#allocation42 + $0x48] sm:$0xf0]  ;;  %v4742_v55 = vld [vmem:[#allocation45 + $0x78] sm:$0xff]  ;;  %3564 = vmatpush.bf16.msrb.mxu0 %v4734_v47 }
 0xb0c   : > { %v3065_v57 = vsub.f32 1.0, %v3064_v54  ;;  %vm3055_vm14 = vmor %vm3053_vm11, %vm3054_vm8  ;;  %v4718_v54 = vld [vmem:[#allocation42 + $0x34] sm:$0xf0]  ;;  %3578 = vmatpush.bf16.msrb.mxu1 %v4742_v55 }
 0xb0d   : > { %v3050_v60 = vsub.f32 1.0, %v3049_v56  ;;  %v4717_v56 = vld [vmem:[#allocation42 + $0x34] sm:$0xf] }
 0xb0e   : > { %v3066_v63 = vmul.f32 %v5127_v52, %v3065_v57 }
 0xb0f   : > { %v3051_v48 = vmul.f32 %v5129_v53, %v3050_v60  ;;  %v4513_v60 = vld [vmem:[#allocation42 + $0x38] sm:$0xf0] }
 0xb10   : > { %v3067_v21 = vadd.f32 %v5127_v52, %v3066_v63  ;;  %v4516_v3 = vor.u32 %v4717_v56, %v4513_v60  ;;  %v4739_v56 = vld [vmem:[#allocation45 + $0x60] sm:$0xff] }
 0xb11   : > { %v3052_v5 = vadd.f32 %v5129_v53, %v3051_v48  ;;  %v4715_v48 = vld [vmem:[#allocation42 + $0x24] sm:$0xf] }
 0xb12   : > { %v3071_v9 = vsel %vm3070_vm12, %v5127_v52, %v3067_v21  ;;  %v4524_v52 = vor.u32 %v4719_v50, %v4521_v34  ;;  %v4741_v50 = vld [vmem:[#allocation45 + $0x70] sm:$0xff]  ;;  %v4732_v34 = vld [vmem:[#allocation45 + $0x28] sm:$0xff] }
 0xb13   : > { %v3056_v49 = vsel %vm3055_vm14, %v5129_v53, %v3052_v5  ;;  %v3076_v10 = vsel %vm3073_vm15, %v3075_v6, %v3071_v9  ;;  %v4511_v53 = vld [vmem:[#allocation42 + $0x30] sm:$0xf]  ;;  %v4504_v5 = vor.u32 %v4716_v62, %v4503_v61  ;;  %v4508_v6 = vor.u32 %v4715_v48, %v4505_v4  ;;  %v4714_v9 = vld [vmem:[#allocation42 + $0x14] sm:$0xf0]  ;;  %3579 = vmatpush.bf16.msrb.mxu1 %v4741_v50 }
 0xb14   : > { %v3061_v13 = vsel %vm3058_vm0, %v3060_v7, %v3056_v49  ;;  %v3079_v0 = vmul.f32 %v3076_v10, %v3039_v44  ;;  %v4528_v44 = vor.u32 %v4722_v43, %v4527_v32  ;;  %v4512_v57 = vor.u32 %v4718_v54, %v4511_v53  ;;  %v4495_v7 = vld [vmem:[#allocation42 + $0x10] sm:$0xf]  ;;  %v4713_v10 = vld [vmem:[#allocation42 + $0x14] sm:$0xf]  ;;  %v5052_v43 = vld [vmem:[#allocation41] ss:$0 sm:$0xff] }
 0xb15   : > { %v3078_v14 = vmul.f32 %v3061_v13, %v3038_v45  ;;  %v4529_v45 = vld [vmem:[#allocation42 + $0x58] sm:$0xf0]  ;;  %v4731_v54 = vld [vmem:[#allocation45 + $0x20] sm:$0xff] }
 0xb16   : > { %v4532_v46 = vor.u32 %v4721_v59, %v4529_v45  ;;  %3324 = vmatpush.bf16.msra.mxu2 %v4528_v44  ;;  %v4497_v13 = vld [vmem:[#allocation42 + $0x18] sm:$0xf0] }
 0xb17   : > { %v3080_v16 = vpack.c.bf16 %v3079_v0, %v3078_v14  ;;  %v4496_v0 = vor.u32 %v4714_v9, %v4495_v7  ;;  %v4500_v14 = vor.u32 %v4713_v10, %v4497_v13  ;;  %v4730_v48 = vld [vmem:[#allocation45 + $0x18] sm:$0xff] }
 0xb18   : > { %3338 = vmatpush.bf16.msrb.mxu3 %v4532_v46  ;;  %v4738_v4 = vld [vmem:[#allocation45 + $0x58] sm:$0xff] }
 0xb19   : > { %3157 = vmatmul.bf16.vlgmr.msra.gmra.mxu1 %v3080_v16  ;;  %v4487_v16 = vld [vmem:[#allocation42] sm:$0xf] }
 0xb1a   : > { %3325 = vmatpush.bf16.msra.mxu2 %v4520_v2  ;;  %v3236_v2 = vld [vmem:[#allocation44] sm:$0x3] }
 0xb1b   : > { %v3239_v53 = vperm.slane %v3236_v2, 1 }
 0xb1c   : > { %3339 = vmatpush.bf16.msrb.mxu3 %v4524_v52  ;;  %v4740_v52 = vld [vmem:[#allocation45 + $0x68] sm:$0xff] }
 0xb1d   : > { %3580 = vmatpush.bf16.msrb.mxu1 %v4740_v52 }
 0xb1e   : > { %3326 = vmatpush.bf16.msra.mxu2 %v4512_v57 }
 0xb20   : > { %3340 = vmatpush.bf16.msrb.mxu3 %v4516_v3 }
 0xb21   : > { %3581 = vmatpush.bf16.msrb.mxu1 %v4739_v56 }
 0xb22   : > { %3327 = vmatpush.bf16.msra.mxu2 %v4504_v5  ;;  %v4737_v5 = vld [vmem:[#allocation45 + $0x50] sm:$0xff] }
 0xb24   : > { %3341 = vmatpush.bf16.msrb.mxu3 %v4508_v6 }
 0xb25   : > { %3582 = vmatpush.bf16.msrb.mxu1 %v4738_v4 }
 0xb26   : > { %3328 = vmatpush.bf16.msra.mxu2 %v4496_v0  ;;  %v4728_v0 = vld [vmem:[#allocation45 + $0x8] sm:$0xff] }
 0xb28   : > { %3342 = vmatpush.bf16.msrb.mxu3 %v4500_v14  ;;  %v4736_v14 = vld [vmem:[#allocation45 + $0x48] sm:$0xff] }
 0xb29   : > { %3583 = vmatpush.bf16.msrb.mxu1 %v4737_v5 }
 0xb2d   : > { %3584 = vmatpush.bf16.msrb.mxu1 %v4736_v14 }
 0xb96   : > { %v3158_v18 = vpop.f32.mrf.mxu1 }
 0xb97   : > { %v3159_v19 = vadd.f32 %v5050_v17, %v3158_v18  ;;  %v4711_v18 = vld [vmem:[#allocation42 + $0x4] sm:$0xf] }
 0xb99   : > { %v7132_v20 = vadd.f32 %v3163_v1, %v3159_v19  ;;  %v4489_v19 = vld [vmem:[#allocation42 + $0x8] sm:$0xf0] }
 0xb9b   : > { %3169 = vadd.xlane.f32.xlu0 %v7132_v20 }
 0xb9e   : > { %v3160_v22 = vpop.f32.mrf.mxu1 }
 0xb9f   : > { %v3161_v25 = vadd.f32 %v5050_v17, %v3160_v22  ;;  %v4712_v17 = vld [vmem:[#allocation42 + $0x4] sm:$0xf0] }
 0xba1   : > { %v7136_v12 = vadd.f32 %v3164_v27, %v3161_v25  ;;  %v4488_v25 = vor.u32 %v4712_v17, %v4487_v16  ;;  %v4492_v27 = vor.u32 %v4711_v18, %v4489_v19 }
 0xba3   : > { %3171 = vadd.xlane.f32.xlu1 %v7136_v12  ;;  %3329 = vmatpush.bf16.msra.mxu2 %v4488_v25 }
 0xba4   : > { %3343 = vmatpush.bf16.msrb.mxu3 %v4492_v27 }
 0xc0e   : > { %v3170_v23 = vpop.xlane.xlu0 %3169 }
 0xc0f   : > { %v3173_v24 = vmul.f32 %v3170_v23, %v6860_v8 }
 0xc11   : > { %v7141_v29 = vsub.f32 %v7132_v20, %v3173_v24 }
 0xc13   : > { %v3177_v11 = vmul.f32 %v7141_v29, %v7141_v29 }
 0xc15   : > { %3179 = vadd.xlane.f32.xlu2 %v3177_v11 }
 0xc16   : > { %v3172_v30 = vpop.xlane.xlu1 %3171 }
 0xc17   : > { %v3174_v33 = vmul.f32 %v3172_v30, %v6860_v8 }
 0xc19   : > { %v7147_v26 = vsub.f32 %v7136_v12, %v3174_v33 }
 0xc1b   : > { %v3178_v37 = vmul.f32 %v7147_v26, %v7147_v26 }
 0xc1d   : > { %3181 = vadd.xlane.f32.xlu0 %v3178_v37 }
 0xc88   : > { %v3180_v63 = vpop.xlane.xlu2 %3179 }
 0xc89   : > { %v3183_v21 = vmul.f32 %v3180_v63, %v6860_v8 }
 0xc8b   : > { %v3185_v49 = vadd.f32 1e-05, %v3183_v21  ;;  %v4729_v21 = vld [vmem:[#allocation45 + $0x10] sm:$0xff] }
 0xc8d   : > { %5130 = vrsqrt.f32 %v3185_v49  ;;  %vm3193_vm2 = vweird.f32 %v3185_v49 }
 0xc90   : > { %v3182_v1 = vpop.xlane.xlu0 %3181 }
 0xc91   : > { %v3184_v22 = vmul.f32 %v3182_v1, %v6860_v8  ;;  %v4727_v1 = vld [vmem:[#allocation45] sm:$0xff] }
 0xc93   : > { %v5131_v23 = vpop.eup %5130  ;;  %v3186_v24 = vadd.f32 1e-05, %v3184_v22  ;;  %v4735_v22 = vld [vmem:[#allocation45 + $0x40] sm:$0xff] }
 0xc94   : > { %v3188_v11 = vmul.f32 %v5131_v23, %v3185_v49  ;;  %vm3194_vm1 = vweird.f32 %v5131_v23  ;;  %3585 = vmatpush.bf16.msrb.mxu1 %v4735_v22 }
 0xc95   : > { %5132 = vrsqrt.f32 %v3186_v24  ;;  %vm3195_vm3 = vmor %vm3193_vm2, %vm3194_vm1  ;;  %vm3203_vm5 = vweird.f32 %v3186_v24 }
 0xc96   : > { %v3189_v30 = vmul.f32 %v5131_v23, %v3188_v11 }
 0xc98   : > { %v3190_v33 = vmul.f32 0.5, %v3189_v30 }
 0xc9a   : > { %v3191_v37 = vsub.f32 1.5, %v3190_v33 }
 0xc9b   : > { %v5133_v28 = vpop.eup %5132 }
 0xc9c   : > { %v3192_v35 = vmul.f32 %v5131_v23, %v3191_v37  ;;  %v3198_v36 = vmul.f32 %v5133_v28, %v3186_v24  ;;  %vm3204_vm4 = vweird.f32 %v5133_v28 }
 0xc9d   : > { %vm3205_vm6 = vmor %vm3203_vm5, %vm3204_vm4 }
 0xc9e   : > { %v3199_v38 = vmul.f32 %v5133_v28, %v3198_v36  ;;  %v3196_v51 = vsel %vm3195_vm3, %v5131_v23, %v3192_v35 }
 0xc9f   : > { %v3207_v40 = vmul.f32 %v3196_v51, %v7141_v29  ;;  %v4733_v29 = vld [vmem:[#allocation45 + $0x30] sm:$0xff] }
 0xca0   : > { %v3200_v39 = vmul.f32 0.5, %v3199_v38  ;;  %3565 = vmatpush.bf16.msrb.mxu0 %v4733_v29 }
 0xca1   : > { %v3212_v32 = vmul.f32 %v5051_v41, %v3207_v40 }
 0xca2   : > { %v3201_v15 = vsub.f32 1.5, %v3200_v39 }
 0xca3   : > { %v3217_v44 = vadd.f32 %v5052_v43, %v3212_v32 }
 0xca4   : > { %v3202_v58 = vmul.f32 %v5133_v28, %v3201_v15  ;;  %3566 = vmatpush.bf16.msrb.mxu0 %v4732_v34 }
 0xca6   : > { %v3206_v31 = vsel %vm3205_vm6, %v5133_v28, %v3202_v58 }
 0xca7   : > { %v3208_v42 = vmul.f32 %v3206_v31, %v7147_v26  ;;  %v3238_v26 = vperm.slane %v3236_v2, 0 }
 0xca8   : > { %3567 = vmatpush.bf16.msrb.mxu0 %v4731_v54 }
 0xca9   : > { %v3213_v59 = vmul.f32 %v5051_v41, %v3208_v42 }
 0xcab   : > { %v3218_v45 = vadd.f32 %v5052_v43, %v3213_v59 }
 0xcac   : > { %3568 = vmatpush.bf16.msrb.mxu0 %v4730_v48 }
 0xcad   : > { %v3219_v46 = vpack.c.bf16 %v3218_v45, %v3217_v44 }
 0xcaf   : > { %3330 = vmatmul.bf16.vlgmr.msra.gmra.mxu2 %v3219_v46  ;;  %3344 = vmatmul.bf16.vlgmr.msrb.gmra.mxu3 %v3219_v46 }
 0xcb0   : > { %3569 = vmatpush.bf16.msrb.mxu0 %v4729_v21 }
 0xcb4   : > { %3570 = vmatpush.bf16.msrb.mxu0 %v4728_v0 }
 0xcb8   : > { %3571 = vmatpush.bf16.msrb.mxu0 %v4727_v1 }
 0xd32   : > { %v3331_v57 = vpop.f32.mrf.mxu2  ;;  %v3345_v60 = vpop.f32.mrf.mxu3 }
 0xd33   : > { %v7155_v61 = vadd.f32 %v3331_v57, %v3238_v26  ;;  %v7157_v62 = vadd.f32 %v3345_v60, %v3239_v53 }
 0xd35   : > { %v4549_v63 = vmul.f32 -1.442695, %v7155_v61  ;;  %v4550_v3 = vmul.f32 -1.442695, %v7157_v62 }
 0xd37   : > { %5134 = vpow2.f32 %v4549_v63 }
 0xd38   : > { %5136 = vpow2.f32 %v4550_v3 }
 0xd3a   : > { %v3333_v6 = vpop.f32.mrf.mxu2  ;;  %v3347_v7 = vpop.f32.mrf.mxu3 }
 0xd3b   : > { %v7161_v9 = vadd.f32 %v3333_v6, %v3238_v26  ;;  %v7163_v49 = vadd.f32 %v3347_v7, %v3239_v53 }
 0xd3d   : > { %v5135_v10 = vpop.eup %5134  ;;  %v4551_v13 = vmul.f32 -1.442695, %v7161_v9  ;;  %v4552_v18 = vmul.f32 -1.442695, %v7163_v49 }
 0xd3e   : > { %v5137_v16 = vpop.eup %5136  ;;  %v3362_v17 = vadd.f32 1.0, %v5135_v10 }
 0xd3f   : > { %v7167_v19 = vadd.f32 1.0, %v5137_v16  ;;  %5138 = vpow2.f32 %v4551_v13 }
 0xd40   : > { %5140 = vrcp.f32 %v3362_v17  ;;  %vm3371_vm13 = vweird.f32 %v3362_v17  ;;  %v3375_v40 = vand.u32 2147483647, %v3362_v17  ;;  %v3377_v41 = vand.u32 2147483648, %v3362_v17 }
 0xd41   : > { %5142 = vrcp.f32 %v7167_v19  ;;  %vm3386_vm7 = vweird.f32 %v7167_v19  ;;  %v3390_v31 = vand.u32 2147483647, %v7167_v19  ;;  %v3392_v44 = vand.u32 2147483648, %v7167_v19 }
 0xd42   : > { %5144 = vpow2.f32 %v4552_v18  ;;  %vm3376_vm12 = vcmp.eq.f32.partialorder %v3375_v40, 8.507059e+37  ;;  %v3378_v29 = vor.u32 1.1754944e-38, %v3377_v41 }
 0xd43   : > { %v3393_v60 = vor.u32 1.1754944e-38, %v3392_v44  ;;  %vm3391_vm3 = vcmp.eq.f32.partialorder %v3390_v31, 8.507059e+37 }
 0xd45   : > { %v5139_v25 = vpop.eup %5138 }
 0xd46   : > { %v5141_v27 = vpop.eup %5140  ;;  %v3364_v23 = vadd.f32 1.0, %v5139_v25 }
 0xd47   : > { %v5143_v24 = vpop.eup %5142  ;;  %v3367_v11 = vmul.f32 %v5141_v27, %v3362_v17  ;;  %vm3372_vm9 = vweird.f32 %v5141_v27  ;;  %v5053_v17 = vld [vmem:[#allocation47] ss:$0 sm:$0xff] }
 0xd48   : > { %v5145_v30 = vpop.eup %5144  ;;  %v3382_v33 = vmul.f32 %v5143_v24, %v7167_v19  ;;  %5146 = vrcp.f32 %v3364_v23  ;;  %v3407_v32 = vand.u32 2147483648, %v3364_v23  ;;  %vm7173_vm8 = vmor %vm3371_vm13, %vm3372_vm9  ;;  %vm3387_vm10 = vweird.f32 %v5143_v24 }
 0xd49   : > { %v3368_v37 = vsub.f32 1.0, %v3367_v11  ;;  %v3365_v28 = vadd.f32 1.0, %v5145_v30  ;;  %v3405_v55 = vand.u32 2147483647, %v3364_v23  ;;  %vm3401_vm14 = vweird.f32 %v3364_v23  ;;  %vm7182_vm15 = vmor %vm3386_vm7, %vm3387_vm10 }
 0xd4a   : > { %v3383_v35 = vsub.f32 1.0, %v3382_v33  ;;  %v3408_v52 = vor.u32 1.1754944e-38, %v3407_v32 }
 0xd4b   : > { %v3369_v36 = vmul.f32 %v5141_v27, %v3368_v37  ;;  %5148 = vrcp.f32 %v3365_v28  ;;  %v3420_v26 = vand.u32 2147483647, %v3365_v28  ;;  %v3422_v53 = vand.u32 2147483648, %v3365_v28 }
 0xd4c   : > { %v3384_v51 = vmul.f32 %v5143_v24, %v3383_v35  ;;  %vm3406_vm2 = vcmp.eq.f32.partialorder %v3405_v55, 8.507059e+37  ;;  %vm3416_vm4 = vweird.f32 %v3365_v28 }
 0xd4d   : > { %v3370_v39 = vadd.f32 %v5141_v27, %v3369_v36  ;;  %v3423_v6 = vor.u32 1.1754944e-38, %v3422_v53  ;;  %vm3421_vm6 = vcmp.eq.f32.partialorder %v3420_v26, 8.507059e+37 }
 0xd4e   : > { %v5147_v38 = vpop.eup %5146  ;;  %v3385_v59 = vadd.f32 %v5143_v24, %v3384_v51 }
 0xd4f   : > { %v3397_v15 = vmul.f32 %v5147_v38, %v3364_v23  ;;  %v3374_v46 = vsel %vm7173_vm8, %v5141_v27, %v3370_v39  ;;  %vm3402_vm11 = vweird.f32 %v5147_v38 }
 0xd50   : > { %v3379_v54 = vsel %vm3376_vm12, %v3378_v29, %v3374_v46  ;;  %v3389_v56 = vsel %vm7182_vm15, %v5143_v24, %v3385_v59  ;;  %vm3403_vm0 = vmor %vm3401_vm14, %vm3402_vm11 }
 0xd51   : > { %v5149_v58 = vpop.eup %5148  ;;  %v3398_v42 = vsub.f32 1.0, %v3397_v15  ;;  %v3426_v4 = vmul.f32 %v3379_v54, %v7155_v61  ;;  %v3394_v21 = vsel %vm3391_vm3, %v3393_v60, %v3389_v56 }
 0xd52   : > { %v3412_v45 = vmul.f32 %v5149_v58, %v3365_v28  ;;  %vm3417_vm1 = vweird.f32 %v5149_v58  ;;  %v3427_v0 = vmul.f32 %v3394_v21, %v7157_v62 }
 0xd53   : > { %v3399_v47 = vmul.f32 %v5147_v38, %v3398_v42  ;;  %vm3418_vm5 = vmor %vm3416_vm4, %vm3417_vm1 }
 0xd54   : > { %v3413_v50 = vsub.f32 1.0, %v3412_v45  ;;  %v5054_v45 = vld [vmem:[#allocation48] ss:$0 sm:$0xff] }
 0xd55   : > { %v3400_v34 = vadd.f32 %v5147_v38, %v3399_v47  ;;  %v5055_v47 = vld [vmem:[%s7350_s4] ss:$0 sm:$0xff]  ;;  %s6010_s4 = scalar_lea.hbm %s6009_s3, 16 }
 0xd56   : > { %v3414_v57 = vmul.f32 %v5149_v58, %v3413_v50  ;;  %p6011_p10 = scmp.ne.s32.totalorder %s6009_s3, %s6010_s4  ;;  %p6016_p1 = scmp.lt.s32.totalorder %s6014_s1, %s6010_s4 }
 0xd57   : > { %v3404_v63 = vsel %vm3403_vm0, %v5147_v38, %v3400_v34 }
 0xd58   : > { %v3409_v3 = vsel %vm3406_vm2, %v3408_v52, %v3404_v63  ;;  %v3415_v48 = vadd.f32 %v5149_v58, %v3414_v57  ;;  %p6012_p12 = pnand %p6011_p10, %p6416_p5  ;;  %p6017_p2 = por %p6016_p1, %p6015_p0 }
 0xd59   : > { %v3428_v5 = vmul.f32 %v3409_v3, %v7161_v9 }
 0xd5a   : > { %v3419_v7 = vsel %vm3418_vm5, %v5149_v58, %v3415_v48  ;;  %p6013_p13 = pneg %p6012_p12 }
 0xd5b   : > { %v3430_v10 = vpack.c.bf16 %v3428_v5, %v3426_v4  ;;  %v3424_v13 = vsel %vm3421_vm6, %v3423_v6, %v3419_v7 }
 0xd5c   : > { %v3429_v14 = vmul.f32 %v3424_v13, %v7163_v49  ;;  %p6018_p3 = pnand %p6017_p2, %p6013_p13 }
 0xd5d   : > { %3572 = vmatmul.bf16.vlgmr.msrb.gmra.mxu0 %v3430_v10 }
 0xd5e   : > { %v3431_v16 = vpack.c.bf16 %v3429_v14, %v3427_v0 }
 0xd60   : > { %3586 = vmatmul.bf16.vlgmr.msrb.gmra.mxu1 %v3431_v16 }
 0xdda   : > { %v3573_v18 = vpop.f32.mrf.mxu0 }
 0xddb   : > { %v3574_v19 = vadd.f32 %v5053_v17, %v3573_v18 }
 0xddd   : > { %v3587_v61 = vpop.f32.mrf.mxu1 }
 0xdde   : > { %v3588_v1 = vadd.f32 %v3587_v61, %v3574_v19 }
 0xde0   : > { %v3592_v22 = vmul.f32 0.5, %v3588_v1 }
 0xde2   : > { %v3575_v9 = vpop.f32.mrf.mxu0  ;;  %v3594_v25 = vadd.f32 %v3592_v22, %v7132_v20 }
 0xde3   : > { %v3576_v27 = vadd.f32 %v5053_v17, %v3575_v9 }
 0xde4   : > { %3598 = vadd.xlane.f32.xlu1 %v3594_v25 }
 0xde5   : > { %v3589_v23 = vpop.f32.mrf.mxu1 }
 0xde6   : > { %v3590_v24 = vadd.f32 %v3589_v23, %v3576_v27 }
 0xde8   : > { %v3593_v11 = vmul.f32 0.5, %v3590_v24 }
 0xdea   : > { %v3595_v62 = vadd.f32 %v3593_v11, %v7136_v12 }
 0xdec   : > { %3600 = vadd.xlane.f32.xlu2 %v3595_v62 }
 0xe57   : > { %v3599_v49 = vpop.xlane.xlu1 %3598 }
 0xe58   : > { %v3602_v30 = vmul.f32 %v3599_v49, %v6860_v8 }
 0xe5a   : > { %v3604_v33 = vsub.f32 %v3594_v25, %v3602_v30 }
 0xe5c   : > { %v3606_v37 = vmul.f32 %v3604_v33, %v3604_v33 }
 0xe5e   : > { %3608 = vadd.xlane.f32.xlu0 %v3606_v37 }
 0xe5f   : > { %v3601_v28 = vpop.xlane.xlu2 %3600 }
 0xe60   : > { %v3603_v35 = vmul.f32 %v3601_v28, %v6860_v8 }
 0xe62   : > { %v3605_v36 = vsub.f32 %v3595_v62, %v3603_v35 }
 0xe64   : > { %v3607_v38 = vmul.f32 %v3605_v36, %v3605_v36 }
 0xe66   : > { %3610 = vadd.xlane.f32.xlu1 %v3607_v38 }
 0xed1   : > { %v3609_v20 = vpop.xlane.xlu0 %3608 }
 0xed2   : > { %v3612_v51 = vmul.f32 %v3609_v20, %v6860_v8 }
 0xed4   : > { %v3614_v39 = vadd.f32 1e-05, %v3612_v51 }
 0xed6   : > { %5150 = vrsqrt.f32 %v3614_v39  ;;  %vm3622_vm13 = vweird.f32 %v3614_v39 }
 0xed9   : > { %v3611_v12 = vpop.xlane.xlu1 %3610 }
 0xeda   : > { %v3613_v15 = vmul.f32 %v3611_v12, %v6860_v8 }
 0xedc   : > { %v5151_v40 = vpop.eup %5150  ;;  %v3615_v41 = vadd.f32 1e-05, %v3613_v15 }
 0xedd   : > { %v3617_v58 = vmul.f32 %v5151_v40, %v3614_v39  ;;  %vm3623_vm9 = vweird.f32 %v5151_v40 }
 0xede   : > { %5152 = vrsqrt.f32 %v3615_v41  ;;  %vm3624_vm7 = vmor %vm3622_vm13, %vm3623_vm9  ;;  %vm3632_vm10 = vweird.f32 %v3615_v41 }
 0xedf   : > { %v3618_v31 = vmul.f32 %v5151_v40, %v3617_v58 }
 0xee1   : > { %v3619_v42 = vmul.f32 0.5, %v3618_v31 }
 0xee3   : > { %v3620_v32 = vsub.f32 1.5, %v3619_v42 }
 0xee4   : > { %v5153_v43 = vpop.eup %5152 }
 0xee5   : > { %v3621_v59 = vmul.f32 %v5151_v40, %v3620_v32  ;;  %v3627_v44 = vmul.f32 %v5153_v43, %v3615_v41  ;;  %vm3633_vm8 = vweird.f32 %v5153_v43 }
 0xee6   : > { %vm3634_vm11 = vmor %vm3632_vm10, %vm3633_vm8 }
 0xee7   : > { %v3625_v46 = vsel %vm3624_vm7, %v5151_v40, %v3621_v59  ;;  %v3628_v8 = vmul.f32 %v5153_v43, %v3627_v44 }
 0xee8   : > { %v3636_v55 = vmul.f32 %v3625_v46, %v3604_v33 }
 0xee9   : > { %v3629_v29 = vmul.f32 0.5, %v3628_v8 }
 0xeea   : > { %v3641_v50 = vmul.f32 %v5054_v45, %v3636_v55 }
 0xeeb   : > { %v3630_v2 = vsub.f32 1.5, %v3629_v29 }
 0xeec   : > { %v3646_v34 = vadd.f32 %v5055_v47, %v3641_v50 }
 0xeed   : > { %v3631_v52 = vmul.f32 %v5153_v43, %v3630_v2 }
 0xeee   : > { %3648 = vst [vmem:[%s1493_s0] sm:$0xff] %v3646_v34 }
 0xeef   : > { %v3635_v26 = vsel %vm3634_vm11, %v5153_v43, %v3631_v52 }
 0xef0   : > { %v3637_v53 = vmul.f32 %v3635_v26, %v3605_v36 }
 0xef2   : > { %v3642_v54 = vmul.f32 %v5054_v45, %v3637_v53 }
 0xef4   : > { %v3647_v56 = vadd.f32 %v5055_v47, %v3642_v54 }
 0xef6   : > { %3649 = vst [vmem:[%s1493_s0 + $0x8] sm:$0xff] %v3647_v56 }
 0xef7   : > { %6021 = shalt.err (!%p6018_p3)
}
 0xef8   : > { %s6196_s18 = smov 128   ;;  %s6197_s5 = smov 8  }
 0xef9   : > { %4864 = dma.vmem_to_hbm [thread:$0]  (%p6416_p5), %s3664_s8, 256, %s3666_s2, %s3651_s22, %s6196_s18, %s6196_s18, %s6197_s5  }
 0xefa PF: > { %s7352_s11 = sld [smem:[#allocation95_spill]] }
 0xefb   : > { %s7353_s0 = sld [smem:[#allocation93_spill]] }
 0xf00   : > { %p4930_p4 = scmp.ge.s32.totalorder %s7352_s11, 2 }
 0xf01   : > { %s3680_s7 = sand.u32 1, %s7353_s0  }
 0xf02   : > { %p4867_p7 = pnand %p4930_p4, %p6420_p6  ;;  %s3681_s9 = scalar_lea.sflag [#allocation5], %s3680_s7 }
 0xf04   : > { %p4868_p8 = pneg %p4867_p7 }
 0xf06   : > { %6103 = dma.done.wait (%p4868_p8), %s3681_s9, 256  }
 0xf07   : > { %6105 = vsyncadd (%p4868_p8), %s3681_s9, 4294967040  ;;  %s7355_s18 = sld [smem:[#allocation96_spill]]  ;;  %s7358_s0 = smov %s6112_s15 }
 0xf08   : > { %s7356_s4 = sld [smem:[#allocation94_spill]] }
 0xf09   : > { %s7357_s16 = sld [smem:[#allocation97_spill]] }
 0xf0d   : > { %p95_p11 = scmp.ge.s32.totalorder %s7355_s18, 4  }
 0xf0e   : > { %s7359_s15 = smov %s7356_s4 }
 0xf0f   :  { %97 = sbr.rel (!%p95_p11) target bundleno = 84 (0x54), region = 346 }
 0xf14   :  { %3687 = vsyncpa [#allocation4], 1 }
 0xf15   :  { %3689 = vsyncpa [#allocation4 + $0x1], 1 }
 0xf16   :  { %3690 = vsyncpa [#allocation7], 1 }
 0xf17   :  { %3691 = vsyncpa [#allocation10], 1 }
 0xf18   :  { %3692 = vsyncpa [#allocation13], 1 }
 0xf19   :  { %3693 = vsyncpa [#allocation16], 1 }
 0xf1a   :  { %3694 = vsyncpa [#allocation19], 1 }
 0xf1b   :  { %3695 = vsyncpa [#allocation22], 1 }
 0xf1c   :  { %3696 = vsyncpa [#allocation25], 1 }
 0xf1d   :  { %3697 = vsyncpa [#allocation28], 1 }
 0xf1e   :  { %3698 = vsyncpa [#allocation31], 1 }
 0xf1f   :  { %3699 = vsyncpa [#allocation34], 1 }
 0xf20   :  { %3700 = vsyncpa [#allocation37], 1 }
 0xf21   :  { %3701 = vsyncpa [#allocation40], 1 }
 0xf22   :  { %3702 = vsyncpa [#allocation43], 1 }
 0xf23   :  { %3703 = vsyncpa [#allocation46], 1 }
 0xf24   :  { %3704 = vsyncpa [#allocation49], 1 }
 0xf25   :  { %3705 = vsyncpa [#allocation5], 1 }
 0xf26   :  { %3707 = vsyncpa [#allocation5 + $0x1], 1 }

// kernel: encoder.2
= control target key start
LH: loop header
LB: loop body
LE: loop exit
PB: predicated region body
PF: predicated region fallthrough
CT: control target
= control target key end

     0   :  { %s5625_s6 = smov 1   ;;  %s5626_s10 = smov 2   ;;  %s6620_s0 = inlined_call_operand.smem [shape: u32[35], index: -1, kind: input, shape index: {}] }
   0x1   :  { %s5701_s5 = sld [smem:[%s6620_s0]]   ;;  %s5627_s14 = smov 3  }
   0x2   :  { %s5706_s9 = sld [smem:[%s6620_s0 + %s5625_s6]]   ;;  %s5628_s18 = smov 4  }
   0x3   :  { %s5711_s13 = sld [smem:[%s6620_s0 + %s5626_s10]]   ;;  %s5629_s22 = smov 5  }
   0x4   :  { %s5716_s17 = sld [smem:[%s6620_s0 + %s5627_s14]]   ;;  %s5630_s26 = smov 6  }
   0x5   :  { %s5721_s21 = sld [smem:[%s6620_s0 + %s5628_s18]]   ;;  %s5631_s30 = smov 7  }
   0x6   :  { %s5726_s25 = sld [smem:[%s6620_s0 + %s5629_s22]]   ;;  %s5632_s4 = smov 8  }
   0x7   :  { %6651 = sst [smem:[#allocation50_spill]] %s5701_s5  ;;  %s5633_s10 = smov 9  }
   0x8   :  { %6652 = sst [smem:[#allocation51_spill]] %s5706_s9  ;;  %s5634_s15 = smov 10  }
   0x9   :  { %6653 = sst [smem:[#allocation52_spill]] %s5711_s13  ;;  %s5635_s20 = smov 11  }
   0xa   :  { %s5731_s29 = sld [smem:[%s6620_s0 + %s5630_s26]]   ;;  %s5636_s26 = smov 12  }
   0xb   :  { %s5736_s3 = sld [smem:[%s6620_s0 + %s5631_s30]]   ;;  %s5637_s1 = smov 13  }
   0xc   :  { %s5741_s8 = sld [smem:[%s6620_s0 + %s5632_s4]]   ;;  %s5638_s7 = smov 14  }
   0xd   :  { %s5746_s14 = sld [smem:[%s6620_s0 + %s5633_s10]]   ;;  %s5640_s22 = smov 16  }
   0xe   :  { %s5751_s19 = sld [smem:[%s6620_s0 + %s5634_s15]]   ;;  %s5639_s15 = smov 15  }
   0xf   :  { %s5756_s24 = sld [smem:[%s6620_s0 + %s5635_s20]]   ;;  %s5641_s28 = smov 17  }
  0x10   :  { %s5761_s30 = sld [smem:[%s6620_s0 + %s5636_s26]]  }
  0x11   :  { %6654 = sst [smem:[#allocation53_spill]] %s5736_s3 }
  0x12   :  { %6655 = sst [smem:[#allocation54_spill]] %s5741_s8 }
  0x13   :  { %s5766_s6 = sld [smem:[%s6620_s0 + %s5637_s1]]  }
  0x14   :  { %6656 = sst [smem:[#allocation55_spill]] %s5751_s19 }
  0x15   :  { %s5771_s12 = sld [smem:[%s6620_s0 + %s5638_s7]]   ;;  %s5642_s7 = smov 18  }
  0x16   :  { %6657 = sst [smem:[#allocation56_spill]] %s5761_s30 }
  0x17   :  { %s5776_s20 = sld [smem:[%s6620_s0 + %s5639_s15]]   ;;  %s5643_s15 = smov 19  }
  0x18   :  { %s5781_s27 = sld [smem:[%s6620_s0 + %s5640_s22]]   ;;  %s5644_s22 = smov 20  }
  0x19   :  { %6658 = sst [smem:[#allocation57_spill]] %s5766_s6 }
  0x1a   :  { %s5786_s4 = sld [smem:[%s6620_s0 + %s5641_s28]]   ;;  %s5645_s28 = smov 21  }
  0x1b   :  { %6659 = sst [smem:[#allocation58_spill]] %s5771_s12 }
  0x1c   :  { %s5791_s9 = sld [smem:[%s6620_s0 + %s5642_s7]]   ;;  %s5646_s7 = smov 22  }
  0x1d   :  { %s5796_s13 = sld [smem:[%s6620_s0 + %s5643_s15]]   ;;  %s5647_s15 = smov 23  }
  0x1e   :  { %6660 = sst [smem:[#allocation59_spill]] %s5781_s27 }
  0x1f   :  { %s5801_s5 = sld [smem:[%s6620_s0 + %s5644_s22]]   ;;  %s5648_s22 = smov 24  }
  0x20   :  { %6661 = sst [smem:[#allocation60_spill]] %s5786_s4 }
  0x21   :  { %s5806_s27 = sld [smem:[%s6620_s0 + %s5645_s28]]   ;;  %s5649_s28 = smov 25  }
  0x22   :  { %6662 = sst [smem:[#allocation61_spill]] %s5791_s9 }
  0x23   :  { %s5811_s9 = sld [smem:[%s6620_s0 + %s5646_s7]]   ;;  %s5650_s7 = smov 26  }
  0x24   :  { %s5816_s12 = sld [smem:[%s6620_s0 + %s5647_s15]]   ;;  %s5651_s15 = smov 27  }
  0x25   :  { %6663 = sst [smem:[#allocation62_spill]] %s5801_s5 }
  0x26   :  { %s5821_s5 = sld [smem:[%s6620_s0 + %s5648_s22]]   ;;  %s5652_s22 = smov 28  }
  0x27   :  { %6664 = sst [smem:[#allocation63_spill]] %s5806_s27 }
  0x28   :  { %s5826_s27 = sld [smem:[%s6620_s0 + %s5649_s28]]   ;;  %s5653_s28 = smov 29  }
  0x29   :  { %s5831_s30 = sld [smem:[%s6620_s0 + %s5650_s7]]   ;;  %s5654_s7 = smov 30  }
  0x2a   :  { %6665 = sst [smem:[#allocation64_spill]] %s5816_s12 }
  0x2b   :  { %s5836_s12 = sld [smem:[%s6620_s0 + %s5651_s15]]   ;;  %s5655_s15 = smov 31  }
  0x2c   :  { %6666 = sst [smem:[#allocation65_spill]] %s5821_s5 }
  0x2d   :  { %s5841_s5 = sld [smem:[%s6620_s0 + %s5652_s22]]   ;;  %s5656_s22 = smov 32  }
  0x2e   :  { %6667 = sst [smem:[#allocation66_spill]] %s5826_s27 }
  0x2f   :  { %6668 = sst [smem:[#allocation67_spill]] %s5831_s30 }
  0x30   :  { %s5846_s27 = sld [smem:[%s6620_s0 + %s5653_s28]]   ;;  %s5657_s28 = smov 33  }
  0x31   :  { %6669 = sst [smem:[#allocation68_spill]] %s5836_s12 }
  0x32   :  { %s5851_s30 = sld [smem:[%s6620_s0 + %s5654_s7]]   ;;  %s5658_s7 = smov 34  }
  0x33   :  { %6670 = sst [smem:[#allocation69_spill]] %s5841_s5 }
  0x34   :  { %s5856_s12 = sld [smem:[%s6620_s0 + %s5655_s15]]  }
  0x35   :  { %s5861_s19 = sld [smem:[%s6620_s0 + %s5656_s22]]  }
  0x36   :  { %6671 = sst [smem:[#allocation70_spill]] %s5846_s27 }
  0x37   :  { %s5866_s27 = sld [smem:[%s6620_s0 + %s5657_s28]]  }
  0x38   :  { %6672 = sst [smem:[#allocation71_spill]] %s5851_s30 }
  0x39   :  { %s5871_s30 = sld [smem:[%s6620_s0 + %s5658_s7]]  }
  0x3a   :  { %6673 = sst [smem:[#allocation72_spill]] %s5856_s12 }
  0x3b   :  { %6674 = sst [smem:[#allocation73_spill]] %s5861_s19 }
  0x3d   :  { %6675 = sst [smem:[#allocation74_spill]] %s5866_s27 }
  0x3f   :  { %6676 = sst [smem:[#allocation75_spill]] %s5871_s30 }
  0x40   :  { %74 = vsyncpa [#allocation4], 0 }
  0x41   :  { %76 = vsyncpa [#allocation4 + $0x1], 0 }
  0x42   :  { %77 = vsyncpa [#allocation6], 0 }
  0x43   :  { %78 = vsyncpa [#allocation9], 0 }
  0x44   :  { %79 = vsyncpa [#allocation12], 0 }
  0x45   :  { %80 = vsyncpa [#allocation15], 0 }
  0x46   :  { %81 = vsyncpa [#allocation18], 0 }
  0x47   :  { %82 = vsyncpa [#allocation21], 0 }
  0x48   :  { %83 = vsyncpa [#allocation24], 0 }
  0x49   :  { %84 = vsyncpa [#allocation27], 0 }
  0x4a   :  { %85 = vsyncpa [#allocation30], 0 }
  0x4b   :  { %86 = vsyncpa [#allocation33], 0 }
  0x4c   :  { %87 = vsyncpa [#allocation36], 0  ;;  %s5873_s15 = smov 0   ;;  %s5875_s16 = smov 0  }
  0x4d   :  { %s5877_s18 = smov 0   ;;  %s5879_s0 = smov 0  }
  0x4e LB: > { %s6677_s8 = sld [smem:[#allocation54_spill]]  ;;  %s5892_s22 = sadd.s32 4294967295, %s5623_s0   ;;  %s5611_s15 = sphi %s5873_s15, %s6729_s15   ;;  %s5623_s0 = sphi %s5879_s0, %s6727_s0   ;;  %s5619_s18 = sphi %s5877_s18, %s6731_s18   ;;  %s5615_s16 = sphi %s5875_s16, %s6730_s16  }
  0x4f   : > { %s6678_s6 = sld [smem:[#allocation57_spill]]  ;;  %s5895_s23 = sadd.s32 1, %s5623_s0  }
  0x50   : > { %s6679_s5 = sld [smem:[#allocation69_spill]]  ;;  %s97_s26 = ssub.s32 %s5623_s0, %s5895_s23 }
  0x51   : > { %s6680_s4 = sld [smem:[#allocation60_spill]]  ;;  %s100_s28 = sadd.s32 1, %s5619_s18 }
  0x52   : > { %s6681_s3 = sld [smem:[#allocation53_spill]]  ;;  %p98_p0 = scmp.eq.s32.totalorder %s97_s26, 0 }
  0x53   : > { %6682 = sst [smem:[#allocation76_spill]] %s5895_s23  ;;  %p107_p1 = scmp.ne.s32.totalorder %s5619_s18, %s5615_s16 }
  0x54   : > { %p108_p2 = scmp.eq.s32.totalorder %s5623_s0, 0  ;;  %p113_p3 = scmp.ne.s32.totalorder %s5615_s16, %s5611_s15 }
  0x55   : > { %s5905_s1 = scalar_select %p98_p0, %s5619_s18, %s100_s28  }
  0x56   : > { %p5907_p4 = por %p108_p2, %p107_p1  ;;  %p114_p5 = scmp.eq.s32.totalorder %s5892_s22, 0 }
  0x57   : > { %6683 = sst [smem:[#allocation77_spill]] %s5905_s1  ;;  %p3868_p6 = scmp.ge.s32.totalorder %s5623_s0, 1 }
  0x58   : > { %p843_p7 = scmp.lt.s32.totalorder %s5623_s0, 3  ;;  %p5916_p8 = por %p114_p5, %p113_p3 }
  0x5a   : > { %s6685_s7 = scalar_select %p5916_p8, 1, 0 }
  0x5b   : > { %p5920_p9 = pnand %p3868_p6, %p843_p7 }
  0x5c   : > { %6686 = sst [smem:[#allocation78_spill]] %s6685_s7  ;;  %s861_s11 = sshll.u32 (!%p5920_p9), %s5716_s17, 4  ;;  %s862_s11 = int_to_ptr.hbm [resolvable:$true] %s861_s11 }
  0x5d   : > { %847 = sbr.rel (%p5920_p9) target bundleno = 382 (0x17e), region = 12  ;;  %s5659_s15 = smov (!%p5920_p9), [#allocation5]  }
  0x5e   : > { %s863_s26 = sshll.u32 (!%p5920_p9), %s5659_s15, 4  ;;  %s884_s28 = sshll.u32 (!%p5920_p9), %s5726_s25, 4  ;;  %s864_s26 = int_to_ptr.vmem [resolvable:$true] %s863_s26  ;;  %s5928_s28 = int_to_ptr.hbm [resolvable:$true] %s884_s28 }
  0x5f   : > { %s4899_s1 = sshra.s32 (!%p5920_p9), %s862_s11, 4  ;;  %s4905_s30 = scalar_lea.hbm (!%p5920_p9), %s5716_s17, 1  ;;  %s4900_s1 = int_to_ptr.hbm [resolvable:$true] %s4899_s1 }
  0x60   : > { %s4901_s23 = scalar_lea.hbm (!%p5920_p9), %s4900_s1, 1  ;;  %p4906_p13 = scmp.lt.s32.totalorder (!%p5920_p9), %s4900_s1, %s5716_s17 }
  0x61   : > { %p4902_p10 = scmp.ne.s32.totalorder (!%p5920_p9), %s4900_s1, %s4901_s23  ;;  %p4907_p0 = scmp.lt.s32.totalorder (!%p5920_p9), %s4905_s30, %s4901_s23 }
  0x63   : > { %p4903_p11 = pnand %p4902_p10, %p114_p5  ;;  %p4908_p1 = por %p4907_p0, %p4906_p13 }
  0x65   : > { %p4904_p12 = pneg %p4903_p11 }
  0x67   : > { %p4909_p2 = pnand %p4908_p1, %p4904_p12 }
  0x69   : > { %4912 = shalt.err (!%p4909_p2)
}
  0x6a   : > { %4546 = dma.hbm_to_vmem [thread:$0]  (%p114_p5), %s862_s11, 16, %s864_s26, [#allocation6]  }
  0x6b   : > { %s5660_s15 = smov [#allocation8]   ;;  %s910_s19 = sshll.u32 %s6681_s3, 4  ;;  %s911_s19 = int_to_ptr.hbm [resolvable:$true] %s910_s19 }
  0x6c   : > { %s886_s27 = sshll.u32 %s5660_s15, 4  ;;  %s4927_s12 = sshra.s32 %s5928_s28, 4  ;;  %s887_s27 = int_to_ptr.vmem [resolvable:$true] %s886_s27  ;;  %s4928_s12 = int_to_ptr.hbm [resolvable:$true] %s4927_s12 }
  0x6d   : > { %s4929_s7 = scalar_lea.hbm %s4928_s12, 128  ;;  %s4933_s30 = scalar_lea.hbm %s5726_s25, 128 }
  0x6e   : > { %p4930_p3 = scmp.ne.s32.totalorder %s4928_s12, %s4929_s7  ;;  %p4934_p10 = scmp.lt.s32.totalorder %s4928_s12, %s5726_s25 }
  0x6f   : > { %p4935_p11 = scmp.lt.s32.totalorder %s4933_s30, %s4929_s7 }
  0x70   : > { %p4931_p6 = pnand %p4930_p3, %p114_p5 }
  0x71   : > { %p4936_p12 = por %p4935_p11, %p4934_p10 }
  0x72   : > { %p4932_p7 = pneg %p4931_p6 }
  0x74   : > { %p4937_p13 = pnand %p4936_p12, %p4932_p7 }
  0x76   : > { %4940 = shalt.err (!%p4937_p13)
}
  0x77   : > { %s6636_s23 = smov 128   ;;  %s6637_s1 = smov 8  }
  0x78   : > { %4550 = dma.hbm_to_vmem [thread:$0]  (%p114_p5), %s5928_s28, 2048, %s887_s27, [#allocation9], %s6636_s23, %s6636_s23, %s6637_s1  }
  0x79   : > { %s5663_s11 = smov [#allocation11]   ;;  %s4955_s12 = sshra.s32 %s911_s19, 4  ;;  %s4956_s12 = int_to_ptr.hbm [resolvable:$true] %s4955_s12 }
  0x7a   : > { %s912_s26 = sshll.u32 %s5663_s11, 4  ;;  %s4957_s7 = scalar_lea.hbm %s4956_s12, 128  ;;  %s913_s26 = int_to_ptr.vmem [resolvable:$true] %s912_s26 }
  0x7b   : > { %p4958_p0 = scmp.ne.s32.totalorder %s4956_s12, %s4957_s7  ;;  %s4961_s15 = scalar_lea.hbm %s6681_s3, 128 }
  0x7c   : > { %p4962_p3 = scmp.lt.s32.totalorder %s4956_s12, %s6681_s3  ;;  %p4963_p6 = scmp.lt.s32.totalorder %s4961_s15, %s4957_s7 }
  0x7d   : > { %p4959_p1 = pnand %p4958_p0, %p114_p5 }
  0x7e   : > { %p4964_p7 = por %p4963_p6, %p4962_p3 }
  0x7f   : > { %p4960_p2 = pneg %p4959_p1 }
  0x81   : > { %p4965_p10 = pnand %p4964_p7, %p4960_p2 }
  0x83   : > { %4968 = shalt.err (!%p4965_p10)
}
  0x84   : > { %s6638_s30 = smov 64   ;;  %s6640_s27 = smov 4  }
  0x85   : > { %4554 = dma.hbm_to_vmem [thread:$0]  (%p114_p5), %s911_s19, 2048, %s913_s26, [#allocation12], %s6638_s30, %s6638_s30, %s6640_s27  }
  0x86   : > { %s937_s28 = sshll.u32 %s5746_s14, 4  ;;  %s5666_s11 = smov [#allocation14]   ;;  %s938_s28 = int_to_ptr.hbm [resolvable:$true] %s937_s28 }
  0x87   : > { %s939_s12 = sshll.u32 %s5666_s11, 4  ;;  %s960_s7 = sshll.u32 %s5756_s24, 4  ;;  %s940_s12 = int_to_ptr.vmem [resolvable:$true] %s939_s12  ;;  %s961_s7 = int_to_ptr.hbm [resolvable:$true] %s960_s7 }
  0x88   : > { %s4983_s15 = sshra.s32 %s938_s28, 4  ;;  %s4989_s1 = scalar_lea.hbm %s5746_s14, 1  ;;  %s4984_s15 = int_to_ptr.hbm [resolvable:$true] %s4983_s15 }
  0x89   : > { %s4985_s23 = scalar_lea.hbm %s4984_s15, 1  ;;  %p4990_p0 = scmp.lt.s32.totalorder %s4984_s15, %s5746_s14 }
  0x8a   : > { %p4986_p11 = scmp.ne.s32.totalorder %s4984_s15, %s4985_s23  ;;  %p4991_p1 = scmp.lt.s32.totalorder %s4989_s1, %s4985_s23 }
  0x8c   : > { %p4987_p12 = pnand %p4986_p11, %p114_p5  ;;  %p4992_p2 = por %p4991_p1, %p4990_p0 }
  0x8e   : > { %p4988_p13 = pneg %p4987_p12 }
  0x90   : > { %p4993_p3 = pnand %p4992_p2, %p4988_p13 }
  0x92   : > { %4996 = shalt.err (!%p4993_p3)
}
  0x93   : > { %4558 = dma.hbm_to_vmem [thread:$0]  (%p114_p5), %s938_s28, 16, %s940_s12, [#allocation15]  }
  0x94   : > { %s5667_s19 = smov [#allocation17]   ;;  %s986_s11 = sshll.u32 %s6678_s6, 4  ;;  %s5966_s11 = int_to_ptr.hbm [resolvable:$true] %s986_s11 }
  0x95   : > { %s962_s26 = sshll.u32 %s5667_s19, 4  ;;  %s5011_s30 = sshra.s32 %s961_s7, 4  ;;  %s963_s26 = int_to_ptr.vmem [resolvable:$true] %s962_s26  ;;  %s5012_s30 = int_to_ptr.hbm [resolvable:$true] %s5011_s30 }
  0x96   : > { %s5013_s23 = scalar_lea.hbm %s5012_s30, 64  ;;  %s5017_s1 = scalar_lea.hbm %s5756_s24, 64 }
  0x97   : > { %p5014_p6 = scmp.ne.s32.totalorder %s5012_s30, %s5013_s23  ;;  %p5018_p11 = scmp.lt.s32.totalorder %s5012_s30, %s5756_s24 }
  0x98   : > { %p5019_p12 = scmp.lt.s32.totalorder %s5017_s1, %s5013_s23 }
  0x99   : > { %p5015_p7 = pnand %p5014_p6, %p114_p5 }
  0x9a   : > { %p5020_p13 = por %p5019_p12, %p5018_p11 }
  0x9b   : > { %p5016_p10 = pneg %p5015_p7 }
  0x9d   : > { %p5021_p0 = pnand %p5020_p13, %p5016_p10 }
  0x9f   : > { %5024 = shalt.err (!%p5021_p0)
}
  0xa0   : > { %s6688_s28 = smov 64   ;;  %s1012_s12 = sshll.u32 %s5776_s20, 4  ;;  %s5978_s12 = int_to_ptr.hbm [resolvable:$true] %s1012_s12 }
  0xa1   : > { %4562 = dma.hbm_to_vmem [thread:$0]  (%p114_p5), %s961_s7, 1024, %s963_s26, [#allocation18], %s6688_s28, %s6688_s28, %s6640_s27  }
  0xa2   : > { %s5668_s15 = smov [#allocation20]   ;;  %s5039_s30 = sshra.s32 %s5966_s11, 4  ;;  %s5040_s30 = int_to_ptr.hbm [resolvable:$true] %s5039_s30 }
  0xa3   : > { %s988_s19 = sshll.u32 %s5668_s15, 4  ;;  %s5041_s23 = scalar_lea.hbm %s5040_s30, 64  ;;  %s989_s19 = int_to_ptr.vmem [resolvable:$true] %s988_s19 }
  0xa4   : > { %p5042_p1 = scmp.ne.s32.totalorder %s5040_s30, %s5041_s23  ;;  %s5045_s1 = scalar_lea.hbm %s6678_s6, 64 }
  0xa5   : > { %p5046_p6 = scmp.lt.s32.totalorder %s5040_s30, %s6678_s6  ;;  %p5047_p7 = scmp.lt.s32.totalorder %s5045_s1, %s5041_s23 }
  0xa6   : > { %p5043_p2 = pnand %p5042_p1, %p114_p5 }
  0xa7   : > { %p5048_p10 = por %p5047_p7, %p5046_p6 }
  0xa8   : > { %p5044_p3 = pneg %p5043_p2 }
  0xaa   : > { %p5049_p11 = pnand %p5048_p10, %p5044_p3 }
  0xac   : > { %5052 = shalt.err (!%p5049_p11)
}
  0xad   : > { %4566 = dma.hbm_to_vmem [thread:$0]  (%p114_p5), %s5966_s11, 1024, %s989_s19, [#allocation21], %s6688_s28, %s6688_s28, %s6640_s27  }
  0xae   : > { %s5669_s7 = smov [#allocation23]   ;;  %s1038_s15 = sshll.u32 %s6680_s4, 4  ;;  %s5992_s15 = int_to_ptr.hbm [resolvable:$true] %s1038_s15 }
  0xaf   : > { %s1014_s26 = sshll.u32 %s5669_s7, 4  ;;  %s5067_s30 = sshra.s32 %s5978_s12, 4  ;;  %s1015_s26 = int_to_ptr.vmem [resolvable:$true] %s1014_s26  ;;  %s5068_s30 = int_to_ptr.hbm [resolvable:$true] %s5067_s30 }
  0xb0   : > { %s5069_s23 = scalar_lea.hbm %s5068_s30, 64  ;;  %s5073_s1 = scalar_lea.hbm %s5776_s20, 64 }
  0xb1   : > { %p5070_p12 = scmp.ne.s32.totalorder %s5068_s30, %s5069_s23  ;;  %p5074_p1 = scmp.lt.s32.totalorder %s5068_s30, %s5776_s20 }
  0xb2   : > { %p5075_p2 = scmp.lt.s32.totalorder %s5073_s1, %s5069_s23 }
  0xb3   : > { %p5071_p13 = pnand %p5070_p12, %p114_p5 }
  0xb4   : > { %p5076_p3 = por %p5075_p2, %p5074_p1 }
  0xb5   : > { %p5072_p0 = pneg %p5071_p13 }
  0xb7   : > { %p5077_p6 = pnand %p5076_p3, %p5072_p0 }
  0xb9   : > { %5080 = shalt.err (!%p5077_p6)
}
  0xba   : > { %4570 = dma.hbm_to_vmem [thread:$0]  (%p114_p5), %s5978_s12, 1024, %s1015_s26, [#allocation24], %s6688_s28, %s6688_s28, %s6640_s27  }
  0xbb   : > { %s1064_s11 = sshll.u32 %s5796_s13, 4  ;;  %s5670_s19 = smov [#allocation26]   ;;  %s6006_s11 = int_to_ptr.hbm [resolvable:$true] %s1064_s11 }
  0xbc   : > { %s1040_s7 = sshll.u32 %s5670_s19, 4  ;;  %s5095_s30 = sshra.s32 %s5992_s15, 4  ;;  %s1041_s7 = int_to_ptr.vmem [resolvable:$true] %s1040_s7  ;;  %s5096_s30 = int_to_ptr.hbm [resolvable:$true] %s5095_s30 }
  0xbd   : > { %s5097_s23 = scalar_lea.hbm %s5096_s30, 64  ;;  %s5101_s1 = scalar_lea.hbm %s6680_s4, 64 }
  0xbe   : > { %p5098_p7 = scmp.ne.s32.totalorder %s5096_s30, %s5097_s23  ;;  %p5102_p12 = scmp.lt.s32.totalorder %s5096_s30, %s6680_s4 }
  0xbf   : > { %p5103_p13 = scmp.lt.s32.totalorder %s5101_s1, %s5097_s23 }
  0xc0   : > { %p5099_p10 = pnand %p5098_p7, %p114_p5 }
  0xc1   : > { %p5104_p0 = por %p5103_p13, %p5102_p12 }
  0xc2   : > { %p5100_p11 = pneg %p5099_p10 }
  0xc4   : > { %p5105_p1 = pnand %p5104_p0, %p5100_p11 }
  0xc6   : > { %5108 = shalt.err (!%p5105_p1)
}
  0xc7   : > { %4574 = dma.hbm_to_vmem [thread:$0]  (%p114_p5), %s5992_s15, 1024, %s1041_s7, [#allocation27], %s6688_s28, %s6688_s28, %s6640_s27  }
  0xc8   : > { %s5671_s12 = smov [#allocation29]   ;;  %s1096_s19 = sshll.u32 %s5811_s9, 4  ;;  %s6020_s19 = int_to_ptr.hbm [resolvable:$true] %s1096_s19 }
  0xc9   : > { %s1066_s26 = sshll.u32 %s5671_s12, 4  ;;  %s5123_s30 = sshra.s32 %s6006_s11, 4  ;;  %s1067_s26 = int_to_ptr.vmem [resolvable:$true] %s1066_s26  ;;  %s5124_s30 = int_to_ptr.hbm [resolvable:$true] %s5123_s30 }
  0xca   : > { %s5125_s23 = scalar_lea.hbm %s5124_s30, 64  ;;  %s5129_s1 = scalar_lea.hbm %s5796_s13, 64 }
  0xcb   : > { %p5126_p2 = scmp.ne.s32.totalorder %s5124_s30, %s5125_s23  ;;  %p5130_p7 = scmp.lt.s32.totalorder %s5124_s30, %s5796_s13 }
  0xcc   : > { %p5131_p10 = scmp.lt.s32.totalorder %s5129_s1, %s5125_s23 }
  0xcd   : > { %p5127_p3 = pnand %p5126_p2, %p114_p5 }
  0xce   : > { %p5132_p11 = por %p5131_p10, %p5130_p7 }
  0xcf   : > { %p5128_p6 = pneg %p5127_p3 }
  0xd1   : > { %p5133_p12 = pnand %p5132_p11, %p5128_p6 }
  0xd3   : > { %5136 = shalt.err (!%p5133_p12)
}
  0xd4   : > { %4578 = dma.hbm_to_vmem [thread:$0]  (%p114_p5), %s6006_s11, 1024, %s1067_s26, [#allocation30], %s6688_s28, %s6688_s28, %s6640_s27  }
  0xd5   : > { %s1133_s15 = sshll.u32 %s6679_s5, 4  ;;  %s5672_s7 = smov [#allocation32]   ;;  %s6034_s15 = int_to_ptr.hbm [resolvable:$true] %s1133_s15 }
  0xd6   : > { %s1098_s12 = sshll.u32 %s5672_s7, 4  ;;  %s5151_s30 = sshra.s32 %s6020_s19, 4  ;;  %s1099_s12 = int_to_ptr.vmem [resolvable:$true] %s1098_s12  ;;  %s5152_s30 = int_to_ptr.hbm [resolvable:$true] %s5151_s30 }
  0xd7   : > { %s5153_s23 = scalar_lea.hbm %s5152_s30, 1  ;;  %s5157_s1 = scalar_lea.hbm %s5811_s9, 1 }
  0xd8   : > { %p5154_p13 = scmp.ne.s32.totalorder %s5152_s30, %s5153_s23  ;;  %p5158_p2 = scmp.lt.s32.totalorder %s5152_s30, %s5811_s9 }
  0xd9   : > { %p5159_p3 = scmp.lt.s32.totalorder %s5157_s1, %s5153_s23 }
  0xda   : > { %p5155_p0 = pnand %p5154_p13, %p114_p5 }
  0xdb   : > { %p5160_p6 = por %p5159_p3, %p5158_p2 }
  0xdc   : > { %p5156_p1 = pneg %p5155_p0 }
  0xde   : > { %p5161_p7 = pnand %p5160_p6, %p5156_p1 }
  0xe0   : > { %5164 = shalt.err (!%p5161_p7)
}
  0xe1   : > { %4582 = dma.hbm_to_vmem [thread:$0]  (%p114_p5), %s6020_s19, 16, %s1099_s12, [#allocation33]  }
  0xe2   : > { %s5673_s11 = smov [#allocation35]   ;;  %s873_s7 = sshll.u32 %s5721_s21, 4  ;;  %s6045_s7 = int_to_ptr.hbm [resolvable:$true] %s873_s7 }
  0xe3   : > { %s1135_s26 = sshll.u32 %s5673_s11, 4  ;;  %s5179_s30 = sshra.s32 %s6034_s15, 4  ;;  %s1136_s26 = int_to_ptr.vmem [resolvable:$true] %s1135_s26  ;;  %s5180_s30 = int_to_ptr.hbm [resolvable:$true] %s5179_s30 }
  0xe4   : > { %s5181_s23 = scalar_lea.hbm %s5180_s30, 128  ;;  %s5185_s1 = scalar_lea.hbm %s6679_s5, 128 }
  0xe5   : > { %p5182_p10 = scmp.ne.s32.totalorder %s5180_s30, %s5181_s23  ;;  %p5186_p13 = scmp.lt.s32.totalorder %s5180_s30, %s6679_s5 }
  0xe6   : > { %p5187_p0 = scmp.lt.s32.totalorder %s5185_s1, %s5181_s23 }
  0xe7   : > { %p5183_p11 = pnand %p5182_p10, %p114_p5 }
  0xe8   : > { %p5188_p1 = por %p5187_p0, %p5186_p13 }
  0xe9   : > { %p5184_p12 = pneg %p5183_p11 }
  0xeb   : > { %p5189_p2 = pnand %p5188_p1, %p5184_p12 }
  0xed   : > { %5192 = shalt.err (!%p5189_p2)
}
  0xee   : > { %s6689_s19 = smov 8   ;;  %s6690_s12 = smov 128  }
  0xef   : > { %4586 = dma.hbm_to_vmem [thread:$0]  (%p114_p5), %s6034_s15, 2048, %s1136_s26, [#allocation36], %s6690_s12, %s6690_s12, %s6689_s19  }
  0xf0   : > { %s899_s11 = sshll.u32 %s5731_s29, 4  ;;  %s5674_s27 = smov [#allocation7]   ;;  %s6059_s11 = int_to_ptr.hbm [resolvable:$true] %s899_s11 }
  0xf1   : > { %s875_s3 = sshll.u32 %s5674_s27, 4  ;;  %s5207_s30 = sshra.s32 %s6045_s7, 4  ;;  %s876_s3 = int_to_ptr.vmem [resolvable:$true] %s875_s3  ;;  %s5208_s30 = int_to_ptr.hbm [resolvable:$true] %s5207_s30 }
  0xf2   : > { %s5209_s23 = scalar_lea.hbm %s5208_s30, 1  ;;  %s5213_s1 = scalar_lea.hbm %s5721_s21, 1 }
  0xf3   : > { %p5210_p3 = scmp.ne.s32.totalorder %s5208_s30, %s5209_s23  ;;  %p5214_p10 = scmp.lt.s32.totalorder %s5208_s30, %s5721_s21 }
  0xf4   : > { %p5215_p11 = scmp.lt.s32.totalorder %s5213_s1, %s5209_s23 }
  0xf5   : > { %p5211_p6 = pnand %p5210_p3, %p114_p5 }
  0xf6   : > { %p5216_p12 = por %p5215_p11, %p5214_p10 }
  0xf7   : > { %p5212_p7 = pneg %p5211_p6 }
  0xf9   : > { %p5217_p13 = pnand %p5216_p12, %p5212_p7 }
  0xfb   : > { %5220 = shalt.err (!%p5217_p13)
}
  0xfc   : > { %4548 = dma.hbm_to_vmem [thread:$0]  (%p114_p5), %s6045_s7, 16, %s876_s3, [#allocation6]  }
  0xfd   : > { %s5675_s27 = smov [#allocation10]   ;;  %s925_s26 = sshll.u32 %s6677_s8, 4  ;;  %s6070_s26 = int_to_ptr.hbm [resolvable:$true] %s925_s26 }
  0xfe   : > { %s901_s15 = sshll.u32 %s5675_s27, 4  ;;  %s5235_s19 = sshra.s32 %s6059_s11, 4  ;;  %s902_s15 = int_to_ptr.vmem [resolvable:$true] %s901_s15  ;;  %s5236_s19 = int_to_ptr.hbm [resolvable:$true] %s5235_s19 }
  0xff   : > { %s5237_s12 = scalar_lea.hbm %s5236_s19, 2  ;;  %s5241_s30 = scalar_lea.hbm %s5731_s29, 2 }
 0x100   : > { %p5238_p0 = scmp.ne.s32.totalorder %s5236_s19, %s5237_s12  ;;  %p5242_p3 = scmp.lt.s32.totalorder %s5236_s19, %s5731_s29 }
 0x101   : > { %p5243_p6 = scmp.lt.s32.totalorder %s5241_s30, %s5237_s12 }
 0x102   : > { %p5239_p1 = pnand %p5238_p0, %p114_p5 }
 0x103   : > { %p5244_p7 = por %p5243_p6, %p5242_p3 }
 0x104   : > { %p5240_p2 = pneg %p5239_p1 }
 0x106   : > { %p5245_p10 = pnand %p5244_p7, %p5240_p2 }
 0x108   : > { %5248 = shalt.err (!%p5245_p10)
}
 0x109   : > { %s6691_s3 = sld [smem:[#allocation55_spill]]  ;;  %s5676_s23 = smov [#allocation13]  }
 0x10a   : > { %4552 = dma.hbm_to_vmem [thread:$0]  (%p114_p5), %s6059_s11, 32, %s902_s15, [#allocation9]  }
 0x10b   : > { %s927_s1 = sshll.u32 %s5676_s23, 4  ;;  %s5263_s27 = sshra.s32 %s6070_s26, 4  ;;  %s928_s1 = int_to_ptr.vmem [resolvable:$true] %s927_s1  ;;  %s5264_s27 = int_to_ptr.hbm [resolvable:$true] %s5263_s27 }
 0x10c   : > { %s5265_s19 = scalar_lea.hbm %s5264_s27, 1  ;;  %s5269_s12 = scalar_lea.hbm %s6677_s8, 1 }
 0x10d   : > { %p5266_p11 = scmp.ne.s32.totalorder %s5264_s27, %s5265_s19  ;;  %p5270_p0 = scmp.lt.s32.totalorder %s5264_s27, %s6677_s8 }
 0x10e   : > { %p5271_p1 = scmp.lt.s32.totalorder %s5269_s12, %s5265_s19 }
 0x10f   : > { %s949_s7 = sshll.u32 %s6691_s3, 4  ;;  %p5267_p12 = pnand %p5266_p11, %p114_p5  ;;  %s6081_s7 = int_to_ptr.hbm [resolvable:$true] %s949_s7 }
 0x110   : > { %p5272_p2 = por %p5271_p1, %p5270_p0 }
 0x111   : > { %p5268_p13 = pneg %p5267_p12 }
 0x113   : > { %p5273_p3 = pnand %p5272_p2, %p5268_p13 }
 0x115   : > { %5276 = shalt.err (!%p5273_p3)
}
 0x116   : > { %s6692_s11 = sld [smem:[#allocation56_spill]]  ;;  %s5677_s15 = smov [#allocation16]  }
 0x117   : > { %4556 = dma.hbm_to_vmem [thread:$0]  (%p114_p5), %s6070_s26, 16, %s928_s1, [#allocation12]  }
 0x118   : > { %s951_s30 = sshll.u32 %s5677_s15, 4  ;;  %s5291_s27 = sshra.s32 %s6081_s7, 4  ;;  %s952_s30 = int_to_ptr.vmem [resolvable:$true] %s951_s30  ;;  %s5292_s27 = int_to_ptr.hbm [resolvable:$true] %s5291_s27 }
 0x119   : > { %s5293_s19 = scalar_lea.hbm %s5292_s27, 1  ;;  %s5297_s12 = scalar_lea.hbm %s6691_s3, 1 }
 0x11a   : > { %p5294_p6 = scmp.ne.s32.totalorder %s5292_s27, %s5293_s19  ;;  %p5298_p11 = scmp.lt.s32.totalorder %s5292_s27, %s6691_s3 }
 0x11b   : > { %p5299_p12 = scmp.lt.s32.totalorder %s5297_s12, %s5293_s19 }
 0x11c   : > { %s975_s23 = sshll.u32 %s6692_s11, 4  ;;  %p5295_p7 = pnand %p5294_p6, %p114_p5  ;;  %s6092_s23 = int_to_ptr.hbm [resolvable:$true] %s975_s23 }
 0x11d   : > { %p5300_p13 = por %p5299_p12, %p5298_p11 }
 0x11e   : > { %p5296_p10 = pneg %p5295_p7 }
 0x120   : > { %p5301_p0 = pnand %p5300_p13, %p5296_p10 }
 0x122   : > { %5304 = shalt.err (!%p5301_p0)
}
 0x123   : > { %s6693_s26 = sld [smem:[#allocation58_spill]]  ;;  %s5678_s15 = smov [#allocation19]  }
 0x124   : > { %4560 = dma.hbm_to_vmem [thread:$0]  (%p114_p5), %s6081_s7, 16, %s952_s30, [#allocation15]  }
 0x125   : > { %s977_s4 = sshll.u32 %s5678_s15, 4  ;;  %s5319_s27 = sshra.s32 %s6092_s23, 4  ;;  %s978_s4 = int_to_ptr.vmem [resolvable:$true] %s977_s4  ;;  %s5320_s27 = int_to_ptr.hbm [resolvable:$true] %s5319_s27 }
 0x126   : > { %s5321_s19 = scalar_lea.hbm %s5320_s27, 1  ;;  %s5325_s12 = scalar_lea.hbm %s6692_s11, 1 }
 0x127   : > { %p5322_p1 = scmp.ne.s32.totalorder %s5320_s27, %s5321_s19  ;;  %p5326_p6 = scmp.lt.s32.totalorder %s5320_s27, %s6692_s11 }
 0x128   : > { %p5327_p7 = scmp.lt.s32.totalorder %s5325_s12, %s5321_s19 }
 0x129   : > { %s1001_s1 = sshll.u32 %s6693_s26, 4  ;;  %p5323_p2 = pnand %p5322_p1, %p114_p5  ;;  %s6103_s1 = int_to_ptr.hbm [resolvable:$true] %s1001_s1 }
 0x12a   : > { %p5328_p10 = por %p5327_p7, %p5326_p6 }
 0x12b   : > { %p5324_p3 = pneg %p5323_p2 }
 0x12d   : > { %p5329_p11 = pnand %p5328_p10, %p5324_p3 }
 0x12f   : > { %5332 = shalt.err (!%p5329_p11)
}
 0x130   : > { %s6694_s7 = sld [smem:[#allocation59_spill]]  ;;  %s5679_s30 = smov [#allocation22]  }
 0x131   : > { %4564 = dma.hbm_to_vmem [thread:$0]  (%p114_p5), %s6092_s23, 16, %s978_s4, [#allocation18]  }
 0x132   : > { %s1003_s15 = sshll.u32 %s5679_s30, 4  ;;  %s5347_s27 = sshra.s32 %s6103_s1, 4  ;;  %s1004_s15 = int_to_ptr.vmem [resolvable:$true] %s1003_s15  ;;  %s5348_s27 = int_to_ptr.hbm [resolvable:$true] %s5347_s27 }
 0x133   : > { %s5349_s19 = scalar_lea.hbm %s5348_s27, 1  ;;  %s5353_s12 = scalar_lea.hbm %s6693_s26, 1 }
 0x134   : > { %p5350_p12 = scmp.ne.s32.totalorder %s5348_s27, %s5349_s19  ;;  %p5354_p1 = scmp.lt.s32.totalorder %s5348_s27, %s6693_s26 }
 0x135   : > { %p5355_p2 = scmp.lt.s32.totalorder %s5353_s12, %s5349_s19 }
 0x136   : > { %s1027_s3 = sshll.u32 %s6694_s7, 4  ;;  %p5351_p13 = pnand %p5350_p12, %p114_p5  ;;  %s6114_s3 = int_to_ptr.hbm [resolvable:$true] %s1027_s3 }
 0x137   : > { %p5356_p3 = por %p5355_p2, %p5354_p1 }
 0x138   : > { %p5352_p0 = pneg %p5351_p13 }
 0x13a   : > { %p5357_p6 = pnand %p5356_p3, %p5352_p0 }
 0x13c   : > { %5360 = shalt.err (!%p5357_p6)
}
 0x13d   : > { %s6695_s4 = sld [smem:[#allocation61_spill]]  ;;  %s5680_s30 = smov [#allocation25]  }
 0x13e   : > { %4568 = dma.hbm_to_vmem [thread:$0]  (%p114_p5), %s6103_s1, 16, %s1004_s15, [#allocation21]  }
 0x13f   : > { %s1029_s5 = sshll.u32 %s5680_s30, 4  ;;  %s5375_s27 = sshra.s32 %s6114_s3, 4  ;;  %s1030_s5 = int_to_ptr.vmem [resolvable:$true] %s1029_s5  ;;  %s5376_s27 = int_to_ptr.hbm [resolvable:$true] %s5375_s27 }
 0x140   : > { %s5377_s19 = scalar_lea.hbm %s5376_s27, 1  ;;  %s5381_s12 = scalar_lea.hbm %s6694_s7, 1 }
 0x141   : > { %p5378_p7 = scmp.ne.s32.totalorder %s5376_s27, %s5377_s19  ;;  %p5382_p12 = scmp.lt.s32.totalorder %s5376_s27, %s6694_s7 }
 0x142   : > { %p5383_p13 = scmp.lt.s32.totalorder %s5381_s12, %s5377_s19 }
 0x143   : > { %s1053_s23 = sshll.u32 %s6695_s4, 4  ;;  %p5379_p10 = pnand %p5378_p7, %p114_p5  ;;  %s6125_s23 = int_to_ptr.hbm [resolvable:$true] %s1053_s23 }
 0x144   : > { %p5384_p0 = por %p5383_p13, %p5382_p12 }
 0x145   : > { %p5380_p11 = pneg %p5379_p10 }
 0x147   : > { %p5385_p1 = pnand %p5384_p0, %p5380_p11 }
 0x149   : > { %5388 = shalt.err (!%p5385_p1)
}
 0x14a   : > { %s6696_s1 = sld [smem:[#allocation62_spill]]  ;;  %s5681_s15 = smov [#allocation28]  }
 0x14b   : > { %4572 = dma.hbm_to_vmem [thread:$0]  (%p114_p5), %s6114_s3, 16, %s1030_s5, [#allocation24]  }
 0x14c   : > { %s1055_s30 = sshll.u32 %s5681_s15, 4  ;;  %s5403_s27 = sshra.s32 %s6125_s23, 4  ;;  %s1056_s30 = int_to_ptr.vmem [resolvable:$true] %s1055_s30  ;;  %s5404_s27 = int_to_ptr.hbm [resolvable:$true] %s5403_s27 }
 0x14d   : > { %s5405_s19 = scalar_lea.hbm %s5404_s27, 1  ;;  %s5409_s12 = scalar_lea.hbm %s6695_s4, 1 }
 0x14e   : > { %p5406_p2 = scmp.ne.s32.totalorder %s5404_s27, %s5405_s19  ;;  %p5410_p7 = scmp.lt.s32.totalorder %s5404_s27, %s6695_s4 }
 0x14f   : > { %p5411_p10 = scmp.lt.s32.totalorder %s5409_s12, %s5405_s19 }
 0x150   : > { %s1078_s6 = sshll.u32 %s6696_s1, 4  ;;  %p5407_p3 = pnand %p5406_p2, %p114_p5  ;;  %s6136_s6 = int_to_ptr.hbm [resolvable:$true] %s1078_s6 }
 0x151   : > { %p5412_p11 = por %p5411_p10, %p5410_p7 }
 0x152   : > { %p5408_p6 = pneg %p5407_p3 }
 0x154   : > { %p5413_p12 = pnand %p5412_p11, %p5408_p6 }
 0x156   : > { %5416 = shalt.err (!%p5413_p12)
}
 0x157   : > { %s6697_s5 = sld [smem:[#allocation65_spill]]  ;;  %s5682_s15 = smov [#allocation31]  }
 0x158   : > { %4576 = dma.hbm_to_vmem [thread:$0]  (%p114_p5), %s6125_s23, 16, %s1056_s30, [#allocation27]  }
 0x159   : > { %s1080_s7 = sshll.u32 %s5682_s15, 4  ;;  %s5431_s27 = sshra.s32 %s6136_s6, 4  ;;  %s1081_s7 = int_to_ptr.vmem [resolvable:$true] %s1080_s7  ;;  %s5432_s27 = int_to_ptr.hbm [resolvable:$true] %s5431_s27 }
 0x15a   : > { %s5433_s19 = scalar_lea.hbm %s5432_s27, 64  ;;  %s5437_s12 = scalar_lea.hbm %s6696_s1, 64 }
 0x15b   : > { %p5434_p13 = scmp.ne.s32.totalorder %s5432_s27, %s5433_s19  ;;  %p5438_p2 = scmp.lt.s32.totalorder %s5432_s27, %s6696_s1 }
 0x15c   : > { %p5439_p3 = scmp.lt.s32.totalorder %s5437_s12, %s5433_s19 }
 0x15d   : > { %s1110_s3 = sshll.u32 %s6697_s5, 4  ;;  %p5435_p0 = pnand %p5434_p13, %p114_p5  ;;  %s6147_s3 = int_to_ptr.hbm [resolvable:$true] %s1110_s3 }
 0x15e   : > { %p5440_p6 = por %p5439_p3, %p5438_p2 }
 0x15f   : > { %p5436_p1 = pneg %p5435_p0 }
 0x161   : > { %p5441_p7 = pnand %p5440_p6, %p5436_p1 }
 0x163   : > { %5444 = shalt.err (!%p5441_p7)
}
 0x164   : > { %s6698_s23 = smov 4   ;;  %s6699_s30 = sld [smem:[#allocation71_spill]] }
 0x165   : > { %4580 = dma.hbm_to_vmem [thread:$0]  (%p114_p5), %s6136_s6, 1024, %s1081_s7, [#allocation30], %s6688_s28, %s6688_s28, %s6698_s23  }
 0x166   : > { %s5683_s15 = smov [#allocation34]   ;;  %s5459_s27 = sshra.s32 %s6147_s3, 4  ;;  %s5460_s27 = int_to_ptr.hbm [resolvable:$true] %s5459_s27 }
 0x167   : > { %s1112_s4 = sshll.u32 %s5683_s15, 4  ;;  %s5461_s19 = scalar_lea.hbm %s5460_s27, 64  ;;  %s1113_s4 = int_to_ptr.vmem [resolvable:$true] %s1112_s4 }
 0x168   : > { %p5462_p10 = scmp.ne.s32.totalorder %s5460_s27, %s5461_s19  ;;  %s5465_s12 = scalar_lea.hbm %s6697_s5, 64 }
 0x169   : > { %p5466_p13 = scmp.lt.s32.totalorder %s5460_s27, %s6697_s5  ;;  %p5467_p0 = scmp.lt.s32.totalorder %s5465_s12, %s5461_s19 }
 0x16a   : > { %s1150_s8 = sshll.u32 %s6699_s30, 4  ;;  %p5463_p11 = pnand %p5462_p10, %p114_p5  ;;  %s1151_s8 = int_to_ptr.hbm [resolvable:$true] %s1150_s8 }
 0x16b   : > { %p5468_p1 = por %p5467_p0, %p5466_p13 }
 0x16c   : > { %p5464_p12 = pneg %p5463_p11 }
 0x16e   : > { %p5469_p2 = pnand %p5468_p1, %p5464_p12 }
 0x170   : > { %5472 = shalt.err (!%p5469_p2)
}
 0x171   : > { %4584 = dma.hbm_to_vmem [thread:$0]  (%p114_p5), %s6147_s3, 1024, %s1113_s4, [#allocation33], %s6688_s28, %s6688_s28, %s6698_s23  }
 0x172   : > { %s5684_s6 = smov [#allocation37]   ;;  %s5487_s15 = sshra.s32 %s1151_s8, 4  ;;  %s5488_s15 = int_to_ptr.hbm [resolvable:$true] %s5487_s15 }
 0x173   : > { %s1152_s7 = sshll.u32 %s5684_s6, 4  ;;  %s5489_s27 = scalar_lea.hbm %s5488_s15, 128  ;;  %s1153_s7 = int_to_ptr.vmem [resolvable:$true] %s1152_s7 }
 0x174   : > { %p5490_p3 = scmp.ne.s32.totalorder %s5488_s15, %s5489_s27  ;;  %s5493_s19 = scalar_lea.hbm %s6699_s30, 128 }
 0x175   : > { %p5494_p10 = scmp.lt.s32.totalorder %s5488_s15, %s6699_s30  ;;  %p5495_p11 = scmp.lt.s32.totalorder %s5493_s19, %s5489_s27 }
 0x176   : > { %p5491_p6 = pnand %p5490_p3, %p114_p5 }
 0x177   : > { %p5496_p12 = por %p5495_p11, %p5494_p10 }
 0x178   : > { %p5492_p7 = pneg %p5491_p6 }
 0x17a   : > { %p5497_p13 = pnand %p5496_p12, %p5492_p7 }
 0x17c   : > { %5500 = shalt.err (!%p5497_p13)
}
 0x17d   : > { %4588 = dma.hbm_to_vmem [thread:$0]  (%p114_p5), %s1151_s8, 2048, %s1153_s7, [#allocation36], %s6688_s28, %s6688_s28, %s6698_s23  }
 0x17e PF: > { %s6700_s4 = sld [smem:[#allocation50_spill]]  ;;  %p4661_p0 = scmp.lt.s32.totalorder %s5623_s0, 2 }
 0x17f   : > { %s1175_s3 = sand.u32 1, %s5619_s18   ;;  %s4423_s12 = sshll.u32 %s5623_s0, 4 }
 0x180   : > { %s3892_s6 = sshll.u32 %s1175_s3, 4  ;;  %p6187_p1 = pnand %p4661_p0, %p5907_p4 }
 0x181   : > { %s1179_s19 = scalar_lea.vmem [#allocation3], %s3892_s6  ;;  %s1176_s28 = scalar_lea.sflag [#allocation4], %s1175_s3 }
 0x182   : > { %s1187_s1 = sshll.u32 %s1179_s19, 4  ;;  %p5519_p3 = pneg %p6187_p1  ;;  %s1188_s1 = int_to_ptr.vmem [resolvable:$true] %s1187_s1 }
 0x184   : > { %s1184_s15 = scalar_lea.hbm %s6700_s4, %s4423_s12  ;;  %s5522_s0 = scalar_lea.hbm %s6700_s4, 32 }
 0x185   : > { %s1185_s27 = sshll.u32 %s1184_s15, 4  ;;  %s1186_s27 = int_to_ptr.hbm [resolvable:$true] %s1185_s27 }
 0x186   : > { %s5515_s23 = sshra.s32 %s1186_s27, 4  ;;  %s5516_s23 = int_to_ptr.hbm [resolvable:$true] %s5515_s23 }
 0x187   : > { %s5517_s7 = scalar_lea.hbm %s5516_s23, 16  ;;  %p5523_p10 = scmp.lt.s32.totalorder %s5516_s23, %s6700_s4 }
 0x188   : > { %p5518_p2 = scmp.ne.s32.totalorder %s5516_s23, %s5517_s7  ;;  %p5524_p11 = scmp.lt.s32.totalorder %s5522_s0, %s5517_s7 }
 0x18a   : > { %p5520_p6 = pnand %p5519_p3, %p5518_p2  ;;  %p5525_p12 = por %p5524_p11, %p5523_p10 }
 0x18c   : > { %p5521_p7 = pneg %p5520_p6 }
 0x18e   : > { %p5526_p13 = pnand %p5525_p12, %p5521_p7 }
 0x190   : > { %5529 = shalt.err (!%p5526_p13)
}
 0x191   : > { %s5685_s2 = smov 128   ;;  %s5686_s12 = smov 8  }
 0x192   : > { %4638 = dma.hbm_to_vmem [thread:$0]  (!%p6187_p1), %s1186_s27, 256, %s1188_s1, %s1176_s28, %s5685_s2, %s5685_s2, %s5686_s12  }
 0x193   : > { %1199 = sbr.rel (%p5920_p9) target bundleno = 3720 (0xe88), region = 156  ;;  %s1201_s6 = sand.u32 (!%p5920_p9), 1, %s5615_s16  }
 0x194   : > { %s6200_s15 = sshll.u32 (!%p5920_p9), %s1201_s6, 4  ;;  %s1202_s19 = scalar_lea.sflag (!%p5920_p9), [#allocation4], %s1201_s6 }
 0x195   : > { %s1205_s23 = scalar_lea.vmem (!%p5920_p9), [#allocation3], %s6200_s15 }
 0x198   : > { %5562 = dma.done.wait (%p5916_p8), %s1202_s19, 256  }
 0x199   : > { %5564 = vsyncadd (%p5916_p8), %s1202_s19, 4294967040 }
 0x19a   : > { %5566 = dma.done.wait (%p114_p5), [#allocation6], 32  }
 0x19b   : > { %5568 = vsyncadd (%p114_p5), [#allocation6], 4294967264 }
 0x19c   : > { %5570 = dma.done.wait (%p114_p5), [#allocation9], 2080  }
 0x19d   : > { %5572 = vsyncadd (%p114_p5), [#allocation9], 4294965216 }
 0x19e   : > { %5574 = dma.done.wait (%p114_p5), [#allocation12], 2064  }
 0x19f   : > { %5576 = vsyncadd (%p114_p5), [#allocation12], 4294965232 }
 0x1a0   : > { %5578 = dma.done.wait (%p114_p5), [#allocation15], 32  }
 0x1a1   : > { %5580 = vsyncadd (%p114_p5), [#allocation15], 4294967264 }
 0x1a2   : > { %5582 = dma.done.wait (%p114_p5), [#allocation18], 1040  }
 0x1a3   : > { %5584 = vsyncadd (%p114_p5), [#allocation18], 4294966256 }
 0x1a4   : > { %5586 = dma.done.wait (%p114_p5), [#allocation21], 1040  }
 0x1a5   : > { %5588 = vsyncadd (%p114_p5), [#allocation21], 4294966256 }
 0x1a6   : > { %5590 = dma.done.wait (%p114_p5), [#allocation24], 1040  }
 0x1a7   : > { %5592 = vsyncadd (%p114_p5), [#allocation24], 4294966256 }
 0x1a8   : > { %5594 = dma.done.wait (%p114_p5), [#allocation27], 1040  }
 0x1a9   : > { %5596 = vsyncadd (%p114_p5), [#allocation27], 4294966256 }
 0x1aa   : > { %5598 = dma.done.wait (%p114_p5), [#allocation30], 2048  }
 0x1ab   : > { %5600 = vsyncadd (%p114_p5), [#allocation30], 4294965248 }
 0x1ac   : > { %5602 = dma.done.wait (%p114_p5), [#allocation33], 1040  }
 0x1ad   : > { %5604 = vsyncadd (%p114_p5), [#allocation33], 4294966256 }
 0x1ae   : > { %5606 = dma.done.wait (%p114_p5), [#allocation36], 4096  }
 0x1af   : > { %5608 = vsyncadd (%p114_p5), [#allocation36], 4294963200  ;;  %v6251_v0 = vld [vmem:[%s1205_s23] sm:$0xff]  ;;  %v6254_v1 = vld [vmem:[%s1205_s23 + $0x8] sm:$0xff]  ;;  %v5687_v2 = vmov 128.0   ;;  %s5688_s10 = smov 1  }
 0x1b0   : > { %1422 = vadd.xlane.f32.xlu0 %v6251_v0  ;;  %4801 = vrcp.f32 %v5687_v2  ;;  %v3979_v17 = vld [vmem:[#allocation8 + $0x70] sm:$0xf]  ;;  %v4440_v18 = vld [vmem:[#allocation8 + $0x74] sm:$0xf0]  ;;  %v4439_v19 = vld [vmem:[#allocation8 + $0x74] sm:$0xf] }
 0x1b1   : > { %v3980_v20 = vor.u32 %v4440_v18, %v3979_v17  ;;  %v3981_v21 = vld [vmem:[#allocation8 + $0x78] sm:$0xf0]  ;;  %v3971_v23 = vld [vmem:[#allocation8 + $0x60] sm:$0xf]  ;;  %v4438_v24 = vld [vmem:[#allocation8 + $0x64] sm:$0xf0] }
 0x1b2   : > { %v3984_v22 = vor.u32 %v4439_v19, %v3981_v21  ;;  %v4437_v25 = vld [vmem:[#allocation8 + $0x64] sm:$0xf]  ;;  %v3972_v26 = vor.u32 %v4438_v24, %v3971_v23  ;;  %v3973_v27 = vld [vmem:[#allocation8 + $0x68] sm:$0xf0]  ;;  %v3963_v29 = vld [vmem:[#allocation8 + $0x50] sm:$0xf] }
 0x1b3   : > { %1582 = vmatpush.bf16.msra.mxu0 %v3980_v20  ;;  %v3976_v28 = vor.u32 %v4437_v25, %v3973_v27  ;;  %v4436_v30 = vld [vmem:[#allocation8 + $0x54] sm:$0xf0]  ;;  %v4435_v31 = vld [vmem:[#allocation8 + $0x54] sm:$0xf]  ;;  %v3965_v33 = vld [vmem:[#allocation8 + $0x58] sm:$0xf0] }
 0x1b4   : > { %1596 = vmatpush.bf16.msra.mxu1 %v3984_v22  ;;  %v3964_v32 = vor.u32 %v4436_v30, %v3963_v29  ;;  %v3968_v34 = vor.u32 %v4435_v31, %v3965_v33  ;;  %v3955_v35 = vld [vmem:[#allocation8 + $0x40] sm:$0xf]  ;;  %v4434_v36 = vld [vmem:[#allocation8 + $0x44] sm:$0xf0]  ;;  %v4433_v37 = vld [vmem:[#allocation8 + $0x44] sm:$0xf] }
 0x1b5   : > { %v3956_v38 = vor.u32 %v4434_v36, %v3955_v35  ;;  %v3957_v39 = vld [vmem:[#allocation8 + $0x48] sm:$0xf0]  ;;  %v3947_v41 = vld [vmem:[#allocation8 + $0x30] sm:$0xf]  ;;  %v4432_v42 = vld [vmem:[#allocation8 + $0x34] sm:$0xf0] }
 0x1b6   : > { %v4802_v3 = vpop.eup %4801  ;;  %v3960_v40 = vor.u32 %v4433_v37, %v3957_v39  ;;  %v4431_v43 = vld [vmem:[#allocation8 + $0x34] sm:$0xf]  ;;  %v3948_v44 = vor.u32 %v4432_v42, %v3947_v41  ;;  %v3949_v45 = vld [vmem:[#allocation8 + $0x38] sm:$0xf0]  ;;  %v3939_v47 = vld [vmem:[#allocation8 + $0x20] sm:$0xf] }
 0x1b7   : > { %v1427_v4 = vmul.f32 128.0, %v4802_v3  ;;  %vm1431_vm0 = vweird.f32 %v4802_v3  ;;  %1583 = vmatpush.bf16.msra.mxu0 %v3972_v26  ;;  %v3952_v46 = vor.u32 %v4431_v43, %v3949_v45  ;;  %v4430_v48 = vld [vmem:[#allocation8 + $0x24] sm:$0xf0]  ;;  %v4429_v49 = vld [vmem:[#allocation8 + $0x24] sm:$0xf]  ;;  %v4448_v35 = vld [vmem:[#allocation11 + $0x38] sm:$0xff] }
 0x1b8   : > { %1424 = vadd.xlane.f32.xlu0 %v6254_v1  ;;  %1597 = vmatpush.bf16.msra.mxu1 %v3976_v28  ;;  %v3940_v50 = vor.u32 %v4430_v48, %v3939_v47  ;;  %v3941_v51 = vld [vmem:[#allocation8 + $0x28] sm:$0xf0]  ;;  %v3931_v53 = vld [vmem:[#allocation8 + $0x10] sm:$0xf]  ;;  %v4428_v54 = vld [vmem:[#allocation8 + $0x14] sm:$0xf0] }
 0x1b9   : > { %v1428_v5 = vsub.f32 1.0, %v1427_v4  ;;  %v3944_v52 = vor.u32 %v4429_v49, %v3941_v51  ;;  %v4427_v55 = vld [vmem:[#allocation8 + $0x14] sm:$0xf]  ;;  %v3932_v56 = vor.u32 %v4428_v54, %v3931_v53  ;;  %v3933_v57 = vld [vmem:[#allocation8 + $0x18] sm:$0xf0]  ;;  %1824 = vmatpush.bf16.msra.mxu2 %v4448_v35  ;;  %v4454_v39 = vld [vmem:[#allocation11 + $0x68] sm:$0xff] }
 0x1ba   : > { %v3923_v58 = vld [vmem:[#allocation8] sm:$0xf]  ;;  %v4426_v59 = vld [vmem:[#allocation8 + $0x4] sm:$0xf0]  ;;  %v3936_v60 = vor.u32 %v4427_v55, %v3933_v57  ;;  %v4425_v61 = vld [vmem:[#allocation8 + $0x4] sm:$0xf] }
 0x1bb   : > { %v1429_v6 = vmul.f32 %v4802_v3, %v1428_v5  ;;  %1584 = vmatpush.bf16.msra.mxu0 %v3964_v32  ;;  %v3925_v62 = vld [vmem:[#allocation8 + $0x8] sm:$0xf0]  ;;  %v3924_v2 = vor.u32 %v4426_v59, %v3923_v58  ;;  %v4784_v25 = vld [vmem:[#allocation5] ss:$0 sm:$0xff]  ;;  %v4785_v30 = vld [vmem:[#allocation7] ss:$0 sm:$0xff] }
 0x1bc   : > { %1598 = vmatpush.bf16.msra.mxu1 %v3968_v34  ;;  %v3928_v4 = vor.u32 %v4425_v61, %v3925_v62  ;;  %v4456_v36 = vld [vmem:[#allocation11 + $0x78] sm:$0xff]  ;;  %v4455_v37 = vld [vmem:[#allocation11 + $0x70] sm:$0xff]  ;;  %v4453_v41 = vld [vmem:[#allocation11 + $0x60] sm:$0xff]  ;;  %s5689_s1 = smov 127   ;;  %s6707_s27 = sld [smem:[#allocation52_spill]] }
 0x1bd   : > { %v1430_v7 = vadd.f32 %v4802_v3, %v1429_v6  ;;  %1838 = vmatpush.bf16.msra.mxu3 %v4456_v36  ;;  %v4452_v45 = vld [vmem:[#allocation11 + $0x58] sm:$0xff]  ;;  %v4451_v51 = vld [vmem:[#allocation11 + $0x50] sm:$0xff]  ;;  %v4442_v54 = vld [vmem:[#allocation11 + $0x8] sm:$0xff]  ;;  %s6708_s8 = sld [smem:[#allocation51_spill]]  ;;  %s5690_s28 = smov 96  }
 0x1be   : > { %v4450_v55 = vld [vmem:[#allocation11 + $0x48] sm:$0xff]  ;;  %v4449_v61 = vld [vmem:[#allocation11 + $0x40] sm:$0xff]  ;;  %s5691_s7 = smov 64   ;;  %s5692_s0 = smov 32  }
 0x1bf   : > { %v6257_v8 = vsel %vm1431_vm0, %v4802_v3, %v1430_v7  ;;  %1585 = vmatpush.bf16.msra.mxu0 %v3956_v38  ;;  %v4446_v38 = vld [vmem:[#allocation11 + $0x28] sm:$0xff]  ;;  %s6711_s2 = sld [smem:[#allocation63_spill]]  ;;  %p1401_p4 = scmp.lt.s32.totalorder %s5892_s22, 1 }
 0x1c0   : > { %1599 = vmatpush.bf16.msra.mxu1 %v3960_v40  ;;  %v4445_v40 = vld [vmem:[#allocation11 + $0x20] sm:$0xff]  ;;  %s6714_s12 = sld [smem:[#allocation64_spill]] }
 0x1c1   : > { %1839 = vmatpush.bf16.msra.mxu3 %v4455_v37  ;;  %s6715_s3 = sld [smem:[#allocation66_spill]]  ;;  %s6733_s22 = smov (!%p1401_p4, %s5892_s22), 1 }
 0x1c2   : > { %s6716_s6 = sld [smem:[#allocation67_spill]] }
 0x1c3   : > { %1586 = vmatpush.bf16.msra.mxu0 %v3948_v44  ;;  %v4444_v44 = vld [vmem:[#allocation11 + $0x18] sm:$0xff]  ;;  %s6717_s15 = sld [smem:[#allocation68_spill]] }
 0x1c4   : > { %1600 = vmatpush.bf16.msra.mxu1 %v3952_v46  ;;  %s6718_s19 = sld [smem:[#allocation70_spill]] }
 0x1c5   : > { %1840 = vmatpush.bf16.msra.mxu3 %v4454_v39  ;;  %s6723_s23 = sld [smem:[#allocation72_spill]] }
 0x1c7   : > { %1587 = vmatpush.bf16.msra.mxu0 %v3940_v50  ;;  %v4443_v50 = vld [vmem:[#allocation11 + $0x10] sm:$0xff] }
 0x1c8   : > { %1601 = vmatpush.bf16.msra.mxu1 %v3944_v52 }
 0x1c9   : > { %1841 = vmatpush.bf16.msra.mxu3 %v4453_v41 }
 0x1cb   : > { %1588 = vmatpush.bf16.msra.mxu0 %v3932_v56 }
 0x1cc   : > { %1602 = vmatpush.bf16.msra.mxu1 %v3936_v60  ;;  %v4441_v60 = vld [vmem:[#allocation11] sm:$0xff] }
 0x1cd   : > { %1842 = vmatpush.bf16.msra.mxu3 %v4452_v45 }
 0x1cf   : > { %1589 = vmatpush.bf16.msra.mxu0 %v3924_v2 }
 0x1d0   : > { %1603 = vmatpush.bf16.msra.mxu1 %v3928_v4 }
 0x1d1   : > { %1843 = vmatpush.bf16.msra.mxu3 %v4451_v51 }
 0x1d5   : > { %1844 = vmatpush.bf16.msra.mxu3 %v4450_v55 }
 0x1d9   : > { %1845 = vmatpush.bf16.msra.mxu3 %v4449_v61 }
 0x223   : > { %v1423_v9 = vpop.xlane.xlu0 %1422 }
 0x224   : > { %v1433_v10 = vmul.f32 %v6257_v8, %v1423_v9 }
 0x226   : > { %v6261_v11 = vsub.f32 %v6251_v0, %v1433_v10 }
 0x228   : > { %v1437_v12 = vmul.f32 %v6261_v11, %v6261_v11 }
 0x22a   : > { %1439 = vadd.xlane.f32.xlu1 %v1437_v12 }
 0x22b   : > { %v1425_v13 = vpop.xlane.xlu0 %1424 }
 0x22c   : > { %v1434_v14 = vmul.f32 %v6257_v8, %v1425_v13 }
 0x22e   : > { %v6267_v15 = vsub.f32 %v6254_v1, %v1434_v14 }
 0x230   : > { %v1438_v16 = vmul.f32 %v6267_v15, %v6267_v15 }
 0x232   : > { %1441 = vadd.xlane.f32.xlu1 %v1438_v16 }
 0x29d   : > { %v1440_v63 = vpop.xlane.xlu1 %1439 }
 0x29e   : > { %v1443_v3 = vmul.f32 %v1440_v63, %v6257_v8 }
 0x2a0   : > { %v1445_v5 = vadd.f32 1e-05, %v1443_v3 }
 0x2a2   : > { %4803 = vrsqrt.f32 %v1445_v5  ;;  %vm1453_vm2 = vweird.f32 %v1445_v5 }
 0x2a5   : > { %v1442_v6 = vpop.xlane.xlu1 %1441 }
 0x2a6   : > { %v1444_v7 = vmul.f32 %v1442_v6, %v6257_v8 }
 0x2a8   : > { %v4804_v9 = vpop.eup %4803  ;;  %v1446_v10 = vadd.f32 1e-05, %v1444_v7 }
 0x2a9   : > { %v1448_v12 = vmul.f32 %v4804_v9, %v1445_v5  ;;  %vm1454_vm1 = vweird.f32 %v4804_v9 }
 0x2aa   : > { %4805 = vrsqrt.f32 %v1446_v10  ;;  %vm1455_vm3 = vmor %vm1453_vm2, %vm1454_vm1  ;;  %vm1463_vm5 = vweird.f32 %v1446_v10 }
 0x2ab   : > { %v1449_v13 = vmul.f32 %v4804_v9, %v1448_v12 }
 0x2ad   : > { %v1450_v14 = vmul.f32 0.5, %v1449_v13 }
 0x2af   : > { %v1451_v16 = vsub.f32 1.5, %v1450_v14 }
 0x2b0   : > { %v4806_v17 = vpop.eup %4805 }
 0x2b1   : > { %v1452_v18 = vmul.f32 %v4804_v9, %v1451_v16  ;;  %v1458_v19 = vmul.f32 %v4806_v17, %v1446_v10  ;;  %vm1464_vm4 = vweird.f32 %v4806_v17 }
 0x2b2   : > { %vm1465_vm6 = vmor %vm1463_vm5, %vm1464_vm4 }
 0x2b3   : > { %v1459_v20 = vmul.f32 %v4806_v17, %v1458_v19  ;;  %v1456_v22 = vsel %vm1455_vm3, %v4804_v9, %v1452_v18 }
 0x2b4   : > { %v1467_v24 = vmul.f32 %v1456_v22, %v6261_v11  ;;  %v4447_v11 = vld [vmem:[#allocation11 + $0x30] sm:$0xff] }
 0x2b5   : > { %v1460_v21 = vmul.f32 0.5, %v1459_v20  ;;  %1825 = vmatpush.bf16.msra.mxu2 %v4447_v11 }
 0x2b6   : > { %v1472_v29 = vmul.f32 %v4784_v25, %v1467_v24 }
 0x2b7   : > { %v1461_v23 = vsub.f32 1.5, %v1460_v21 }
 0x2b8   : > { %v1477_v32 = vadd.f32 %v4785_v30, %v1472_v29 }
 0x2b9   : > { %v1462_v26 = vmul.f32 %v4806_v17, %v1461_v23  ;;  %1826 = vmatpush.bf16.msra.mxu2 %v4446_v38 }
 0x2bb   : > { %v1466_v27 = vsel %vm1465_vm6, %v4806_v17, %v1462_v26 }
 0x2bc   : > { %v1468_v28 = vmul.f32 %v1466_v27, %v6267_v15  ;;  %v1496_v15 = vld [vmem:[#allocation10] sm:$0x3] }
 0x2bd   : > { %1827 = vmatpush.bf16.msra.mxu2 %v4445_v40  ;;  %v1498_v42 = vperm.slane %v1496_v15, 0  ;;  %v1499_v43 = vperm.slane %v1496_v15, 1 }
 0x2be   : > { %v1473_v31 = vmul.f32 %v4784_v25, %v1468_v28 }
 0x2c0   : > { %v1478_v33 = vadd.f32 %v4785_v30, %v1473_v31  ;;  %v4477_v30 = vld [vmem:[#allocation23 + $0x20] sm:$0xff] }
 0x2c1   : > { %1828 = vmatpush.bf16.msra.mxu2 %v4444_v44 }
 0x2c2   : > { %v1479_v34 = vpack.c.bf16 %v1478_v33, %v1477_v32 }
 0x2c4   : > { %1590 = vmatmul.bf16.vlgmr.msra.gmra.mxu0 %v1479_v34  ;;  %1604 = vmatmul.bf16.vlgmr.msra.gmra.mxu1 %v1479_v34 }
 0x2c5   : > { %1829 = vmatpush.bf16.msra.mxu2 %v4443_v50 }
 0x2c9   : > { %1830 = vmatpush.bf16.msra.mxu2 %v4442_v54 }
 0x2cd   : > { %1831 = vmatpush.bf16.msra.mxu2 %v4441_v60 }
 0x341   : > { %v1591_v46 = vpop.f32.mrf.mxu0  ;;  %v1605_v47 = vpop.f32.mrf.mxu1 }
 0x342   : > { %v6275_v48 = vadd.f32 %v1591_v46, %v1498_v42  ;;  %v6277_v49 = vadd.f32 %v1605_v47, %v1499_v43 }
 0x344   : > { %v3985_v52 = vmul.f32 -1.442695, %v6275_v48  ;;  %v3986_v53 = vmul.f32 -1.442695, %v6277_v49 }
 0x346   : > { %4807 = vpow2.f32 %v3985_v52 }
 0x347   : > { %4809 = vpow2.f32 %v3986_v53 }
 0x349   : > { %v1593_v56 = vpop.f32.mrf.mxu0  ;;  %v1607_v57 = vpop.f32.mrf.mxu1 }
 0x34a   : > { %v6281_v58 = vadd.f32 %v1593_v56, %v1498_v42  ;;  %v6283_v59 = vadd.f32 %v1607_v57, %v1499_v43 }
 0x34c   : > { %v4808_v62 = vpop.eup %4807  ;;  %v3987_v63 = vmul.f32 -1.442695, %v6281_v58  ;;  %v3988_v4 = vmul.f32 -1.442695, %v6283_v59 }
 0x34d   : > { %v4810_v2 = vpop.eup %4809  ;;  %v1622_v3 = vadd.f32 1.0, %v4808_v62 }
 0x34e   : > { %v1623_v5 = vadd.f32 1.0, %v4810_v2  ;;  %4811 = vpow2.f32 %v3987_v63  ;;  %v4786_v63 = vld [vmem:[#allocation13] ss:$0 sm:$0xff] }
 0x34f   : > { %4813 = vrcp.f32 %v1622_v3  ;;  %vm1631_vm8 = vweird.f32 %v1622_v3  ;;  %v1635_v24 = vand.u32 2147483647, %v1622_v3  ;;  %v1637_v25 = vand.u32 2147483648, %v1622_v3 }
 0x350   : > { %4815 = vrcp.f32 %v1623_v5  ;;  %vm1646_vm9 = vweird.f32 %v1623_v5  ;;  %v1650_v27 = vand.u32 2147483647, %v1623_v5  ;;  %v1652_v32 = vand.u32 2147483648, %v1623_v5 }
 0x351   : > { %4817 = vpow2.f32 %v3988_v4  ;;  %vm1636_vm13 = vcmp.eq.f32.partialorder %v1635_v24, 8.507059e+37  ;;  %v1638_v11 = vor.u32 1.1754944e-38, %v1637_v25  ;;  %v4479_v24 = vld [vmem:[#allocation23 + $0x30] sm:$0xff]  ;;  %v4462_v25 = vld [vmem:[#allocation17 + $0x28] sm:$0xff] }
 0x352   : > { %v1653_v45 = vor.u32 1.1754944e-38, %v1652_v32  ;;  %vm1651_vm3 = vcmp.eq.f32.partialorder %v1650_v27, 8.507059e+37  ;;  %v4478_v27 = vld [vmem:[#allocation23 + $0x28] sm:$0xff]  ;;  %v4468_v32 = vld [vmem:[#allocation20 + $0x18] sm:$0xff] }
 0x354   : > { %v4812_v6 = vpop.eup %4811 }
 0x355   : > { %v4814_v7 = vpop.eup %4813  ;;  %v1624_v9 = vadd.f32 1.0, %v4812_v6 }
 0x356   : > { %v4816_v10 = vpop.eup %4815  ;;  %v1627_v12 = vmul.f32 %v4814_v7, %v1622_v3  ;;  %vm1632_vm7 = vweird.f32 %v4814_v7 }
 0x357   : > { %v4818_v13 = vpop.eup %4817  ;;  %v1642_v14 = vmul.f32 %v4816_v10, %v1623_v5  ;;  %4819 = vrcp.f32 %v1624_v9  ;;  %v1667_v29 = vand.u32 2147483648, %v1624_v9  ;;  %vm6287_vm10 = vmor %vm1631_vm8, %vm1632_vm7  ;;  %vm1647_vm11 = vweird.f32 %v4816_v10 }
 0x358   : > { %v1628_v16 = vsub.f32 1.0, %v1627_v12  ;;  %v1625_v17 = vadd.f32 1.0, %v4818_v13  ;;  %v1665_v36 = vand.u32 2147483647, %v1624_v9  ;;  %vm1661_vm14 = vweird.f32 %v1624_v9  ;;  %vm6294_vm15 = vmor %vm1646_vm9, %vm1647_vm11 }
 0x359   : > { %v1643_v18 = vsub.f32 1.0, %v1642_v14  ;;  %v1668_v15 = vor.u32 1.1754944e-38, %v1667_v29  ;;  %v4469_v29 = vld [vmem:[#allocation20 + $0x20] sm:$0xff] }
 0x35a   : > { %v1629_v19 = vmul.f32 %v4814_v7, %v1628_v16  ;;  %4821 = vrcp.f32 %v1625_v17  ;;  %v1680_v40 = vand.u32 2147483647, %v1625_v17  ;;  %v1682_v41 = vand.u32 2147483648, %v1625_v17 }
 0x35b   : > { %v1644_v21 = vmul.f32 %v4816_v10, %v1643_v18  ;;  %vm1666_vm2 = vcmp.eq.f32.partialorder %v1665_v36, 8.507059e+37  ;;  %vm1676_vm4 = vweird.f32 %v1625_v17  ;;  %v4475_v36 = vld [vmem:[#allocation23 + $0x10] sm:$0xff] }
 0x35c   : > { %v1630_v22 = vadd.f32 %v4814_v7, %v1629_v19  ;;  %v1683_v54 = vor.u32 1.1754944e-38, %v1682_v41  ;;  %vm1681_vm6 = vcmp.eq.f32.partialorder %v1680_v40, 8.507059e+37  ;;  %v4464_v19 = vld [vmem:[#allocation17 + $0x38] sm:$0xff]  ;;  %v4457_v41 = vld [vmem:[#allocation17] sm:$0xff] }
 0x35d   : > { %v4820_v20 = vpop.eup %4819  ;;  %v1645_v31 = vadd.f32 %v4816_v10, %v1644_v21  ;;  %v4480_v21 = vld [vmem:[#allocation23 + $0x38] sm:$0xff]  ;;  %1977 = vmatpush.bf16.msrb.mxu0 %v4464_v19 }
 0x35e   : > { %v1657_v23 = vmul.f32 %v4820_v20, %v1624_v9  ;;  %v1634_v34 = vsel %vm6287_vm10, %v4814_v7, %v1630_v22  ;;  %vm1662_vm12 = vweird.f32 %v4820_v20  ;;  %2141 = vmatpush.bf16.msrb.mxu2 %v4480_v21  ;;  %v4463_v22 = vld [vmem:[#allocation17 + $0x30] sm:$0xff]  ;;  %v1413_v21 = vlaneseq }
 0x35f   : > { %v1639_v42 = vsel %vm1636_vm13, %v1638_v11, %v1634_v34  ;;  %v1649_v43 = vsel %vm6294_vm15, %v4816_v10, %v1645_v31  ;;  %vm1663_vm0 = vmor %vm1661_vm14, %vm1662_vm12  ;;  %v4460_v31 = vld [vmem:[#allocation17 + $0x18] sm:$0xff]  ;;  %v4459_v34 = vld [vmem:[#allocation17 + $0x10] sm:$0xff]  ;;  %vm2194_vm14 = vcmask 261120   ;;  %vm2217_vm15 = vcmask 130048  }
 0x360   : > { %v4822_v26 = vpop.eup %4821  ;;  %v1658_v28 = vsub.f32 1.0, %v1657_v23  ;;  %v1686_v51 = vmul.f32 %v1639_v42, %v6275_v48  ;;  %v1654_v52 = vsel %vm1651_vm3, %v1653_v45, %v1649_v43  ;;  %v4471_v23 = vld [vmem:[#allocation20 + $0x30] sm:$0xff]  ;;  %v4458_v11 = vld [vmem:[#allocation17 + $0x8] sm:$0xff] }
 0x361   : > { %v1672_v33 = vmul.f32 %v4822_v26, %v1625_v17  ;;  %vm1677_vm1 = vweird.f32 %v4822_v26  ;;  %v1687_v60 = vmul.f32 %v1654_v52, %v6277_v49  ;;  %1978 = vmatpush.bf16.msrb.mxu0 %v4463_v22  ;;  %v4465_v42 = vld [vmem:[#allocation20] sm:$0xff]  ;;  %v1414_v22 = vand.u32 127, %v1413_v21 }
 0x362   : > { %v1659_v35 = vmul.f32 %v4820_v20, %v1658_v28  ;;  %vm1678_vm5 = vmor %vm1676_vm4, %vm1677_vm1  ;;  %2142 = vmatpush.bf16.msrb.mxu2 %v4479_v24  ;;  %v4461_v28 = vld [vmem:[#allocation17 + $0x20] sm:$0xff]  ;;  %vm2420_vm1 = vcmask 785920  }
 0x363   : > { %v1673_v37 = vsub.f32 1.0, %v1672_v33  ;;  %v4476_v33 = vld [vmem:[#allocation23 + $0x18] sm:$0xff]  ;;  %v4473_v43 = vld [vmem:[#allocation23] sm:$0xff]  ;;  %v1415_v24 = vand.u32 1, %v1414_v22 }
 0x364   : > { %v1660_v39 = vadd.f32 %v4820_v20, %v1659_v35  ;;  %v4467_v35 = vld [vmem:[#allocation20 + $0x10] sm:$0xff] }
 0x365   : > { %v1674_v44 = vmul.f32 %v4822_v26, %v1673_v37  ;;  %1979 = vmatpush.bf16.msrb.mxu0 %v4462_v25  ;;  %v4466_v37 = vld [vmem:[#allocation20 + $0x8] sm:$0xff]  ;;  %vm6329_vm13 = vcmp.eq.s32.totalorder %v1415_v24, 0 }
 0x366   : > { %v1664_v46 = vsel %vm1663_vm0, %v4820_v20, %v1660_v39  ;;  %v4472_v20 = vld [vmem:[#allocation20 + $0x38] sm:$0xff]  ;;  %2143 = vmatpush.bf16.msrb.mxu2 %v4478_v27  ;;  %v4474_v39 = vld [vmem:[#allocation23 + $0x8] sm:$0xff]  ;;  %vm2340_vm0 = vcmask 523520  }
 0x367   : > { %v1669_v47 = vsel %vm1666_vm2, %v1668_v15, %v1664_v46  ;;  %v1675_v50 = vadd.f32 %v4822_v26, %v1674_v44  ;;  %2059 = vmatpush.bf16.msrb.mxu1 %v4472_v20  ;;  %vm2500_vm2 = vcmask 1048320  }
 0x368   : > { %v1688_v53 = vmul.f32 %v1669_v47, %v6281_v58 }
 0x369   : > { %v1679_v55 = vsel %vm1678_vm5, %v4822_v26, %v1675_v50  ;;  %v4470_v26 = vld [vmem:[#allocation20 + $0x28] sm:$0xff]  ;;  %1980 = vmatpush.bf16.msrb.mxu0 %v4461_v28 }
 0x36a   : > { %v1684_v56 = vsel %vm1681_vm6, %v1683_v54, %v1679_v55  ;;  %v1690_v57 = vpack.c.bf16 %v1688_v53, %v1686_v51  ;;  %2144 = vmatpush.bf16.msrb.mxu2 %v4477_v30 }
 0x36b   : > { %v1689_v61 = vmul.f32 %v1684_v56, %v6283_v59  ;;  %2060 = vmatpush.bf16.msrb.mxu1 %v4471_v23 }
 0x36c   : > { %1832 = vmatmul.bf16.vlgmr.msra.gmra.mxu2 %v1690_v57 }
 0x36d   : > { %v1691_v62 = vpack.c.bf16 %v1689_v61, %v1687_v60  ;;  %1981 = vmatpush.bf16.msrb.mxu0 %v4460_v31 }
 0x36e   : > { %2145 = vmatpush.bf16.msrb.mxu2 %v4476_v33  ;;  %v1410_v33 = vld [vmem:[%s6708_s8 + $0x8] sm:$0xff] }
 0x36f   : > { %1846 = vmatmul.bf16.vlgmr.msra.gmra.mxu3 %v1691_v62  ;;  %2061 = vmatpush.bf16.msrb.mxu1 %v4470_v26 }
 0x371   : > { %1982 = vmatpush.bf16.msrb.mxu0 %v4459_v34  ;;  %v1412_v34 = vld [vmem:[%s6707_s27 + $0x8] sm:$0xff] }
 0x372   : > { %2146 = vmatpush.bf16.msrb.mxu2 %v4475_v36 }
 0x373   : > { %2062 = vmatpush.bf16.msrb.mxu1 %v4469_v29  ;;  %v1411_v29 = vld [vmem:[%s6707_s27] sm:$0xff] }
 0x375   : > { %1983 = vmatpush.bf16.msrb.mxu0 %v4458_v11 }
 0x376   : > { %2147 = vmatpush.bf16.msrb.mxu2 %v4474_v39 }
 0x377   : > { %2063 = vmatpush.bf16.msrb.mxu1 %v4468_v32  ;;  %v1409_v32 = vld [vmem:[%s6708_s8] sm:$0xff] }
 0x379   : > { %1984 = vmatpush.bf16.msrb.mxu0 %v4457_v41 }
 0x37a   : > { %2148 = vmatpush.bf16.msrb.mxu2 %v4473_v43 }
 0x37b   : > { %2064 = vmatpush.bf16.msrb.mxu1 %v4467_v35 }
 0x37f   : > { %2065 = vmatpush.bf16.msrb.mxu1 %v4466_v37 }
 0x383   : > { %2066 = vmatpush.bf16.msrb.mxu1 %v4465_v42 }
 0x3ef   : > { %v1833_v2 = vpop.f32.mrf.mxu2 }
 0x3f0   : > { %v1834_v3 = vadd.f32 %v4786_v63, %v1833_v2  ;;  %v4787_v2 = vld [vmem:[#allocation14] ss:$0 sm:$0xff] }
 0x3f2   : > { %v1847_v48 = vpop.f32.mrf.mxu3 }
 0x3f3   : > { %v1848_v4 = vadd.f32 %v1847_v48, %v1834_v3 }
 0x3f5   : > { %v1852_v5 = vmul.f32 0.5, %v1848_v4 }
 0x3f7   : > { %v6305_v58 = vadd.f32 %v1852_v5, %v6251_v0  ;;  %v1835_v6 = vpop.f32.mrf.mxu2 }
 0x3f8   : > { %v1836_v7 = vadd.f32 %v4786_v63, %v1835_v6  ;;  %v4788_v6 = vld [vmem:[#allocation16] ss:$0 sm:$0xff] }
 0x3f9   : > { %1858 = vadd.xlane.f32.xlu2 %v6305_v58 }
 0x3fa   : > { %v1849_v9 = vpop.f32.mrf.mxu3 }
 0x3fb   : > { %v1850_v49 = vadd.f32 %v1849_v9, %v1836_v7 }
 0x3fd   : > { %v1853_v10 = vmul.f32 0.5, %v1850_v49 }
 0x3ff   : > { %v6309_v59 = vadd.f32 %v1853_v10, %v6254_v1 }
 0x401   : > { %1860 = vadd.xlane.f32.xlu2 %v6309_v59 }
 0x46c   : > { %v1859_v12 = vpop.xlane.xlu2 %1858 }
 0x46d   : > { %v1862_v13 = vmul.f32 %v1859_v12, %v6257_v8  ;;  %v4790_v12 = vld [vmem:[#allocation22] ss:$0 sm:$0xff] }
 0x46f   : > { %v6314_v14 = vsub.f32 %v6305_v58, %v1862_v13 }
 0x471   : > { %v1866_v0 = vmul.f32 %v6314_v14, %v6314_v14 }
 0x473   : > { %1868 = vadd.xlane.f32.xlu0 %v1866_v0 }
 0x474   : > { %v1861_v16 = vpop.xlane.xlu2 %1860 }
 0x475   : > { %v1863_v17 = vmul.f32 %v1861_v16, %v6257_v8  ;;  %v4789_v16 = vld [vmem:[#allocation19] ss:$0 sm:$0xff] }
 0x477   : > { %v6320_v18 = vsub.f32 %v6309_v59, %v1863_v17 }
 0x479   : > { %v1867_v1 = vmul.f32 %v6320_v18, %v6320_v18 }
 0x47b   : > { %1870 = vadd.xlane.f32.xlu1 %v1867_v1 }
 0x4e6   : > { %v1869_v38 = vpop.xlane.xlu0 %1868 }
 0x4e7   : > { %v1872_v15 = vmul.f32 %v1869_v38, %v6257_v8 }
 0x4e9   : > { %v1874_v40 = vadd.f32 1e-05, %v1872_v15  ;;  %v4791_v15 = vld [vmem:[#allocation25] ss:$0 sm:$0xff] }
 0x4eb   : > { %4823 = vrsqrt.f32 %v1874_v40  ;;  %vm1882_vm8 = vweird.f32 %v1874_v40 }
 0x4ee   : > { %v1871_v44 = vpop.xlane.xlu1 %1870 }
 0x4ef   : > { %v1873_v45 = vmul.f32 %v1871_v44, %v6257_v8 }
 0x4f1   : > { %v4824_v46 = vpop.eup %4823  ;;  %v1875_v47 = vadd.f32 1e-05, %v1873_v45 }
 0x4f2   : > { %v1877_v50 = vmul.f32 %v4824_v46, %v1874_v40  ;;  %vm1883_vm7 = vweird.f32 %v4824_v46 }
 0x4f3   : > { %4825 = vrsqrt.f32 %v1875_v47  ;;  %vm1884_vm9 = vmor %vm1882_vm8, %vm1883_vm7  ;;  %vm1892_vm11 = vweird.f32 %v1875_v47 }
 0x4f4   : > { %v1878_v51 = vmul.f32 %v4824_v46, %v1877_v50 }
 0x4f6   : > { %v1879_v52 = vmul.f32 0.5, %v1878_v51 }
 0x4f8   : > { %v1880_v53 = vsub.f32 1.5, %v1879_v52 }
 0x4f9   : > { %v4826_v54 = vpop.eup %4825 }
 0x4fa   : > { %v1881_v55 = vmul.f32 %v4824_v46, %v1880_v53  ;;  %v1887_v56 = vmul.f32 %v4826_v54, %v1875_v47  ;;  %vm1893_vm10 = vweird.f32 %v4826_v54 }
 0x4fb   : > { %vm1894_vm12 = vmor %vm1892_vm11, %vm1893_vm10 }
 0x4fc   : > { %v1888_v57 = vmul.f32 %v4826_v54, %v1887_v56  ;;  %v1885_v60 = vsel %vm1884_vm9, %v4824_v46, %v1881_v55 }
 0x4fd   : > { %v1896_v63 = vmul.f32 %v1885_v60, %v6314_v14 }
 0x4fe   : > { %v1889_v61 = vmul.f32 0.5, %v1888_v57 }
 0x4ff   : > { %v1901_v5 = vmul.f32 %v4787_v2, %v1896_v63 }
 0x500   : > { %v1890_v62 = vsub.f32 1.5, %v1889_v61 }
 0x501   : > { %v1906_v9 = vadd.f32 %v4788_v6, %v1901_v5 }
 0x502   : > { %v1891_v3 = vmul.f32 %v4826_v54, %v1890_v62 }
 0x504   : > { %v1895_v48 = vsel %vm1894_vm12, %v4826_v54, %v1891_v3 }
 0x505   : > { %v1897_v4 = vmul.f32 %v1895_v48, %v6320_v18 }
 0x507   : > { %v1902_v7 = vmul.f32 %v4787_v2, %v1897_v4 }
 0x509   : > { %v1907_v49 = vadd.f32 %v4788_v6, %v1902_v7 }
 0x50b   : > { %v1908_v10 = vpack.c.bf16 %v1907_v49, %v1906_v9 }
 0x50d   : > { %1985 = vmatmul.bf16.vlgmr.msrb.gmra.mxu0 %v1908_v10  ;;  %2067 = vmatmul.bf16.vlgmr.msrb.gmra.mxu1 %v1908_v10 }
 0x50e   : > { %2149 = vmatmul.bf16.vlgmr.msrb.gmra.mxu2 %v1908_v10 }
 0x58a   : > { %v2068_v13 = vpop.f32.mrf.mxu1  ;;  %v1986_v14 = vpop.f32.mrf.mxu0 }
 0x58b   : > { %v2069_v0 = vadd.f32 %v4790_v12, %v2068_v13  ;;  %v1987_v1 = vadd.f32 %v4789_v16, %v1986_v14 }
 0x58d   : > { %2177 = vrot.lane.b32.xlu1 %v2069_v0, %s5688_s10  ;;  %2173 = vrot.lane.b32.xlu2 %v2069_v0, %s5689_s1  ;;  %v2181_v39 = vmul.f32 %v2069_v0, %v1409_v32  ;;  %v2163_v62 = vmul.f32 %v1987_v1, %v1409_v32 }
 0x591   : > { %v2150_v25 = vpop.f32.mrf.mxu2 }
 0x592   : > { %v2070_v17 = vpop.f32.mrf.mxu1  ;;  %v1988_v19 = vpop.f32.mrf.mxu0  ;;  %v2151_v45 = vadd.f32 %v4791_v15, %v2150_v25 }
 0x593   : > { %v2071_v18 = vadd.f32 %v4790_v12, %v2070_v17  ;;  %v1989_v20 = vadd.f32 %v4789_v16, %v1988_v19 }
 0x595   : > { %2175 = vrot.lane.b32.xlu0 %v2071_v18, %s5689_s1  ;;  %2179 = vrot.lane.b32.xlu2 %v2071_v18, %s5688_s10  ;;  %v2182_v40 = vmul.f32 %v2071_v18, %v1410_v33  ;;  %v2164_v63 = vmul.f32 %v1989_v20, %v1410_v33 }
 0x596   : > { %2159 = vrot.lane.b32.xlu1 %v1987_v1, %s5688_s10 }
 0x599   : > { %v2152_v37 = vpop.f32.mrf.mxu2 }
 0x59a   : > { %v2153_v42 = vadd.f32 %v4791_v15, %v2152_v37 }
 0x59c   : > { %v6341_v51 = vpack.c.bf16 %v2153_v42, %v2151_v45 }
 0x59d   : > { %2157 = vrot.lane.b32.xlu2 %v1989_v20, %s5689_s1  ;;  %2155 = vrot.lane.b32.xlu0 %v1987_v1, %s5689_s1  ;;  %s6725_s1 = sld [smem:[#allocation74_spill]] }
 0x5a5   : > { %2161 = vrot.lane.b32.xlu0 %v1989_v20, %s5688_s10  ;;  %s6724_s10 = sld [smem:[#allocation73_spill]] }
 0x5e7   : > { %v2174_v23 = vpop.permute.xlu2 %2173 }
 0x5e8   : > { %v2183_v28 = vsub.f32 0.0, %v2174_v23 }
 0x5ef   : > { %v2180_v36 = vpop.permute.xlu2 %2179 }
 0x5f7   : > { %v2158_v53 = vpop.permute.xlu2 %2157 }
 0x5f8   : > { %v2166_v56 = vsub.f32 0.0, %v2158_v53 }
 0x5ff   : > { %v2178_v27 = vpop.permute.xlu1 %2177 }
 0x600   : > { %v2185_v30 = vsel %vm6329_vm13, %v2183_v28, %v2178_v27 }
 0x601   : > { %v2187_v11 = vmul.f32 %v2185_v30, %v1411_v29 }
 0x603   : > { %v2189_v43 = vadd.f32 %v2187_v11, %v2181_v39 }
 0x607   : > { %v2176_v31 = vpop.permute.xlu0 %2175 }
 0x608   : > { %v2184_v35 = vsub.f32 0.0, %v2176_v31  ;;  %v2160_v54 = vpop.permute.xlu1 %2159 }
 0x60a   : > { %v2186_v38 = vsel %vm6329_vm13, %v2184_v35, %v2180_v36 }
 0x60b   : > { %v2188_v41 = vmul.f32 %v2186_v38, %v1412_v34 }
 0x60d   : > { %v2190_v44 = vadd.f32 %v2188_v41, %v2182_v40 }
 0x60f   : > { %v2156_v46 = vpop.permute.xlu0 %2155  ;;  %v2192_v47 = vpack.c.bf16 %v2190_v44, %v2189_v43 }
 0x610   : > { %v2165_v50 = vsub.f32 0.0, %v2156_v46 }
 0x611   : > { %2264 = vrot.lane.b32.xlu2 %v2192_v47, %s5690_s28  ;;  %2345 = vrot.lane.b32.xlu1 %v2192_v47, %s5691_s7  ;;  %v2199_v52 = vsel %vm2194_vm14, %v2192_v47, 0 }
 0x612   : > { %2208 = vmatpush.bf16.xpose.msrb.mxu3 %v2199_v52  ;;  %v2167_v55 = vsel %vm6329_vm13, %v2165_v50, %v2160_v54 }
 0x613   : > { %v2169_v57 = vmul.f32 %v2167_v55, %v1411_v29 }
 0x615   : > { %v2171_v3 = vadd.f32 %v2169_v57, %v2163_v62 }
 0x617   : > { %v2162_v60 = vpop.permute.xlu0 %2161 }
 0x618   : > { %v2168_v61 = vsel %vm6329_vm13, %v2166_v56, %v2162_v60 }
 0x619   : > { %v2170_v2 = vmul.f32 %v2168_v61, %v1412_v34  ;;  %2425 = vrot.lane.b32.xlu1 %v2192_v47, %s5692_s0 }
 0x61a   : > { %2251 = vmatpush.bf16.msra.mxu3 %v6341_v51 }
 0x61b   : > { %v2172_v48 = vadd.f32 %v2170_v2, %v2164_v63 }
 0x61d   : > { %v2191_v4 = vpack.c.bf16 %v2172_v48, %v2171_v3 }
 0x61f   : > { %2343 = vrot.lane.b32.xlu2 %v2191_v4, %s5691_s7  ;;  %2261 = vrot.lane.b32.xlu0 %v2191_v4, %s5690_s28 }
 0x620   : > { %4149 = vmatmul.msk.bf16.vlgmr.msrb.gmra.mxu3 %vm2194_vm14, %v2191_v4 }
 0x627   : > { %2423 = vrot.lane.b32.xlu0 %v2191_v4, %s5692_s0 }
 0x66b   : > { %v2265_v5 = vpop.permute.xlu2 %2264 }
 0x66c   : > { %v2270_v6 = vsel %vm2194_vm14, %v2265_v5, 0 }
 0x66d   : > { %2279 = vmatpush.bf16.xpose.msra.mxu0 %v2270_v6 }
 0x679   : > { %v2344_v49 = vpop.permute.xlu2 %2343 }
 0x683   : > { %v2346_v7 = vpop.permute.xlu1 %2345 }
 0x684   : > { %v2351_v9 = vsel %vm2194_vm14, %v2346_v7, 0 }
 0x685   : > { %2360 = vmatpush.bf16.xpose.msra.mxu2 %v2351_v9 }
 0x68b   : > { %v2426_v10 = vpop.permute.xlu1 %2425 }
 0x68c   : > { %v2431_v12 = vsel %vm2194_vm14, %v2426_v10, 0  ;;  %4153 = vmatmul.msk.bf16.vlgmr.msra.gmra.mxu2 %vm2194_vm14, %v2344_v49 }
 0x68d   : > { %2440 = vmatpush.bf16.xpose.msrb.mxu0 %v2431_v12 }
 0x691   : > { %v2262_v13 = vpop.permute.xlu0 %2261 }
 0x692   : > { %4151 = vmatmul.msk.bf16.vlgmr.msra.gmra.mxu0 %vm2194_vm14, %v2262_v13 }
 0x699   : > { %v2424_v0 = vpop.permute.xlu0 %2423 }
 0x6a2   : > { %4155 = vmatmul.msk.bf16.vlgmr.msrb.gmra.mxu0 %vm2194_vm14, %v2424_v0 }
 0x6a3   : > { %v2210_v14 = vpop.f32.mrf.mxu3 }
 0x6a4   : > { %v2215_v16 = vmul.f32 0.17677669, %v2210_v14 }
 0x6a6   : > { %v2218_v17 = vsel %vm2217_vm15, %v2215_v16, -inf }
 0x6a7   : > { %2219 = vmax.xlane.f32.xlu2 %v2218_v17 }
 0x6ab   : > { %v2212_v18 = vpop.f32.mrf.mxu3 }
 0x6ac   : > { %v2216_v1 = vmul.f32 0.17677669, %v2212_v18 }
 0x6ae   : > { %v2221_v19 = vsel %vm2217_vm15, %v2216_v1, -inf }
 0x6af   : > { %2222 = vmax.xlane.f32.xlu1 %v2221_v19 }
 0x70f   : > { %v2281_v20 = vpop.f32.mrf.mxu0  ;;  %v2362_v22 = vpop.f32.mrf.mxu2 }
 0x710   : > { %v2286_v23 = vmul.f32 0.17677669, %v2281_v20  ;;  %v2367_v24 = vmul.f32 0.17677669, %v2362_v22 }
 0x712   : > { %v2288_v25 = vsel %vm2217_vm15, %v2286_v23, -inf  ;;  %v2369_v26 = vsel %vm2217_vm15, %v2367_v24, -inf }
 0x713   : > { %2289 = vmax.xlane.f32.xlu0 %v2288_v25  ;;  %2370 = vmax.xlane.f32.xlu1 %v2369_v26 }
 0x717   : > { %v2283_v27 = vpop.f32.mrf.mxu0  ;;  %v2364_v28 = vpop.f32.mrf.mxu2 }
 0x718   : > { %v2287_v29 = vmul.f32 0.17677669, %v2283_v27  ;;  %v2368_v30 = vmul.f32 0.17677669, %v2364_v28 }
 0x71a   : > { %v2220_v31 = vpop.xlane.xlu2 %2219  ;;  %v2372_v32 = vsel %vm2217_vm15, %v2368_v30, -inf  ;;  %v2291_v33 = vsel %vm2217_vm15, %v2287_v29, -inf }
 0x71b   : > { %v2224_v34 = vsub.f32 %v2215_v16, %v2220_v31  ;;  %2373 = vmax.xlane.f32.xlu0 %v2372_v32  ;;  %2292 = vmax.xlane.f32.xlu2 %v2291_v33 }
 0x71d   : > { %v2226_v35 = vmul.f32 1.442695, %v2224_v34 }
 0x71f   : > { %4827 = vpow2.f32 %v2226_v35  ;;  %v2442_v36 = vpop.f32.mrf.mxu0 }
 0x720   : > { %v2447_v11 = vmul.f32 0.17677669, %v2442_v36 }
 0x722   : > { %v2223_v37 = vpop.xlane.xlu1 %2222  ;;  %v2449_v38 = vsel %vm2217_vm15, %v2447_v11, -inf }
 0x723   : > { %v2225_v39 = vsub.f32 %v2216_v1, %v2223_v37  ;;  %2450 = vmax.xlane.f32.xlu2 %v2449_v38 }
 0x725   : > { %v4828_v15 = vpop.eup %4827  ;;  %v2228_v40 = vmul.f32 1.442695, %v2225_v39 }
 0x726   : > { %v2230_v41 = vsel %vm2217_vm15, %v4828_v15, 0.0 }
 0x727   : > { %4829 = vpow2.f32 %v2228_v40  ;;  %2231 = vadd.xlane.f32.xlu0 %v2230_v41  ;;  %v2444_v42 = vpop.f32.mrf.mxu0 }
 0x728   : > { %v2448_v43 = vmul.f32 0.17677669, %v2444_v42 }
 0x72a   : > { %v2452_v44 = vsel %vm2217_vm15, %v2448_v43, -inf }
 0x72b   : > { %2453 = vmax.xlane.f32.xlu1 %v2452_v44 }
 0x72d   : > { %v4830_v45 = vpop.eup %4829 }
 0x72e   : > { %v2233_v46 = vsel %vm2217_vm15, %v4830_v45, 0.0 }
 0x72f   : > { %2234 = vadd.xlane.f32.xlu2 %v2233_v46 }
 0x747   : > { %2312 = vrot.lane.b32.xlu2 %v6341_v51, %s5690_s28 }
 0x786   : > { %v2290_v47 = vpop.xlane.xlu0 %2289  ;;  %v2371_v50 = vpop.xlane.xlu1 %2370 }
 0x787   : > { %v2294_v52 = vsub.f32 %v2286_v23, %v2290_v47  ;;  %v2375_v54 = vsub.f32 %v2367_v24, %v2371_v50 }
 0x789   : > { %v2296_v53 = vmul.f32 1.442695, %v2294_v52  ;;  %v2377_v55 = vmul.f32 1.442695, %v2375_v54 }
 0x78b   : > { %4831 = vpow2.f32 %v2296_v53 }
 0x78c   : > { %4833 = vpow2.f32 %v2377_v55 }
 0x78e   : > { %v2293_v56 = vpop.xlane.xlu2 %2292  ;;  %v2374_v57 = vpop.xlane.xlu0 %2373 }
 0x78f   : > { %v2295_v60 = vsub.f32 %v2287_v29, %v2293_v56  ;;  %v2376_v63 = vsub.f32 %v2368_v30, %v2374_v57 }
 0x791   : > { %v4832_v61 = vpop.eup %4831  ;;  %v2298_v62 = vmul.f32 1.442695, %v2295_v60  ;;  %v2379_v3 = vmul.f32 1.442695, %v2376_v63  ;;  %v4487_v63 = vld [vmem:[#allocation26 + $0x30] sm:$0xff] }
 0x792   : > { %v2300_v2 = vsel %vm2217_vm15, %v4832_v61, 0.0  ;;  %v4834_v4 = vpop.eup %4833 }
 0x793   : > { %2301 = vadd.xlane.f32.xlu1 %v2300_v2  ;;  %4835 = vpow2.f32 %v2298_v62  ;;  %v2381_v9 = vsel %vm2217_vm15, %v4834_v4, 0.0  ;;  %v4488_v62 = vld [vmem:[#allocation26 + $0x38] sm:$0xff] }
 0x794   : > { %4837 = vpow2.f32 %v2379_v3  ;;  %2570 = vmatpush.bf16.msrb.mxu2 %v4488_v62  ;;  %v4486_v3 = vld [vmem:[#allocation26 + $0x28] sm:$0xff] }
 0x796   : > { %v2451_v48 = vpop.xlane.xlu2 %2450 }
 0x797   : > { %v2455_v5 = vsub.f32 %v2447_v11, %v2451_v48  ;;  %v4485_v48 = vld [vmem:[#allocation26 + $0x20] sm:$0xff] }
 0x798   : > { %2571 = vmatpush.bf16.msrb.mxu2 %v4487_v63 }
 0x799   : > { %v2457_v6 = vmul.f32 1.442695, %v2455_v5  ;;  %v4836_v7 = vpop.eup %4835 }
 0x79a   : > { %v2303_v49 = vsel %vm2217_vm15, %v4836_v7, 0.0  ;;  %v2232_v12 = vpop.xlane.xlu0 %2231  ;;  %v4838_v0 = vpop.eup %4837 }
 0x79b   : > { %4839 = vpow2.f32 %v2457_v6  ;;  %2382 = vadd.xlane.f32.xlu1 %v2381_v9  ;;  %2304 = vadd.xlane.f32.xlu0 %v2303_v49  ;;  %v2384_v1 = vsel %vm2217_vm15, %v4838_v0, 0.0  ;;  %v4483_v6 = vld [vmem:[#allocation26 + $0x10] sm:$0xff]  ;;  %v4481_v9 = vld [vmem:[#allocation26] sm:$0xff] }
 0x79c   : > { %4841 = vrcp.f32 %v2232_v12  ;;  %2572 = vmatpush.bf16.msrb.mxu2 %v4486_v3  ;;  %v4496_v49 = vld [vmem:[#allocation29 + $0x38] sm:$0xff]  ;;  %v4495_v12 = vld [vmem:[#allocation29 + $0x30] sm:$0xff] }
 0x79e   : > { %v2454_v10 = vpop.xlane.xlu1 %2453 }
 0x79f   : > { %v2456_v13 = vsub.f32 %v2448_v43, %v2454_v10  ;;  %v4504_v10 = vld [vmem:[#allocation31 + $0x38] sm:$0xff] }
 0x7a0   : > { %2573 = vmatpush.bf16.msrb.mxu2 %v4485_v48  ;;  %2735 = vmatpush.bf16.msra.mxu0 %v4504_v10 }
 0x7a1   : > { %v4840_v14 = vpop.eup %4839  ;;  %v2459_v16 = vmul.f32 1.442695, %v2456_v13  ;;  %v4503_v13 = vld [vmem:[#allocation31 + $0x30] sm:$0xff] }
 0x7a2   : > { %v2235_v17 = vpop.xlane.xlu2 %2234  ;;  %v2461_v18 = vsel %vm2217_vm15, %v4840_v14, 0.0  ;;  %v4842_v19 = vpop.eup %4841 }
 0x7a3   : > { %4843 = vpow2.f32 %v2459_v16  ;;  %2462 = vadd.xlane.f32.xlu1 %v2461_v18  ;;  %2385 = vadd.xlane.f32.xlu0 %v2384_v1  ;;  %v2238_v25 = vmul.f32 %v4842_v19, %v4828_v15  ;;  %v4501_v18 = vld [vmem:[#allocation31 + $0x20] sm:$0xff] }
 0x7a4   : > { %4845 = vrcp.f32 %v2235_v17  ;;  %2736 = vmatpush.bf16.msra.mxu0 %v4503_v13  ;;  %v4493_v17 = vld [vmem:[#allocation29 + $0x20] sm:$0xff] }
 0x7a9   : > { %v4844_v20 = vpop.eup %4843 }
 0x7aa   : > { %v4846_v22 = vpop.eup %4845  ;;  %v2313_v23 = vpop.permute.xlu2 %2312  ;;  %v2464_v24 = vsel %vm2217_vm15, %v4844_v20, 0.0 }
 0x7ab   : > { %v2239_v26 = vmul.f32 %v4846_v22, %v4830_v45  ;;  %2325 = vmatpush.bf16.msra.mxu1 %v2313_v23  ;;  %2465 = vadd.xlane.f32.xlu0 %v2464_v24  ;;  %v4492_v24 = vld [vmem:[#allocation29 + $0x18] sm:$0xff] }
 0x7ad   : > { %v2240_v27 = vpack.c.bf16 %v2239_v26, %v2238_v25  ;;  %v4500_v25 = vld [vmem:[#allocation31 + $0x18] sm:$0xff]  ;;  %v4491_v26 = vld [vmem:[#allocation29 + $0x10] sm:$0xff] }
 0x7af   : > { %4150 = vmatmul.msk.bf16.vlgmr.msra.gmra.mxu3 %vm2217_vm15, %v2240_v27  ;;  %v4499_v27 = vld [vmem:[#allocation31 + $0x10] sm:$0xff] }
 0x7bc   : > { %2392 = vrot.lane.b32.xlu1 %v6341_v51, %s5691_s7 }
 0x7bf   : > { %2472 = vrot.lane.b32.xlu0 %v6341_v51, %s5692_s0 }
 0x806   : > { %v2302_v28 = vpop.xlane.xlu1 %2301 }
 0x807   : > { %4847 = vrcp.f32 %v2302_v28  ;;  %v4490_v28 = vld [vmem:[#allocation29 + $0x8] sm:$0xff] }
 0x80d   : > { %v4848_v30 = vpop.eup %4847 }
 0x80e   : > { %v2305_v29 = vpop.xlane.xlu0 %2304  ;;  %v2308_v32 = vmul.f32 %v4848_v30, %v4832_v61  ;;  %v2383_v36 = vpop.xlane.xlu1 %2382  ;;  %v4489_v30 = vld [vmem:[#allocation29] sm:$0xff] }
 0x80f   : > { %4849 = vrcp.f32 %v2305_v29  ;;  %v4498_v29 = vld [vmem:[#allocation31 + $0x8] sm:$0xff] }
 0x815   : > { %v4850_v31 = vpop.eup %4849 }
 0x816   : > { %v2309_v33 = vmul.f32 %v4850_v31, %v4836_v7  ;;  %v2386_v35 = vpop.xlane.xlu0 %2385  ;;  %v2463_v37 = vpop.xlane.xlu1 %2462  ;;  %v4482_v7 = vld [vmem:[#allocation26 + $0x8] sm:$0xff] }
 0x817   : > { %4851 = vrcp.f32 %v2386_v35  ;;  %v4497_v31 = vld [vmem:[#allocation31] sm:$0xff] }
 0x818   : > { %v2310_v34 = vpack.c.bf16 %v2309_v33, %v2308_v32  ;;  %4853 = vrcp.f32 %v2383_v36 }
 0x81a   : > { %4152 = vmatmul.msk.bf16.vlgmr.msra.gmra.mxu1 %vm2217_vm15, %v2310_v34  ;;  %v4792_v34 = vld [vmem:[#allocation28] ss:$0 sm:$0xff] }
 0x81d   : > { %v4852_v38 = vpop.eup %4851 }
 0x81e   : > { %v2466_v11 = vpop.xlane.xlu0 %2465  ;;  %v4854_v51 = vpop.eup %4853  ;;  %v2390_v39 = vmul.f32 %v4852_v38, %v4838_v0  ;;  %v4494_v0 = vld [vmem:[#allocation29 + $0x28] sm:$0xff] }
 0x81f   : > { %4855 = vrcp.f32 %v2466_v11  ;;  %v2389_v40 = vmul.f32 %v4854_v51, %v4834_v4  ;;  %v4484_v4 = vld [vmem:[#allocation26 + $0x18] sm:$0xff] }
 0x820   : > { %4857 = vrcp.f32 %v2463_v37  ;;  %2574 = vmatpush.bf16.msrb.mxu2 %v4484_v4 }
 0x821   : > { %v2391_v43 = vpack.c.bf16 %v2390_v39, %v2389_v40 }
 0x824   : > { %2575 = vmatpush.bf16.msrb.mxu2 %v4483_v6 }
 0x825   : > { %v4856_v15 = vpop.eup %4855 }
 0x826   : > { %v4858_v42 = vpop.eup %4857  ;;  %v2470_v44 = vmul.f32 %v4856_v15, %v4844_v20  ;;  %v4512_v15 = vld [vmem:[#allocation34 + $0x38] sm:$0xff] }
 0x827   : > { %v2469_v45 = vmul.f32 %v4858_v42, %v4840_v14  ;;  %v4502_v14 = vld [vmem:[#allocation31 + $0x28] sm:$0xff]  ;;  %v4511_v42 = vld [vmem:[#allocation34 + $0x30] sm:$0xff] }
 0x828   : > { %2576 = vmatpush.bf16.msrb.mxu2 %v4482_v7  ;;  %2737 = vmatpush.bf16.msra.mxu0 %v4502_v14 }
 0x829   : > { %v2471_v50 = vpack.c.bf16 %v2470_v44, %v2469_v45  ;;  %v4509_v45 = vld [vmem:[#allocation34 + $0x20] sm:$0xff] }
 0x82c   : > { %2577 = vmatpush.bf16.msrb.mxu2 %v4481_v9  ;;  %2738 = vmatpush.bf16.msra.mxu0 %v4501_v18 }
 0x82e   : > { %v2393_v41 = vpop.permute.xlu1 %2392 }
 0x82f   : > { %2405 = vmatpush.bf16.msrb.mxu3 %v2393_v41 }
 0x830   : > { %2739 = vmatpush.bf16.msra.mxu0 %v4500_v25 }
 0x831   : > { %v2473_v47 = vpop.permute.xlu0 %2472 }
 0x832   : > { %v2253_v46 = vpop.f32.mrf.mxu3  ;;  %4154 = vmatmul.msk.bf16.vlgmr.msrb.gmra.mxu3 %vm2217_vm15, %v2391_v43  ;;  %2485 = vmatpush.bf16.msrb.mxu1 %v2473_v47 }
 0x833   : > { %2258 = vst.msk [vmem:[#allocation2] sm:$0xff] %vm2194_vm14, %v2253_v46  ;;  %2657 = vmatpush.bf16.msra.mxu3 %v4496_v49  ;;  %v4506_v49 = vld [vmem:[#allocation34 + $0x8] sm:$0xff] }
 0x834   : > { %2740 = vmatpush.bf16.msra.mxu0 %v4499_v27 }
 0x835   : > { %4156 = vmatmul.msk.bf16.vlgmr.msrb.gmra.mxu1 %vm2217_vm15, %v2471_v50 }
 0x836   : > { %3056 = vmatpush.bf16.msra.mxu1 %v4512_v15 }
 0x837   : > { %2658 = vmatpush.bf16.msra.mxu3 %v4495_v12 }
 0x838   : > { %2741 = vmatpush.bf16.msra.mxu0 %v4498_v29 }
 0x83a   : > { %v2255_v52 = vpop.f32.mrf.mxu3  ;;  %3057 = vmatpush.bf16.msra.mxu1 %v4511_v42 }
 0x83b   : > { %2259 = vst.msk [vmem:[#allocation2 + $0x8] sm:$0xff] %vm2194_vm14, %v2255_v52  ;;  %2659 = vmatpush.bf16.msra.mxu3 %v4494_v0 }
 0x83c   : > { %2742 = vmatpush.bf16.msra.mxu0 %v4497_v31 }
 0x83f   : > { %2660 = vmatpush.bf16.msra.mxu3 %v4493_v17 }
 0x843   : > { %2661 = vmatpush.bf16.msra.mxu3 %v4492_v24 }
 0x847   : > { %2662 = vmatpush.bf16.msra.mxu3 %v4491_v26 }
 0x84b   : > { %2663 = vmatpush.bf16.msra.mxu3 %v4490_v28 }
 0x84f   : > { %2664 = vmatpush.bf16.msra.mxu3 %v4489_v30 }
 0x897   : > { %v2327_v53 = vpop.f32.mrf.mxu1 }
 0x898   : > { %2334 = vrot.lane.b32.xlu2 %v2327_v53, %s5692_s0  ;;  %v4508_v53 = vld [vmem:[#allocation34 + $0x18] sm:$0xff] }
 0x89f   : > { %v2329_v54 = vpop.f32.mrf.mxu1 }
 0x8a0   : > { %2336 = vrot.lane.b32.xlu2 %v2329_v54, %s5692_s0 }
 0x8b2   : > { %v2487_v55 = vpop.f32.mrf.mxu1 }
 0x8b3   : > { %2494 = vrot.lane.b32.xlu1 %v2487_v55, %s5690_s28  ;;  %v6407_v55 = vshrl.u32 %v1413_v21, 7 }
 0x8b5   : > { %v2407_v56 = vpop.f32.mrf.mxu3  ;;  %v6417_v4 = vadd.s32 4294967293, %v6407_v55  ;;  %v6423_v6 = vadd.s32 4294967294, %v6407_v55  ;;  %v6426_v10 = vadd.s32 4294967295, %v6407_v55  ;;  %vm2792_vm7 = vcmp.lt.s32.totalorder %v6407_v55, 3 }
 0x8b6   : > { %2414 = vrot.lane.b32.xlu2 %v2407_v56, %s5691_s7  ;;  %vm2812_vm8 = vcmp.lt.s32.totalorder %v6407_v55, 2  ;;  %vm2832_vm12 = vcmp.lt.s32.totalorder %v6407_v55, 1 }
 0x8b7   : > { %vm2797_vm10 = vcmp.ge.s32.totalorder %v6417_v4, 0  ;;  %vm2817_vm11 = vcmp.ge.s32.totalorder %v6423_v6, 0  ;;  %vm2837_vm14 = vcmp.ge.s32.totalorder %v6426_v10, 0 }
 0x8ba   : > { %v2489_v57 = vpop.f32.mrf.mxu1 }
 0x8bd   : > { %v2409_v60 = vpop.f32.mrf.mxu3 }
 0x8be   : > { %2496 = vrot.lane.b32.xlu2 %v2489_v57, %s5690_s28  ;;  %2416 = vrot.lane.b32.xlu0 %v2409_v60, %s5691_s7  ;;  %v4507_v60 = vld [vmem:[#allocation34 + $0x10] sm:$0xff]  ;;  %s6726_s28 = sld [smem:[#allocation75_spill]]  ;;  %s4424_s7 = sshll.u32 %s6733_s22, 4 }
 0x8c4   : > { %s1405_s0 = scalar_lea.vmem %s6726_s28, %s4424_s7 }
 0x8f2   : > { %v2335_v61 = vpop.permute.xlu2 %2334 }
 0x8f3   : > { %2341 = vst.msk [vmem:[#allocation2] sm:$0xff] %vm2340_vm0, %v2335_v61 }
 0x8fa   : > { %v2337_v2 = vpop.permute.xlu2 %2336 }
 0x8fb   : > { %2342 = vst.msk [vmem:[#allocation2 + $0x8] sm:$0xff] %vm2340_vm0, %v2337_v2  ;;  %v6410_v2 = vld [vmem:[%s6711_s2] sm:$0xff]  ;;  %vm2857_vm0 = vcmp.lt.s32.totalorder %v6407_v55, 7 }
 0x8fc   : > { %v2850_v12 = vperm.slane %v6410_v2, 3  ;;  %v2805_v0 = vperm.slane %v6410_v2, 0  ;;  %v2825_v18 = vperm.slane %v6410_v2, 1  ;;  %v2870_v28 = vperm.slane %v6410_v2, 4 }
 0x8fd   : > { %v2890_v31 = vperm.slane %v6410_v2, 5 }
 0x910   : > { %v2415_v5 = vpop.permute.xlu2 %2414 }
 0x911   : > { %2421 = vst.msk [vmem:[#allocation2] sm:$0xff] %vm2420_vm1, %v2415_v5  ;;  %v1419_v5 = vadd.s32 8, %v6407_v55 }
 0x913   : > { %v6444_v26 = vadd.s32 3, %v1419_v5 }
 0x918   : > { %v2497_v19 = vpop.permute.xlu2 %2496 }
 0x925   : > { %v2495_v16 = vpop.permute.xlu1 %2494 }
 0x926   : > { %2501 = vst.msk [vmem:[#allocation2] sm:$0xff] %vm2500_vm2, %v2495_v16 }
 0x92d   : > { %v2503_v20 = vld [vmem:[#allocation2] sm:$0xff] }
 0x930   : > { %v2417_v1 = vpop.permute.xlu0 %2416 }
 0x931   : > { %2422 = vst.msk [vmem:[#allocation2 + $0x8] sm:$0xff] %vm2420_vm1, %v2417_v1  ;;  %v6436_v1 = vadd.s32 1, %v1419_v5 }
 0x932   : > { %2502 = vst.msk [vmem:[#allocation2 + $0x8] sm:$0xff] %vm2500_vm2, %v2497_v19  ;;  %vm2877_vm2 = vcmp.lt.s32.totalorder %v6407_v55, 6 }
 0x939   : > { %v2504_v22 = vld [vmem:[#allocation2 + $0x8] sm:$0xff] }
 0x93a   : > { %v2505_v23 = vpack.c.bf16 %v2504_v22, %v2503_v20  ;;  %v4505_v20 = vld [vmem:[#allocation34] sm:$0xff]  ;;  %v2845_v22 = vperm.slane %v6410_v2, 2 }
 0x93c   : > { %2578 = vmatmul.bf16.vlgmr.msrb.gmra.mxu2 %v2505_v23  ;;  %v2881_v23 = vadd.s32 2, %v1419_v5 }
 0x9bf   : > { %v2579_v32 = vpop.f32.mrf.mxu2 }
 0x9c0   : > { %v2584_v33 = vadd.f32 %v2579_v32, %v6305_v58  ;;  %v6450_v32 = vadd.s32 4, %v1419_v5 }
 0x9c2   : > { %v6400_v11 = vadd.f32 %v4792_v34, %v2584_v33 }
 0x9c7   : > { %v2581_v35 = vpop.f32.mrf.mxu2 }
 0x9c8   : > { %v2585_v36 = vadd.f32 %v2581_v35, %v6309_v59  ;;  %v4510_v59 = vld [vmem:[#allocation34 + $0x28] sm:$0xff] }
 0x9c9   : > { %3058 = vmatpush.bf16.msra.mxu1 %v4510_v59 }
 0x9ca   : > { %v6402_v37 = vadd.f32 %v4792_v34, %v2585_v36  ;;  %v2910_v34 = vperm.slane %v6410_v2, 6 }
 0x9cc   : > { %v2592_v38 = vpack.c.bf16 %v6402_v37, %v6400_v11 }
 0x9cd   : > { %3059 = vmatpush.bf16.msra.mxu1 %v4509_v45 }
 0x9ce   : > { %2665 = vmatmul.bf16.vlgmr.msra.gmra.mxu3 %v2592_v38  ;;  %2743 = vmatmul.bf16.vlgmr.msra.gmra.mxu0 %v2592_v38 }
 0x9d1   : > { %3060 = vmatpush.bf16.msra.mxu1 %v4508_v53 }
 0x9d5   : > { %3061 = vmatpush.bf16.msra.mxu1 %v4507_v60 }
 0x9d9   : > { %3062 = vmatpush.bf16.msra.mxu1 %v4506_v49 }
 0x9dd   : > { %3063 = vmatpush.bf16.msra.mxu1 %v4505_v20 }
 0xa4b   : > { %v2744_v51 = vpop.f32.mrf.mxu0 }
 0xa4c   : > { %v4253_v39 = vmul.f32 -1.442695, %v2744_v51 }
 0xa4e   : > { %4859 = vpow2.f32 %v4253_v39 }
 0xa51   : > { %v2666_v62 = vpop.f32.mrf.mxu3 }
 0xa53   : > { %v2746_v40 = vpop.f32.mrf.mxu0 }
 0xa54   : > { %v4860_v41 = vpop.eup %4859  ;;  %v4254_v58 = vmul.f32 -1.442695, %v2746_v40 }
 0xa55   : > { %v2755_v43 = vadd.f32 1.0, %v4860_v41 }
 0xa56   : > { %4861 = vpow2.f32 %v4254_v58 }
 0xa57   : > { %4863 = vrcp.f32 %v2755_v43  ;;  %v2768_v57 = vand.u32 2147483648, %v2755_v43  ;;  %vm2762_vm4 = vweird.f32 %v2755_v43  ;;  %v2766_v63 = vand.u32 2147483647, %v2755_v43 }
 0xa59   : > { %v2769_v7 = vor.u32 1.1754944e-38, %v2768_v57  ;;  %vm2767_vm6 = vcmp.eq.f32.partialorder %v2766_v63, 8.507059e+37  ;;  %v2668_v29 = vpop.f32.mrf.mxu3 }
 0xa5c   : > { %v4862_v44 = vpop.eup %4861 }
 0xa5d   : > { %v4864_v46 = vpop.eup %4863  ;;  %v2756_v47 = vadd.f32 1.0, %v4862_v44 }
 0xa5e   : > { %v2758_v50 = vmul.f32 %v4864_v46, %v2755_v43  ;;  %vm2763_vm3 = vweird.f32 %v4864_v46 }
 0xa5f   : > { %4865 = vrcp.f32 %v2756_v47  ;;  %vm6412_vm5 = vmor %vm2762_vm4, %vm2763_vm3  ;;  %v2783_v13 = vand.u32 2147483648, %v2756_v47  ;;  %v2781_v17 = vand.u32 2147483647, %v2756_v47  ;;  %vm2777_vm13 = vweird.f32 %v2756_v47 }
 0xa60   : > { %v2759_v52 = vsub.f32 1.0, %v2758_v50  ;;  %vm2865_vm3 = vcmp.lt.s32.totalorder %v6436_v1, 16  ;;  %vm2885_vm4 = vcmp.lt.s32.totalorder %v2881_v23, 16 }
 0xa61   : > { %v2784_v25 = vor.u32 1.1754944e-38, %v2783_v13  ;;  %vm2782_vm1 = vcmp.eq.f32.partialorder %v2781_v17, 8.507059e+37 }
 0xa62   : > { %v2760_v54 = vmul.f32 %v4864_v46, %v2759_v52 }
 0xa64   : > { %v2761_v56 = vadd.f32 %v4864_v46, %v2760_v54 }
 0xa65   : > { %v4866_v61 = vpop.eup %4865 }
 0xa66   : > { %v2773_v48 = vmul.f32 %v4866_v61, %v2756_v47  ;;  %v2765_v21 = vsel %vm6412_vm5, %v4864_v46, %v2761_v56  ;;  %vm2778_vm9 = vweird.f32 %v4866_v61  ;;  %vm2897_vm5 = vcmp.lt.s32.totalorder %v6407_v55, 5 }
 0xa67   : > { %v2770_v14 = vsel %vm2767_vm6, %v2769_v7, %v2765_v21  ;;  %vm2779_vm15 = vmor %vm2777_vm13, %vm2778_vm9  ;;  %vm2905_vm6 = vcmp.lt.s32.totalorder %v6444_v26, 16  ;;  %vm2917_vm9 = vcmp.lt.s32.totalorder %v6407_v55, 4  ;;  %vm2925_vm13 = vcmp.lt.s32.totalorder %v6450_v32, 16 }
 0xa68   : > { %v2774_v9 = vsub.f32 1.0, %v2773_v48  ;;  %v6440_v24 = vmul.f32 %v2770_v14, %v2666_v62 }
 0xa6a   : > { %v2775_v16 = vmul.f32 %v4866_v61, %v2774_v9  ;;  %v2790_v35 = vrot.slane %v6440_v24, 5  ;;  %v2810_v36 = vrot.slane %v6440_v24, 6  ;;  %v2830_v38 = vrot.slane %v6440_v24, 7 }
 0xa6b   : > { %v2855_v51 = vrot.slane %v6440_v24, 1  ;;  %v2875_v41 = vrot.slane %v6440_v24, 2  ;;  %v2895_v59 = vrot.slane %v6440_v24, 3 }
 0xa6c   : > { %v2776_v19 = vadd.f32 %v4866_v61, %v2775_v16  ;;  %v2915_v16 = vrot.slane %v6440_v24, 4 }
 0xa6e   : > { %v2780_v27 = vsel %vm2779_vm15, %v4866_v61, %v2776_v19 }
 0xa6f   : > { %v2785_v30 = vsel %vm2782_vm1, %v2784_v25, %v2780_v27  ;;  %v2930_v27 = vperm.slane %v6410_v2, 7 }
 0xa70   : > { %v6452_v33 = vmul.f32 %v2785_v30, %v2668_v29 }
 0xa72   : > { %v2791_v39 = vrot.slane %v6452_v33, 5  ;;  %v2811_v15 = vrot.slane %v6452_v33, 6  ;;  %v2831_v40 = vrot.slane %v6452_v33, 7  ;;  %v2852_v58 = vmul.f32 %v2850_v12, %v6452_v33 }
 0xa73   : > { %v2856_v42 = vrot.slane %v6452_v33, 1  ;;  %v2876_v43 = vrot.slane %v6452_v33, 2  ;;  %v2896_v48 = vrot.slane %v6452_v33, 3  ;;  %v2916_v6 = vrot.slane %v6452_v33, 4 }
 0xa74   : > { %v2793_v44 = vsel %vm2792_vm7, %v2790_v35, %v2791_v39  ;;  %v2794_v45 = vsel %vm2792_vm7, %v2791_v39, %v2790_v35  ;;  %v2813_v46 = vsel %vm2812_vm8, %v2810_v36, %v2811_v15  ;;  %v2814_v47 = vsel %vm2812_vm8, %v2811_v15, %v2810_v36 }
 0xa75   : > { %v2803_v50 = vsel %vm2797_vm10, %v2794_v45, 0.0  ;;  %v2807_v52 = vmul.f32 %v2805_v0, %v2793_v44  ;;  %v2823_v53 = vsel %vm2817_vm11, %v2814_v47, 0.0  ;;  %v2827_v54 = vmul.f32 %v2825_v18, %v2813_v46 }
 0xa76   : > { %v2806_v56 = vmul.f32 %v2805_v0, %v2803_v50  ;;  %v2826_v57 = vmul.f32 %v2825_v18, %v2823_v53  ;;  %v2833_v60 = vsel %vm2832_vm12, %v2830_v38, %v2831_v40  ;;  %v2834_v61 = vsel %vm2832_vm12, %v2831_v40, %v2830_v38  ;;  %v4793_v40 = vld [vmem:[#allocation32] ss:$0 sm:$0xff] }
 0xa77   : > { %v2829_v62 = vadd.f32 %v2827_v54, %v2807_v52  ;;  %v2843_v63 = vsel %vm2837_vm14, %v2834_v61, 0.0  ;;  %v2847_v3 = vmul.f32 %v2845_v22, %v2833_v60  ;;  %v2859_v5 = vsel %vm2857_vm0, %v2856_v42, %v2855_v51 }
 0xa78   : > { %v2828_v4 = vadd.f32 %v2826_v57, %v2806_v56  ;;  %v2846_v21 = vmul.f32 %v2845_v22, %v2843_v63  ;;  %v2858_v9 = vsel %vm2857_vm0, %v2855_v51, %v2856_v42  ;;  %v2869_v49 = vsel %vm2865_vm3, %v2859_v5, 0.0  ;;  %v4794_v42 = vld [vmem:[%s6714_s12] ss:$0 sm:$0xff] }
 0xa79   : > { %v2849_v7 = vadd.f32 %v2847_v3, %v2829_v62  ;;  %v2879_v10 = vsel %vm2877_vm2, %v2876_v43, %v2875_v41  ;;  %v2851_v0 = vmul.f32 %v2850_v12, %v6440_v24  ;;  %v2872_v18 = vmul.f32 %v2870_v28, %v2869_v49 }
 0xa7a   : > { %v2848_v13 = vadd.f32 %v2846_v21, %v2828_v4  ;;  %v2889_v14 = vsel %vm2885_vm4, %v2879_v10, 0.0  ;;  %v2878_v19 = vsel %vm2877_vm2, %v2875_v41, %v2876_v43  ;;  %v2899_v1 = vsel %vm2897_vm5, %v2896_v48, %v2895_v59 }
 0xa7b   : > { %v2854_v17 = vadd.f32 %v2852_v58, %v2849_v7  ;;  %v2871_v22 = vmul.f32 %v2870_v28, %v2858_v9  ;;  %v2909_v25 = vsel %vm2905_vm6, %v2899_v1, 0.0  ;;  %v2892_v23 = vmul.f32 %v2890_v31, %v2889_v14 }
 0xa7c   : > { %v2853_v20 = vadd.f32 %v2851_v0, %v2848_v13  ;;  %v2898_v24 = vsel %vm2897_vm5, %v2895_v59, %v2896_v48  ;;  %v2919_v29 = vsel %vm2917_vm9, %v2916_v6, %v2915_v16  ;;  %v2891_v28 = vmul.f32 %v2890_v31, %v2878_v19 }
 0xa7d   : > { %v2874_v12 = vadd.f32 %v2872_v18, %v2854_v17  ;;  %v2929_v26 = vsel %vm2925_vm13, %v2919_v29, 0.0  ;;  %v2912_v35 = vmul.f32 %v2910_v34, %v2909_v25  ;;  %v2918_v36 = vsel %vm2917_vm9, %v2915_v16, %v2916_v6  ;;  %v4795_v17 = vld [vmem:[%s6715_s3] ss:$0 sm:$0xff] }
 0xa7e   : > { %v2873_v30 = vadd.f32 %v2871_v22, %v2853_v20  ;;  %v2911_v51 = vmul.f32 %v2910_v34, %v2898_v24  ;;  %v2932_v15 = vmul.f32 %v2930_v27, %v2929_v26  ;;  %v2931_v58 = vmul.f32 %v2930_v27, %v2918_v36  ;;  %v4527_v36 = vld [vmem:[#allocation35 + $0x74] sm:$0xf] }
 0xa7f   : > { %v2894_v33 = vadd.f32 %v2892_v23, %v2874_v12  ;;  %v3070_v1 = vmul.f32 2.0, %v6400_v11  ;;  %v3071_v27 = vmul.f32 2.0, %v6402_v37 }
 0xa80   : > { %v2893_v38 = vadd.f32 %v2891_v28, %v2873_v30 }
 0xa81   : > { %v2914_v39 = vadd.f32 %v2912_v35, %v2894_v33  ;;  %v4347_v33 = vld [vmem:[#allocation35 + $0x70] sm:$0xf]  ;;  %v4528_v35 = vld [vmem:[#allocation35 + $0x74] sm:$0xf0] }
 0xa82   : > { %v2913_v41 = vadd.f32 %v2911_v51, %v2893_v38  ;;  %v4348_v38 = vor.u32 %v4528_v35, %v4347_v33  ;;  %v4349_v51 = vld [vmem:[#allocation35 + $0x78] sm:$0xf0] }
 0xa83   : > { %v2934_v31 = vadd.f32 %v2932_v15, %v2914_v39  ;;  %v4352_v39 = vor.u32 %v4527_v36, %v4349_v51  ;;  %v4339_v15 = vld [vmem:[#allocation35 + $0x60] sm:$0xf] }
 0xa84   : > { %v2933_v32 = vadd.f32 %v2931_v58, %v2913_v41  ;;  %3229 = vmatpush.bf16.msra.mxu2 %v4348_v38  ;;  %v4525_v41 = vld [vmem:[#allocation35 + $0x64] sm:$0xf] }
 0xa85   : > { %v2940_v43 = vmul.f32 %v4793_v40, %v2934_v31  ;;  %3243 = vmatpush.bf16.msrb.mxu3 %v4352_v39  ;;  %v4341_v31 = vld [vmem:[#allocation35 + $0x68] sm:$0xf0] }
 0xa86   : > { %v2939_v59 = vmul.f32 %v4793_v40, %v2933_v32  ;;  %v4526_v40 = vld [vmem:[#allocation35 + $0x64] sm:$0xf0]  ;;  %v4331_v32 = vld [vmem:[#allocation35 + $0x50] sm:$0xf] }
 0xa87   : > { %v2946_v44 = vadd.f32 %v4794_v42, %v2940_v43  ;;  %v4340_v58 = vor.u32 %v4526_v40, %v4339_v15  ;;  %v4524_v43 = vld [vmem:[#allocation35 + $0x54] sm:$0xf0] }
 0xa88   : > { %v2945_v45 = vadd.f32 %v4794_v42, %v2939_v59  ;;  %v4344_v42 = vor.u32 %v4525_v41, %v4341_v31  ;;  %v4523_v59 = vld [vmem:[#allocation35 + $0x54] sm:$0xf]  ;;  %v4796_v41 = vld [vmem:[%s6716_s6] ss:$0 sm:$0xff] }
 0xa89   : > { %v4256_v46 = vmul.f32 -1.442695, %v2946_v44  ;;  %3230 = vmatpush.bf16.msra.mxu2 %v4340_v58 }
 0xa8a   : > { %v4255_v47 = vmul.f32 -1.442695, %v2945_v45  ;;  %3244 = vmatpush.bf16.msrb.mxu3 %v4344_v42 }
 0xa8b   : > { %4867 = vpow2.f32 %v4256_v46 }
 0xa8c   : > { %4869 = vpow2.f32 %v4255_v47  ;;  %v4323_v47 = vld [vmem:[#allocation35 + $0x40] sm:$0xf] }
 0xa91   : > { %v4868_v55 = vpop.eup %4867 }
 0xa92   : > { %v4870_v50 = vpop.eup %4869  ;;  %v2954_v2 = vadd.f32 1.0, %v4868_v55  ;;  %v4522_v55 = vld [vmem:[#allocation35 + $0x44] sm:$0xf0] }
 0xa93   : > { %v2953_v34 = vadd.f32 1.0, %v4870_v50  ;;  %v4521_v50 = vld [vmem:[#allocation35 + $0x44] sm:$0xf] }
 0xa94   : > { %4871 = vrcp.f32 %v2954_v2  ;;  %v2981_v61 = vand.u32 2147483648, %v2954_v2  ;;  %v2979_v3 = vand.u32 2147483647, %v2954_v2  ;;  %vm2975_vm10 = vweird.f32 %v2954_v2 }
 0xa95   : > { %4873 = vrcp.f32 %v2953_v34  ;;  %v2966_v62 = vand.u32 2147483648, %v2953_v34  ;;  %v2964_v4 = vand.u32 2147483647, %v2953_v34  ;;  %vm2960_vm11 = vweird.f32 %v2953_v34 }
 0xa96   : > { %v2982_v6 = vor.u32 1.1754944e-38, %v2981_v61  ;;  %vm2980_vm15 = vcmp.eq.f32.partialorder %v2979_v3, 8.507059e+37  ;;  %v4307_v61 = vld [vmem:[#allocation35 + $0x20] sm:$0xf] }
 0xa97   : > { %v2967_v7 = vor.u32 1.1754944e-38, %v2966_v62  ;;  %vm2965_vm0 = vcmp.eq.f32.partialorder %v2964_v4, 8.507059e+37  ;;  %v4518_v62 = vld [vmem:[#allocation35 + $0x24] sm:$0xf0]  ;;  %v4309_v4 = vld [vmem:[#allocation35 + $0x28] sm:$0xf0] }
 0xa9a   : > { %v4872_v52 = vpop.eup %4871 }
 0xa9b   : > { %v4874_v53 = vpop.eup %4873  ;;  %v2971_v54 = vmul.f32 %v4872_v52, %v2954_v2  ;;  %vm2976_vm7 = vweird.f32 %v4872_v52  ;;  %v4324_v2 = vor.u32 %v4522_v55, %v4323_v47  ;;  %v4536_v47 = vld [vmem:[#allocation37 + $0x38] sm:$0xff] }
 0xa9c   : > { %v2956_v56 = vmul.f32 %v4874_v53, %v2953_v34  ;;  %vm2961_vm8 = vweird.f32 %v4874_v53  ;;  %vm2977_vm12 = vmor %vm2975_vm10, %vm2976_vm7  ;;  %v4325_v34 = vld [vmem:[#allocation35 + $0x48] sm:$0xf0]  ;;  %v4544_v55 = vld [vmem:[#allocation37 + $0x78] sm:$0xff]  ;;  %3471 = vmatpush.bf16.msrb.mxu0 %v4536_v47 }
 0xa9d   : > { %v2972_v57 = vsub.f32 1.0, %v2971_v54  ;;  %vm2962_vm14 = vmor %vm2960_vm11, %vm2961_vm8  ;;  %v4520_v54 = vld [vmem:[#allocation35 + $0x34] sm:$0xf0]  ;;  %3485 = vmatpush.bf16.msrb.mxu1 %v4544_v55 }
 0xa9e   : > { %v2957_v60 = vsub.f32 1.0, %v2956_v56  ;;  %v4519_v56 = vld [vmem:[#allocation35 + $0x34] sm:$0xf] }
 0xa9f   : > { %v2973_v63 = vmul.f32 %v4872_v52, %v2972_v57 }
 0xaa0   : > { %v2958_v48 = vmul.f32 %v4874_v53, %v2957_v60  ;;  %v4317_v60 = vld [vmem:[#allocation35 + $0x38] sm:$0xf0] }
 0xaa1   : > { %v2974_v21 = vadd.f32 %v4872_v52, %v2973_v63  ;;  %v4320_v3 = vor.u32 %v4519_v56, %v4317_v60  ;;  %v4541_v56 = vld [vmem:[#allocation37 + $0x60] sm:$0xff] }
 0xaa2   : > { %v2959_v5 = vadd.f32 %v4874_v53, %v2958_v48  ;;  %v4517_v48 = vld [vmem:[#allocation35 + $0x24] sm:$0xf] }
 0xaa3   : > { %v2978_v9 = vsel %vm2977_vm12, %v4872_v52, %v2974_v21  ;;  %v4328_v52 = vor.u32 %v4521_v50, %v4325_v34  ;;  %v4543_v50 = vld [vmem:[#allocation37 + $0x70] sm:$0xff]  ;;  %v4534_v34 = vld [vmem:[#allocation37 + $0x28] sm:$0xff] }
 0xaa4   : > { %v2963_v49 = vsel %vm2962_vm14, %v4874_v53, %v2959_v5  ;;  %v2983_v10 = vsel %vm2980_vm15, %v2982_v6, %v2978_v9  ;;  %v4315_v53 = vld [vmem:[#allocation35 + $0x30] sm:$0xf]  ;;  %v4308_v5 = vor.u32 %v4518_v62, %v4307_v61  ;;  %v4312_v6 = vor.u32 %v4517_v48, %v4309_v4  ;;  %v4516_v9 = vld [vmem:[#allocation35 + $0x14] sm:$0xf0]  ;;  %3486 = vmatpush.bf16.msrb.mxu1 %v4543_v50 }
 0xaa5   : > { %v2968_v13 = vsel %vm2965_vm0, %v2967_v7, %v2963_v49  ;;  %v2986_v0 = vmul.f32 %v2983_v10, %v2946_v44  ;;  %v4332_v44 = vor.u32 %v4524_v43, %v4331_v32  ;;  %v4316_v57 = vor.u32 %v4520_v54, %v4315_v53  ;;  %v4299_v7 = vld [vmem:[#allocation35 + $0x10] sm:$0xf]  ;;  %v4515_v10 = vld [vmem:[#allocation35 + $0x14] sm:$0xf]  ;;  %v4797_v43 = vld [vmem:[%s6717_s15] ss:$0 sm:$0xff] }
 0xaa6   : > { %v2985_v14 = vmul.f32 %v2968_v13, %v2945_v45  ;;  %v4333_v45 = vld [vmem:[#allocation35 + $0x58] sm:$0xf0]  ;;  %v4533_v54 = vld [vmem:[#allocation37 + $0x20] sm:$0xff] }
 0xaa7   : > { %v4336_v46 = vor.u32 %v4523_v59, %v4333_v45  ;;  %3231 = vmatpush.bf16.msra.mxu2 %v4332_v44  ;;  %v4301_v13 = vld [vmem:[#allocation35 + $0x18] sm:$0xf0] }
 0xaa8   : > { %v2987_v16 = vpack.c.bf16 %v2986_v0, %v2985_v14  ;;  %v4300_v0 = vor.u32 %v4516_v9, %v4299_v7  ;;  %v4304_v14 = vor.u32 %v4515_v10, %v4301_v13  ;;  %v4532_v48 = vld [vmem:[#allocation37 + $0x18] sm:$0xff] }
 0xaa9   : > { %3245 = vmatpush.bf16.msrb.mxu3 %v4336_v46  ;;  %v4540_v4 = vld [vmem:[#allocation37 + $0x58] sm:$0xff] }
 0xaaa   : > { %3064 = vmatmul.bf16.vlgmr.msra.gmra.mxu1 %v2987_v16  ;;  %v4291_v16 = vld [vmem:[#allocation35] sm:$0xf] }
 0xaab   : > { %3232 = vmatpush.bf16.msra.mxu2 %v4324_v2  ;;  %v3143_v2 = vld [vmem:[%s6718_s19] sm:$0x3] }
 0xaac   : > { %v3146_v53 = vperm.slane %v3143_v2, 1 }
 0xaad   : > { %3246 = vmatpush.bf16.msrb.mxu3 %v4328_v52  ;;  %v3145_v52 = vperm.slane %v3143_v2, 0 }
 0xaaf   : > { %3233 = vmatpush.bf16.msra.mxu2 %v4316_v57 }
 0xab1   : > { %3247 = vmatpush.bf16.msrb.mxu3 %v4320_v3 }
 0xab3   : > { %3234 = vmatpush.bf16.msra.mxu2 %v4308_v5  ;;  %v4539_v5 = vld [vmem:[#allocation37 + $0x50] sm:$0xff] }
 0xab5   : > { %3248 = vmatpush.bf16.msrb.mxu3 %v4312_v6 }
 0xab7   : > { %3235 = vmatpush.bf16.msra.mxu2 %v4300_v0  ;;  %v4530_v0 = vld [vmem:[#allocation37 + $0x8] sm:$0xff] }
 0xab9   : > { %3249 = vmatpush.bf16.msrb.mxu3 %v4304_v14  ;;  %v4538_v14 = vld [vmem:[#allocation37 + $0x48] sm:$0xff] }
 0xb27   : > { %v3065_v18 = vpop.f32.mrf.mxu1 }
 0xb28   : > { %v3066_v19 = vadd.f32 %v4795_v17, %v3065_v18  ;;  %v4513_v18 = vld [vmem:[#allocation35 + $0x4] sm:$0xf] }
 0xb2a   : > { %v6532_v20 = vadd.f32 %v3070_v1, %v3066_v19  ;;  %v4293_v19 = vld [vmem:[#allocation35 + $0x8] sm:$0xf0] }
 0xb2c   : > { %3076 = vadd.xlane.f32.xlu0 %v6532_v20 }
 0xb2f   : > { %v3067_v22 = vpop.f32.mrf.mxu1 }
 0xb30   : > { %v3068_v25 = vadd.f32 %v4795_v17, %v3067_v22  ;;  %v4514_v17 = vld [vmem:[#allocation35 + $0x4] sm:$0xf0] }
 0xb32   : > { %v6536_v12 = vadd.f32 %v3071_v27, %v3068_v25  ;;  %v4292_v25 = vor.u32 %v4514_v17, %v4291_v16  ;;  %v4296_v27 = vor.u32 %v4513_v18, %v4293_v19 }
 0xb34   : > { %3078 = vadd.xlane.f32.xlu1 %v6536_v12  ;;  %3236 = vmatpush.bf16.msra.mxu2 %v4292_v25 }
 0xb35   : > { %3250 = vmatpush.bf16.msrb.mxu3 %v4296_v27 }
 0xb9f   : > { %v3077_v23 = vpop.xlane.xlu0 %3076 }
 0xba0   : > { %v3080_v24 = vmul.f32 %v3077_v23, %v6257_v8 }
 0xba2   : > { %v6541_v29 = vsub.f32 %v6532_v20, %v3080_v24 }
 0xba4   : > { %v3084_v11 = vmul.f32 %v6541_v29, %v6541_v29 }
 0xba6   : > { %3086 = vadd.xlane.f32.xlu2 %v3084_v11 }
 0xba7   : > { %v3079_v30 = vpop.xlane.xlu1 %3078 }
 0xba8   : > { %v3081_v28 = vmul.f32 %v3079_v30, %v6257_v8 }
 0xbaa   : > { %v6547_v26 = vsub.f32 %v6536_v12, %v3081_v28 }
 0xbac   : > { %v3085_v37 = vmul.f32 %v6547_v26, %v6547_v26 }
 0xbae   : > { %3088 = vadd.xlane.f32.xlu0 %v3085_v37 }
 0xc19   : > { %v3087_v63 = vpop.xlane.xlu2 %3086 }
 0xc1a   : > { %v3090_v21 = vmul.f32 %v3087_v63, %v6257_v8 }
 0xc1c   : > { %v3092_v49 = vadd.f32 1e-05, %v3090_v21  ;;  %v4531_v21 = vld [vmem:[#allocation37 + $0x10] sm:$0xff] }
 0xc1e   : > { %4875 = vrsqrt.f32 %v3092_v49  ;;  %vm3100_vm2 = vweird.f32 %v3092_v49 }
 0xc21   : > { %v3089_v1 = vpop.xlane.xlu0 %3088 }
 0xc22   : > { %v3091_v22 = vmul.f32 %v3089_v1, %v6257_v8  ;;  %v4529_v1 = vld [vmem:[#allocation37] sm:$0xff] }
 0xc24   : > { %v4876_v23 = vpop.eup %4875  ;;  %v3093_v24 = vadd.f32 1e-05, %v3091_v22  ;;  %v4537_v22 = vld [vmem:[#allocation37 + $0x40] sm:$0xff] }
 0xc25   : > { %v3095_v11 = vmul.f32 %v4876_v23, %v3092_v49  ;;  %vm3101_vm1 = vweird.f32 %v4876_v23 }
 0xc26   : > { %4877 = vrsqrt.f32 %v3093_v24  ;;  %vm3102_vm3 = vmor %vm3100_vm2, %vm3101_vm1  ;;  %vm3110_vm5 = vweird.f32 %v3093_v24 }
 0xc27   : > { %v3096_v30 = vmul.f32 %v4876_v23, %v3095_v11 }
 0xc29   : > { %v3097_v28 = vmul.f32 0.5, %v3096_v30 }
 0xc2b   : > { %v3098_v37 = vsub.f32 1.5, %v3097_v28 }
 0xc2c   : > { %v4878_v33 = vpop.eup %4877 }
 0xc2d   : > { %v3099_v35 = vmul.f32 %v4876_v23, %v3098_v37  ;;  %v3105_v36 = vmul.f32 %v4878_v33, %v3093_v24  ;;  %vm3111_vm4 = vweird.f32 %v4878_v33 }
 0xc2e   : > { %vm3112_vm6 = vmor %vm3110_vm5, %vm3111_vm4 }
 0xc2f   : > { %v3106_v38 = vmul.f32 %v4878_v33, %v3105_v36  ;;  %v3103_v51 = vsel %vm3102_vm3, %v4876_v23, %v3099_v35 }
 0xc30   : > { %v3114_v40 = vmul.f32 %v3103_v51, %v6541_v29  ;;  %v4535_v29 = vld [vmem:[#allocation37 + $0x30] sm:$0xff] }
 0xc31   : > { %v3107_v39 = vmul.f32 0.5, %v3106_v38  ;;  %3472 = vmatpush.bf16.msrb.mxu0 %v4535_v29 }
 0xc32   : > { %v3119_v32 = vmul.f32 %v4796_v41, %v3114_v40 }
 0xc33   : > { %v3108_v15 = vsub.f32 1.5, %v3107_v39 }
 0xc34   : > { %v3124_v44 = vadd.f32 %v4797_v43, %v3119_v32 }
 0xc35   : > { %v3109_v58 = vmul.f32 %v4878_v33, %v3108_v15  ;;  %3473 = vmatpush.bf16.msrb.mxu0 %v4534_v34 }
 0xc37   : > { %v3113_v31 = vsel %vm3112_vm6, %v4878_v33, %v3109_v58 }
 0xc38   : > { %v3115_v42 = vmul.f32 %v3113_v31, %v6547_v26  ;;  %v4542_v26 = vld [vmem:[#allocation37 + $0x68] sm:$0xff] }
 0xc39   : > { %3487 = vmatpush.bf16.msrb.mxu1 %v4542_v26  ;;  %3474 = vmatpush.bf16.msrb.mxu0 %v4533_v54 }
 0xc3a   : > { %v3120_v59 = vmul.f32 %v4796_v41, %v3115_v42 }
 0xc3c   : > { %v3125_v45 = vadd.f32 %v4797_v43, %v3120_v59 }
 0xc3d   : > { %3488 = vmatpush.bf16.msrb.mxu1 %v4541_v56  ;;  %3475 = vmatpush.bf16.msrb.mxu0 %v4532_v48 }
 0xc3e   : > { %v3126_v46 = vpack.c.bf16 %v3125_v45, %v3124_v44 }
 0xc40   : > { %3237 = vmatmul.bf16.vlgmr.msra.gmra.mxu2 %v3126_v46  ;;  %3251 = vmatmul.bf16.vlgmr.msrb.gmra.mxu3 %v3126_v46 }
 0xc41   : > { %3489 = vmatpush.bf16.msrb.mxu1 %v4540_v4  ;;  %3476 = vmatpush.bf16.msrb.mxu0 %v4531_v21 }
 0xc45   : > { %3490 = vmatpush.bf16.msrb.mxu1 %v4539_v5  ;;  %3477 = vmatpush.bf16.msrb.mxu0 %v4530_v0 }
 0xc49   : > { %3491 = vmatpush.bf16.msrb.mxu1 %v4538_v14  ;;  %3478 = vmatpush.bf16.msrb.mxu0 %v4529_v1 }
 0xc4d   : > { %3492 = vmatpush.bf16.msrb.mxu1 %v4537_v22 }
 0xcc3   : > { %v3238_v57 = vpop.f32.mrf.mxu2  ;;  %v3252_v60 = vpop.f32.mrf.mxu3 }
 0xcc4   : > { %v6558_v61 = vadd.f32 %v3238_v57, %v3145_v52  ;;  %v6560_v62 = vadd.f32 %v3252_v60, %v3146_v53 }
 0xcc6   : > { %v4353_v63 = vmul.f32 -1.442695, %v6558_v61  ;;  %v4354_v3 = vmul.f32 -1.442695, %v6560_v62 }
 0xcc8   : > { %4879 = vpow2.f32 %v4353_v63 }
 0xcc9   : > { %4881 = vpow2.f32 %v4354_v3 }
 0xccb   : > { %v3240_v6 = vpop.f32.mrf.mxu2  ;;  %v3254_v7 = vpop.f32.mrf.mxu3 }
 0xccc   : > { %v6564_v9 = vadd.f32 %v3240_v6, %v3145_v52  ;;  %v6566_v49 = vadd.f32 %v3254_v7, %v3146_v53 }
 0xcce   : > { %v4880_v10 = vpop.eup %4879  ;;  %v4355_v13 = vmul.f32 -1.442695, %v6564_v9  ;;  %v4356_v18 = vmul.f32 -1.442695, %v6566_v49 }
 0xccf   : > { %v4882_v16 = vpop.eup %4881  ;;  %v3269_v17 = vadd.f32 1.0, %v4880_v10 }
 0xcd0   : > { %v6570_v19 = vadd.f32 1.0, %v4882_v16  ;;  %4883 = vpow2.f32 %v4355_v13 }
 0xcd1   : > { %4885 = vrcp.f32 %v3269_v17  ;;  %vm3278_vm13 = vweird.f32 %v3269_v17  ;;  %v3282_v40 = vand.u32 2147483647, %v3269_v17  ;;  %v3284_v41 = vand.u32 2147483648, %v3269_v17 }
 0xcd2   : > { %4887 = vrcp.f32 %v6570_v19  ;;  %vm3293_vm7 = vweird.f32 %v6570_v19  ;;  %v3297_v31 = vand.u32 2147483647, %v6570_v19  ;;  %v3299_v44 = vand.u32 2147483648, %v6570_v19 }
 0xcd3   : > { %4889 = vpow2.f32 %v4356_v18  ;;  %vm3283_vm12 = vcmp.eq.f32.partialorder %v3282_v40, 8.507059e+37  ;;  %v3285_v29 = vor.u32 1.1754944e-38, %v3284_v41 }
 0xcd4   : > { %v3300_v60 = vor.u32 1.1754944e-38, %v3299_v44  ;;  %vm3298_vm3 = vcmp.eq.f32.partialorder %v3297_v31, 8.507059e+37 }
 0xcd6   : > { %v4884_v25 = vpop.eup %4883 }
 0xcd7   : > { %v4886_v27 = vpop.eup %4885  ;;  %v3271_v23 = vadd.f32 1.0, %v4884_v25 }
 0xcd8   : > { %v4888_v24 = vpop.eup %4887  ;;  %v3274_v11 = vmul.f32 %v4886_v27, %v3269_v17  ;;  %vm3279_vm9 = vweird.f32 %v4886_v27  ;;  %v4798_v17 = vld [vmem:[%s6723_s23] ss:$0 sm:$0xff] }
 0xcd9   : > { %v4890_v30 = vpop.eup %4889  ;;  %v3289_v28 = vmul.f32 %v4888_v24, %v6570_v19  ;;  %4891 = vrcp.f32 %v3271_v23  ;;  %v3314_v32 = vand.u32 2147483648, %v3271_v23  ;;  %vm6576_vm8 = vmor %vm3278_vm13, %vm3279_vm9  ;;  %vm3294_vm10 = vweird.f32 %v4888_v24 }
 0xcda   : > { %v3275_v37 = vsub.f32 1.0, %v3274_v11  ;;  %v3272_v33 = vadd.f32 1.0, %v4890_v30  ;;  %v3312_v55 = vand.u32 2147483647, %v3271_v23  ;;  %vm3308_vm14 = vweird.f32 %v3271_v23  ;;  %vm6585_vm15 = vmor %vm3293_vm7, %vm3294_vm10 }
 0xcdb   : > { %v3290_v35 = vsub.f32 1.0, %v3289_v28  ;;  %v3315_v26 = vor.u32 1.1754944e-38, %v3314_v32 }
 0xcdc   : > { %v3276_v36 = vmul.f32 %v4886_v27, %v3275_v37  ;;  %4893 = vrcp.f32 %v3272_v33  ;;  %v3327_v52 = vand.u32 2147483647, %v3272_v33  ;;  %v3329_v53 = vand.u32 2147483648, %v3272_v33 }
 0xcdd   : > { %v3291_v51 = vmul.f32 %v4888_v24, %v3290_v35  ;;  %vm3313_vm2 = vcmp.eq.f32.partialorder %v3312_v55, 8.507059e+37  ;;  %vm3323_vm4 = vweird.f32 %v3272_v33 }
 0xcde   : > { %v3277_v39 = vadd.f32 %v4886_v27, %v3276_v36  ;;  %v3330_v6 = vor.u32 1.1754944e-38, %v3329_v53  ;;  %vm3328_vm6 = vcmp.eq.f32.partialorder %v3327_v52, 8.507059e+37 }
 0xcdf   : > { %v4892_v38 = vpop.eup %4891  ;;  %v3292_v59 = vadd.f32 %v4888_v24, %v3291_v51 }
 0xce0   : > { %v3304_v15 = vmul.f32 %v4892_v38, %v3271_v23  ;;  %v3281_v46 = vsel %vm6576_vm8, %v4886_v27, %v3277_v39  ;;  %vm3309_vm11 = vweird.f32 %v4892_v38 }
 0xce1   : > { %v3286_v54 = vsel %vm3283_vm12, %v3285_v29, %v3281_v46  ;;  %v3296_v56 = vsel %vm6585_vm15, %v4888_v24, %v3292_v59  ;;  %vm3310_vm0 = vmor %vm3308_vm14, %vm3309_vm11 }
 0xce2   : > { %v4894_v58 = vpop.eup %4893  ;;  %v3305_v42 = vsub.f32 1.0, %v3304_v15  ;;  %v3333_v4 = vmul.f32 %v3286_v54, %v6558_v61  ;;  %v3301_v21 = vsel %vm3298_vm3, %v3300_v60, %v3296_v56 }
 0xce3   : > { %v3319_v45 = vmul.f32 %v4894_v58, %v3272_v33  ;;  %vm3324_vm1 = vweird.f32 %v4894_v58  ;;  %v3334_v0 = vmul.f32 %v3301_v21, %v6560_v62 }
 0xce4   : > { %v3306_v47 = vmul.f32 %v4892_v38, %v3305_v42  ;;  %vm3325_vm5 = vmor %vm3323_vm4, %vm3324_vm1 }
 0xce5   : > { %v3320_v50 = vsub.f32 1.0, %v3319_v45  ;;  %v4799_v45 = vld [vmem:[%s6724_s10] ss:$0 sm:$0xff] }
 0xce6   : > { %v3307_v34 = vadd.f32 %v4892_v38, %v3306_v47  ;;  %v4800_v47 = vld [vmem:[%s6725_s1] ss:$0 sm:$0xff] }
 0xce7   : > { %v3321_v57 = vmul.f32 %v4894_v58, %v3320_v50 }
 0xce8   : > { %v3311_v63 = vsel %vm3310_vm0, %v4892_v38, %v3307_v34 }
 0xce9   : > { %v3316_v3 = vsel %vm3313_vm2, %v3315_v26, %v3311_v63  ;;  %v3322_v48 = vadd.f32 %v4894_v58, %v3321_v57 }
 0xcea   : > { %v3335_v5 = vmul.f32 %v3316_v3, %v6564_v9 }
 0xceb   : > { %v3326_v7 = vsel %vm3325_vm5, %v4894_v58, %v3322_v48 }
 0xcec   : > { %v3337_v10 = vpack.c.bf16 %v3335_v5, %v3333_v4  ;;  %v3331_v13 = vsel %vm3328_vm6, %v3330_v6, %v3326_v7 }
 0xced   : > { %v3336_v14 = vmul.f32 %v3331_v13, %v6566_v49 }
 0xcee   : > { %3479 = vmatmul.bf16.vlgmr.msrb.gmra.mxu0 %v3337_v10 }
 0xcef   : > { %v3338_v16 = vpack.c.bf16 %v3336_v14, %v3334_v0 }
 0xcf1   : > { %3493 = vmatmul.bf16.vlgmr.msrb.gmra.mxu1 %v3338_v16 }
 0xd6b   : > { %v3480_v18 = vpop.f32.mrf.mxu0 }
 0xd6c   : > { %v3481_v19 = vadd.f32 %v4798_v17, %v3480_v18 }
 0xd6e   : > { %v3494_v61 = vpop.f32.mrf.mxu1 }
 0xd6f   : > { %v3495_v1 = vadd.f32 %v3494_v61, %v3481_v19 }
 0xd71   : > { %v3499_v22 = vmul.f32 0.5, %v3495_v1 }
 0xd73   : > { %v3482_v9 = vpop.f32.mrf.mxu0  ;;  %v3501_v25 = vadd.f32 %v3499_v22, %v6532_v20 }
 0xd74   : > { %v3483_v27 = vadd.f32 %v4798_v17, %v3482_v9 }
 0xd75   : > { %3505 = vadd.xlane.f32.xlu1 %v3501_v25 }
 0xd76   : > { %v3496_v23 = vpop.f32.mrf.mxu1 }
 0xd77   : > { %v3497_v24 = vadd.f32 %v3496_v23, %v3483_v27 }
 0xd79   : > { %v3500_v11 = vmul.f32 0.5, %v3497_v24 }
 0xd7b   : > { %v3502_v62 = vadd.f32 %v3500_v11, %v6536_v12 }
 0xd7d   : > { %3507 = vadd.xlane.f32.xlu2 %v3502_v62 }
 0xde8   : > { %v3506_v49 = vpop.xlane.xlu1 %3505 }
 0xde9   : > { %v3509_v30 = vmul.f32 %v3506_v49, %v6257_v8 }
 0xdeb   : > { %v3511_v28 = vsub.f32 %v3501_v25, %v3509_v30 }
 0xded   : > { %v3513_v37 = vmul.f32 %v3511_v28, %v3511_v28 }
 0xdef   : > { %3515 = vadd.xlane.f32.xlu0 %v3513_v37 }
 0xdf0   : > { %v3508_v33 = vpop.xlane.xlu2 %3507 }
 0xdf1   : > { %v3510_v35 = vmul.f32 %v3508_v33, %v6257_v8 }
 0xdf3   : > { %v3512_v36 = vsub.f32 %v3502_v62, %v3510_v35 }
 0xdf5   : > { %v3514_v20 = vmul.f32 %v3512_v36, %v3512_v36 }
 0xdf7   : > { %3517 = vadd.xlane.f32.xlu1 %v3514_v20 }
 0xe62   : > { %v3516_v38 = vpop.xlane.xlu0 %3515 }
 0xe63   : > { %v3519_v51 = vmul.f32 %v3516_v38, %v6257_v8 }
 0xe65   : > { %v3521_v39 = vadd.f32 1e-05, %v3519_v51 }
 0xe67   : > { %4895 = vrsqrt.f32 %v3521_v39  ;;  %vm3529_vm13 = vweird.f32 %v3521_v39 }
 0xe6a   : > { %v3518_v12 = vpop.xlane.xlu1 %3517 }
 0xe6b   : > { %v3520_v15 = vmul.f32 %v3518_v12, %v6257_v8 }
 0xe6d   : > { %v4896_v40 = vpop.eup %4895  ;;  %v3522_v41 = vadd.f32 1e-05, %v3520_v15 }
 0xe6e   : > { %v3524_v58 = vmul.f32 %v4896_v40, %v3521_v39  ;;  %vm3530_vm9 = vweird.f32 %v4896_v40 }
 0xe6f   : > { %4897 = vrsqrt.f32 %v3522_v41  ;;  %vm3531_vm7 = vmor %vm3529_vm13, %vm3530_vm9  ;;  %vm3539_vm10 = vweird.f32 %v3522_v41 }
 0xe70   : > { %v3525_v31 = vmul.f32 %v4896_v40, %v3524_v58 }
 0xe72   : > { %v3526_v42 = vmul.f32 0.5, %v3525_v31 }
 0xe74   : > { %v3527_v32 = vsub.f32 1.5, %v3526_v42 }
 0xe75   : > { %v4898_v43 = vpop.eup %4897 }
 0xe76   : > { %v3528_v59 = vmul.f32 %v4896_v40, %v3527_v32  ;;  %v3534_v44 = vmul.f32 %v4898_v43, %v3522_v41  ;;  %vm3540_vm8 = vweird.f32 %v4898_v43 }
 0xe77   : > { %vm3541_vm11 = vmor %vm3539_vm10, %vm3540_vm8 }
 0xe78   : > { %v3532_v46 = vsel %vm3531_vm7, %v4896_v40, %v3528_v59  ;;  %v3535_v8 = vmul.f32 %v4898_v43, %v3534_v44 }
 0xe79   : > { %v3543_v55 = vmul.f32 %v3532_v46, %v3511_v28 }
 0xe7a   : > { %v3536_v29 = vmul.f32 0.5, %v3535_v8 }
 0xe7b   : > { %v3548_v50 = vmul.f32 %v4799_v45, %v3543_v55 }
 0xe7c   : > { %v3537_v2 = vsub.f32 1.5, %v3536_v29 }
 0xe7d   : > { %v3553_v34 = vadd.f32 %v4800_v47, %v3548_v50 }
 0xe7e   : > { %v3538_v26 = vmul.f32 %v4898_v43, %v3537_v2 }
 0xe7f   : > { %3555 = vst [vmem:[%s1405_s0] sm:$0xff] %v3553_v34 }
 0xe80   : > { %v3542_v52 = vsel %vm3541_vm11, %v4898_v43, %v3538_v26 }
 0xe81   : > { %v3544_v53 = vmul.f32 %v3542_v52, %v3512_v36 }
 0xe83   : > { %v3549_v54 = vmul.f32 %v4799_v45, %v3544_v53 }
 0xe85   : > { %v3554_v56 = vadd.f32 %v4800_v47, %v3549_v54 }
 0xe87   : > { %3556 = vst [vmem:[%s1405_s0 + $0x8] sm:$0xff] %v3554_v56 }
 0xe88 PF: > { %s6727_s0 = sld [smem:[#allocation76_spill]]  ;;  %s6729_s15 = smov %s5615_s16 }
 0xe89   : > { %s6728_s22 = sld [smem:[#allocation77_spill]]  ;;  %s6730_s16 = smov %s5619_s18 }
 0xe8e   : > { %p90_p5 = scmp.ge.s32.totalorder %s6727_s0, 4  }
 0xe8f   : > { %s6731_s18 = smov %s6728_s22 }
 0xe90   :  { %92 = sbr.rel (!%p90_p5) target bundleno = 78 (0x4e), region = 318 }
 0xe95   :  { %3578 = vsyncpa [#allocation4], 1 }
 0xe96   :  { %3580 = vsyncpa [#allocation4 + $0x1], 1 }
 0xe97   :  { %3581 = vsyncpa [#allocation6], 1 }
 0xe98   :  { %3582 = vsyncpa [#allocation9], 1 }
 0xe99   :  { %3583 = vsyncpa [#allocation12], 1 }
 0xe9a   :  { %3584 = vsyncpa [#allocation15], 1 }
 0xe9b   :  { %3585 = vsyncpa [#allocation18], 1 }
 0xe9c   :  { %3586 = vsyncpa [#allocation21], 1 }
 0xe9d   :  { %3587 = vsyncpa [#allocation24], 1 }
 0xe9e   :  { %3588 = vsyncpa [#allocation27], 1 }
 0xe9f   :  { %3589 = vsyncpa [#allocation30], 1 }
 0xea0   :  { %3590 = vsyncpa [#allocation33], 1 }
 0xea1   :  { %3591 = vsyncpa [#allocation36], 1 }

</bundles_post_ra>
